<compile_context>
chip_gen: v5e
topology: v5e:2x2
jax: 0.10.0
libtpu: 0.0.40
codegen_flags: <defaults>
</compile_context>

<pallas_src>
import jax
import jax.numpy as jnp
from jax import lax
from jax.experimental import pallas as pl
from jax.experimental.pallas import tpu as pltpu

VMEM = pltpu.MemorySpace.VMEM

KSZ = 10                      # Conv1d kernel_size (all stages)
PAD = 1                       # Conv1d padding (all stages)
CH = (1, 64, 128, 128, 64)    # channel chain conv1..conv4
HID = 32                      # LSTM hidden size
NSTAGE = 4


def _stage_dims(length):
    """For each conv stage: (padded_in_len, conv_out_len, pooled_len)."""
    dims = []
    cur = length
    for _ in range(NSTAGE):
        lp = cur + 2 * PAD
        lout = lp - KSZ + 1
        t = lout // 2                      # MaxPool1d(2): floor, trailing element dropped
        dims.append((lp, lout, t))
        cur = t
    return dims


def _make_kernel(batch, length):
    dims = _stage_dims(length)

    def even_rows_selector(t):
        # (t, 2t-1) matrix with S[i, 2i] = 1: compacts even rows via one MXU matmul,
        # avoiding strided value slices and sublane reshapes.
        r = lax.broadcasted_iota(jnp.int32, (t, 2 * t - 1), 0)
        c = lax.broadcasted_iota(jnp.int32, (t, 2 * t - 1), 1)
        return jnp.where(c == 2 * r, 1.0, 0.0).astype(jnp.float32)

    def conv_stage(tin_ref, w_ref, b_ref, lp_in, cin, cout, tout_ref):
        """tin_ref: (batch*lp_in, cin) tape (each sample zero-padded top/bottom).
        Writes the pooled+ReLU result (already padded for the next conv) into tout_ref,
        or returns the per-sample (t, cout) values when tout_ref is None."""
        m = batch * lp_in - (KSZ - 1)
        t = (lp_in - KSZ + 1) // 2
        # Conv1d as a sum of K shifted contiguous matmuls over the whole tape.
        acc = None
        for k in range(KSZ):
            xk = tin_ref[pl.ds(k, m), :]                    # (m, cin), contiguous
            wk = w_ref[k]                                   # (cin, cout)
            if cin == 1:
                contrib = xk * wk                           # VPU broadcast outer product
            else:
                contrib = jnp.dot(xk, wk, preferred_element_type=jnp.float32)
            acc = contrib if acc is None else acc + contrib
        sel = even_rows_selector(t)
        bias = b_ref[...]                                   # (1, cout)
        pooled = []
        for nn in range(batch):
            base = nn * lp_in
            lo = acc[base:base + 2 * t - 1, :]
            hi = acc[base + 1:base + 2 * t, :]
            pm = jnp.maximum(lo, hi)                        # pm[j] = max(conv[j], conv[j+1])
            p = jnp.dot(sel, pm, preferred_element_type=jnp.float32)  # rows 2i -> pool
            pooled.append(jnp.maximum(p + bias, 0.0))       # shared bias + ReLU commute w/ max
        if tout_ref is not None:
            lp_out = t + 2
            zrow = jnp.zeros((1, cout), jnp.float32)
            for nn in range(batch):
                off = nn * lp_out
                tout_ref[pl.ds(off, 1), :] = zrow           # next stage's zero pad rows only
                tout_ref[pl.ds(off + 1, t), :] = pooled[nn]
                tout_ref[pl.ds(off + t + 1, 1), :] = zrow
        return pooled

    def kernel(x_ref,
               w1_ref, b1_ref, w2_ref, b2_ref, w3_ref, b3_ref, w4_ref, b4_ref,
               wih0_ref, whh0_ref, b0_ref, w1c_ref, b1c_ref, wfc_ref, bfc_ref,
               o_ref, t1_ref, t2_ref, t3_ref):
        # ---------------- conv stack (conv + ReLU + maxpool fused) ----------------
        conv_stage(x_ref, w1_ref, b1_ref, dims[0][0], CH[0], CH[1], t1_ref)
        conv_stage(t1_ref, w2_ref, b2_ref, dims[1][0], CH[1], CH[2], t2_ref)
        conv_stage(t2_ref, w3_ref, b3_ref, dims[2][0], CH[2], CH[3], t3_ref)
        xs = conv_stage(t3_ref, w4_ref, b4_ref, dims[3][0], CH[3], CH[4], None)
        # xs: per-sample (T4, 64) LSTM inputs, time along sublanes.

        # ------------- 2-layer LSTM (PyTorch gate order i,f,g,o) + Linear ------------
        t4 = dims[3][2]
        wih0 = wih0_ref[...]
        whh0 = whh0_ref[...]
        b0 = b0_ref[...]
        w1c = w1c_ref[...]
        b1c = b1c_ref[...]
        # Layer-0 input projection hoisted off the recurrent critical path.
        gx = [jnp.dot(x, wih0, preferred_element_type=jnp.float32) + b0 for x in xs]

        def gates(g):
            s = jax.nn.sigmoid(g)
            th = jnp.tanh(g)
            return (s[:, 0:HID], s[:, HID:2 * HID],
                    th[:, 2 * HID:3 * HID], s[:, 3 * HID:4 * HID])

        h0 = jnp.zeros((batch, HID), jnp.float32)
        c0 = jnp.zeros((batch, HID), jnp.float32)
        h1 = jnp.zeros((batch, HID), jnp.float32)
        c1 = jnp.zeros((batch, HID), jnp.float32)
        for step in range(t4):                               # T4 = 5, fully unrolled
            gx_t = jnp.concatenate([g[step:step + 1, :] for g in gx], axis=0)   # (N, 4H)
            g0 = gx_t + jnp.dot(h0, whh0, preferred_element_type=jnp.float32)
            i0, f0, gg0, o0 = gates(g0)
            c0 = f0 * c0 + i0 * gg0
            h0 = o0 * jnp.tanh(c0)
            # layer 1: merged [w_ih1; w_hh1] -> a single matmul on the serial path
            g1 = jnp.dot(jnp.concatenate([h0, h1], axis=1), w1c,
                         preferred_element_type=jnp.float32) + b1c
            i1, f1, gg1, o1 = gates(g1)
            c1 = f1 * c1 + i1 * gg1
            h1 = o1 * jnp.tanh(c1)

        out = jnp.dot(h1, wfc_ref[...], preferred_element_type=jnp.float32) + bfc_ref[...]
        o_ref[...] = out.astype(o_ref.dtype)

    return kernel


@jax.jit
def cnn_lstm_forward(x_ncl, params):
    """x_ncl: (N, 1, L) exactly like the PyTorch module (batch, channels, length)."""
    n, c, length = x_ncl.shape
    assert c == CH[0] == 1
    dims = _stage_dims(length)

    x = x_ncl.reshape(n, length).astype(jnp.float32)
    x = jnp.pad(x, ((0, 0), (PAD, PAD)))                  # conv1 zero padding
    x_tape = x.reshape(n * (length + 2 * PAD), 1)         # batch stacked along rows

    def cw(w):                                            # (Cout, Cin, K) -> (K, Cin, Cout)
        return jnp.transpose(w, (2, 1, 0))

    w1, b1 = params["conv1"]
    w2, b2 = params["conv2"]
    w3, b3 = params["conv3"]
    w4, b4 = params["conv4"]
    w_ih0, w_hh0, b_ih0, b_hh0 = params["lstm0"]
    w_ih1, w_hh1, b_ih1, b_hh1 = params["lstm1"]
    w_fc, b_fc = params["fc"]

    scratch = [pltpu.VMEM((n * (dims[i][2] + 2), CH[i + 1]), jnp.float32)
               for i in range(NSTAGE - 1)]

    return pl.pallas_call(
        _make_kernel(n, length),
        out_shape=jax.ShapeDtypeStruct((n, 1), jnp.float32),
        in_specs=[pl.BlockSpec(memory_space=VMEM)] * 16,
        out_specs=pl.BlockSpec(memory_space=VMEM),
        scratch_shapes=scratch,
    )(x_tape,
      cw(w1), b1.reshape(1, -1), cw(w2), b2.reshape(1, -1),
      cw(w3), b3.reshape(1, -1), cw(w4), b4.reshape(1, -1),
      w_ih0.T, w_hh0.T, (b_ih0 + b_hh0).reshape(1, -1),
      jnp.concatenate([w_ih1.T, w_hh1.T], axis=0), (b_ih1 + b_hh1).reshape(1, -1),
      w_fc.T, b_fc.reshape(1, 1))


def init_params(key):
    def u(k, shape, fan_in):
        bound = 1.0 / jnp.sqrt(jnp.float32(fan_in))
        return jax.random.uniform(k, shape, jnp.float32, -bound, bound)

    ks = iter(jax.random.split(key, 32))
    p = {}
    p["conv1"] = (u(next(ks), (64, 1, 10), 1 * 10), u(next(ks), (64,), 1 * 10))
    p["conv2"] = (u(next(ks), (128, 64, 10), 64 * 10), u(next(ks), (128,), 64 * 10))
    p["conv3"] = (u(next(ks), (128, 128, 10), 128 * 10), u(next(ks), (128,), 128 * 10))
    p["conv4"] = (u(next(ks), (64, 128, 10), 128 * 10), u(next(ks), (64,), 128 * 10))
    h = HID
    p["lstm0"] = (u(next(ks), (4 * h, 64), h), u(next(ks), (4 * h, h), h),
                  u(next(ks), (4 * h,), h), u(next(ks), (4 * h,), h))
    p["lstm1"] = (u(next(ks), (4 * h, h), h), u(next(ks), (4 * h, h), h),
                  u(next(ks), (4 * h,), h), u(next(ks), (4 * h,), h))
    p["fc"] = (u(next(ks), (1, h), h), u(next(ks), (1,), h))
    return p


if __name__ == "__main__":
    key = jax.random.PRNGKey(0)
    pkey, xkey = jax.random.split(key)
    params = init_params(pkey)

    # (batch=2, channels=1, length=200): 4x (conv k=10 p=1 + pool/2) -> 5 LSTM steps.
    x = jax.random.normal(xkey, (2, 1, 200), jnp.float32)

    out = jax.block_until_ready(cnn_lstm_forward(x, params))
    assert out.shape == (2, 1), out.shape
    assert bool(jnp.all(jnp.isfinite(out)))
    print("KERNEL_OK")
</pallas_src>

<mosaic_0001>
module attributes {stable_mosaic.version = 11 : i64} {
  func.func @kernel(%arg0: memref<404x1xf32, #tpu.memory_space<vmem>>, %arg1: memref<10x1x64xf32, #tpu.memory_space<vmem>>, %arg2: memref<1x64xf32, #tpu.memory_space<vmem>>, %arg3: memref<10x64x128xf32, #tpu.memory_space<vmem>>, %arg4: memref<1x128xf32, #tpu.memory_space<vmem>>, %arg5: memref<10x128x128xf32, #tpu.memory_space<vmem>>, %arg6: memref<1x128xf32, #tpu.memory_space<vmem>>, %arg7: memref<10x128x64xf32, #tpu.memory_space<vmem>>, %arg8: memref<1x64xf32, #tpu.memory_space<vmem>>, %arg9: memref<64x128xf32, #tpu.memory_space<vmem>>, %arg10: memref<32x128xf32, #tpu.memory_space<vmem>>, %arg11: memref<1x128xf32, #tpu.memory_space<vmem>>, %arg12: memref<64x128xf32, #tpu.memory_space<vmem>>, %arg13: memref<1x128xf32, #tpu.memory_space<vmem>>, %arg14: memref<32x1xf32, #tpu.memory_space<vmem>>, %arg15: memref<1x1xf32, #tpu.memory_space<vmem>>, %arg16: memref<2x1xf32, #tpu.memory_space<vmem>>, %arg17: memref<196x64xf32, #tpu.memory_space<vmem>>, %arg18: memref<92x128xf32, #tpu.memory_space<vmem>>, %arg19: memref<40x128xf32, #tpu.memory_space<vmem>>) attributes {dimension_semantics = [], scalar_prefetch = 0 : i64, scratch_operands = 3 : i64, tpu.core_type = #tpu.core_type<tc>} {
    %c0 = arith.constant 0 : index
    %c0_0 = arith.constant 0 : index
    %0 = vector.load %arg0[%c0, %c0_0] : memref<404x1xf32, #tpu.memory_space<vmem>>, vector<395x1xf32>
    %c0_1 = arith.constant 0 : index
    %c0_2 = arith.constant 0 : index
    %c0_3 = arith.constant 0 : index
    %1 = vector.load %arg1[%c0_1, %c0_2, %c0_3] : memref<10x1x64xf32, #tpu.memory_space<vmem>>, vector<1x1x64xf32>
    %2 = vector.shape_cast %1 : vector<1x1x64xf32> to vector<1x64xf32>
    %3 = vector.broadcast %0 : vector<395x1xf32> to vector<395x64xf32>
    %4 = vector.broadcast %2 : vector<1x64xf32> to vector<395x64xf32>
    %5 = arith.mulf %3, %4 : vector<395x64xf32>
    %c1 = arith.constant 1 : index
    %c0_4 = arith.constant 0 : index
    %6 = vector.load %arg0[%c1, %c0_4] : memref<404x1xf32, #tpu.memory_space<vmem>>, vector<395x1xf32>
    %c1_5 = arith.constant 1 : index
    %c0_6 = arith.constant 0 : index
    %c0_7 = arith.constant 0 : index
    %7 = vector.load %arg1[%c1_5, %c0_6, %c0_7] : memref<10x1x64xf32, #tpu.memory_space<vmem>>, vector<1x1x64xf32>
    %8 = vector.shape_cast %7 : vector<1x1x64xf32> to vector<1x64xf32>
    %9 = vector.broadcast %6 : vector<395x1xf32> to vector<395x64xf32>
    %10 = vector.broadcast %8 : vector<1x64xf32> to vector<395x64xf32>
    %11 = arith.mulf %9, %10 : vector<395x64xf32>
    %12 = arith.addf %5, %11 : vector<395x64xf32>
    %c2 = arith.constant 2 : index
    %c0_8 = arith.constant 0 : index
    %13 = vector.load %arg0[%c2, %c0_8] : memref<404x1xf32, #tpu.memory_space<vmem>>, vector<395x1xf32>
    %c2_9 = arith.constant 2 : index
    %c0_10 = arith.constant 0 : index
    %c0_11 = arith.constant 0 : index
    %14 = vector.load %arg1[%c2_9, %c0_10, %c0_11] : memref<10x1x64xf32, #tpu.memory_space<vmem>>, vector<1x1x64xf32>
    %15 = vector.shape_cast %14 : vector<1x1x64xf32> to vector<1x64xf32>
    %16 = vector.broadcast %13 : vector<395x1xf32> to vector<395x64xf32>
    %17 = vector.broadcast %15 : vector<1x64xf32> to vector<395x64xf32>
    %18 = arith.mulf %16, %17 : vector<395x64xf32>
    %19 = arith.addf %12, %18 : vector<395x64xf32>
    %c3 = arith.constant 3 : index
    %c0_12 = arith.constant 0 : index
    %20 = vector.load %arg0[%c3, %c0_12] : memref<404x1xf32, #tpu.memory_space<vmem>>, vector<395x1xf32>
    %c3_13 = arith.constant 3 : index
    %c0_14 = arith.constant 0 : index
    %c0_15 = arith.constant 0 : index
    %21 = vector.load %arg1[%c3_13, %c0_14, %c0_15] : memref<10x1x64xf32, #tpu.memory_space<vmem>>, vector<1x1x64xf32>
    %22 = vector.shape_cast %21 : vector<1x1x64xf32> to vector<1x64xf32>
    %23 = vector.broadcast %20 : vector<395x1xf32> to vector<395x64xf32>
    %24 = vector.broadcast %22 : vector<1x64xf32> to vector<395x64xf32>
    %25 = arith.mulf %23, %24 : vector<395x64xf32>
    %26 = arith.addf %19, %25 : vector<395x64xf32>
    %c4 = arith.constant 4 : index
    %c0_16 = arith.constant 0 : index
    %27 = vector.load %arg0[%c4, %c0_16] : memref<404x1xf32, #tpu.memory_space<vmem>>, vector<395x1xf32>
    %c4_17 = arith.constant 4 : index
    %c0_18 = arith.constant 0 : index
    %c0_19 = arith.constant 0 : index
    %28 = vector.load %arg1[%c4_17, %c0_18, %c0_19] : memref<10x1x64xf32, #tpu.memory_space<vmem>>, vector<1x1x64xf32>
    %29 = vector.shape_cast %28 : vector<1x1x64xf32> to vector<1x64xf32>
    %30 = vector.broadcast %27 : vector<395x1xf32> to vector<395x64xf32>
    %31 = vector.broadcast %29 : vector<1x64xf32> to vector<395x64xf32>
    %32 = arith.mulf %30, %31 : vector<395x64xf32>
    %33 = arith.addf %26, %32 : vector<395x64xf32>
    %c5 = arith.constant 5 : index
    %c0_20 = arith.constant 0 : index
    %34 = vector.load %arg0[%c5, %c0_20] : memref<404x1xf32, #tpu.memory_space<vmem>>, vector<395x1xf32>
    %c5_21 = arith.constant 5 : index
    %c0_22 = arith.constant 0 : index
    %c0_23 = arith.constant 0 : index
    %35 = vector.load %arg1[%c5_21, %c0_22, %c0_23] : memref<10x1x64xf32, #tpu.memory_space<vmem>>, vector<1x1x64xf32>
    %36 = vector.shape_cast %35 : vector<1x1x64xf32> to vector<1x64xf32>
    %37 = vector.broadcast %34 : vector<395x1xf32> to vector<395x64xf32>
    %38 = vector.broadcast %36 : vector<1x64xf32> to vector<395x64xf32>
    %39 = arith.mulf %37, %38 : vector<395x64xf32>
    %40 = arith.addf %33, %39 : vector<395x64xf32>
    %c6 = arith.constant 6 : index
    %c0_24 = arith.constant 0 : index
    %41 = vector.load %arg0[%c6, %c0_24] : memref<404x1xf32, #tpu.memory_space<vmem>>, vector<395x1xf32>
    %c6_25 = arith.constant 6 : index
    %c0_26 = arith.constant 0 : index
    %c0_27 = arith.constant 0 : index
    %42 = vector.load %arg1[%c6_25, %c0_26, %c0_27] : memref<10x1x64xf32, #tpu.memory_space<vmem>>, vector<1x1x64xf32>
    %43 = vector.shape_cast %42 : vector<1x1x64xf32> to vector<1x64xf32>
    %44 = vector.broadcast %41 : vector<395x1xf32> to vector<395x64xf32>
    %45 = vector.broadcast %43 : vector<1x64xf32> to vector<395x64xf32>
    %46 = arith.mulf %44, %45 : vector<395x64xf32>
    %47 = arith.addf %40, %46 : vector<395x64xf32>
    %c7 = arith.constant 7 : index
    %c0_28 = arith.constant 0 : index
    %48 = vector.load %arg0[%c7, %c0_28] : memref<404x1xf32, #tpu.memory_space<vmem>>, vector<395x1xf32>
    %c7_29 = arith.constant 7 : index
    %c0_30 = arith.constant 0 : index
    %c0_31 = arith.constant 0 : index
    %49 = vector.load %arg1[%c7_29, %c0_30, %c0_31] : memref<10x1x64xf32, #tpu.memory_space<vmem>>, vector<1x1x64xf32>
    %50 = vector.shape_cast %49 : vector<1x1x64xf32> to vector<1x64xf32>
    %51 = vector.broadcast %48 : vector<395x1xf32> to vector<395x64xf32>
    %52 = vector.broadcast %50 : vector<1x64xf32> to vector<395x64xf32>
    %53 = arith.mulf %51, %52 : vector<395x64xf32>
    %54 = arith.addf %47, %53 : vector<395x64xf32>
    %c8 = arith.constant 8 : index
    %c0_32 = arith.constant 0 : index
    %55 = vector.load %arg0[%c8, %c0_32] : memref<404x1xf32, #tpu.memory_space<vmem>>, vector<395x1xf32>
    %c8_33 = arith.constant 8 : index
    %c0_34 = arith.constant 0 : index
    %c0_35 = arith.constant 0 : index
    %56 = vector.load %arg1[%c8_33, %c0_34, %c0_35] : memref<10x1x64xf32, #tpu.memory_space<vmem>>, vector<1x1x64xf32>
    %57 = vector.shape_cast %56 : vector<1x1x64xf32> to vector<1x64xf32>
    %58 = vector.broadcast %55 : vector<395x1xf32> to vector<395x64xf32>
    %59 = vector.broadcast %57 : vector<1x64xf32> to vector<395x64xf32>
    %60 = arith.mulf %58, %59 : vector<395x64xf32>
    %61 = arith.addf %54, %60 : vector<395x64xf32>
    %c9 = arith.constant 9 : index
    %c0_36 = arith.constant 0 : index
    %62 = vector.load %arg0[%c9, %c0_36] : memref<404x1xf32, #tpu.memory_space<vmem>>, vector<395x1xf32>
    %c9_37 = arith.constant 9 : index
    %c0_38 = arith.constant 0 : index
    %c0_39 = arith.constant 0 : index
    %63 = vector.load %arg1[%c9_37, %c0_38, %c0_39] : memref<10x1x64xf32, #tpu.memory_space<vmem>>, vector<1x1x64xf32>
    %64 = vector.shape_cast %63 : vector<1x1x64xf32> to vector<1x64xf32>
    %65 = vector.broadcast %62 : vector<395x1xf32> to vector<395x64xf32>
    %66 = vector.broadcast %64 : vector<1x64xf32> to vector<395x64xf32>
    %67 = arith.mulf %65, %66 : vector<395x64xf32>
    %68 = arith.addf %61, %67 : vector<395x64xf32>
    %69 = tpu.iota {dimensions = array<i32: 0>} : vector<96x191xi32>
    %70 = tpu.iota {dimensions = array<i32: 1>} : vector<96x191xi32>
    %c2_i32 = arith.constant 2 : i32
    %71 = vector.broadcast %c2_i32 : i32 to vector<96x191xi32>
    %72 = arith.muli %71, %69 : vector<96x191xi32>
    %73 = arith.cmpi eq, %70, %72 : vector<96x191xi32>
    %cst = arith.constant 1.000000e+00 : f32
    %cst_40 = arith.constant 0.000000e+00 : f32
    %74 = vector.broadcast %cst : f32 to vector<96x191xf32>
    %75 = vector.broadcast %cst_40 : f32 to vector<96x191xf32>
    %76 = arith.select %73, %74, %75 : vector<96x191xi1>, vector<96x191xf32>
    %c0_41 = arith.constant 0 : index
    %c0_42 = arith.constant 0 : index
    %77 = vector.load %arg2[%c0_41, %c0_42] : memref<1x64xf32, #tpu.memory_space<vmem>>, vector<1x64xf32>
    %78 = vector.extract_strided_slice %68 {offsets = [0, 0], sizes = [191, 64], strides = [1, 1]} : vector<395x64xf32> to vector<191x64xf32>
    %79 = vector.extract_strided_slice %68 {offsets = [1, 0], sizes = [191, 64], strides = [1, 1]} : vector<395x64xf32> to vector<191x64xf32>
    %80 = arith.maximumf %78, %79 : vector<191x64xf32>
    %cst_43 = arith.constant dense<0.000000e+00> : vector<96x64xf32>
    %81 = tpu.matmul %76, %80, %cst_43 {dimension_numbers = #tpu.dot_dimension_numbers<[1], [0], [0], [1], [0, 0, 1, 1], [], []>} : vector<96x191xf32>, vector<191x64xf32>, vector<96x64xf32> -> vector<96x64xf32>
    %82 = vector.broadcast %77 : vector<1x64xf32> to vector<96x64xf32>
    %83 = arith.addf %81, %82 : vector<96x64xf32>
    %cst_44 = arith.constant 0.000000e+00 : f32
    %84 = vector.broadcast %cst_44 : f32 to vector<96x64xf32>
    %85 = arith.maximumf %83, %84 : vector<96x64xf32>
    %86 = vector.extract_strided_slice %68 {offsets = [202, 0], sizes = [191, 64], strides = [1, 1]} : vector<395x64xf32> to vector<191x64xf32>
    %87 = vector.extract_strided_slice %68 {offsets = [203, 0], sizes = [191, 64], strides = [1, 1]} : vector<395x64xf32> to vector<191x64xf32>
    %88 = arith.maximumf %86, %87 : vector<191x64xf32>
    %cst_45 = arith.constant dense<0.000000e+00> : vector<96x64xf32>
    %89 = tpu.matmul %76, %88, %cst_45 {dimension_numbers = #tpu.dot_dimension_numbers<[1], [0], [0], [1], [0, 0, 1, 1], [], []>} : vector<96x191xf32>, vector<191x64xf32>, vector<96x64xf32> -> vector<96x64xf32>
    %90 = vector.broadcast %77 : vector<1x64xf32> to vector<96x64xf32>
    %91 = arith.addf %89, %90 : vector<96x64xf32>
    %cst_46 = arith.constant 0.000000e+00 : f32
    %92 = vector.broadcast %cst_46 : f32 to vector<96x64xf32>
    %93 = arith.maximumf %91, %92 : vector<96x64xf32>
    %cst_47 = arith.constant 0.000000e+00 : f32
    %94 = vector.broadcast %cst_47 : f32 to vector<1x64xf32>
    %c0_48 = arith.constant 0 : index
    %c0_49 = arith.constant 0 : index
    %95 = vector.load %arg17[%c0_48, %c0_49] : memref<196x64xf32, #tpu.memory_space<vmem>>, vector<1x64xf32>
    tpu.vector_store %arg17[%c0_48, %c0_49], %94 {strides = array<i32>} : memref<196x64xf32, #tpu.memory_space<vmem>>, vector<1x64xf32>,
    %c1_50 = arith.constant 1 : index
    %c0_51 = arith.constant 0 : index
    %96 = vector.load %arg17[%c1_50, %c0_51] : memref<196x64xf32, #tpu.memory_space<vmem>>, vector<96x64xf32>
    tpu.vector_store %arg17[%c1_50, %c0_51], %85 {strides = array<i32>} : memref<196x64xf32, #tpu.memory_space<vmem>>, vector<96x64xf32>,
    %c97 = arith.constant 97 : index
    %c0_52 = arith.constant 0 : index
    %97 = vector.load %arg17[%c97, %c0_52] : memref<196x64xf32, #tpu.memory_space<vmem>>, vector<1x64xf32>
    tpu.vector_store %arg17[%c97, %c0_52], %94 {strides = array<i32>} : memref<196x64xf32, #tpu.memory_space<vmem>>, vector<1x64xf32>,
    %c98 = arith.constant 98 : index
    %c0_53 = arith.constant 0 : index
    %98 = vector.load %arg17[%c98, %c0_53] : memref<196x64xf32, #tpu.memory_space<vmem>>, vector<1x64xf32>
    tpu.vector_store %arg17[%c98, %c0_53], %94 {strides = array<i32>} : memref<196x64xf32, #tpu.memory_space<vmem>>, vector<1x64xf32>,
    %c99 = arith.constant 99 : index
    %c0_54 = arith.constant 0 : index
    %99 = vector.load %arg17[%c99, %c0_54] : memref<196x64xf32, #tpu.memory_space<vmem>>, vector<96x64xf32>
    tpu.vector_store %arg17[%c99, %c0_54], %93 {strides = array<i32>} : memref<196x64xf32, #tpu.memory_space<vmem>>, vector<96x64xf32>,
    %c195 = arith.constant 195 : index
    %c0_55 = arith.constant 0 : index
    %100 = vector.load %arg17[%c195, %c0_55] : memref<196x64xf32, #tpu.memory_space<vmem>>, vector<1x64xf32>
    tpu.vector_store %arg17[%c195, %c0_55], %94 {strides = array<i32>} : memref<196x64xf32, #tpu.memory_space<vmem>>, vector<1x64xf32>,
    %c0_56 = arith.constant 0 : index
    %c0_57 = arith.constant 0 : index
    %101 = vector.load %arg17[%c0_56, %c0_57] : memref<196x64xf32, #tpu.memory_space<vmem>>, vector<187x64xf32>
    %c0_58 = arith.constant 0 : index
    %c0_59 = arith.constant 0 : index
    %c0_60 = arith.constant 0 : index
    %102 = vector.load %arg3[%c0_58, %c0_59, %c0_60] : memref<10x64x128xf32, #tpu.memory_space<vmem>>, vector<1x64x128xf32>
    %103 = vector.shape_cast %102 : vector<1x64x128xf32> to vector<64x128xf32>
    %cst_61 = arith.constant dense<0.000000e+00> : vector<187x128xf32>
    %104 = tpu.matmul %101, %103, %cst_61 {dimension_numbers = #tpu.dot_dimension_numbers<[1], [0], [0], [1], [0, 0, 1, 1], [], []>} : vector<187x64xf32>, vector<64x128xf32>, vector<187x128xf32> -> vector<187x128xf32>
    %c1_62 = arith.constant 1 : index
    %c0_63 = arith.constant 0 : index
    %105 = vector.load %arg17[%c1_62, %c0_63] : memref<196x64xf32, #tpu.memory_space<vmem>>, vector<187x64xf32>
    %c1_64 = arith.constant 1 : index
    %c0_65 = arith.constant 0 : index
    %c0_66 = arith.constant 0 : index
    %106 = vector.load %arg3[%c1_64, %c0_65, %c0_66] : memref<10x64x128xf32, #tpu.memory_space<vmem>>, vector<1x64x128xf32>
    %107 = vector.shape_cast %106 : vector<1x64x128xf32> to vector<64x128xf32>
    %cst_67 = arith.constant dense<0.000000e+00> : vector<187x128xf32>
    %108 = tpu.matmul %105, %107, %cst_67 {dimension_numbers = #tpu.dot_dimension_numbers<[1], [0], [0], [1], [0, 0, 1, 1], [], []>} : vector<187x64xf32>, vector<64x128xf32>, vector<187x128xf32> -> vector<187x128xf32>
    %109 = arith.addf %104, %108 : vector<187x128xf32>
    %c2_68 = arith.constant 2 : index
    %c0_69 = arith.constant 0 : index
    %110 = vector.load %arg17[%c2_68, %c0_69] : memref<196x64xf32, #tpu.memory_space<vmem>>, vector<187x64xf32>
    %c2_70 = arith.constant 2 : index
    %c0_71 = arith.constant 0 : index
    %c0_72 = arith.constant 0 : index
    %111 = vector.load %arg3[%c2_70, %c0_71, %c0_72] : memref<10x64x128xf32, #tpu.memory_space<vmem>>, vector<1x64x128xf32>
    %112 = vector.shape_cast %111 : vector<1x64x128xf32> to vector<64x128xf32>
    %cst_73 = arith.constant dense<0.000000e+00> : vector<187x128xf32>
    %113 = tpu.matmul %110, %112, %cst_73 {dimension_numbers = #tpu.dot_dimension_numbers<[1], [0], [0], [1], [0, 0, 1, 1], [], []>} : vector<187x64xf32>, vector<64x128xf32>, vector<187x128xf32> -> vector<187x128xf32>
    %114 = arith.addf %109, %113 : vector<187x128xf32>
    %c3_74 = arith.constant 3 : index
    %c0_75 = arith.constant 0 : index
    %115 = vector.load %arg17[%c3_74, %c0_75] : memref<196x64xf32, #tpu.memory_space<vmem>>, vector<187x64xf32>
    %c3_76 = arith.constant 3 : index
    %c0_77 = arith.constant 0 : index
    %c0_78 = arith.constant 0 : index
    %116 = vector.load %arg3[%c3_76, %c0_77, %c0_78] : memref<10x64x128xf32, #tpu.memory_space<vmem>>, vector<1x64x128xf32>
    %117 = vector.shape_cast %116 : vector<1x64x128xf32> to vector<64x128xf32>
    %cst_79 = arith.constant dense<0.000000e+00> : vector<187x128xf32>
    %118 = tpu.matmul %115, %117, %cst_79 {dimension_numbers = #tpu.dot_dimension_numbers<[1], [0], [0], [1], [0, 0, 1, 1], [], []>} : vector<187x64xf32>, vector<64x128xf32>, vector<187x128xf32> -> vector<187x128xf32>
    %119 = arith.addf %114, %118 : vector<187x128xf32>
    %c4_80 = arith.constant 4 : index
    %c0_81 = arith.constant 0 : index
    %120 = vector.load %arg17[%c4_80, %c0_81] : memref<196x64xf32, #tpu.memory_space<vmem>>, vector<187x64xf32>
    %c4_82 = arith.constant 4 : index
    %c0_83 = arith.constant 0 : index
    %c0_84 = arith.constant 0 : index
    %121 = vector.load %arg3[%c4_82, %c0_83, %c0_84] : memref<10x64x128xf32, #tpu.memory_space<vmem>>, vector<1x64x128xf32>
    %122 = vector.shape_cast %121 : vector<1x64x128xf32> to vector<64x128xf32>
    %cst_85 = arith.constant dense<0.000000e+00> : vector<187x128xf32>
    %123 = tpu.matmul %120, %122, %cst_85 {dimension_numbers = #tpu.dot_dimension_numbers<[1], [0], [0], [1], [0, 0, 1, 1], [], []>} : vector<187x64xf32>, vector<64x128xf32>, vector<187x128xf32> -> vector<187x128xf32>
    %124 = arith.addf %119, %123 : vector<187x128xf32>
    %c5_86 = arith.constant 5 : index
    %c0_87 = arith.constant 0 : index
    %125 = vector.load %arg17[%c5_86, %c0_87] : memref<196x64xf32, #tpu.memory_space<vmem>>, vector<187x64xf32>
    %c5_88 = arith.constant 5 : index
    %c0_89 = arith.constant 0 : index
    %c0_90 = arith.constant 0 : index
    %126 = vector.load %arg3[%c5_88, %c0_89, %c0_90] : memref<10x64x128xf32, #tpu.memory_space<vmem>>, vector<1x64x128xf32>
    %127 = vector.shape_cast %126 : vector<1x64x128xf32> to vector<64x128xf32>
    %cst_91 = arith.constant dense<0.000000e+00> : vector<187x128xf32>
    %128 = tpu.matmul %125, %127, %cst_91 {dimension_numbers = #tpu.dot_dimension_numbers<[1], [0], [0], [1], [0, 0, 1, 1], [], []>} : vector<187x64xf32>, vector<64x128xf32>, vector<187x128xf32> -> vector<187x128xf32>
    %129 = arith.addf %124, %128 : vector<187x128xf32>
    %c6_92 = arith.constant 6 : index
    %c0_93 = arith.constant 0 : index
    %130 = vector.load %arg17[%c6_92, %c0_93] : memref<196x64xf32, #tpu.memory_space<vmem>>, vector<187x64xf32>
    %c6_94 = arith.constant 6 : index
    %c0_95 = arith.constant 0 : index
    %c0_96 = arith.constant 0 : index
    %131 = vector.load %arg3[%c6_94, %c0_95, %c0_96] : memref<10x64x128xf32, #tpu.memory_space<vmem>>, vector<1x64x128xf32>
    %132 = vector.shape_cast %131 : vector<1x64x128xf32> to vector<64x128xf32>
    %cst_97 = arith.constant dense<0.000000e+00> : vector<187x128xf32>
    %133 = tpu.matmul %130, %132, %cst_97 {dimension_numbers = #tpu.dot_dimension_numbers<[1], [0], [0], [1], [0, 0, 1, 1], [], []>} : vector<187x64xf32>, vector<64x128xf32>, vector<187x128xf32> -> vector<187x128xf32>
    %134 = arith.addf %129, %133 : vector<187x128xf32>
    %c7_98 = arith.constant 7 : index
    %c0_99 = arith.constant 0 : index
    %135 = vector.load %arg17[%c7_98, %c0_99] : memref<196x64xf32, #tpu.memory_space<vmem>>, vector<187x64xf32>
    %c7_100 = arith.constant 7 : index
    %c0_101 = arith.constant 0 : index
    %c0_102 = arith.constant 0 : index
    %136 = vector.load %arg3[%c7_100, %c0_101, %c0_102] : memref<10x64x128xf32, #tpu.memory_space<vmem>>, vector<1x64x128xf32>
    %137 = vector.shape_cast %136 : vector<1x64x128xf32> to vector<64x128xf32>
    %cst_103 = arith.constant dense<0.000000e+00> : vector<187x128xf32>
    %138 = tpu.matmul %135, %137, %cst_103 {dimension_numbers = #tpu.dot_dimension_numbers<[1], [0], [0], [1], [0, 0, 1, 1], [], []>} : vector<187x64xf32>, vector<64x128xf32>, vector<187x128xf32> -> vector<187x128xf32>
    %139 = arith.addf %134, %138 : vector<187x128xf32>
    %c8_104 = arith.constant 8 : index
    %c0_105 = arith.constant 0 : index
    %140 = vector.load %arg17[%c8_104, %c0_105] : memref<196x64xf32, #tpu.memory_space<vmem>>, vector<187x64xf32>
    %c8_106 = arith.constant 8 : index
    %c0_107 = arith.constant 0 : index
    %c0_108 = arith.constant 0 : index
    %141 = vector.load %arg3[%c8_106, %c0_107, %c0_108] : memref<10x64x128xf32, #tpu.memory_space<vmem>>, vector<1x64x128xf32>
    %142 = vector.shape_cast %141 : vector<1x64x128xf32> to vector<64x128xf32>
    %cst_109 = arith.constant dense<0.000000e+00> : vector<187x128xf32>
    %143 = tpu.matmul %140, %142, %cst_109 {dimension_numbers = #tpu.dot_dimension_numbers<[1], [0], [0], [1], [0, 0, 1, 1], [], []>} : vector<187x64xf32>, vector<64x128xf32>, vector<187x128xf32> -> vector<187x128xf32>
    %144 = arith.addf %139, %143 : vector<187x128xf32>
    %c9_110 = arith.constant 9 : index
    %c0_111 = arith.constant 0 : index
    %145 = vector.load %arg17[%c9_110, %c0_111] : memref<196x64xf32, #tpu.memory_space<vmem>>, vector<187x64xf32>
    %c9_112 = arith.constant 9 : index
    %c0_113 = arith.constant 0 : index
    %c0_114 = arith.constant 0 : index
    %146 = vector.load %arg3[%c9_112, %c0_113, %c0_114] : memref<10x64x128xf32, #tpu.memory_space<vmem>>, vector<1x64x128xf32>
    %147 = vector.shape_cast %146 : vector<1x64x128xf32> to vector<64x128xf32>
    %cst_115 = arith.constant dense<0.000000e+00> : vector<187x128xf32>
    %148 = tpu.matmul %145, %147, %cst_115 {dimension_numbers = #tpu.dot_dimension_numbers<[1], [0], [0], [1], [0, 0, 1, 1], [], []>} : vector<187x64xf32>, vector<64x128xf32>, vector<187x128xf32> -> vector<187x128xf32>
    %149 = arith.addf %144, %148 : vector<187x128xf32>
    %150 = tpu.iota {dimensions = array<i32: 0>} : vector<44x87xi32>
    %151 = tpu.iota {dimensions = array<i32: 1>} : vector<44x87xi32>
    %c2_i32_116 = arith.constant 2 : i32
    %152 = vector.broadcast %c2_i32_116 : i32 to vector<44x87xi32>
    %153 = arith.muli %152, %150 : vector<44x87xi32>
    %154 = arith.cmpi eq, %151, %153 : vector<44x87xi32>
    %cst_117 = arith.constant 1.000000e+00 : f32
    %cst_118 = arith.constant 0.000000e+00 : f32
    %155 = vector.broadcast %cst_117 : f32 to vector<44x87xf32>
    %156 = vector.broadcast %cst_118 : f32 to vector<44x87xf32>
    %157 = arith.select %154, %155, %156 : vector<44x87xi1>, vector<44x87xf32>
    %c0_119 = arith.constant 0 : index
    %c0_120 = arith.constant 0 : index
    %158 = vector.load %arg4[%c0_119, %c0_120] : memref<1x128xf32, #tpu.memory_space<vmem>>, vector<1x128xf32>
    %159 = vector.extract_strided_slice %149 {offsets = [0, 0], sizes = [87, 128], strides = [1, 1]} : vector<187x128xf32> to vector<87x128xf32>
    %160 = vector.extract_strided_slice %149 {offsets = [1, 0], sizes = [87, 128], strides = [1, 1]} : vector<187x128xf32> to vector<87x128xf32>
    %161 = arith.maximumf %159, %160 : vector<87x128xf32>
    %cst_121 = arith.constant dense<0.000000e+00> : vector<44x128xf32>
    %162 = tpu.matmul %157, %161, %cst_121 {dimension_numbers = #tpu.dot_dimension_numbers<[1], [0], [0], [1], [0, 0, 1, 1], [], []>} : vector<44x87xf32>, vector<87x128xf32>, vector<44x128xf32> -> vector<44x128xf32>
    %163 = vector.broadcast %158 : vector<1x128xf32> to vector<44x128xf32>
    %164 = arith.addf %162, %163 : vector<44x128xf32>
    %cst_122 = arith.constant 0.000000e+00 : f32
    %165 = vector.broadcast %cst_122 : f32 to vector<44x128xf32>
    %166 = arith.maximumf %164, %165 : vector<44x128xf32>
    %167 = vector.extract_strided_slice %149 {offsets = [98, 0], sizes = [87, 128], strides = [1, 1]} : vector<187x128xf32> to vector<87x128xf32>
    %168 = vector.extract_strided_slice %149 {offsets = [99, 0], sizes = [87, 128], strides = [1, 1]} : vector<187x128xf32> to vector<87x128xf32>
    %169 = arith.maximumf %167, %168 : vector<87x128xf32>
    %cst_123 = arith.constant dense<0.000000e+00> : vector<44x128xf32>
    %170 = tpu.matmul %157, %169, %cst_123 {dimension_numbers = #tpu.dot_dimension_numbers<[1], [0], [0], [1], [0, 0, 1, 1], [], []>} : vector<44x87xf32>, vector<87x128xf32>, vector<44x128xf32> -> vector<44x128xf32>
    %171 = vector.broadcast %158 : vector<1x128xf32> to vector<44x128xf32>
    %172 = arith.addf %170, %171 : vector<44x128xf32>
    %cst_124 = arith.constant 0.000000e+00 : f32
    %173 = vector.broadcast %cst_124 : f32 to vector<44x128xf32>
    %174 = arith.maximumf %172, %173 : vector<44x128xf32>
    %cst_125 = arith.constant 0.000000e+00 : f32
    %175 = vector.broadcast %cst_125 : f32 to vector<1x128xf32>
    %c0_126 = arith.constant 0 : index
    %c0_127 = arith.constant 0 : index
    %176 = vector.load %arg18[%c0_126, %c0_127] : memref<92x128xf32, #tpu.memory_space<vmem>>, vector<1x128xf32>
    tpu.vector_store %arg18[%c0_126, %c0_127], %175 {strides = array<i32>} : memref<92x128xf32, #tpu.memory_space<vmem>>, vector<1x128xf32>,
    %c1_128 = arith.constant 1 : index
    %c0_129 = arith.constant 0 : index
    %177 = vector.load %arg18[%c1_128, %c0_129] : memref<92x128xf32, #tpu.memory_space<vmem>>, vector<44x128xf32>
    tpu.vector_store %arg18[%c1_128, %c0_129], %166 {strides = array<i32>} : memref<92x128xf32, #tpu.memory_space<vmem>>, vector<44x128xf32>,
    %c45 = arith.constant 45 : index
    %c0_130 = arith.constant 0 : index
    %178 = vector.load %arg18[%c45, %c0_130] : memref<92x128xf32, #tpu.memory_space<vmem>>, vector<1x128xf32>
    tpu.vector_store %arg18[%c45, %c0_130], %175 {strides = array<i32>} : memref<92x128xf32, #tpu.memory_space<vmem>>, vector<1x128xf32>,
    %c46 = arith.constant 46 : index
    %c0_131 = arith.constant 0 : index
    %179 = vector.load %arg18[%c46, %c0_131] : memref<92x128xf32, #tpu.memory_space<vmem>>, vector<1x128xf32>
    tpu.vector_store %arg18[%c46, %c0_131], %175 {strides = array<i32>} : memref<92x128xf32, #tpu.memory_space<vmem>>, vector<1x128xf32>,
    %c47 = arith.constant 47 : index
    %c0_132 = arith.constant 0 : index
    %180 = vector.load %arg18[%c47, %c0_132] : memref<92x128xf32, #tpu.memory_space<vmem>>, vector<44x128xf32>
    tpu.vector_store %arg18[%c47, %c0_132], %174 {strides = array<i32>} : memref<92x128xf32, #tpu.memory_space<vmem>>, vector<44x128xf32>,
    %c91 = arith.constant 91 : index
    %c0_133 = arith.constant 0 : index
    %181 = vector.load %arg18[%c91, %c0_133] : memref<92x128xf32, #tpu.memory_space<vmem>>, vector<1x128xf32>
    tpu.vector_store %arg18[%c91, %c0_133], %175 {strides = array<i32>} : memref<92x128xf32, #tpu.memory_space<vmem>>, vector<1x128xf32>,
    %c0_134 = arith.constant 0 : index
    %c0_135 = arith.constant 0 : index
    %182 = vector.load %arg18[%c0_134, %c0_135] : memref<92x128xf32, #tpu.memory_space<vmem>>, vector<83x128xf32>
    %c0_136 = arith.constant 0 : index
    %c0_137 = arith.constant 0 : index
    %c0_138 = arith.constant 0 : index
    %183 = vector.load %arg5[%c0_136, %c0_137, %c0_138] : memref<10x128x128xf32, #tpu.memory_space<vmem>>, vector<1x128x128xf32>
    %184 = vector.shape_cast %183 : vector<1x128x128xf32> to vector<128x128xf32>
    %cst_139 = arith.constant dense<0.000000e+00> : vector<83x128xf32>
    %185 = tpu.matmul %182, %184, %cst_139 {dimension_numbers = #tpu.dot_dimension_numbers<[1], [0], [0], [1], [0, 0, 1, 1], [], []>} : vector<83x128xf32>, vector<128x128xf32>, vector<83x128xf32> -> vector<83x128xf32>
    %c1_140 = arith.constant 1 : index
    %c0_141 = arith.constant 0 : index
    %186 = vector.load %arg18[%c1_140, %c0_141] : memref<92x128xf32, #tpu.memory_space<vmem>>, vector<83x128xf32>
    %c1_142 = arith.constant 1 : index
    %c0_143 = arith.constant 0 : index
    %c0_144 = arith.constant 0 : index
    %187 = vector.load %arg5[%c1_142, %c0_143, %c0_144] : memref<10x128x128xf32, #tpu.memory_space<vmem>>, vector<1x128x128xf32>
    %188 = vector.shape_cast %187 : vector<1x128x128xf32> to vector<128x128xf32>
    %cst_145 = arith.constant dense<0.000000e+00> : vector<83x128xf32>
    %189 = tpu.matmul %186, %188, %cst_145 {dimension_numbers = #tpu.dot_dimension_numbers<[1], [0], [0], [1], [0, 0, 1, 1], [], []>} : vector<83x128xf32>, vector<128x128xf32>, vector<83x128xf32> -> vector<83x128xf32>
    %190 = arith.addf %185, %189 : vector<83x128xf32>
    %c2_146 = arith.constant 2 : index
    %c0_147 = arith.constant 0 : index
    %191 = vector.load %arg18[%c2_146, %c0_147] : memref<92x128xf32, #tpu.memory_space<vmem>>, vector<83x128xf32>
    %c2_148 = arith.constant 2 : index
    %c0_149 = arith.constant 0 : index
    %c0_150 = arith.constant 0 : index
    %192 = vector.load %arg5[%c2_148, %c0_149, %c0_150] : memref<10x128x128xf32, #tpu.memory_space<vmem>>, vector<1x128x128xf32>
    %193 = vector.shape_cast %192 : vector<1x128x128xf32> to vector<128x128xf32>
    %cst_151 = arith.constant dense<0.000000e+00> : vector<83x128xf32>
    %194 = tpu.matmul %191, %193, %cst_151 {dimension_numbers = #tpu.dot_dimension_numbers<[1], [0], [0], [1], [0, 0, 1, 1], [], []>} : vector<83x128xf32>, vector<128x128xf32>, vector<83x128xf32> -> vector<83x128xf32>
    %195 = arith.addf %190, %194 : vector<83x128xf32>
    %c3_152 = arith.constant 3 : index
    %c0_153 = arith.constant 0 : index
    %196 = vector.load %arg18[%c3_152, %c0_153] : memref<92x128xf32, #tpu.memory_space<vmem>>, vector<83x128xf32>
    %c3_154 = arith.constant 3 : index
    %c0_155 = arith.constant 0 : index
    %c0_156 = arith.constant 0 : index
    %197 = vector.load %arg5[%c3_154, %c0_155, %c0_156] : memref<10x128x128xf32, #tpu.memory_space<vmem>>, vector<1x128x128xf32>
    %198 = vector.shape_cast %197 : vector<1x128x128xf32> to vector<128x128xf32>
    %cst_157 = arith.constant dense<0.000000e+00> : vector<83x128xf32>
    %199 = tpu.matmul %196, %198, %cst_157 {dimension_numbers = #tpu.dot_dimension_numbers<[1], [0], [0], [1], [0, 0, 1, 1], [], []>} : vector<83x128xf32>, vector<128x128xf32>, vector<83x128xf32> -> vector<83x128xf32>
    %200 = arith.addf %195, %199 : vector<83x128xf32>
    %c4_158 = arith.constant 4 : index
    %c0_159 = arith.constant 0 : index
    %201 = vector.load %arg18[%c4_158, %c0_159] : memref<92x128xf32, #tpu.memory_space<vmem>>, vector<83x128xf32>
    %c4_160 = arith.constant 4 : index
    %c0_161 = arith.constant 0 : index
    %c0_162 = arith.constant 0 : index
    %202 = vector.load %arg5[%c4_160, %c0_161, %c0_162] : memref<10x128x128xf32, #tpu.memory_space<vmem>>, vector<1x128x128xf32>
    %203 = vector.shape_cast %202 : vector<1x128x128xf32> to vector<128x128xf32>
    %cst_163 = arith.constant dense<0.000000e+00> : vector<83x128xf32>
    %204 = tpu.matmul %201, %203, %cst_163 {dimension_numbers = #tpu.dot_dimension_numbers<[1], [0], [0], [1], [0, 0, 1, 1], [], []>} : vector<83x128xf32>, vector<128x128xf32>, vector<83x128xf32> -> vector<83x128xf32>
    %205 = arith.addf %200, %204 : vector<83x128xf32>
    %c5_164 = arith.constant 5 : index
    %c0_165 = arith.constant 0 : index
    %206 = vector.load %arg18[%c5_164, %c0_165] : memref<92x128xf32, #tpu.memory_space<vmem>>, vector<83x128xf32>
    %c5_166 = arith.constant 5 : index
    %c0_167 = arith.constant 0 : index
    %c0_168 = arith.constant 0 : index
    %207 = vector.load %arg5[%c5_166, %c0_167, %c0_168] : memref<10x128x128xf32, #tpu.memory_space<vmem>>, vector<1x128x128xf32>
    %208 = vector.shape_cast %207 : vector<1x128x128xf32> to vector<128x128xf32>
    %cst_169 = arith.constant dense<0.000000e+00> : vector<83x128xf32>
    %209 = tpu.matmul %206, %208, %cst_169 {dimension_numbers = #tpu.dot_dimension_numbers<[1], [0], [0], [1], [0, 0, 1, 1], [], []>} : vector<83x128xf32>, vector<128x128xf32>, vector<83x128xf32> -> vector<83x128xf32>
    %210 = arith.addf %205, %209 : vector<83x128xf32>
    %c6_170 = arith.constant 6 : index
    %c0_171 = arith.constant 0 : index
    %211 = vector.load %arg18[%c6_170, %c0_171] : memref<92x128xf32, #tpu.memory_space<vmem>>, vector<83x128xf32>
    %c6_172 = arith.constant 6 : index
    %c0_173 = arith.constant 0 : index
    %c0_174 = arith.constant 0 : index
    %212 = vector.load %arg5[%c6_172, %c0_173, %c0_174] : memref<10x128x128xf32, #tpu.memory_space<vmem>>, vector<1x128x128xf32>
    %213 = vector.shape_cast %212 : vector<1x128x128xf32> to vector<128x128xf32>
    %cst_175 = arith.constant dense<0.000000e+00> : vector<83x128xf32>
    %214 = tpu.matmul %211, %213, %cst_175 {dimension_numbers = #tpu.dot_dimension_numbers<[1], [0], [0], [1], [0, 0, 1, 1], [], []>} : vector<83x128xf32>, vector<128x128xf32>, vector<83x128xf32> -> vector<83x128xf32>
    %215 = arith.addf %210, %214 : vector<83x128xf32>
    %c7_176 = arith.constant 7 : index
    %c0_177 = arith.constant 0 : index
    %216 = vector.load %arg18[%c7_176, %c0_177] : memref<92x128xf32, #tpu.memory_space<vmem>>, vector<83x128xf32>
    %c7_178 = arith.constant 7 : index
    %c0_179 = arith.constant 0 : index
    %c0_180 = arith.constant 0 : index
    %217 = vector.load %arg5[%c7_178, %c0_179, %c0_180] : memref<10x128x128xf32, #tpu.memory_space<vmem>>, vector<1x128x128xf32>
    %218 = vector.shape_cast %217 : vector<1x128x128xf32> to vector<128x128xf32>
    %cst_181 = arith.constant dense<0.000000e+00> : vector<83x128xf32>
    %219 = tpu.matmul %216, %218, %cst_181 {dimension_numbers = #tpu.dot_dimension_numbers<[1], [0], [0], [1], [0, 0, 1, 1], [], []>} : vector<83x128xf32>, vector<128x128xf32>, vector<83x128xf32> -> vector<83x128xf32>
    %220 = arith.addf %215, %219 : vector<83x128xf32>
    %c8_182 = arith.constant 8 : index
    %c0_183 = arith.constant 0 : index
    %221 = vector.load %arg18[%c8_182, %c0_183] : memref<92x128xf32, #tpu.memory_space<vmem>>, vector<83x128xf32>
    %c8_184 = arith.constant 8 : index
    %c0_185 = arith.constant 0 : index
    %c0_186 = arith.constant 0 : index
    %222 = vector.load %arg5[%c8_184, %c0_185, %c0_186] : memref<10x128x128xf32, #tpu.memory_space<vmem>>, vector<1x128x128xf32>
    %223 = vector.shape_cast %222 : vector<1x128x128xf32> to vector<128x128xf32>
    %cst_187 = arith.constant dense<0.000000e+00> : vector<83x128xf32>
    %224 = tpu.matmul %221, %223, %cst_187 {dimension_numbers = #tpu.dot_dimension_numbers<[1], [0], [0], [1], [0, 0, 1, 1], [], []>} : vector<83x128xf32>, vector<128x128xf32>, vector<83x128xf32> -> vector<83x128xf32>
    %225 = arith.addf %220, %224 : vector<83x128xf32>
    %c9_188 = arith.constant 9 : index
    %c0_189 = arith.constant 0 : index
    %226 = vector.load %arg18[%c9_188, %c0_189] : memref<92x128xf32, #tpu.memory_space<vmem>>, vector<83x128xf32>
    %c9_190 = arith.constant 9 : index
    %c0_191 = arith.constant 0 : index
    %c0_192 = arith.constant 0 : index
    %227 = vector.load %arg5[%c9_190, %c0_191, %c0_192] : memref<10x128x128xf32, #tpu.memory_space<vmem>>, vector<1x128x128xf32>
    %228 = vector.shape_cast %227 : vector<1x128x128xf32> to vector<128x128xf32>
    %cst_193 = arith.constant dense<0.000000e+00> : vector<83x128xf32>
    %229 = tpu.matmul %226, %228, %cst_193 {dimension_numbers = #tpu.dot_dimension_numbers<[1], [0], [0], [1], [0, 0, 1, 1], [], []>} : vector<83x128xf32>, vector<128x128xf32>, vector<83x128xf32> -> vector<83x128xf32>
    %230 = arith.addf %225, %229 : vector<83x128xf32>
    %231 = tpu.iota {dimensions = array<i32: 0>} : vector<18x35xi32>
    %232 = tpu.iota {dimensions = array<i32: 1>} : vector<18x35xi32>
    %c2_i32_194 = arith.constant 2 : i32
    %233 = vector.broadcast %c2_i32_194 : i32 to vector<18x35xi32>
    %234 = arith.muli %233, %231 : vector<18x35xi32>
    %235 = arith.cmpi eq, %232, %234 : vector<18x35xi32>
    %cst_195 = arith.constant 1.000000e+00 : f32
    %cst_196 = arith.constant 0.000000e+00 : f32
    %236 = vector.broadcast %cst_195 : f32 to vector<18x35xf32>
    %237 = vector.broadcast %cst_196 : f32 to vector<18x35xf32>
    %238 = arith.select %235, %236, %237 : vector<18x35xi1>, vector<18x35xf32>
    %c0_197 = arith.constant 0 : index
    %c0_198 = arith.constant 0 : index
    %239 = vector.load %arg6[%c0_197, %c0_198] : memref<1x128xf32, #tpu.memory_space<vmem>>, vector<1x128xf32>
    %240 = vector.extract_strided_slice %230 {offsets = [0, 0], sizes = [35, 128], strides = [1, 1]} : vector<83x128xf32> to vector<35x128xf32>
    %241 = vector.extract_strided_slice %230 {offsets = [1, 0], sizes = [35, 128], strides = [1, 1]} : vector<83x128xf32> to vector<35x128xf32>
    %242 = arith.maximumf %240, %241 : vector<35x128xf32>
    %cst_199 = arith.constant dense<0.000000e+00> : vector<18x128xf32>
    %243 = tpu.matmul %238, %242, %cst_199 {dimension_numbers = #tpu.dot_dimension_numbers<[1], [0], [0], [1], [0, 0, 1, 1], [], []>} : vector<18x35xf32>, vector<35x128xf32>, vector<18x128xf32> -> vector<18x128xf32>
    %244 = vector.broadcast %239 : vector<1x128xf32> to vector<18x128xf32>
    %245 = arith.addf %243, %244 : vector<18x128xf32>
    %cst_200 = arith.constant 0.000000e+00 : f32
    %246 = vector.broadcast %cst_200 : f32 to vector<18x128xf32>
    %247 = arith.maximumf %245, %246 : vector<18x128xf32>
    %248 = vector.extract_strided_slice %230 {offsets = [46, 0], sizes = [35, 128], strides = [1, 1]} : vector<83x128xf32> to vector<35x128xf32>
    %249 = vector.extract_strided_slice %230 {offsets = [47, 0], sizes = [35, 128], strides = [1, 1]} : vector<83x128xf32> to vector<35x128xf32>
    %250 = arith.maximumf %248, %249 : vector<35x128xf32>
    %cst_201 = arith.constant dense<0.000000e+00> : vector<18x128xf32>
    %251 = tpu.matmul %238, %250, %cst_201 {dimension_numbers = #tpu.dot_dimension_numbers<[1], [0], [0], [1], [0, 0, 1, 1], [], []>} : vector<18x35xf32>, vector<35x128xf32>, vector<18x128xf32> -> vector<18x128xf32>
    %252 = vector.broadcast %239 : vector<1x128xf32> to vector<18x128xf32>
    %253 = arith.addf %251, %252 : vector<18x128xf32>
    %cst_202 = arith.constant 0.000000e+00 : f32
    %254 = vector.broadcast %cst_202 : f32 to vector<18x128xf32>
    %255 = arith.maximumf %253, %254 : vector<18x128xf32>
    %cst_203 = arith.constant 0.000000e+00 : f32
    %256 = vector.broadcast %cst_203 : f32 to vector<1x128xf32>
    %c0_204 = arith.constant 0 : index
    %c0_205 = arith.constant 0 : index
    %257 = vector.load %arg19[%c0_204, %c0_205] : memref<40x128xf32, #tpu.memory_space<vmem>>, vector<1x128xf32>
    tpu.vector_store %arg19[%c0_204, %c0_205], %256 {strides = array<i32>} : memref<40x128xf32, #tpu.memory_space<vmem>>, vector<1x128xf32>,
    %c1_206 = arith.constant 1 : index
    %c0_207 = arith.constant 0 : index
    %258 = vector.load %arg19[%c1_206, %c0_207] : memref<40x128xf32, #tpu.memory_space<vmem>>, vector<18x128xf32>
    tpu.vector_store %arg19[%c1_206, %c0_207], %247 {strides = array<i32>} : memref<40x128xf32, #tpu.memory_space<vmem>>, vector<18x128xf32>,
    %c19 = arith.constant 19 : index
    %c0_208 = arith.constant 0 : index
    %259 = vector.load %arg19[%c19, %c0_208] : memref<40x128xf32, #tpu.memory_space<vmem>>, vector<1x128xf32>
    tpu.vector_store %arg19[%c19, %c0_208], %256 {strides = array<i32>} : memref<40x128xf32, #tpu.memory_space<vmem>>, vector<1x128xf32>,
    %c20 = arith.constant 20 : index
    %c0_209 = arith.constant 0 : index
    %260 = vector.load %arg19[%c20, %c0_209] : memref<40x128xf32, #tpu.memory_space<vmem>>, vector<1x128xf32>
    tpu.vector_store %arg19[%c20, %c0_209], %256 {strides = array<i32>} : memref<40x128xf32, #tpu.memory_space<vmem>>, vector<1x128xf32>,
    %c21 = arith.constant 21 : index
    %c0_210 = arith.constant 0 : index
    %261 = vector.load %arg19[%c21, %c0_210] : memref<40x128xf32, #tpu.memory_space<vmem>>, vector<18x128xf32>
    tpu.vector_store %arg19[%c21, %c0_210], %255 {strides = array<i32>} : memref<40x128xf32, #tpu.memory_space<vmem>>, vector<18x128xf32>,
    %c39 = arith.constant 39 : index
    %c0_211 = arith.constant 0 : index
    %262 = vector.load %arg19[%c39, %c0_211] : memref<40x128xf32, #tpu.memory_space<vmem>>, vector<1x128xf32>
    tpu.vector_store %arg19[%c39, %c0_211], %256 {strides = array<i32>} : memref<40x128xf32, #tpu.memory_space<vmem>>, vector<1x128xf32>,
    %c0_212 = arith.constant 0 : index
    %c0_213 = arith.constant 0 : index
    %263 = vector.load %arg19[%c0_212, %c0_213] : memref<40x128xf32, #tpu.memory_space<vmem>>, vector<31x128xf32>
    %c0_214 = arith.constant 0 : index
    %c0_215 = arith.constant 0 : index
    %c0_216 = arith.constant 0 : index
    %264 = vector.load %arg7[%c0_214, %c0_215, %c0_216] : memref<10x128x64xf32, #tpu.memory_space<vmem>>, vector<1x128x64xf32>
    %265 = vector.shape_cast %264 : vector<1x128x64xf32> to vector<128x64xf32>
    %cst_217 = arith.constant dense<0.000000e+00> : vector<31x64xf32>
    %266 = tpu.matmul %263, %265, %cst_217 {dimension_numbers = #tpu.dot_dimension_numbers<[1], [0], [0], [1], [0, 0, 1, 1], [], []>} : vector<31x128xf32>, vector<128x64xf32>, vector<31x64xf32> -> vector<31x64xf32>
    %c1_218 = arith.constant 1 : index
    %c0_219 = arith.constant 0 : index
    %267 = vector.load %arg19[%c1_218, %c0_219] : memref<40x128xf32, #tpu.memory_space<vmem>>, vector<31x128xf32>
    %c1_220 = arith.constant 1 : index
    %c0_221 = arith.constant 0 : index
    %c0_222 = arith.constant 0 : index
    %268 = vector.load %arg7[%c1_220, %c0_221, %c0_222] : memref<10x128x64xf32, #tpu.memory_space<vmem>>, vector<1x128x64xf32>
    %269 = vector.shape_cast %268 : vector<1x128x64xf32> to vector<128x64xf32>
    %cst_223 = arith.constant dense<0.000000e+00> : vector<31x64xf32>
    %270 = tpu.matmul %267, %269, %cst_223 {dimension_numbers = #tpu.dot_dimension_numbers<[1], [0], [0], [1], [0, 0, 1, 1], [], []>} : vector<31x128xf32>, vector<128x64xf32>, vector<31x64xf32> -> vector<31x64xf32>
    %271 = arith.addf %266, %270 : vector<31x64xf32>
    %c2_224 = arith.constant 2 : index
    %c0_225 = arith.constant 0 : index
    %272 = vector.load %arg19[%c2_224, %c0_225] : memref<40x128xf32, #tpu.memory_space<vmem>>, vector<31x128xf32>
    %c2_226 = arith.constant 2 : index
    %c0_227 = arith.constant 0 : index
    %c0_228 = arith.constant 0 : index
    %273 = vector.load %arg7[%c2_226, %c0_227, %c0_228] : memref<10x128x64xf32, #tpu.memory_space<vmem>>, vector<1x128x64xf32>
    %274 = vector.shape_cast %273 : vector<1x128x64xf32> to vector<128x64xf32>
    %cst_229 = arith.constant dense<0.000000e+00> : vector<31x64xf32>
    %275 = tpu.matmul %272, %274, %cst_229 {dimension_numbers = #tpu.dot_dimension_numbers<[1], [0], [0], [1], [0, 0, 1, 1], [], []>} : vector<31x128xf32>, vector<128x64xf32>, vector<31x64xf32> -> vector<31x64xf32>
    %276 = arith.addf %271, %275 : vector<31x64xf32>
    %c3_230 = arith.constant 3 : index
    %c0_231 = arith.constant 0 : index
    %277 = vector.load %arg19[%c3_230, %c0_231] : memref<40x128xf32, #tpu.memory_space<vmem>>, vector<31x128xf32>
    %c3_232 = arith.constant 3 : index
    %c0_233 = arith.constant 0 : index
    %c0_234 = arith.constant 0 : index
    %278 = vector.load %arg7[%c3_232, %c0_233, %c0_234] : memref<10x128x64xf32, #tpu.memory_space<vmem>>, vector<1x128x64xf32>
    %279 = vector.shape_cast %278 : vector<1x128x64xf32> to vector<128x64xf32>
    %cst_235 = arith.constant dense<0.000000e+00> : vector<31x64xf32>
    %280 = tpu.matmul %277, %279, %cst_235 {dimension_numbers = #tpu.dot_dimension_numbers<[1], [0], [0], [1], [0, 0, 1, 1], [], []>} : vector<31x128xf32>, vector<128x64xf32>, vector<31x64xf32> -> vector<31x64xf32>
    %281 = arith.addf %276, %280 : vector<31x64xf32>
    %c4_236 = arith.constant 4 : index
    %c0_237 = arith.constant 0 : index
    %282 = vector.load %arg19[%c4_236, %c0_237] : memref<40x128xf32, #tpu.memory_space<vmem>>, vector<31x128xf32>
    %c4_238 = arith.constant 4 : index
    %c0_239 = arith.constant 0 : index
    %c0_240 = arith.constant 0 : index
    %283 = vector.load %arg7[%c4_238, %c0_239, %c0_240] : memref<10x128x64xf32, #tpu.memory_space<vmem>>, vector<1x128x64xf32>
    %284 = vector.shape_cast %283 : vector<1x128x64xf32> to vector<128x64xf32>
    %cst_241 = arith.constant dense<0.000000e+00> : vector<31x64xf32>
    %285 = tpu.matmul %282, %284, %cst_241 {dimension_numbers = #tpu.dot_dimension_numbers<[1], [0], [0], [1], [0, 0, 1, 1], [], []>} : vector<31x128xf32>, vector<128x64xf32>, vector<31x64xf32> -> vector<31x64xf32>
    %286 = arith.addf %281, %285 : vector<31x64xf32>
    %c5_242 = arith.constant 5 : index
    %c0_243 = arith.constant 0 : index
    %287 = vector.load %arg19[%c5_242, %c0_243] : memref<40x128xf32, #tpu.memory_space<vmem>>, vector<31x128xf32>
    %c5_244 = arith.constant 5 : index
    %c0_245 = arith.constant 0 : index
    %c0_246 = arith.constant 0 : index
    %288 = vector.load %arg7[%c5_244, %c0_245, %c0_246] : memref<10x128x64xf32, #tpu.memory_space<vmem>>, vector<1x128x64xf32>
    %289 = vector.shape_cast %288 : vector<1x128x64xf32> to vector<128x64xf32>
    %cst_247 = arith.constant dense<0.000000e+00> : vector<31x64xf32>
    %290 = tpu.matmul %287, %289, %cst_247 {dimension_numbers = #tpu.dot_dimension_numbers<[1], [0], [0], [1], [0, 0, 1, 1], [], []>} : vector<31x128xf32>, vector<128x64xf32>, vector<31x64xf32> -> vector<31x64xf32>
    %291 = arith.addf %286, %290 : vector<31x64xf32>
    %c6_248 = arith.constant 6 : index
    %c0_249 = arith.constant 0 : index
    %292 = vector.load %arg19[%c6_248, %c0_249] : memref<40x128xf32, #tpu.memory_space<vmem>>, vector<31x128xf32>
    %c6_250 = arith.constant 6 : index
    %c0_251 = arith.constant 0 : index
    %c0_252 = arith.constant 0 : index
    %293 = vector.load %arg7[%c6_250, %c0_251, %c0_252] : memref<10x128x64xf32, #tpu.memory_space<vmem>>, vector<1x128x64xf32>
    %294 = vector.shape_cast %293 : vector<1x128x64xf32> to vector<128x64xf32>
    %cst_253 = arith.constant dense<0.000000e+00> : vector<31x64xf32>
    %295 = tpu.matmul %292, %294, %cst_253 {dimension_numbers = #tpu.dot_dimension_numbers<[1], [0], [0], [1], [0, 0, 1, 1], [], []>} : vector<31x128xf32>, vector<128x64xf32>, vector<31x64xf32> -> vector<31x64xf32>
    %296 = arith.addf %291, %295 : vector<31x64xf32>
    %c7_254 = arith.constant 7 : index
    %c0_255 = arith.constant 0 : index
    %297 = vector.load %arg19[%c7_254, %c0_255] : memref<40x128xf32, #tpu.memory_space<vmem>>, vector<31x128xf32>
    %c7_256 = arith.constant 7 : index
    %c0_257 = arith.constant 0 : index
    %c0_258 = arith.constant 0 : index
    %298 = vector.load %arg7[%c7_256, %c0_257, %c0_258] : memref<10x128x64xf32, #tpu.memory_space<vmem>>, vector<1x128x64xf32>
    %299 = vector.shape_cast %298 : vector<1x128x64xf32> to vector<128x64xf32>
    %cst_259 = arith.constant dense<0.000000e+00> : vector<31x64xf32>
    %300 = tpu.matmul %297, %299, %cst_259 {dimension_numbers = #tpu.dot_dimension_numbers<[1], [0], [0], [1], [0, 0, 1, 1], [], []>} : vector<31x128xf32>, vector<128x64xf32>, vector<31x64xf32> -> vector<31x64xf32>
    %301 = arith.addf %296, %300 : vector<31x64xf32>
    %c8_260 = arith.constant 8 : index
    %c0_261 = arith.constant 0 : index
    %302 = vector.load %arg19[%c8_260, %c0_261] : memref<40x128xf32, #tpu.memory_space<vmem>>, vector<31x128xf32>
    %c8_262 = arith.constant 8 : index
    %c0_263 = arith.constant 0 : index
    %c0_264 = arith.constant 0 : index
    %303 = vector.load %arg7[%c8_262, %c0_263, %c0_264] : memref<10x128x64xf32, #tpu.memory_space<vmem>>, vector<1x128x64xf32>
    %304 = vector.shape_cast %303 : vector<1x128x64xf32> to vector<128x64xf32>
    %cst_265 = arith.constant dense<0.000000e+00> : vector<31x64xf32>
    %305 = tpu.matmul %302, %304, %cst_265 {dimension_numbers = #tpu.dot_dimension_numbers<[1], [0], [0], [1], [0, 0, 1, 1], [], []>} : vector<31x128xf32>, vector<128x64xf32>, vector<31x64xf32> -> vector<31x64xf32>
    %306 = arith.addf %301, %305 : vector<31x64xf32>
    %c9_266 = arith.constant 9 : index
    %c0_267 = arith.constant 0 : index
    %307 = vector.load %arg19[%c9_266, %c0_267] : memref<40x128xf32, #tpu.memory_space<vmem>>, vector<31x128xf32>
    %c9_268 = arith.constant 9 : index
    %c0_269 = arith.constant 0 : index
    %c0_270 = arith.constant 0 : index
    %308 = vector.load %arg7[%c9_268, %c0_269, %c0_270] : memref<10x128x64xf32, #tpu.memory_space<vmem>>, vector<1x128x64xf32>
    %309 = vector.shape_cast %308 : vector<1x128x64xf32> to vector<128x64xf32>
    %cst_271 = arith.constant dense<0.000000e+00> : vector<31x64xf32>
    %310 = tpu.matmul %307, %309, %cst_271 {dimension_numbers = #tpu.dot_dimension_numbers<[1], [0], [0], [1], [0, 0, 1, 1], [], []>} : vector<31x128xf32>, vector<128x64xf32>, vector<31x64xf32> -> vector<31x64xf32>
    %311 = arith.addf %306, %310 : vector<31x64xf32>
    %312 = tpu.iota {dimensions = array<i32: 0>} : vector<5x9xi32>
    %313 = tpu.iota {dimensions = array<i32: 1>} : vector<5x9xi32>
    %c2_i32_272 = arith.constant 2 : i32
    %314 = vector.broadcast %c2_i32_272 : i32 to vector<5x9xi32>
    %315 = arith.muli %314, %312 : vector<5x9xi32>
    %316 = arith.cmpi eq, %313, %315 : vector<5x9xi32>
    %cst_273 = arith.constant 1.000000e+00 : f32
    %cst_274 = arith.constant 0.000000e+00 : f32
    %317 = vector.broadcast %cst_273 : f32 to vector<5x9xf32>
    %318 = vector.broadcast %cst_274 : f32 to vector<5x9xf32>
    %319 = arith.select %316, %317, %318 : vector<5x9xi1>, vector<5x9xf32>
    %c0_275 = arith.constant 0 : index
    %c0_276 = arith.constant 0 : index
    %320 = vector.load %arg8[%c0_275, %c0_276] : memref<1x64xf32, #tpu.memory_space<vmem>>, vector<1x64xf32>
    %321 = vector.extract_strided_slice %311 {offsets = [0, 0], sizes = [9, 64], strides = [1, 1]} : vector<31x64xf32> to vector<9x64xf32>
    %322 = vector.extract_strided_slice %311 {offsets = [1, 0], sizes = [9, 64], strides = [1, 1]} : vector<31x64xf32> to vector<9x64xf32>
    %323 = arith.maximumf %321, %322 : vector<9x64xf32>
    %cst_277 = arith.constant dense<0.000000e+00> : vector<5x64xf32>
    %324 = tpu.matmul %319, %323, %cst_277 {dimension_numbers = #tpu.dot_dimension_numbers<[1], [0], [0], [1], [0, 0, 1, 1], [], []>} : vector<5x9xf32>, vector<9x64xf32>, vector<5x64xf32> -> vector<5x64xf32>
    %325 = vector.broadcast %320 : vector<1x64xf32> to vector<5x64xf32>
    %326 = arith.addf %324, %325 : vector<5x64xf32>
    %cst_278 = arith.constant 0.000000e+00 : f32
    %327 = vector.broadcast %cst_278 : f32 to vector<5x64xf32>
    %328 = arith.maximumf %326, %327 : vector<5x64xf32>
    %329 = vector.extract_strided_slice %311 {offsets = [20, 0], sizes = [9, 64], strides = [1, 1]} : vector<31x64xf32> to vector<9x64xf32>
    %330 = vector.extract_strided_slice %311 {offsets = [21, 0], sizes = [9, 64], strides = [1, 1]} : vector<31x64xf32> to vector<9x64xf32>
    %331 = arith.maximumf %329, %330 : vector<9x64xf32>
    %cst_279 = arith.constant dense<0.000000e+00> : vector<5x64xf32>
    %332 = tpu.matmul %319, %331, %cst_279 {dimension_numbers = #tpu.dot_dimension_numbers<[1], [0], [0], [1], [0, 0, 1, 1], [], []>} : vector<5x9xf32>, vector<9x64xf32>, vector<5x64xf32> -> vector<5x64xf32>
    %333 = vector.broadcast %320 : vector<1x64xf32> to vector<5x64xf32>
    %334 = arith.addf %332, %333 : vector<5x64xf32>
    %cst_280 = arith.constant 0.000000e+00 : f32
    %335 = vector.broadcast %cst_280 : f32 to vector<5x64xf32>
    %336 = arith.maximumf %334, %335 : vector<5x64xf32>
    %c0_281 = arith.constant 0 : index
    %c0_282 = arith.constant 0 : index
    %337 = vector.load %arg9[%c0_281, %c0_282] : memref<64x128xf32, #tpu.memory_space<vmem>>, vector<64x128xf32>
    %c0_283 = arith.constant 0 : index
    %c0_284 = arith.constant 0 : index
    %338 = vector.load %arg10[%c0_283, %c0_284] : memref<32x128xf32, #tpu.memory_space<vmem>>, vector<32x128xf32>
    %c0_285 = arith.constant 0 : index
    %c0_286 = arith.constant 0 : index
    %339 = vector.load %arg11[%c0_285, %c0_286] : memref<1x128xf32, #tpu.memory_space<vmem>>, vector<1x128xf32>
    %c0_287 = arith.constant 0 : index
    %c0_288 = arith.constant 0 : index
    %340 = vector.load %arg12[%c0_287, %c0_288] : memref<64x128xf32, #tpu.memory_space<vmem>>, vector<64x128xf32>
    %c0_289 = arith.constant 0 : index
    %c0_290 = arith.constant 0 : index
    %341 = vector.load %arg13[%c0_289, %c0_290] : memref<1x128xf32, #tpu.memory_space<vmem>>, vector<1x128xf32>
    %cst_291 = arith.constant dense<0.000000e+00> : vector<5x128xf32>
    %342 = tpu.matmul %328, %337, %cst_291 {dimension_numbers = #tpu.dot_dimension_numbers<[1], [0], [0], [1], [0, 0, 1, 1], [], []>} : vector<5x64xf32>, vector<64x128xf32>, vector<5x128xf32> -> vector<5x128xf32>
    %343 = vector.broadcast %339 : vector<1x128xf32> to vector<5x128xf32>
    %344 = arith.addf %342, %343 : vector<5x128xf32>
    %cst_292 = arith.constant dense<0.000000e+00> : vector<5x128xf32>
    %345 = tpu.matmul %336, %337, %cst_292 {dimension_numbers = #tpu.dot_dimension_numbers<[1], [0], [0], [1], [0, 0, 1, 1], [], []>} : vector<5x64xf32>, vector<64x128xf32>, vector<5x128xf32> -> vector<5x128xf32>
    %346 = vector.broadcast %339 : vector<1x128xf32> to vector<5x128xf32>
    %347 = arith.addf %345, %346 : vector<5x128xf32>
    %cst_293 = arith.constant 0.000000e+00 : f32
    %348 = vector.broadcast %cst_293 : f32 to vector<2x32xf32>
    %cst_294 = arith.constant 0.000000e+00 : f32
    %349 = vector.broadcast %cst_294 : f32 to vector<2x32xf32>
    %cst_295 = arith.constant 0.000000e+00 : f32
    %350 = vector.broadcast %cst_295 : f32 to vector<2x32xf32>
    %cst_296 = arith.constant 0.000000e+00 : f32
    %351 = vector.broadcast %cst_296 : f32 to vector<2x32xf32>
    %352 = vector.extract_strided_slice %344 {offsets = [0, 0], sizes = [1, 128], strides = [1, 1]} : vector<5x128xf32> to vector<1x128xf32>
    %353 = vector.extract_strided_slice %347 {offsets = [0, 0], sizes = [1, 128], strides = [1, 1]} : vector<5x128xf32> to vector<1x128xf32>
    %354 = tpu.concatenate %352, %353 in 0 : vector<1x128xf32>, vector<1x128xf32> -> vector<2x128xf32>
    %cst_297 = arith.constant dense<0.000000e+00> : vector<2x128xf32>
    %355 = tpu.matmul %348, %338, %cst_297 {dimension_numbers = #tpu.dot_dimension_numbers<[1], [0], [0], [1], [0, 0, 1, 1], [], []>} : vector<2x32xf32>, vector<32x128xf32>, vector<2x128xf32> -> vector<2x128xf32>
    %356 = arith.addf %354, %355 : vector<2x128xf32>
    %357 = arith.negf %356 : vector<2x128xf32>
    %358 = math.exp %357 : vector<2x128xf32>
    %cst_298 = arith.constant 1.000000e+00 : f32
    %359 = vector.broadcast %cst_298 : f32 to vector<2x128xf32>
    %360 = arith.addf %359, %358 : vector<2x128xf32>
    %361 = arith.divf %359, %360 : vector<2x128xf32>
    %362 = math.tanh %356 : vector<2x128xf32>
    %363 = vector.extract_strided_slice %361 {offsets = [0, 0], sizes = [2, 32], strides = [1, 1]} : vector<2x128xf32> to vector<2x32xf32>
    %364 = vector.extract_strided_slice %361 {offsets = [0, 32], sizes = [2, 32], strides = [1, 1]} : vector<2x128xf32> to vector<2x32xf32>
    %365 = vector.extract_strided_slice %362 {offsets = [0, 64], sizes = [2, 32], strides = [1, 1]} : vector<2x128xf32> to vector<2x32xf32>
    %366 = vector.extract_strided_slice %361 {offsets = [0, 96], sizes = [2, 32], strides = [1, 1]} : vector<2x128xf32> to vector<2x32xf32>
    %367 = arith.mulf %364, %349 : vector<2x32xf32>
    %368 = arith.mulf %363, %365 : vector<2x32xf32>
    %369 = arith.addf %367, %368 : vector<2x32xf32>
    %370 = math.tanh %369 : vector<2x32xf32>
    %371 = arith.mulf %366, %370 : vector<2x32xf32>
    %372 = tpu.concatenate %371, %350 in 1 : vector<2x32xf32>, vector<2x32xf32> -> vector<2x64xf32>
    %cst_299 = arith.constant dense<0.000000e+00> : vector<2x128xf32>
    %373 = tpu.matmul %372, %340, %cst_299 {dimension_numbers = #tpu.dot_dimension_numbers<[1], [0], [0], [1], [0, 0, 1, 1], [], []>} : vector<2x64xf32>, vector<64x128xf32>, vector<2x128xf32> -> vector<2x128xf32>
    %374 = vector.broadcast %341 : vector<1x128xf32> to vector<2x128xf32>
    %375 = arith.addf %373, %374 : vector<2x128xf32>
    %376 = arith.negf %375 : vector<2x128xf32>
    %377 = math.exp %376 : vector<2x128xf32>
    %cst_300 = arith.constant 1.000000e+00 : f32
    %378 = vector.broadcast %cst_300 : f32 to vector<2x128xf32>
    %379 = arith.addf %378, %377 : vector<2x128xf32>
    %380 = arith.divf %378, %379 : vector<2x128xf32>
    %381 = math.tanh %375 : vector<2x128xf32>
    %382 = vector.extract_strided_slice %380 {offsets = [0, 0], sizes = [2, 32], strides = [1, 1]} : vector<2x128xf32> to vector<2x32xf32>
    %383 = vector.extract_strided_slice %380 {offsets = [0, 32], sizes = [2, 32], strides = [1, 1]} : vector<2x128xf32> to vector<2x32xf32>
    %384 = vector.extract_strided_slice %381 {offsets = [0, 64], sizes = [2, 32], strides = [1, 1]} : vector<2x128xf32> to vector<2x32xf32>
    %385 = vector.extract_strided_slice %380 {offsets = [0, 96], sizes = [2, 32], strides = [1, 1]} : vector<2x128xf32> to vector<2x32xf32>
    %386 = arith.mulf %383, %351 : vector<2x32xf32>
    %387 = arith.mulf %382, %384 : vector<2x32xf32>
    %388 = arith.addf %386, %387 : vector<2x32xf32>
    %389 = math.tanh %388 : vector<2x32xf32>
    %390 = arith.mulf %385, %389 : vector<2x32xf32>
    %391 = vector.extract_strided_slice %344 {offsets = [1, 0], sizes = [1, 128], strides = [1, 1]} : vector<5x128xf32> to vector<1x128xf32>
    %392 = vector.extract_strided_slice %347 {offsets = [1, 0], sizes = [1, 128], strides = [1, 1]} : vector<5x128xf32> to vector<1x128xf32>
    %393 = tpu.concatenate %391, %392 in 0 : vector<1x128xf32>, vector<1x128xf32> -> vector<2x128xf32>
    %cst_301 = arith.constant dense<0.000000e+00> : vector<2x128xf32>
    %394 = tpu.matmul %371, %338, %cst_301 {dimension_numbers = #tpu.dot_dimension_numbers<[1], [0], [0], [1], [0, 0, 1, 1], [], []>} : vector<2x32xf32>, vector<32x128xf32>, vector<2x128xf32> -> vector<2x128xf32>
    %395 = arith.addf %393, %394 : vector<2x128xf32>
    %396 = arith.negf %395 : vector<2x128xf32>
    %397 = math.exp %396 : vector<2x128xf32>
    %cst_302 = arith.constant 1.000000e+00 : f32
    %398 = vector.broadcast %cst_302 : f32 to vector<2x128xf32>
    %399 = arith.addf %398, %397 : vector<2x128xf32>
    %400 = arith.divf %398, %399 : vector<2x128xf32>
    %401 = math.tanh %395 : vector<2x128xf32>
    %402 = vector.extract_strided_slice %400 {offsets = [0, 0], sizes = [2, 32], strides = [1, 1]} : vector<2x128xf32> to vector<2x32xf32>
    %403 = vector.extract_strided_slice %400 {offsets = [0, 32], sizes = [2, 32], strides = [1, 1]} : vector<2x128xf32> to vector<2x32xf32>
    %404 = vector.extract_strided_slice %401 {offsets = [0, 64], sizes = [2, 32], strides = [1, 1]} : vector<2x128xf32> to vector<2x32xf32>
    %405 = vector.extract_strided_slice %400 {offsets = [0, 96], sizes = [2, 32], strides = [1, 1]} : vector<2x128xf32> to vector<2x32xf32>
    %406 = arith.mulf %403, %369 : vector<2x32xf32>
    %407 = arith.mulf %402, %404 : vector<2x32xf32>
    %408 = arith.addf %406, %407 : vector<2x32xf32>
    %409 = math.tanh %408 : vector<2x32xf32>
    %410 = arith.mulf %405, %409 : vector<2x32xf32>
    %411 = tpu.concatenate %410, %390 in 1 : vector<2x32xf32>, vector<2x32xf32> -> vector<2x64xf32>
    %cst_303 = arith.constant dense<0.000000e+00> : vector<2x128xf32>
    %412 = tpu.matmul %411, %340, %cst_303 {dimension_numbers = #tpu.dot_dimension_numbers<[1], [0], [0], [1], [0, 0, 1, 1], [], []>} : vector<2x64xf32>, vector<64x128xf32>, vector<2x128xf32> -> vector<2x128xf32>
    %413 = vector.broadcast %341 : vector<1x128xf32> to vector<2x128xf32>
    %414 = arith.addf %412, %413 : vector<2x128xf32>
    %415 = arith.negf %414 : vector<2x128xf32>
    %416 = math.exp %415 : vector<2x128xf32>
    %cst_304 = arith.constant 1.000000e+00 : f32
    %417 = vector.broadcast %cst_304 : f32 to vector<2x128xf32>
    %418 = arith.addf %417, %416 : vector<2x128xf32>
    %419 = arith.divf %417, %418 : vector<2x128xf32>
    %420 = math.tanh %414 : vector<2x128xf32>
    %421 = vector.extract_strided_slice %419 {offsets = [0, 0], sizes = [2, 32], strides = [1, 1]} : vector<2x128xf32> to vector<2x32xf32>
    %422 = vector.extract_strided_slice %419 {offsets = [0, 32], sizes = [2, 32], strides = [1, 1]} : vector<2x128xf32> to vector<2x32xf32>
    %423 = vector.extract_strided_slice %420 {offsets = [0, 64], sizes = [2, 32], strides = [1, 1]} : vector<2x128xf32> to vector<2x32xf32>
    %424 = vector.extract_strided_slice %419 {offsets = [0, 96], sizes = [2, 32], strides = [1, 1]} : vector<2x128xf32> to vector<2x32xf32>
    %425 = arith.mulf %422, %388 : vector<2x32xf32>
    %426 = arith.mulf %421, %423 : vector<2x32xf32>
    %427 = arith.addf %425, %426 : vector<2x32xf32>
    %428 = math.tanh %427 : vector<2x32xf32>
    %429 = arith.mulf %424, %428 : vector<2x32xf32>
    %430 = vector.extract_strided_slice %344 {offsets = [2, 0], sizes = [1, 128], strides = [1, 1]} : vector<5x128xf32> to vector<1x128xf32>
    %431 = vector.extract_strided_slice %347 {offsets = [2, 0], sizes = [1, 128], strides = [1, 1]} : vector<5x128xf32> to vector<1x128xf32>
    %432 = tpu.concatenate %430, %431 in 0 : vector<1x128xf32>, vector<1x128xf32> -> vector<2x128xf32>
    %cst_305 = arith.constant dense<0.000000e+00> : vector<2x128xf32>
    %433 = tpu.matmul %410, %338, %cst_305 {dimension_numbers = #tpu.dot_dimension_numbers<[1], [0], [0], [1], [0, 0, 1, 1], [], []>} : vector<2x32xf32>, vector<32x128xf32>, vector<2x128xf32> -> vector<2x128xf32>
    %434 = arith.addf %432, %433 : vector<2x128xf32>
    %435 = arith.negf %434 : vector<2x128xf32>
    %436 = math.exp %435 : vector<2x128xf32>
    %cst_306 = arith.constant 1.000000e+00 : f32
    %437 = vector.broadcast %cst_306 : f32 to vector<2x128xf32>
    %438 = arith.addf %437, %436 : vector<2x128xf32>
    %439 = arith.divf %437, %438 : vector<2x128xf32>
    %440 = math.tanh %434 : vector<2x128xf32>
    %441 = vector.extract_strided_slice %439 {offsets = [0, 0], sizes = [2, 32], strides = [1, 1]} : vector<2x128xf32> to vector<2x32xf32>
    %442 = vector.extract_strided_slice %439 {offsets = [0, 32], sizes = [2, 32], strides = [1, 1]} : vector<2x128xf32> to vector<2x32xf32>
    %443 = vector.extract_strided_slice %440 {offsets = [0, 64], sizes = [2, 32], strides = [1, 1]} : vector<2x128xf32> to vector<2x32xf32>
    %444 = vector.extract_strided_slice %439 {offsets = [0, 96], sizes = [2, 32], strides = [1, 1]} : vector<2x128xf32> to vector<2x32xf32>
    %445 = arith.mulf %442, %408 : vector<2x32xf32>
    %446 = arith.mulf %441, %443 : vector<2x32xf32>
    %447 = arith.addf %445, %446 : vector<2x32xf32>
    %448 = math.tanh %447 : vector<2x32xf32>
    %449 = arith.mulf %444, %448 : vector<2x32xf32>
    %450 = tpu.concatenate %449, %429 in 1 : vector<2x32xf32>, vector<2x32xf32> -> vector<2x64xf32>
    %cst_307 = arith.constant dense<0.000000e+00> : vector<2x128xf32>
    %451 = tpu.matmul %450, %340, %cst_307 {dimension_numbers = #tpu.dot_dimension_numbers<[1], [0], [0], [1], [0, 0, 1, 1], [], []>} : vector<2x64xf32>, vector<64x128xf32>, vector<2x128xf32> -> vector<2x128xf32>
    %452 = vector.broadcast %341 : vector<1x128xf32> to vector<2x128xf32>
    %453 = arith.addf %451, %452 : vector<2x128xf32>
    %454 = arith.negf %453 : vector<2x128xf32>
    %455 = math.exp %454 : vector<2x128xf32>
    %cst_308 = arith.constant 1.000000e+00 : f32
    %456 = vector.broadcast %cst_308 : f32 to vector<2x128xf32>
    %457 = arith.addf %456, %455 : vector<2x128xf32>
    %458 = arith.divf %456, %457 : vector<2x128xf32>
    %459 = math.tanh %453 : vector<2x128xf32>
    %460 = vector.extract_strided_slice %458 {offsets = [0, 0], sizes = [2, 32], strides = [1, 1]} : vector<2x128xf32> to vector<2x32xf32>
    %461 = vector.extract_strided_slice %458 {offsets = [0, 32], sizes = [2, 32], strides = [1, 1]} : vector<2x128xf32> to vector<2x32xf32>
    %462 = vector.extract_strided_slice %459 {offsets = [0, 64], sizes = [2, 32], strides = [1, 1]} : vector<2x128xf32> to vector<2x32xf32>
    %463 = vector.extract_strided_slice %458 {offsets = [0, 96], sizes = [2, 32], strides = [1, 1]} : vector<2x128xf32> to vector<2x32xf32>
    %464 = arith.mulf %461, %427 : vector<2x32xf32>
    %465 = arith.mulf %460, %462 : vector<2x32xf32>
    %466 = arith.addf %464, %465 : vector<2x32xf32>
    %467 = math.tanh %466 : vector<2x32xf32>
    %468 = arith.mulf %463, %467 : vector<2x32xf32>
    %469 = vector.extract_strided_slice %344 {offsets = [3, 0], sizes = [1, 128], strides = [1, 1]} : vector<5x128xf32> to vector<1x128xf32>
    %470 = vector.extract_strided_slice %347 {offsets = [3, 0], sizes = [1, 128], strides = [1, 1]} : vector<5x128xf32> to vector<1x128xf32>
    %471 = tpu.concatenate %469, %470 in 0 : vector<1x128xf32>, vector<1x128xf32> -> vector<2x128xf32>
    %cst_309 = arith.constant dense<0.000000e+00> : vector<2x128xf32>
    %472 = tpu.matmul %449, %338, %cst_309 {dimension_numbers = #tpu.dot_dimension_numbers<[1], [0], [0], [1], [0, 0, 1, 1], [], []>} : vector<2x32xf32>, vector<32x128xf32>, vector<2x128xf32> -> vector<2x128xf32>
    %473 = arith.addf %471, %472 : vector<2x128xf32>
    %474 = arith.negf %473 : vector<2x128xf32>
    %475 = math.exp %474 : vector<2x128xf32>
    %cst_310 = arith.constant 1.000000e+00 : f32
    %476 = vector.broadcast %cst_310 : f32 to vector<2x128xf32>
    %477 = arith.addf %476, %475 : vector<2x128xf32>
    %478 = arith.divf %476, %477 : vector<2x128xf32>
    %479 = math.tanh %473 : vector<2x128xf32>
    %480 = vector.extract_strided_slice %478 {offsets = [0, 0], sizes = [2, 32], strides = [1, 1]} : vector<2x128xf32> to vector<2x32xf32>
    %481 = vector.extract_strided_slice %478 {offsets = [0, 32], sizes = [2, 32], strides = [1, 1]} : vector<2x128xf32> to vector<2x32xf32>
    %482 = vector.extract_strided_slice %479 {offsets = [0, 64], sizes = [2, 32], strides = [1, 1]} : vector<2x128xf32> to vector<2x32xf32>
    %483 = vector.extract_strided_slice %478 {offsets = [0, 96], sizes = [2, 32], strides = [1, 1]} : vector<2x128xf32> to vector<2x32xf32>
    %484 = arith.mulf %481, %447 : vector<2x32xf32>
    %485 = arith.mulf %480, %482 : vector<2x32xf32>
    %486 = arith.addf %484, %485 : vector<2x32xf32>
    %487 = math.tanh %486 : vector<2x32xf32>
    %488 = arith.mulf %483, %487 : vector<2x32xf32>
    %489 = tpu.concatenate %488, %468 in 1 : vector<2x32xf32>, vector<2x32xf32> -> vector<2x64xf32>
    %cst_311 = arith.constant dense<0.000000e+00> : vector<2x128xf32>
    %490 = tpu.matmul %489, %340, %cst_311 {dimension_numbers = #tpu.dot_dimension_numbers<[1], [0], [0], [1], [0, 0, 1, 1], [], []>} : vector<2x64xf32>, vector<64x128xf32>, vector<2x128xf32> -> vector<2x128xf32>
    %491 = vector.broadcast %341 : vector<1x128xf32> to vector<2x128xf32>
    %492 = arith.addf %490, %491 : vector<2x128xf32>
    %493 = arith.negf %492 : vector<2x128xf32>
    %494 = math.exp %493 : vector<2x128xf32>
    %cst_312 = arith.constant 1.000000e+00 : f32
    %495 = vector.broadcast %cst_312 : f32 to vector<2x128xf32>
    %496 = arith.addf %495, %494 : vector<2x128xf32>
    %497 = arith.divf %495, %496 : vector<2x128xf32>
    %498 = math.tanh %492 : vector<2x128xf32>
    %499 = vector.extract_strided_slice %497 {offsets = [0, 0], sizes = [2, 32], strides = [1, 1]} : vector<2x128xf32> to vector<2x32xf32>
    %500 = vector.extract_strided_slice %497 {offsets = [0, 32], sizes = [2, 32], strides = [1, 1]} : vector<2x128xf32> to vector<2x32xf32>
    %501 = vector.extract_strided_slice %498 {offsets = [0, 64], sizes = [2, 32], strides = [1, 1]} : vector<2x128xf32> to vector<2x32xf32>
    %502 = vector.extract_strided_slice %497 {offsets = [0, 96], sizes = [2, 32], strides = [1, 1]} : vector<2x128xf32> to vector<2x32xf32>
    %503 = arith.mulf %500, %466 : vector<2x32xf32>
    %504 = arith.mulf %499, %501 : vector<2x32xf32>
    %505 = arith.addf %503, %504 : vector<2x32xf32>
    %506 = math.tanh %505 : vector<2x32xf32>
    %507 = arith.mulf %502, %506 : vector<2x32xf32>
    %508 = vector.extract_strided_slice %344 {offsets = [4, 0], sizes = [1, 128], strides = [1, 1]} : vector<5x128xf32> to vector<1x128xf32>
    %509 = vector.extract_strided_slice %347 {offsets = [4, 0], sizes = [1, 128], strides = [1, 1]} : vector<5x128xf32> to vector<1x128xf32>
    %510 = tpu.concatenate %508, %509 in 0 : vector<1x128xf32>, vector<1x128xf32> -> vector<2x128xf32>
    %cst_313 = arith.constant dense<0.000000e+00> : vector<2x128xf32>
    %511 = tpu.matmul %488, %338, %cst_313 {dimension_numbers = #tpu.dot_dimension_numbers<[1], [0], [0], [1], [0, 0, 1, 1], [], []>} : vector<2x32xf32>, vector<32x128xf32>, vector<2x128xf32> -> vector<2x128xf32>
    %512 = arith.addf %510, %511 : vector<2x128xf32>
    %513 = arith.negf %512 : vector<2x128xf32>
    %514 = math.exp %513 : vector<2x128xf32>
    %cst_314 = arith.constant 1.000000e+00 : f32
    %515 = vector.broadcast %cst_314 : f32 to vector<2x128xf32>
    %516 = arith.addf %515, %514 : vector<2x128xf32>
    %517 = arith.divf %515, %516 : vector<2x128xf32>
    %518 = math.tanh %512 : vector<2x128xf32>
    %519 = vector.extract_strided_slice %517 {offsets = [0, 0], sizes = [2, 32], strides = [1, 1]} : vector<2x128xf32> to vector<2x32xf32>
    %520 = vector.extract_strided_slice %517 {offsets = [0, 32], sizes = [2, 32], strides = [1, 1]} : vector<2x128xf32> to vector<2x32xf32>
    %521 = vector.extract_strided_slice %518 {offsets = [0, 64], sizes = [2, 32], strides = [1, 1]} : vector<2x128xf32> to vector<2x32xf32>
    %522 = vector.extract_strided_slice %517 {offsets = [0, 96], sizes = [2, 32], strides = [1, 1]} : vector<2x128xf32> to vector<2x32xf32>
    %523 = arith.mulf %520, %486 : vector<2x32xf32>
    %524 = arith.mulf %519, %521 : vector<2x32xf32>
    %525 = arith.addf %523, %524 : vector<2x32xf32>
    %526 = math.tanh %525 : vector<2x32xf32>
    %527 = arith.mulf %522, %526 : vector<2x32xf32>
    %528 = tpu.concatenate %527, %507 in 1 : vector<2x32xf32>, vector<2x32xf32> -> vector<2x64xf32>
    %cst_315 = arith.constant dense<0.000000e+00> : vector<2x128xf32>
    %529 = tpu.matmul %528, %340, %cst_315 {dimension_numbers = #tpu.dot_dimension_numbers<[1], [0], [0], [1], [0, 0, 1, 1], [], []>} : vector<2x64xf32>, vector<64x128xf32>, vector<2x128xf32> -> vector<2x128xf32>
    %530 = vector.broadcast %341 : vector<1x128xf32> to vector<2x128xf32>
    %531 = arith.addf %529, %530 : vector<2x128xf32>
    %532 = arith.negf %531 : vector<2x128xf32>
    %533 = math.exp %532 : vector<2x128xf32>
    %cst_316 = arith.constant 1.000000e+00 : f32
    %534 = vector.broadcast %cst_316 : f32 to vector<2x128xf32>
    %535 = arith.addf %534, %533 : vector<2x128xf32>
    %536 = arith.divf %534, %535 : vector<2x128xf32>
    %537 = math.tanh %531 : vector<2x128xf32>
    %538 = vector.extract_strided_slice %536 {offsets = [0, 0], sizes = [2, 32], strides = [1, 1]} : vector<2x128xf32> to vector<2x32xf32>
    %539 = vector.extract_strided_slice %536 {offsets = [0, 32], sizes = [2, 32], strides = [1, 1]} : vector<2x128xf32> to vector<2x32xf32>
    %540 = vector.extract_strided_slice %537 {offsets = [0, 64], sizes = [2, 32], strides = [1, 1]} : vector<2x128xf32> to vector<2x32xf32>
    %541 = vector.extract_strided_slice %536 {offsets = [0, 96], sizes = [2, 32], strides = [1, 1]} : vector<2x128xf32> to vector<2x32xf32>
    %542 = arith.mulf %539, %505 : vector<2x32xf32>
    %543 = arith.mulf %538, %540 : vector<2x32xf32>
    %544 = arith.addf %542, %543 : vector<2x32xf32>
    %545 = math.tanh %544 : vector<2x32xf32>
    %546 = arith.mulf %541, %545 : vector<2x32xf32>
    %c0_317 = arith.constant 0 : index
    %c0_318 = arith.constant 0 : index
    %547 = vector.load %arg14[%c0_317, %c0_318] : memref<32x1xf32, #tpu.memory_space<vmem>>, vector<32x1xf32>
    %cst_319 = arith.constant dense<0.000000e+00> : vector<2x1xf32>
    %548 = tpu.matmul %546, %547, %cst_319 {dimension_numbers = #tpu.dot_dimension_numbers<[1], [0], [0], [1], [0, 0, 1, 1], [], []>} : vector<2x32xf32>, vector<32x1xf32>, vector<2x1xf32> -> vector<2x1xf32>
    %c0_320 = arith.constant 0 : index
    %c0_321 = arith.constant 0 : index
    %549 = vector.load %arg15[%c0_320, %c0_321] : memref<1x1xf32, #tpu.memory_space<vmem>>, vector<1x1xf32>
    %550 = vector.broadcast %549 : vector<1x1xf32> to vector<2x1xf32>
    %551 = arith.addf %548, %550 : vector<2x1xf32>
    %c0_322 = arith.constant 0 : index
    %c0_323 = arith.constant 0 : index
    %552 = vector.load %arg16[%c0_322, %c0_323] : memref<2x1xf32, #tpu.memory_space<vmem>>, vector<2x1xf32>
    tpu.vector_store %arg16[%c0_322, %c0_323], %551 {strides = array<i32>} : memref<2x1xf32, #tpu.memory_space<vmem>>, vector<2x1xf32>,
    return
  }
}

</mosaic_0001>

<bundles_post_ra>
// kernel: cnn_lstm_forward.1
= control target key start
LH: loop header
LB: loop body
LE: loop exit
PB: predicated region body
PF: predicated region fallthrough
CT: control target
= control target key end

     0   :  { %v10369_v0 = vmov 0   ;;  %vm4076_vm0 = vcmask 1046528   ;;  %vm4482_vm1 = vcmask 1045504   ;;  %vm4175_vm3 = vcmask 515072   ;;  %s10373_s19 = smov 32   ;;  %s16954_s0 = inlined_call_operand.vmem [shape: f32[404,1], index: 0, kind: input, shape index: {}]   ;;  %s16955_s1 = inlined_call_operand.vmem [shape: f32[10,1,64], index: 1, kind: input, shape index: {}]   ;;  %s16956_s2 = inlined_call_operand.vmem [shape: f32[1,64], index: 2, kind: input, shape index: {}]   ;;  %s16957_s3 = inlined_call_operand.vmem [shape: f32[10,64,128], index: 3, kind: input, shape index: {}]   ;;  %s16958_s4 = inlined_call_operand.vmem [shape: f32[1,128], index: 4, kind: input, shape index: {}]   ;;  %s16959_s5 = inlined_call_operand.vmem [shape: f32[10,128,128], index: 5, kind: input, shape index: {}]   ;;  %s16960_s6 = inlined_call_operand.vmem [shape: f32[1,128], index: 6, kind: input, shape index: {}]   ;;  %s16961_s7 = inlined_call_operand.vmem [shape: f32[10,128,64], index: 7, kind: input, shape index: {}]   ;;  %s16962_s8 = inlined_call_operand.vmem [shape: f32[1,64], index: 8, kind: input, shape index: {}]   ;;  %s16963_s9 = inlined_call_operand.vmem [shape: f32[64,128], index: 9, kind: input, shape index: {}]   ;;  %s16964_s11 = inlined_call_operand.vmem [shape: f32[1,128], index: 11, kind: input, shape index: {}]   ;;  %s16965_s10 = inlined_call_operand.vmem [shape: f32[32,128], index: 10, kind: input, shape index: {}]   ;;  %s16966_s12 = inlined_call_operand.vmem [shape: f32[64,128], index: 12, kind: input, shape index: {}]   ;;  %s16967_s13 = inlined_call_operand.vmem [shape: f32[1,128], index: 13, kind: input, shape index: {}]   ;;  %s16968_s14 = inlined_call_operand.vmem [shape: f32[32,1], index: 14, kind: input, shape index: {}]   ;;  %s16969_s15 = inlined_call_operand.<no memory space> [shape: f32[1,1], index: 15, kind: input, shape index: {}]   ;;  %s16970_s16 = inlined_call_operand.vmem [shape: f32[2,1], index: 16, kind: output, shape index: {}]  }
   0x1   :  { %17033 = sst [smem:[#allocation52_spill]] %s16954_s0  ;;  %10233 = vset.pattern.permute.xlu2 %v10369_v0  ;;  %10232 = vset.pattern.permute.xlu1 %v10369_v0 }
   0x2   :  { %s17034_s23 = sld [smem:[#allocation52_spill]]  ;;  %10231 = vset.pattern.permute.xlu0 %v10369_v0 }
   0x8   :  { %v10462_v1 = vld [vmem:[%s17034_s23 + $0x79] sm:$0xff]  ;;  %v10472_v3 = vld [vmem:[%s17034_s23 + $0x70] sm:$0xff]  ;;  %v10480_v4 = vld [vmem:[%s17034_s23 + $0x81] sm:$0xff] }
   0x9   :  { %v10467_v2 = vld [vmem:[%s17034_s23 + $0x78] sm:$0xff]  ;;  %530 = vperm.xlu1 %10232, %v10462_v1   ;;  %177 = vperm.xlu2 %10233, %v10472_v3   ;;  %v10485_v5 = vld [vmem:[%s17034_s23 + $0x80] sm:$0xff]  ;;  %v10504_v9 = vld [vmem:[%s17034_s23 + $0x68] sm:$0xff] }
   0xa   :  { %182 = vperm.xlu0 %10231, %v10467_v2   ;;  %v10490_v6 = vld [vmem:[%s17034_s23 + $0x71] sm:$0xff]  ;;  %v815_v7 = vld [vmem:[%s17034_s23 + $0x82] sm:$0xff]  ;;  %v814_v8 = vld [vmem:[%s17034_s23 + $0x7a] sm:$0xff] }
   0xb   :  { %v813_v10 = vld [vmem:[%s17034_s23 + $0x72] sm:$0xff]  ;;  %v10513_v11 = vld [vmem:[%s17034_s23 + $0x69] sm:$0xff]  ;;  %v1211_v12 = vld [vmem:[%s17034_s23 + $0x7b] sm:$0xff] }
   0xc   :  { %v10522_v13 = vld [vmem:[%s17034_s23 + $0x60] sm:$0xff]  ;;  %v1210_v16 = vld [vmem:[%s17034_s23 + $0x73] sm:$0xff]  ;;  %v812_v17 = vld [vmem:[%s17034_s23 + $0x6a] sm:$0xff] }
   0xd   :  { %v1212_v14 = vld [vmem:[%s17034_s23 + $0x83] sm:$0xff]  ;;  %v10546_v19 = vld [vmem:[%s17034_s23 + $0x58] sm:$0xff]  ;;  %v1209_v22 = vld [vmem:[%s17034_s23 + $0x6b] sm:$0xff] }
   0xe   :  { %v10530_v15 = vld [vmem:[%s17034_s23 + $0x61] sm:$0xff]  ;;  %v413_v21 = vld [vmem:[%s17034_s23 + $0x59] sm:$0xff]  ;;  %v10573_v27 = vld [vmem:[%s17034_s23 + $0x50] sm:$0xff] }
   0xf   :  { %v1608_v18 = vld [vmem:[%s17034_s23 + $0x7c] sm:$0xff]  ;;  %v1609_v20 = vld [vmem:[%s17034_s23 + $0x84] sm:$0xff]  ;;  %v1607_v24 = vld [vmem:[%s17034_s23 + $0x74] sm:$0xff] }
  0x10   :  { %v811_v23 = vld [vmem:[%s17034_s23 + $0x62] sm:$0xff]  ;;  %v810_v28 = vld [vmem:[%s17034_s23 + $0x5a] sm:$0xff]  ;;  %v412_v29 = vld [vmem:[%s17034_s23 + $0x51] sm:$0xff] }
  0x11   :  { %535 = vperm.xlu1 %10232, %v10480_v4   ;;  %525 = vperm.xlu2 %10233, %v10490_v6   ;;  %v2006_v25 = vld [vmem:[%s17034_s23 + $0x85] sm:$0xff]  ;;  %v2005_v26 = vld [vmem:[%s17034_s23 + $0x7d] sm:$0xff]  ;;  %v2004_v31 = vld [vmem:[%s17034_s23 + $0x75] sm:$0xff] }
  0x12   :  { %187 = vperm.xlu0 %10231, %v10485_v5   ;;  %v1208_v30 = vld [vmem:[%s17034_s23 + $0x63] sm:$0xff]  ;;  %v1606_v32 = vld [vmem:[%s17034_s23 + $0x6c] sm:$0xff]  ;;  %v1207_v38 = vld [vmem:[%s17034_s23 + $0x5b] sm:$0xff] }
  0x13   :  { %v2402_v33 = vld [vmem:[%s17034_s23 + $0x7e] sm:$0xff]  ;;  %v64_v34 = vld [vmem:[%s17034_s23 + $0x48] sm:$0xff]  ;;  %v809_v39 = vld [vmem:[%s17034_s23 + $0x52] sm:$0xff] }
  0x14   :  { %v2403_v35 = vld [vmem:[%s17034_s23 + $0x86] sm:$0xff]  ;;  %v2401_v42 = vld [vmem:[%s17034_s23 + $0x76] sm:$0xff]  ;;  %v2400_v58 = vld [vmem:[%s17034_s23 + $0x6e] sm:$0xff] }
  0x15   :  { %v411_v36 = vld [vmem:[%s17034_s23 + $0x49] sm:$0xff]  ;;  %v2799_v44 = vld [vmem:[%s17034_s23 + $0x7f] sm:$0xff]  ;;  %v1206_v52 = vld [vmem:[%s17034_s23 + $0x53] sm:$0xff] }
  0x16   :  { %v1605_v40 = vld [vmem:[%s17034_s23 + $0x64] sm:$0xff]  ;;  %v2003_v43 = vld [vmem:[%s17034_s23 + $0x6d] sm:$0xff]  ;;  %v1604_v54 = vld [vmem:[%s17034_s23 + $0x5c] sm:$0xff] }
  0x17   :  { %v63_v46 = vld [vmem:[%s17034_s23 + $0x40] sm:$0xff]  ;;  %v808_v53 = vld [vmem:[%s17034_s23 + $0x4a] sm:$0xff]  ;;  %v2798_v60 = vld [vmem:[%s17034_s23 + $0x77] sm:$0xff] }
  0x18   :  { %v2800_v47 = vld [vmem:[%s17034_s23 + $0x87] sm:$0xff] }
  0x19   :  { %932 = vperm.xlu1 %10232, %v815_v7   ;;  %172 = vperm.xlu2 %10233, %v10504_v9   ;;  %v410_v48 = vld [vmem:[%s17034_s23 + $0x41] sm:$0xff]  ;;  %v62_v7 = vld [vmem:[%s17034_s23 + $0x38] sm:$0xff] }
  0x1a   :  { %927 = vperm.xlu0 %10231, %v814_v8   ;;  %v2002_v59 = vld [vmem:[%s17034_s23 + $0x65] sm:$0xff] }
  0x1b   :  { %v10675_v0 = vld [vmem:[%s17034_s23 + $0x88] sm:$0xff] }
  0x1c   :  { %17035 = vst [vmem:[#allocation6_spill] sm:$0xff] %v10675_v0 }
  0x21   :  { %922 = vperm.xlu1 %10232, %v813_v10   ;;  %1324 = vperm.xlu2 %10233, %v1211_v12  }
  0x22   :  { %520 = vperm.xlu0 %10231, %v10513_v11  }
  0x29   :  { %167 = vperm.xlu1 %10232, %v10522_v13   ;;  %515 = vperm.xlu2 %10233, %v10530_v15  }
  0x2a   :  { %1329 = vperm.xlu0 %10231, %v1212_v14   ;;  %v807_v14 = vld [vmem:[%s17034_s23 + $0x42] sm:$0xff] }
  0x31   :  { %1319 = vperm.xlu1 %10232, %v1210_v16   ;;  %1721 = vperm.xlu2 %10233, %v1608_v18   ;;  %v409_v16 = vld [vmem:[%s17034_s23 + $0x39] sm:$0xff] }
  0x32   :  { %917 = vperm.xlu0 %10231, %v812_v17   ;;  %v1205_v17 = vld [vmem:[%s17034_s23 + $0x4b] sm:$0xff] }
  0x39   :  { %162 = vperm.xlu1 %10232, %v10546_v19   ;;  %510 = vperm.xlu2 %10233, %v413_v21   ;;  %v2001_v21 = vld [vmem:[%s17034_s23 + $0x5d] sm:$0xff] }
  0x3a   :  { %1726 = vperm.xlu0 %10231, %v1609_v20  }
  0x41   :  { %1314 = vperm.xlu1 %10232, %v1209_v22   ;;  %1716 = vperm.xlu2 %10233, %v1607_v24   ;;  %v1603_v22 = vld [vmem:[%s17034_s23 + $0x54] sm:$0xff] }
  0x42   :  { %912 = vperm.xlu0 %10231, %v811_v23   ;;  %v2399_v23 = vld [vmem:[%s17034_s23 + $0x66] sm:$0xff] }
  0x49   :  { %2123 = vperm.xlu1 %10232, %v2006_v25   ;;  %157 = vperm.xlu2 %10233, %v10573_v27  }
  0x4a   :  { %2118 = vperm.xlu0 %10231, %v2005_v26  }
  0x51   :  { %907 = vperm.xlu1 %10232, %v810_v28   ;;  %1309 = vperm.xlu2 %10233, %v1208_v30   ;;  %v2797_v28 = vld [vmem:[%s17034_s23 + $0x6f] sm:$0xff] }
  0x52   :  { %505 = vperm.xlu0 %10231, %v412_v29  }
  0x59   :  { %2113 = vperm.xlu1 %10232, %v2004_v31   ;;  %2515 = vperm.xlu2 %10233, %v2402_v33   ;;  %v10735_v33 = vld [vmem:[%s17034_s23 + $0x89] sm:$0xff] }
  0x5a   :  { %1711 = vperm.xlu0 %10231, %v1606_v32   ;;  %v61_v32 = vld [vmem:[%s17034_s23 + $0x30] sm:$0xff]  ;;  %17037 = vst [vmem:[#allocation8_spill] sm:$0xff] %v10735_v33 }
  0x61   :  { %152 = vperm.xlu1 %10232, %v64_v34   ;;  %500 = vperm.xlu2 %10233, %v411_v36   ;;  %v1204_v36 = vld [vmem:[%s17034_s23 + $0x43] sm:$0xff] }
  0x62   :  { %2520 = vperm.xlu0 %10231, %v2403_v35  }
  0x63   :  { %v10603_v37 = vpop.permute.xlu2 %177 }
  0x69   :  { %1304 = vperm.xlu1 %10232, %v1207_v38   ;;  %1706 = vperm.xlu2 %10233, %v1605_v40   ;;  %v806_v38 = vld [vmem:[%s17034_s23 + $0x3a] sm:$0xff] }
  0x6a   :  { %902 = vperm.xlu0 %10231, %v809_v39   ;;  %v1602_v39 = vld [vmem:[%s17034_s23 + $0x4c] sm:$0xff] }
  0x6b   :  { %v10614_v41 = vpop.permute.xlu2 %525 }
  0x71   :  { %2510 = vperm.xlu1 %10232, %v2401_v42   ;;  %2912 = vperm.xlu2 %10233, %v2799_v44   ;;  %v2398_v44 = vld [vmem:[%s17034_s23 + $0x5e] sm:$0xff] }
  0x72   :  { %2108 = vperm.xlu0 %10231, %v2003_v43  }
  0x73   :  { %v10625_v45 = vpop.permute.xlu2 %172 }
  0x79   :  { %147 = vperm.xlu1 %10232, %v63_v46   ;;  %495 = vperm.xlu2 %10233, %v410_v48   ;;  %v2000_v46 = vld [vmem:[%s17034_s23 + $0x55] sm:$0xff] }
  0x7a   :  { %2917 = vperm.xlu0 %10231, %v2800_v47   ;;  %v2796_v47 = vld [vmem:[%s17034_s23 + $0x67] sm:$0xff] }
  0x7b   :  { %v10636_v49 = vpop.permute.xlu1 %530  ;;  %v10640_v51 = vpop.permute.xlu2 %1324 }
  0x7c   :  { %v10638_v50 = vpop.permute.xlu0 %182 }
  0x81   :  { %1299 = vperm.xlu1 %10232, %v1206_v52   ;;  %1701 = vperm.xlu2 %10233, %v1604_v54   ;;  %v78_v54 = vld [vmem:[%s17034_s23 + $0xb8] sm:$0xff] }
  0x82   :  { %897 = vperm.xlu0 %10231, %v808_v53  }
  0x83   :  { %v10651_v55 = vpop.permute.xlu1 %535  ;;  %v10655_v57 = vpop.permute.xlu2 %515 }
  0x84   :  { %v10653_v56 = vpop.permute.xlu0 %187 }
  0x89   :  { %2505 = vperm.xlu1 %10232, %v2400_v58   ;;  %2907 = vperm.xlu2 %10233, %v2798_v60  }
  0x8a   :  { %2103 = vperm.xlu0 %10231, %v2002_v59  }
  0x8b   :  { %v10666_v61 = vpop.permute.xlu1 %932  ;;  %v10670_v63 = vpop.permute.xlu2 %1721 }
  0x8c   :  { %v10668_v62 = vpop.permute.xlu0 %927 }
  0x91   :  { %3314 = vperm.xlu1 %10232, %v10675_v0   ;;  %142 = vperm.xlu2 %10233, %v62_v7   ;;  %v60_v7 = vld [vmem:[%s17034_s23 + $0x28] sm:$0xff] }
  0x92   :  { %3309 = vperm.xlu0 %10231, %v10485_v5  }
  0x93   :  { %v10682_v8 = vpop.permute.xlu1 %922  ;;  %v10686_v12 = vpop.permute.xlu2 %510 }
  0x94   :  { %v10684_v10 = vpop.permute.xlu0 %520 }
  0x99   :  { %892 = vperm.xlu1 %10232, %v807_v14   ;;  %1294 = vperm.xlu2 %10233, %v1205_v17   ;;  %v425_v14 = vld [vmem:[%s17034_s23 + $0xb9] sm:$0xff] }
  0x9a   :  { %490 = vperm.xlu0 %10231, %v409_v16  }
  0x9b   :  { %v10697_v5 = vpop.permute.xlu1 %167  ;;  %v10701_v20 = vpop.permute.xlu2 %1716 }
  0x9c   :  { %v10699_v18 = vpop.permute.xlu0 %1329 }
  0xa1   :  { %2098 = vperm.xlu1 %10232, %v2001_v21   ;;  %2500 = vperm.xlu2 %10233, %v2399_v23   ;;  %v424_v21 = vld [vmem:[%s17034_s23 + $0xb1] sm:$0xff] }
  0xa2   :  { %1696 = vperm.xlu0 %10231, %v1603_v22   ;;  %v407_v22 = vld [vmem:[%s17034_s23 + $0x29] sm:$0xff]  ;;  %v805_v23 = vld [vmem:[%s17034_s23 + $0x32] sm:$0xff] }
  0xa3   :  { %v10712_v24 = vpop.permute.xlu1 %1319  ;;  %v10716_v26 = vpop.permute.xlu2 %157 }
  0xa4   :  { %v10714_v25 = vpop.permute.xlu0 %917  ;;  %17036 = vst [vmem:[#allocation7_spill] sm:$0xff] %v10716_v26 }
  0xa9   :  { %3304 = vperm.xlu1 %10232, %v10467_v2   ;;  %3706 = vperm.xlu2 %10233, %v10480_v4   ;;  %v408_v2 = vld [vmem:[%s17034_s23 + $0x31] sm:$0xff] }
  0xaa   :  { %2902 = vperm.xlu0 %10231, %v2797_v28  }
  0xab   :  { %v10723_v29 = vpop.permute.xlu1 %162  ;;  %v10727_v31 = vpop.permute.xlu2 %1309 }
  0xac   :  { %v10725_v30 = vpop.permute.xlu0 %1726 }
  0xb1   :  { %137 = vperm.xlu1 %10232, %v61_v32   ;;  %485 = vperm.xlu2 %10233, %v408_v2  }
  0xb2   :  { %3711 = vperm.xlu0 %10231, %v10735_v33  }
  0xb3   :  { %v10741_v4 = vpop.permute.xlu1 %1314  ;;  %v10745_v35 = vpop.permute.xlu2 %2515 }
  0xb4   :  { %v10743_v34 = vpop.permute.xlu0 %912 }
  0xb9   :  { %1289 = vperm.xlu1 %10232, %v1204_v36   ;;  %1691 = vperm.xlu2 %10233, %v1602_v39   ;;  %v1601_v36 = vld [vmem:[%s17034_s23 + $0x44] sm:$0xff]  ;;  %v1999_v39 = vld [vmem:[%s17034_s23 + $0x4d] sm:$0xff] }
  0xba   :  { %887 = vperm.xlu0 %10231, %v806_v38   ;;  %v1203_v38 = vld [vmem:[%s17034_s23 + $0x3b] sm:$0xff] }
  0xbb   :  { %v10756_v40 = vpop.permute.xlu1 %2123  ;;  %v10760_v43 = vpop.permute.xlu2 %500 }
  0xbc   :  { %v10758_v42 = vpop.permute.xlu0 %2118  ;;  %17038 = vst [vmem:[#allocation9_spill] sm:$0xff] %v10760_v43  ;;  %v2396_v43 = vld [vmem:[%s17034_s23 + $0x4e] sm:$0xff] }
  0xc1   :  { %2495 = vperm.xlu1 %10232, %v2398_v44   ;;  %2897 = vperm.xlu2 %10233, %v2796_v47  }
  0xc2   :  { %2093 = vperm.xlu0 %10231, %v2000_v46  }
  0xc3   :  { %v10771_v48 = vpop.permute.xlu1 %907  ;;  %v10775_v53 = vpop.permute.xlu2 %1706 }
  0xc4   :  { %v10773_v52 = vpop.permute.xlu0 %505 }
  0xc5   :  { %17039 = vst [vmem:[#allocation10_spill] sm:$0xff] %v10773_v52 }
  0xc9   :  { %3701 = vperm.xlu1 %10232, %v10462_v1   ;;  %222 = vperm.xlu2 %10233, %v78_v54   ;;  %v77_v1 = vld [vmem:[%s17034_s23 + $0xb0] sm:$0xff]  ;;  %v2795_v54 = vld [vmem:[%s17034_s23 + $0x5f] sm:$0xff] }
  0xca   :  { %3299 = vperm.xlu0 %10231, %v10472_v3  }
  0xcb   :  { %v10782_v58 = vpop.permute.xlu1 %2113  ;;  %v10786_v60 = vpop.permute.xlu2 %2912 }
  0xcc   :  { %v10784_v59 = vpop.permute.xlu0 %1711 }
  0xd1   :  { %132 = vperm.xlu1 %10232, %v60_v7   ;;  %217 = vperm.xlu2 %10233, %v77_v1   ;;  %v2397_v7 = vld [vmem:[%s17034_s23 + $0x56] sm:$0xff] }
  0xd2   :  { %570 = vperm.xlu0 %10231, %v425_v14  }
  0xd3   :  { %v10797_v3 = vpop.permute.xlu1 %152  ;;  %v10801_v17 = vpop.permute.xlu2 %495 }
  0xd4   :  { %17040 = vst [vmem:[#allocation11_spill] sm:$0xff] %v10797_v3  ;;  %v10799_v16 = vpop.permute.xlu0 %2520 }
  0xd5   :  { %17041 = vst [vmem:[#allocation12_spill] sm:$0xff] %v10801_v17  ;;  %v804_v17 = vld [vmem:[%s17034_s23 + $0x2a] sm:$0xff] }
  0xd9   :  { %565 = vperm.xlu1 %10232, %v424_v21   ;;  %882 = vperm.xlu2 %10233, %v805_v23   ;;  %v59_v23 = vld [vmem:[%s17034_s23 + $0x20] sm:$0xff] }
  0xda   :  { %480 = vperm.xlu0 %10231, %v407_v22   ;;  %v822_v22 = vld [vmem:[%s17034_s23 + $0xba] sm:$0xff] }
  0xdb   :  { %v10812_v28 = vpop.permute.xlu1 %1304  ;;  %v10816_v2 = vpop.permute.xlu2 %1701 }
  0xdc   :  { %v10814_v32 = vpop.permute.xlu0 %902  ;;  %17043 = vst [vmem:[#allocation14_spill] sm:$0xff] %v10816_v2 }
  0xdd   :  { %17042 = vst [vmem:[#allocation13_spill] sm:$0xff] %v10814_v32 }
  0xe1   :  { %1686 = vperm.xlu1 %10232, %v1601_v36   ;;  %2088 = vperm.xlu2 %10233, %v1999_v39   ;;  %v406_v39 = vld [vmem:[%s17034_s23 + $0x21] sm:$0xff] }
  0xe2   :  { %1284 = vperm.xlu0 %10231, %v1203_v38  }
  0xe3   :  { %v10827_v44 = vpop.permute.xlu1 %2510  ;;  %v10831_v47 = vpop.permute.xlu2 %2907 }
  0xe4   :  { %v10829_v46 = vpop.permute.xlu0 %2108 }
  0xe9   :  { %2892 = vperm.xlu1 %10232, %v2795_v54   ;;  %3294 = vperm.xlu2 %10233, %v10504_v9   ;;  %v76_v54 = vld [vmem:[%s17034_s23 + $0xa8] sm:$0xff] }
  0xea   :  { %2490 = vperm.xlu0 %10231, %v2397_v7   ;;  %v423_v7 = vld [vmem:[%s17034_s23 + $0xa9] sm:$0xff] }
  0xeb   :  { %v10840_v14 = vpop.permute.xlu1 %147  ;;  %v10844_v21 = vpop.permute.xlu2 %142 }
  0xec   :  { %17044 = vst [vmem:[#allocation15_spill] sm:$0xff] %v10840_v14  ;;  %v10842_v1 = vpop.permute.xlu0 %2917 }
  0xed   :  { %17045 = vst [vmem:[#allocation16_spill] sm:$0xff] %v10844_v21  ;;  %v821_v21 = vld [vmem:[%s17034_s23 + $0xb2] sm:$0xff] }
  0xf1   :  { %967 = vperm.xlu1 %10232, %v822_v22   ;;  %127 = vperm.xlu2 %10233, %v59_v23  }
  0xf2   :  { %3696 = vperm.xlu0 %10231, %v10490_v6  }
  0xf3   :  { %v10853_v36 = vpop.permute.xlu1 %1299  ;;  %v10857_v38 = vpop.permute.xlu2 %1294 }
  0xf4   :  { %17046 = vst [vmem:[#allocation17_spill] sm:$0xff] %v10853_v36  ;;  %v10855_v9 = vpop.permute.xlu0 %897 }
  0xf5   :  { %17047 = vst [vmem:[#allocation18_spill] sm:$0xff] %v10855_v9  ;;  %v10895_v9 = vld [vmem:[%s16955_s1 + $0x1] ss:$0 sm:$0xff] }
  0xf6   :  { %17048 = vst [vmem:[#allocation19_spill] sm:$0xff] %v10857_v38  ;;  %v10890_v38 = vld [vmem:[%s16955_s1] ss:$0 sm:$0xff]  ;;  %v716_v3 = vmul.f32 %v10895_v9, %v10636_v49  ;;  %v10926_v49 = vld [vmem:[%s16955_s1 + $0x3] ss:$0 sm:$0xff] }
  0xf7   :  { %v368_v36 = vmul.f32 %v10890_v38, %v10638_v50  ;;  %v2794_v50 = vld [vmem:[%s17034_s23 + $0x57] sm:$0xff] }
  0xf9   :  { %475 = vperm.xlu1 %10232, %v406_v39   ;;  %560 = vperm.xlu2 %10233, %v423_v7   ;;  %v1202_v39 = vld [vmem:[%s17034_s23 + $0x33] sm:$0xff]  ;;  %v765_v0 = vadd.f32 %v716_v3, %v368_v36  ;;  %v10941_v3 = vld [vmem:[%s16955_s1 + $0x5] ss:$0 sm:$0xff] }
  0xfa   :  { %212 = vperm.xlu0 %10231, %v76_v54  }
  0xfb   :  { %v10868_v6 = vpop.permute.xlu1 %2505  ;;  %v10872_v23 = vpop.permute.xlu2 %2500 }
  0xfc   :  { %v10870_v22 = vpop.permute.xlu0 %2103 }
 0x101   :  { %962 = vperm.xlu1 %10232, %v821_v21   ;;  %1279 = vperm.xlu2 %10233, %v1202_v39   ;;  %v10903_v21 = vld [vmem:[%s16955_s1 + $0x2] ss:$0 sm:$0xff] }
 0x102   :  { %877 = vperm.xlu0 %10231, %v804_v17   ;;  %v1998_v17 = vld [vmem:[%s17034_s23 + $0x45] sm:$0xff]  ;;  %v1600_v39 = vld [vmem:[%s17034_s23 + $0x3c] sm:$0xff]  ;;  %v1113_v32 = vmul.f32 %v10903_v21, %v10668_v62  ;;  %v1510_v62 = vmul.f32 %v10926_v49, %v10640_v51  ;;  %v369_v51 = vmul.f32 %v10890_v38, %v10653_v56 }
 0x103   :  { %v10883_v54 = vpop.permute.xlu1 %3314  ;;  %v10885_v14 = vpop.permute.xlu2 %3706  ;;  %v58_v56 = vld [vmem:[%s17034_s23 + $0x18] sm:$0xff] }
 0x104   :  { %v3310_v7 = vpop.permute.xlu0 %3309  ;;  %v1162_v2 = vadd.f32 %v1113_v32, %v765_v0  ;;  %v717_v0 = vmul.f32 %v10895_v9, %v10651_v55  ;;  %v10964_v55 = vld [vmem:[%s16955_s1 + $0x6] ss:$0 sm:$0xff] }
 0x106   :  { %v1559_v32 = vadd.f32 %v1510_v62, %v1162_v2  ;;  %v766_v2 = vadd.f32 %v717_v0, %v369_v51  ;;  %v75_v62 = vld [vmem:[%s17034_s23 + $0xa0] sm:$0xff] }
 0x109   :  { %2083 = vperm.xlu1 %10232, %v1998_v17   ;;  %2485 = vperm.xlu2 %10233, %v2396_v43   ;;  %v10936_v43 = vld [vmem:[%s16955_s1 + $0x4] ss:$0 sm:$0xff] }
 0x10a   :  { %1681 = vperm.xlu0 %10231, %v1600_v39   ;;  %v1908_v0 = vmul.f32 %v10936_v43, %v10725_v30 }
 0x10b   :  { %v10917_v26 = vpop.permute.xlu1 %892  ;;  %v10921_v33 = vpop.permute.xlu2 %485 }
 0x10c   :  { %17049 = vst [vmem:[#allocation20_spill] sm:$0xff] %v10917_v26  ;;  %v10919_v52 = vpop.permute.xlu0 %490  ;;  %v2305_v26 = vmul.f32 %v10941_v3, %v10756_v40 }
 0x10d   :  { %17050 = vst [vmem:[#allocation21_spill] sm:$0xff] %v10919_v52 }
 0x10e   :  { %17051 = vst [vmem:[#allocation22_spill] sm:$0xff] %v10921_v33  ;;  %v1114_v33 = vmul.f32 %v10903_v21, %v10666_v61  ;;  %v1511_v61 = vmul.f32 %v10926_v49, %v10699_v18  ;;  %v10987_v18 = vld [vmem:[%s16955_s1 + $0x8] ss:$0 sm:$0xff] }
 0x110   :  { %v1163_v52 = vadd.f32 %v1114_v33, %v766_v2 }
 0x111   :  { %3289 = vperm.xlu1 %10232, %v10522_v13   ;;  %3691 = vperm.xlu2 %10233, %v10513_v11   ;;  %v1907_v13 = vmul.f32 %v10936_v43, %v10670_v63  ;;  %v2304_v11 = vmul.f32 %v10941_v3, %v10758_v42  ;;  %v10974_v63 = vld [vmem:[%s16955_s1 + $0x7] ss:$0 sm:$0xff]  ;;  %v1219_v42 = vld [vmem:[%s17034_s23 + $0xbb] sm:$0xff] }
 0x112   :  { %2887 = vperm.xlu0 %10231, %v2794_v50   ;;  %v3098_v33 = vmul.f32 %v10974_v63, %v10786_v60  ;;  %v3099_v60 = vmul.f32 %v10974_v63, %v10842_v1 }
 0x113   :  { %v10949_v36 = vpop.permute.xlu1 %2098  ;;  %v10953_v39 = vpop.permute.xlu2 %1691  ;;  %v1956_v50 = vadd.f32 %v1907_v13, %v1559_v32  ;;  %v1560_v32 = vadd.f32 %v1511_v61, %v1163_v52  ;;  %v2701_v13 = vmul.f32 %v10964_v55, %v10745_v35  ;;  %v2702_v52 = vmul.f32 %v10964_v55, %v10799_v16  ;;  %v422_v35 = vld [vmem:[%s17034_s23 + $0xa1] sm:$0xff]  ;;  %v405_v16 = vld [vmem:[%s17034_s23 + $0x19] sm:$0xff] }
 0x114   :  { %v10951_v17 = vpop.permute.xlu0 %1696  ;;  %17052 = vst [vmem:[#allocation23_spill] sm:$0xff] %v10953_v39  ;;  %v3495_v61 = vmul.f32 %v10987_v18, %v3310_v7  ;;  %v803_v7 = vld [vmem:[%s17034_s23 + $0x22] sm:$0xff] }
 0x115   :  { %v2353_v51 = vadd.f32 %v2304_v11, %v1956_v50  ;;  %v1957_v50 = vadd.f32 %v1908_v0, %v1560_v32 }
 0x117   :  { %v2354_v40 = vadd.f32 %v2305_v26, %v1957_v50  ;;  %v3496_v26 = vmul.f32 %v10987_v18, %v10883_v54  ;;  %v715_v54 = vmul.f32 %v10895_v9, %v10614_v41 }
 0x119   :  { %122 = vperm.xlu1 %10232, %v58_v56   ;;  %207 = vperm.xlu2 %10233, %v75_v62   ;;  %v2750_v56 = vadd.f32 %v2701_v13, %v2353_v51  ;;  %v11012_v62 = vld [vmem:[%s16955_s1 + $0x9] ss:$0 sm:$0xff]  ;;  %v2751_v0 = vadd.f32 %v2702_v52, %v2354_v40  ;;  %v820_v40 = vld [vmem:[%s17034_s23 + $0xaa] sm:$0xff] }
 0x11a   :  { %1364 = vperm.xlu0 %10231, %v1219_v42   ;;  %v3892_v32 = vmul.f32 %v11012_v62, %v10885_v14 }
 0x11b   :  { %v10995_v30 = vpop.permute.xlu1 %3304  ;;  %v10999_v2 = vpop.permute.xlu2 %2897  ;;  %v3147_v42 = vadd.f32 %v3098_v33, %v2750_v56  ;;  %v3148_v1 = vadd.f32 %v3099_v60, %v2751_v0 }
 0x11c   :  { %v10997_v11 = vpop.permute.xlu0 %2902 }
 0x11d   :  { %v3544_v51 = vadd.f32 %v3495_v61, %v3147_v42  ;;  %v3545_v56 = vadd.f32 %v3496_v26, %v3148_v1  ;;  %v367_v61 = vmul.f32 %v10890_v38, %v10603_v37  ;;  %v1218_v42 = vld [vmem:[%s17034_s23 + $0xb3] sm:$0xff]  ;;  %v1112_v37 = vmul.f32 %v10903_v21, %v10682_v8 }
 0x11f   :  { %v3941_v52 = vadd.f32 %v3892_v32, %v3544_v51 }
 0x121   :  { %555 = vperm.xlu1 %10232, %v422_v35   ;;  %872 = vperm.xlu2 %10233, %v803_v7   ;;  %v1201_v35 = vld [vmem:[%s17034_s23 + $0x2b] sm:$0xff]  ;;  %v4106_v41 = vrot.slane %v3941_v52, 1 }
 0x122   :  { %470 = vperm.xlu0 %10231, %v405_v16   ;;  %v764_v16 = vadd.f32 %v715_v54, %v367_v61  ;;  %v1906_v61 = vmul.f32 %v10936_v43, %v10701_v20  ;;  %v2793_v20 = vld [vmem:[%s17034_s23 + $0x4f] sm:$0xff] }
 0x123   :  { %v11024_v13 = vpop.permute.xlu1 %137  ;;  %v11026_v50 = vpop.permute.xlu2 %222 }
 0x124   :  { %v3712_v33 = vpop.permute.xlu0 %3711  ;;  %v1161_v51 = vadd.f32 %v1112_v37, %v764_v16 }
 0x125   :  { %v3893_v39 = vmul.f32 %v11012_v62, %v3712_v33  ;;  %v1599_v33 = vld [vmem:[%s17034_s23 + $0x34] sm:$0xff] }
 0x127   :  { %v11036_v14 = vadd.f32 %v3893_v39, %v3545_v56  ;;  %v1509_v39 = vmul.f32 %v10926_v49, %v10712_v24  ;;  %v1997_v24 = vld [vmem:[%s17034_s23 + $0x3d] sm:$0xff]  ;;  %v2395_v56 = vld [vmem:[%s17034_s23 + $0x46] sm:$0xff] }
 0x129   :  { %17053 = vst [vmem:[#allocation24_spill] sm:$0xff] %v11036_v14  ;;  %1274 = vperm.xlu1 %10232, %v1201_v35   ;;  %v16974_v60 = vrot.slane %v11036_v14, 1  ;;  %1359 = vperm.xlu2 %10233, %v1218_v42   ;;  %v1558_v32 = vadd.f32 %v1509_v39, %v1161_v51  ;;  %v2700_v35 = vmul.f32 %v10964_v55, %v10827_v44 }
 0x12a   :  { %957 = vperm.xlu0 %10231, %v820_v40   ;;  %v3494_v44 = vmul.f32 %v10987_v18, %v10995_v30 }
 0x12b   :  { %v11049_v7 = vpop.permute.xlu1 %1289  ;;  %v4109_v0 = vsel %vm4076_vm0, %v4106_v41, %v16974_v60  ;;  %v11056_v8 = vpop.permute.xlu2 %217  ;;  %v1955_v54 = vadd.f32 %v1906_v61, %v1558_v32  ;;  %v2302_v60 = vmul.f32 %v10941_v3, %v10829_v46  ;;  %v1904_v46 = vmul.f32 %v10936_v43, %v10775_v53 }
 0x12c   :  { %v11054_v26 = vpop.permute.xlu0 %887  ;;  %v4163_v1 = vmax.f32 %v3941_v52, %v4109_v0  ;;  %v2303_v52 = vmul.f32 %v10941_v3, %v10782_v58  ;;  %v3097_v58 = vmul.f32 %v10974_v63, %v10831_v47  ;;  %v57_v47 = vld [vmem:[%s17034_s23 + $0x10] sm:$0xff] }
 0x12e   :  { %4215 = vmatpush.msra.mxu0 %v4163_v1  ;;  %v2352_v42 = vadd.f32 %v2303_v52, %v1955_v54 }
 0x130   :  { %v2749_v39 = vadd.f32 %v2700_v35, %v2352_v42 }
 0x131   :  { %2078 = vperm.xlu1 %10232, %v1997_v24   ;;  %2480 = vperm.xlu2 %10233, %v2395_v56  }
 0x132   :  { %1676 = vperm.xlu0 %10231, %v1599_v33   ;;  %v3146_v0 = vadd.f32 %v3097_v58, %v2749_v39  ;;  %v421_v39 = vld [vmem:[%s17034_s23 + $0x99] sm:$0xff] }
 0x133   :  { %v11073_v40 = vpop.permute.xlu1 %2495  ;;  %v11077_v16 = vpop.permute.xlu2 %882 }
 0x134   :  { %v11075_v37 = vpop.permute.xlu0 %2093  ;;  %v3543_v1 = vadd.f32 %v3494_v44, %v3146_v0 }
 0x139   :  { %3284 = vperm.xlu1 %10232, %v10546_v19   ;;  %3686 = vperm.xlu2 %10233, %v10530_v15   ;;  %v1616_v19 = vld [vmem:[%s17034_s23 + $0xbc] sm:$0xff] }
 0x13a   :  { %2882 = vperm.xlu0 %10231, %v2793_v20   ;;  %v74_v15 = vld [vmem:[%s17034_s23 + $0x98] sm:$0xff] }
 0x13b   :  { %v3702_v51 = vpop.permute.xlu1 %3701  ;;  %v11090_v24 = vpop.permute.xlu2 %2088  ;;  %v404_v20 = vld [vmem:[%s17034_s23 + $0x11] sm:$0xff] }
 0x13c   :  { %v11088_v32 = vpop.permute.xlu0 %3299  ;;  %v3891_v33 = vmul.f32 %v11012_v62, %v3702_v51  ;;  %v1200_v51 = vld [vmem:[%s17034_s23 + $0x23] sm:$0xff] }
 0x13e   :  { %v11096_v56 = vadd.f32 %v3891_v33, %v3543_v1  ;;  %v819_v1 = vld [vmem:[%s17034_s23 + $0xa2] sm:$0xff]  ;;  %v1217_v33 = vld [vmem:[%s17034_s23 + $0xab] sm:$0xff] }
 0x140   :  { %v16975_v30 = vrot.slane %v11096_v56, 1 }
 0x141   :  { %117 = vperm.xlu1 %10232, %v57_v47   ;;  %202 = vperm.xlu2 %10233, %v74_v15   ;;  %v714_v47 = vmul.f32 %v10895_v9, %v10684_v10  ;;  %v365_v10 = vmul.f32 %v10890_v38, %v10697_v5  ;;  %v1905_v5 = vmul.f32 %v10936_v43, %v10784_v59  ;;  %v2792_v59 = vld [vmem:[%s17034_s23 + $0x47] sm:$0xff] }
 0x142   :  { %1761 = vperm.xlu0 %10231, %v1616_v19   ;;  %v4107_v61 = vsel %vm4076_vm0, %v16975_v30, %v4106_v41  ;;  %v802_v41 = vld [vmem:[%s17034_s23 + $0x1a] sm:$0xff] }
 0x143   :  { %v11108_v52 = vpop.permute.xlu1 %132  ;;  %v4162_v54 = vmax.f32 %v11096_v56, %v4107_v61  ;;  %v11113_v42 = vpop.permute.xlu2 %3294 }
 0x144   :  { %v11111_v35 = vpop.permute.xlu0 %570 }
 0x145   :  { %4216 = vmatpush.msra.mxu0 %v4162_v54  ;;  %v366_v54 = vmul.f32 %v10890_v38, %v10625_v45  ;;  %v1996_v45 = vld [vmem:[%s17034_s23 + $0x35] sm:$0xff] }
 0x149   :  { %550 = vperm.xlu1 %10232, %v421_v39   ;;  %867 = vperm.xlu2 %10233, %v802_v41   ;;  %v1111_v39 = vmul.f32 %v10903_v21, %v10714_v25  ;;  %v763_v41 = vadd.f32 %v714_v47, %v366_v54  ;;  %v713_v25 = vmul.f32 %v10895_v9, %v10655_v57 }
 0x14a   :  { %465 = vperm.xlu0 %10231, %v404_v20   ;;  %v1615_v20 = vld [vmem:[%s17034_s23 + $0xb4] sm:$0xff]  ;;  %v1110_v47 = vmul.f32 %v10903_v21, %v10743_v34  ;;  %v2699_v34 = vmul.f32 %v10964_v55, %v10868_v6  ;;  %v2301_v6 = vmul.f32 %v10941_v3, %v10870_v22  ;;  %v2013_v22 = vld [vmem:[%s17034_s23 + $0xbd] sm:$0xff] }
 0x14b   :  { %v11124_v58 = vpop.permute.xlu1 %565  ;;  %v11128_v0 = vpop.permute.xlu2 %127 }
 0x14c   :  { %v11126_v44 = vpop.permute.xlu0 %480 }
 0x151   :  { %1269 = vperm.xlu1 %10232, %v1200_v51   ;;  %1354 = vperm.xlu2 %10233, %v1217_v33   ;;  %v1508_v51 = vmul.f32 %v10926_v49, %v10741_v4  ;;  %v1160_v33 = vadd.f32 %v1111_v39, %v763_v41  ;;  %v762_v4 = vadd.f32 %v713_v25, %v365_v10 }
 0x152   :  { %952 = vperm.xlu0 %10231, %v819_v1   ;;  %v1598_v1 = vld [vmem:[%s17034_s23 + $0x2c] sm:$0xff] }
 0x153   :  { %v11141_v19 = vpop.permute.xlu1 %1686  ;;  %v11145_v61 = vpop.permute.xlu2 %560  ;;  %v1557_v54 = vadd.f32 %v1508_v51, %v1160_v33  ;;  %v1159_v39 = vadd.f32 %v1110_v47, %v762_v4  ;;  %v3096_v51 = vmul.f32 %v10974_v63, %v10997_v11  ;;  %v3493_v33 = vmul.f32 %v10987_v18, %v11088_v32 }
 0x154   :  { %v11143_v15 = vpop.permute.xlu0 %1284  ;;  %17054 = vst [vmem:[#allocation25_spill] sm:$0xff] %v11145_v61  ;;  %v2698_v32 = vmul.f32 %v10964_v55, %v10872_v23 }
 0x155   :  { %v1954_v41 = vadd.f32 %v1905_v5, %v1557_v54 }
 0x157   :  { %v2351_v10 = vadd.f32 %v2302_v60, %v1954_v41  ;;  %v56_v41 = vld [vmem:[%s17034_s23 + $0x8] sm:$0xff] }
 0x159   :  { %1756 = vperm.xlu1 %10232, %v1615_v20   ;;  %2073 = vperm.xlu2 %10233, %v1996_v45   ;;  %v1507_v20 = vmul.f32 %v10926_v49, %v10727_v31  ;;  %v2748_v25 = vadd.f32 %v2699_v34, %v2351_v10 }
 0x15a   :  { %1671 = vperm.xlu0 %10231, %v1598_v1   ;;  %v2394_v1 = vld [vmem:[%s17034_s23 + $0x3e] sm:$0xff] }
 0x15b   :  { %v11172_v30 = vpop.permute.xlu1 %2892  ;;  %v11176_v57 = vpop.permute.xlu2 %1279  ;;  %v1556_v45 = vadd.f32 %v1507_v20, %v1159_v39  ;;  %v3145_v53 = vadd.f32 %v3096_v51, %v2748_v25  ;;  %v3588_v39 = vld [vmem:[%s17034_s23 + $0x59] sm:$0xff]  ;;  %v3492_v20 = vmul.f32 %v10987_v18, %v11113_v42  ;;  %v403_v42 = vld [vmem:[%s17034_s23 + $0x9] sm:$0xff] }
 0x15c   :  { %v11174_v14 = vpop.permute.xlu0 %2490 }
 0x15d   :  { %v1953_v31 = vadd.f32 %v1904_v46, %v1556_v45  ;;  %v3542_v4 = vadd.f32 %v3493_v33, %v3145_v53 }
 0x15f   :  { %v2350_v5 = vadd.f32 %v2301_v6, %v1953_v31  ;;  %v73_v31 = vld [vmem:[%s17034_s23 + $0x90] sm:$0xff] }
 0x161   :  { %2877 = vperm.xlu1 %10232, %v2792_v59   ;;  %3279 = vperm.xlu2 %10233, %v10573_v27   ;;  %v3095_v27 = vmul.f32 %v10974_v63, %v10999_v2  ;;  %v2747_v59 = vadd.f32 %v2698_v32, %v2350_v5  ;;  %v17055_v2 = vrot.slane %v11096_v56, 1  ;;  %v420_v56 = vld [vmem:[%s17034_s23 + $0x91] sm:$0xff] }
 0x162   :  { %2475 = vperm.xlu0 %10231, %v2394_v1  }
 0x163   :  { %v11197_v60 = vpop.permute.xlu1 %967  ;;  %v11199_v47 = vpop.permute.xlu2 %2485  ;;  %v3144_v23 = vadd.f32 %v3095_v27, %v2747_v59  ;;  %v818_v27 = vld [vmem:[%s17034_s23 + $0x9a] sm:$0xff] }
 0x164   :  { %v3697_v11 = vpop.permute.xlu0 %3696 }
 0x165   :  { %v3890_v54 = vmul.f32 %v11012_v62, %v3697_v11  ;;  %v3541_v25 = vadd.f32 %v3492_v20, %v3144_v23  ;;  %v1216_v23 = vld [vmem:[%s17034_s23 + $0xa3] sm:$0xff] }
 0x167   :  { %v3939_v34 = vadd.f32 %v3890_v54, %v3542_v4 }
 0x169   :  { %2158 = vperm.xlu1 %10232, %v2013_v22   ;;  %v4102_v46 = vrot.slane %v3939_v34, 1  ;;  %112 = vperm.xlu2 %10233, %v56_v41   ;;  %v1199_v41 = vld [vmem:[%s17034_s23 + $0x1b] sm:$0xff] }
 0x16a   :  { %3681 = vperm.xlu0 %10231, %v3588_v39   ;;  %v801_v39 = vld [vmem:[%s17034_s23 + $0x12] sm:$0xff] }
 0x16b   :  { %v11217_v10 = vpop.permute.xlu1 %475  ;;  %v4105_v51 = vsel %vm4076_vm0, %v4102_v46, %v17055_v2  ;;  %v3692_v45 = vpop.permute.xlu2 %3691  ;;  %v1614_v2 = vld [vmem:[%s17034_s23 + $0xac] sm:$0xff] }
 0x16c   :  { %v11222_v1 = vpop.permute.xlu0 %212  ;;  %v4161_v6 = vmax.f32 %v3939_v34, %v4105_v51  ;;  %v3889_v33 = vmul.f32 %v11012_v62, %v3692_v45  ;;  %v364_v51 = vmul.f32 %v10890_v38, %v10723_v29  ;;  %v712_v45 = vmul.f32 %v10895_v9, %v10686_v12  ;;  %v2012_v29 = vld [vmem:[%s17034_s23 + $0xb5] sm:$0xff]  ;;  %v1995_v12 = vld [vmem:[%s17034_s23 + $0x2d] sm:$0xff] }
 0x16d   :  { %17056 = vst [vmem:[#allocation26_spill] sm:$0xff] %v11222_v1  ;;  %v17080_v1 = vld [vmem:[#allocation13_spill] sm:$0xff] }
 0x16e   :  { %4217 = vmatpush.msra.mxu0 %v4161_v6  ;;  %v11234_v53 = vadd.f32 %v3889_v33, %v3541_v25  ;;  %v1109_v6 = vmul.f32 %v10903_v21, %v10771_v48  ;;  %v2393_v48 = vld [vmem:[%s17034_s23 + $0x36] sm:$0xff] }
 0x170   :  { %v4100_v11 = vrot.slane %v11234_v53, 1 }
 0x171   :  { %460 = vperm.xlu1 %10232, %v403_v42   ;;  %545 = vperm.xlu2 %10233, %v420_v56   ;;  %v1506_v56 = vmul.f32 %v10926_v49, %v10812_v28 }
 0x172   :  { %197 = vperm.xlu0 %10231, %v73_v31   ;;  %v4103_v4 = vsel %vm4076_vm0, %v4100_v11, %v4102_v46  ;;  %v1597_v46 = vld [vmem:[%s17034_s23 + $0x24] sm:$0xff]  ;;  %v761_v31 = vadd.f32 %v712_v45, %v364_v51  ;;  %v2697_v51 = vmul.f32 %v10964_v55, %v11073_v40 }
 0x173   :  { %v11237_v5 = vpop.permute.xlu1 %962  ;;  %v11244_v22 = vpop.permute.xlu2 %207  ;;  %v4160_v32 = vmax.f32 %v11234_v53, %v4103_v4  ;;  %v3189_v45 = vld [vmem:[%s17034_s23 + $0x48] sm:$0xff] }
 0x174   :  { %v11242_v54 = vpop.permute.xlu0 %877  ;;  %17057 = vst [vmem:[#allocation27_spill] sm:$0xff] %v11244_v22  ;;  %v1158_v4 = vadd.f32 %v1109_v6, %v761_v31  ;;  %v3094_v31 = vmul.f32 %v10974_v63, %v11172_v30  ;;  %v17067_v53 = vld [vmem:[#allocation8_spill] sm:$0xff]  ;;  %v1197_v22 = vld [vmem:[%s17034_s23 + $0xb] sm:$0xff] }
 0x175   :  { %4218 = vmatpush.msra.mxu0 %v4160_v32 }
 0x176   :  { %v1555_v32 = vadd.f32 %v1506_v56, %v1158_v4  ;;  %v3587_v56 = vld [vmem:[%s17034_s23 + $0x51] sm:$0xff] }
 0x179   :  { %947 = vperm.xlu1 %10232, %v818_v27   ;;  %1264 = vperm.xlu2 %10233, %v1199_v41   ;;  %v17059_v27 = vld [vmem:[#allocation14_spill] sm:$0xff] }
 0x17a   :  { %862 = vperm.xlu0 %10231, %v801_v39   ;;  %v1903_v28 = vmul.f32 %v10936_v43, %v17059_v27  ;;  %v2300_v39 = vmul.f32 %v10941_v3, %v10949_v36  ;;  %v2791_v36 = vld [vmem:[%s17034_s23 + $0x3f] sm:$0xff] }
 0x17b   :  { %v11256_v34 = vpop.permute.xlu1 %2083  ;;  %v11260_v20 = vpop.permute.xlu2 %872 }
 0x17c   :  { %v11258_v59 = vpop.permute.xlu0 %1681  ;;  %17058 = vst [vmem:[#allocation28_spill] sm:$0xff] %v11260_v20 }
 0x181   :  { %1666 = vperm.xlu1 %10232, %v1597_v46   ;;  %1751 = vperm.xlu2 %10233, %v1614_v2   ;;  %v1952_v2 = vadd.f32 %v1903_v28, %v1555_v32  ;;  %v55_v28 = vld [vmem:[%s17034_s23] sm:$0xff] }
 0x182   :  { %1349 = vperm.xlu0 %10231, %v1216_v23  }
 0x183   :  { %v3290_v25 = vpop.permute.xlu1 %3289  ;;  %v11279_v42 = vpop.permute.xlu2 %1359  ;;  %v2349_v6 = vadd.f32 %v2300_v39, %v1952_v2 }
 0x184   :  { %v11277_v33 = vpop.permute.xlu0 %2887  ;;  %v3491_v4 = vmul.f32 %v10987_v18, %v3290_v25  ;;  %v2410_v25 = vld [vmem:[%s17034_s23 + $0xbe] sm:$0xff] }
 0x189   :  { %2153 = vperm.xlu1 %10232, %v2012_v29   ;;  %2470 = vperm.xlu2 %10233, %v2393_v48   ;;  %v2746_v29 = vadd.f32 %v2697_v51, %v2349_v6  ;;  %v17063_v51 = vld [vmem:[#allocation6_spill] sm:$0xff] }
 0x18a   :  { %2068 = vperm.xlu0 %10231, %v1995_v12  }
 0x18b   :  { %v11296_v41 = vpop.permute.xlu1 %122  ;;  %v11300_v23 = vpop.permute.xlu2 %2480  ;;  %v3143_v40 = vadd.f32 %v3094_v31, %v2746_v29  ;;  %v402_v29 = vld [vmem:[%s17034_s23 + $0x1] sm:$0xff] }
 0x18c   :  { %17060 = vst [vmem:[#allocation14_spill] sm:$0xff] %v11296_v41  ;;  %v11298_v46 = vpop.permute.xlu0 %1364  ;;  %v2807_v41 = vld [vmem:[%s17034_s23 + $0xbf] sm:$0xff] }
 0x18d   :  { %v3540_v32 = vadd.f32 %v3491_v4, %v3143_v40  ;;  %v800_v4 = vld [vmem:[%s17034_s23 + $0xa] sm:$0xff] }
 0x191   :  { %3274 = vperm.xlu1 %10232, %v3189_v45   ;;  %3676 = vperm.xlu2 %10233, %v3587_v56  }
 0x192   :  { %2872 = vperm.xlu0 %10231, %v2791_v36  }
 0x193   :  { %v11316_v12 = vpop.permute.xlu1 %555  ;;  %v3687_v30 = vpop.permute.xlu2 %3686 }
 0x194   :  { %17061 = vst [vmem:[#allocation29_spill] sm:$0xff] %v11316_v12  ;;  %v11318_v48 = vpop.permute.xlu0 %470  ;;  %v3888_v27 = vmul.f32 %v11012_v62, %v3687_v30 }
 0x195   :  { %17062 = vst [vmem:[#allocation30_spill] sm:$0xff] %v11318_v48 }
 0x196   :  { %v11327_v39 = vadd.f32 %v3888_v27, %v3540_v32  ;;  %v1198_v32 = vld [vmem:[%s17034_s23 + $0x13] sm:$0xff] }
 0x197   :  { %v817_v27 = vld [vmem:[%s17034_s23 + $0x92] sm:$0xff] }
 0x198   :  { %v16978_v2 = vrot.slane %v11327_v39, 1 }
 0x199   :  { %107 = vperm.xlu1 %10232, %v55_v28   ;;  %192 = vperm.xlu2 %10233, %v17063_v51   ;;  %v1215_v28 = vld [vmem:[%s17034_s23 + $0x9b] sm:$0xff] }
 0x19a   :  { %2555 = vperm.xlu0 %10231, %v2410_v25   ;;  %v4101_v6 = vsel %vm4076_vm0, %v16978_v2, %v4100_v11  ;;  %v2011_v2 = vld [vmem:[%s17034_s23 + $0xad] sm:$0xff] }
 0x19b   :  { %v11331_v45 = vpop.permute.xlu1 %1274  ;;  %v11340_v36 = vpop.permute.xlu2 %202  ;;  %v4159_v56 = vmax.f32 %v11327_v39, %v4101_v6 }
 0x19c   :  { %17064 = vst [vmem:[#allocation6_spill] sm:$0xff] %v11331_v45  ;;  %v11338_v31 = vpop.permute.xlu0 %957 }
 0x19d   :  { %17065 = vst [vmem:[#allocation31_spill] sm:$0xff] %v11338_v31  ;;  %4219 = vmatpush.msra.mxu0 %v4159_v56  ;;  %v1613_v56 = vld [vmem:[%s17034_s23 + $0xa4] sm:$0xff]  ;;  %v17079_v31 = vld [vmem:[#allocation7_spill] sm:$0xff] }
 0x19e   :  { %17066 = vst [vmem:[#allocation32_spill] sm:$0xff] %v11340_v36  ;;  %v3188_v36 = vld [vmem:[%s17034_s23 + $0x40] sm:$0xff]  ;;  %v363_v61 = vmul.f32 %v10890_v38, %v17079_v31 }
 0x1a1   :  { %540 = vperm.xlu1 %10232, %v17067_v53   ;;  %857 = vperm.xlu2 %10233, %v800_v4   ;;  %v1994_v4 = vld [vmem:[%s17034_s23 + $0x25] sm:$0xff] }
 0x1a2   :  { %455 = vperm.xlu0 %10231, %v402_v29   ;;  %v1596_v29 = vld [vmem:[%s17034_s23 + $0x1c] sm:$0xff] }
 0x1a3   :  { %v11350_v11 = vpop.permute.xlu1 %2078  ;;  %v11354_v30 = vpop.permute.xlu2 %867 }
 0x1a4   :  { %v11352_v40 = vpop.permute.xlu0 %1676  ;;  %17068 = vst [vmem:[#allocation8_spill] sm:$0xff] %v11354_v30  ;;  %v2790_v30 = vld [vmem:[%s17034_s23 + $0x37] sm:$0xff] }
 0x1a9   :  { %1259 = vperm.xlu1 %10232, %v1198_v32   ;;  %1344 = vperm.xlu2 %10233, %v1215_v28   ;;  %v2392_v28 = vld [vmem:[%s17034_s23 + $0x2e] sm:$0xff] }
 0x1aa   :  { %942 = vperm.xlu0 %10231, %v817_v27  }
 0x1ab   :  { %v11365_v25 = vpop.permute.xlu1 %3284  ;;  %v11369_v6 = vpop.permute.xlu2 %1354 }
 0x1ac   :  { %v11367_v51 = vpop.permute.xlu0 %2882  ;;  %17069 = vst [vmem:[#allocation33_spill] sm:$0xff] %v11369_v6 }
 0x1b1   :  { %1746 = vperm.xlu1 %10232, %v1613_v56   ;;  %2063 = vperm.xlu2 %10233, %v1994_v4   ;;  %v2409_v56 = vld [vmem:[%s17034_s23 + $0xb6] sm:$0xff] }
 0x1b2   :  { %1661 = vperm.xlu0 %10231, %v1596_v29  }
 0x1b3   :  { %v11380_v53 = vpop.permute.xlu1 %117  ;;  %v11384_v27 = vpop.permute.xlu2 %2073 }
 0x1b4   :  { %17070 = vst [vmem:[#allocation34_spill] sm:$0xff] %v11380_v53  ;;  %v11382_v32 = vpop.permute.xlu0 %1761 }
 0x1b9   :  { %2465 = vperm.xlu1 %10232, %v2392_v28   ;;  %2550 = vperm.xlu2 %10233, %v2409_v56   ;;  %v3586_v28 = vld [vmem:[%s17034_s23 + $0x49] sm:$0xff] }
 0x1ba   :  { %2148 = vperm.xlu0 %10231, %v2011_v2  }
 0x1bb   :  { %v11395_v29 = vpop.permute.xlu1 %550  ;;  %v11399_v53 = vpop.permute.xlu2 %3279 }
 0x1bc   :  { %17071 = vst [vmem:[#allocation35_spill] sm:$0xff] %v11395_v29  ;;  %v11397_v4 = vpop.permute.xlu0 %465  ;;  %v799_v29 = vld [vmem:[%s17034_s23 + $0x2] sm:$0xff] }
 0x1bd   :  { %17072 = vst [vmem:[#allocation36_spill] sm:$0xff] %v11397_v4 }
 0x1c1   :  { %3269 = vperm.xlu1 %10232, %v3188_v36   ;;  %3671 = vperm.xlu2 %10233, %v3586_v28   ;;  %v816_v36 = vld [vmem:[%s17034_s23 + $0x8a] sm:$0xff] }
 0x1c2   :  { %2867 = vperm.xlu0 %10231, %v2790_v30   ;;  %v17076_v30 = vld [vmem:[#allocation10_spill] sm:$0xff] }
 0x1c3   :  { %v11410_v2 = vpop.permute.xlu1 %1269  ;;  %v11414_v4 = vpop.permute.xlu2 %112  ;;  %v711_v28 = vmul.f32 %v10895_v9, %v17076_v30 }
 0x1c4   :  { %17073 = vst [vmem:[#allocation37_spill] sm:$0xff] %v11410_v2  ;;  %v11412_v56 = vpop.permute.xlu0 %952 }
 0x1c5   :  { %17074 = vst [vmem:[#allocation38_spill] sm:$0xff] %v11412_v56  ;;  %v1108_v56 = vmul.f32 %v10903_v21, %v17080_v1  ;;  %v1902_v1 = vmul.f32 %v10936_v43, %v10951_v17  ;;  %v1993_v17 = vld [vmem:[%s17034_s23 + $0x1d] sm:$0xff] }
 0x1c6   :  { %17075 = vst [vmem:[#allocation39_spill] sm:$0xff] %v11414_v4 }
 0x1c9   :  { %852 = vperm.xlu1 %10232, %v799_v29   ;;  %937 = vperm.xlu2 %10233, %v816_v36   ;;  %v760_v29 = vadd.f32 %v711_v28, %v363_v61  ;;  %v17081_v36 = vld [vmem:[#allocation17_spill] sm:$0xff]  ;;  %v2299_v61 = vmul.f32 %v10941_v3, %v11075_v37  ;;  %v1612_v37 = vld [vmem:[%s17034_s23 + $0x9c] sm:$0xff] }
 0x1ca   :  { %2952 = vperm.xlu0 %10231, %v2807_v41   ;;  %v1214_v41 = vld [vmem:[%s17034_s23 + $0x93] sm:$0xff]  ;;  %v1505_v30 = vmul.f32 %v10926_v49, %v17081_v36 }
 0x1cb   :  { %v11427_v48 = vpop.permute.xlu1 %1756  ;;  %v11431_v6 = vpop.permute.xlu2 %545  ;;  %v1157_v31 = vadd.f32 %v1108_v56, %v760_v29  ;;  %v2696_v56 = vmul.f32 %v10964_v55, %v11174_v14 }
 0x1cc   :  { %v11429_v4 = vpop.permute.xlu0 %1671  ;;  %17078 = vst [vmem:[#allocation40_spill] sm:$0xff] %v11431_v6  ;;  %v1595_v6 = vld [vmem:[%s17034_s23 + $0x14] sm:$0xff] }
 0x1cd   :  { %17077 = vst [vmem:[#allocation10_spill] sm:$0xff] %v11429_v4  ;;  %v1554_v12 = vadd.f32 %v1505_v30, %v1157_v31  ;;  %v3490_v30 = vmul.f32 %v10987_v18, %v11365_v25  ;;  %v17085_v31 = vld [vmem:[#allocation18_spill] sm:$0xff] }
 0x1ce   :  { %v2408_v25 = vld [vmem:[%s17034_s23 + $0xae] sm:$0xff] }
 0x1cf   :  { %v1951_v2 = vadd.f32 %v1902_v1, %v1554_v12  ;;  %v17083_v12 = vld [vmem:[#allocation11_spill] sm:$0xff]  ;;  %v1107_v1 = vmul.f32 %v10903_v21, %v17085_v31  ;;  %v2298_v31 = vmul.f32 %v10941_v3, %v11090_v24 }
 0x1d0   :  { %v362_v29 = vmul.f32 %v10890_v38, %v17083_v12  ;;  %v3187_v24 = vld [vmem:[%s17034_s23 + $0x38] sm:$0xff] }
 0x1d1   :  { %1339 = vperm.xlu1 %10232, %v1214_v41   ;;  %1656 = vperm.xlu2 %10233, %v1595_v6   ;;  %v3093_v6 = vmul.f32 %v10974_v63, %v11277_v33  ;;  %v2010_v41 = vld [vmem:[%s17034_s23 + $0xa5] sm:$0xff] }
 0x1d2   :  { %1254 = vperm.xlu0 %10231, %v1197_v22   ;;  %v2348_v22 = vadd.f32 %v2299_v61, %v1951_v2  ;;  %v17084_v2 = vld [vmem:[#allocation9_spill] sm:$0xff] }
 0x1d3   :  { %v11452_v28 = vpop.permute.xlu1 %2877  ;;  %v11456_v4 = vpop.permute.xlu2 %1264  ;;  %v710_v33 = vmul.f32 %v10895_v9, %v17084_v2 }
 0x1d4   :  { %v11454_v36 = vpop.permute.xlu0 %2475  ;;  %17082 = vst [vmem:[#allocation7_spill] sm:$0xff] %v11456_v4  ;;  %v2745_v14 = vadd.f32 %v2696_v56, %v2348_v22 }
 0x1d5   :  { %v759_v12 = vadd.f32 %v710_v33, %v362_v29 }
 0x1d6   :  { %v3142_v61 = vadd.f32 %v3093_v6, %v2745_v14  ;;  %v2789_v6 = vld [vmem:[%s17034_s23 + $0x2f] sm:$0xff]  ;;  %v17086_v14 = vld [vmem:[#allocation19_spill] sm:$0xff] }
 0x1d7   :  { %v1504_v29 = vmul.f32 %v10926_v49, %v17086_v14 }
 0x1d8   :  { %v3539_v56 = vadd.f32 %v3490_v30, %v3142_v61  ;;  %v17087_v30 = vld [vmem:[#allocation23_spill] sm:$0xff]  ;;  %v17089_v61 = vrot.slane %v11327_v39, 1  ;;  %v3092_v39 = vmul.f32 %v10974_v63, %v11367_v51 }
 0x1d9   :  { %2058 = vperm.xlu1 %10232, %v1993_v17   ;;  %2143 = vperm.xlu2 %10233, %v2010_v41   ;;  %v1156_v17 = vadd.f32 %v1107_v1, %v759_v12 }
 0x1da   :  { %1741 = vperm.xlu0 %10231, %v1612_v37   ;;  %v2391_v37 = vld [vmem:[%s17034_s23 + $0x26] sm:$0xff] }
 0x1db   :  { %v11479_v4 = vpop.permute.xlu1 %2158  ;;  %v11481_v20 = vpop.permute.xlu2 %1751  ;;  %v1553_v33 = vadd.f32 %v1504_v29, %v1156_v17 }
 0x1dc   :  { %v3682_v45 = vpop.permute.xlu0 %3681 }
 0x1dd   :  { %v3887_v22 = vmul.f32 %v11012_v62, %v3682_v45  ;;  %v1901_v45 = vmul.f32 %v10936_v43, %v17087_v30 }
 0x1df   :  { %v3936_v41 = vadd.f32 %v3887_v22, %v3539_v56  ;;  %v1950_v30 = vadd.f32 %v1901_v45, %v1553_v33 }
 0x1e1   :  { %2545 = vperm.xlu1 %10232, %v2408_v25   ;;  %v4096_v2 = vrot.slane %v3936_v41, 1  ;;  %2862 = vperm.xlu2 %10233, %v2789_v6   ;;  %v2695_v25 = vmul.f32 %v10964_v55, %v11199_v47  ;;  %v2347_v17 = vadd.f32 %v2298_v31, %v1950_v30  ;;  %v3585_v6 = vld [vmem:[%s17034_s23 + $0x41] sm:$0xff]  ;;  %v3489_v47 = vmul.f32 %v10987_v18, %v11399_v53 }
 0x1e2   :  { %2460 = vperm.xlu0 %10231, %v2391_v37   ;;  %v2806_v37 = vld [vmem:[%s17034_s23 + $0xb7] sm:$0xff]  ;;  %v3204_v53 = vld [vmem:[%s17034_s23 + $0xc0] sm:$0xff] }
 0x1e3   :  { %v11499_v1 = vpop.permute.xlu1 %460  ;;  %v4099_v12 = vsel %vm4076_vm0, %v4096_v2, %v17089_v61  ;;  %v11506_v22 = vpop.permute.xlu2 %2470 }
 0x1e4   :  { %17088 = vst [vmem:[#allocation13_spill] sm:$0xff] %v11499_v1  ;;  %v11504_v56 = vpop.permute.xlu0 %197  ;;  %v4158_v14 = vmax.f32 %v3936_v41, %v4099_v12  ;;  %v2744_v41 = vadd.f32 %v2695_v25, %v2347_v17  ;;  %v1196_v12 = vld [vmem:[%s17034_s23 + $0x3] sm:$0xff] }
 0x1e5   :  { %17090 = vst [vmem:[#allocation17_spill] sm:$0xff] %v11504_v56  ;;  %v17098_v56 = vld [vmem:[#allocation12_spill] sm:$0xff] }
 0x1e6   :  { %4220 = vmatpush.msra.mxu0 %v4158_v14  ;;  %v3141_v29 = vadd.f32 %v3092_v39, %v2744_v41  ;;  %v1213_v14 = vld [vmem:[%s17034_s23 + $0x8b] sm:$0xff]  ;;  %v1611_v41 = vld [vmem:[%s17034_s23 + $0x94] sm:$0xff] }
 0x1e8   :  { %v3538_v31 = vadd.f32 %v3489_v47, %v3141_v29  ;;  %v1594_v47 = vld [vmem:[%s17034_s23 + $0xc] sm:$0xff]  ;;  %v1992_v29 = vld [vmem:[%s17034_s23 + $0x15] sm:$0xff] }
 0x1e9   :  { %3264 = vperm.xlu1 %10232, %v3187_v24   ;;  %3666 = vperm.xlu2 %10233, %v3585_v6  }
 0x1ea   :  { %2947 = vperm.xlu0 %10231, %v2806_v37  }
 0x1eb   :  { %v11523_v45 = vpop.permute.xlu1 %947  ;;  %v3677_v51 = vpop.permute.xlu2 %3676 }
 0x1ec   :  { %17091 = vst [vmem:[#allocation11_spill] sm:$0xff] %v11523_v45  ;;  %v11525_v33 = vpop.permute.xlu0 %862  ;;  %v3886_v61 = vmul.f32 %v11012_v62, %v3677_v51 }
 0x1ed   :  { %17092 = vst [vmem:[#allocation9_spill] sm:$0xff] %v11525_v33  ;;  %v709_v33 = vmul.f32 %v10895_v9, %v17098_v56 }
 0x1ee   :  { %v11537_v30 = vadd.f32 %v3886_v61, %v3538_v31  ;;  %v2390_v61 = vld [vmem:[%s17034_s23 + $0x1e] sm:$0xff] }
 0x1f0   :  { %v16979_v25 = vrot.slane %v11537_v30, 1 }
 0x1f1   :  { %1249 = vperm.xlu1 %10232, %v1196_v12   ;;  %1334 = vperm.xlu2 %10233, %v1213_v14   ;;  %v2009_v12 = vld [vmem:[%s17034_s23 + $0x9d] sm:$0xff] }
 0x1f2   :  { %3349 = vperm.xlu0 %10231, %v3204_v53   ;;  %v4097_v17 = vsel %vm4076_vm0, %v16979_v25, %v4096_v2  ;;  %v2407_v53 = vld [vmem:[%s17034_s23 + $0xa6] sm:$0xff] }
 0x1f3   :  { %v11540_v24 = vpop.permute.xlu1 %1666  ;;  %v11547_v37 = vpop.permute.xlu2 %192  ;;  %v4157_v6 = vmax.f32 %v11537_v30, %v4097_v17 }
 0x1f4   :  { %v11545_v39 = vpop.permute.xlu0 %1349  ;;  %17093 = vst [vmem:[#allocation18_spill] sm:$0xff] %v11547_v37 }
 0x1f5   :  { %4221 = vmatpush.msra.mxu0 %v4157_v6 }
 0x1f9   :  { %1736 = vperm.xlu1 %10232, %v1611_v41   ;;  %2053 = vperm.xlu2 %10233, %v1992_v29   ;;  %v2805_v41 = vld [vmem:[%s17034_s23 + $0xaf] sm:$0xff] }
 0x1fa   :  { %1651 = vperm.xlu0 %10231, %v1594_v47   ;;  %v2788_v47 = vld [vmem:[%s17034_s23 + $0x27] sm:$0xff]  ;;  %v3186_v29 = vld [vmem:[%s17034_s23 + $0x30] sm:$0xff] }
 0x1fb   :  { %v11559_v2 = vpop.permute.xlu1 %2153  ;;  %v11563_v31 = vpop.permute.xlu2 %857 }
 0x1fc   :  { %v11561_v51 = vpop.permute.xlu0 %2068  ;;  %17094 = vst [vmem:[#allocation19_spill] sm:$0xff] %v11563_v31  ;;  %v17099_v31 = vld [vmem:[#allocation20_spill] sm:$0xff] }
 0x1fd   :  { %v1106_v1 = vmul.f32 %v10903_v21, %v17099_v31  ;;  %v1900_v21 = vmul.f32 %v10936_v43, %v11141_v19  ;;  %v1610_v43 = vld [vmem:[%s17034_s23 + $0x8c] sm:$0xff] }
 0x201   :  { %2455 = vperm.xlu1 %10232, %v2390_v61   ;;  %2540 = vperm.xlu2 %10233, %v2407_v53   ;;  %v17096_v61 = vld [vmem:[#allocation15_spill] sm:$0xff] }
 0x202   :  { %2138 = vperm.xlu0 %10231, %v2009_v12   ;;  %v361_v12 = vmul.f32 %v10890_v38, %v17096_v61  ;;  %v1503_v38 = vmul.f32 %v10926_v49, %v11049_v7  ;;  %v3601_v61 = vld [vmem:[%s17034_s23 + $0xc1] sm:$0xff] }
 0x203   :  { %v3275_v14 = vpop.permute.xlu1 %3274  ;;  %v11576_v6 = vpop.permute.xlu2 %1344 }
 0x204   :  { %v11574_v17 = vpop.permute.xlu0 %2872  ;;  %17095 = vst [vmem:[#allocation23_spill] sm:$0xff] %v11576_v6 }
 0x209   :  { %2942 = vperm.xlu1 %10232, %v2805_v41   ;;  %3259 = vperm.xlu2 %10233, %v3186_v29   ;;  %v3584_v41 = vld [vmem:[%s17034_s23 + $0x39] sm:$0xff] }
 0x20a   :  { %2857 = vperm.xlu0 %10231, %v2788_v47   ;;  %v758_v47 = vadd.f32 %v709_v33, %v361_v12  ;;  %v3203_v29 = vld [vmem:[%s17034_s23 + $0xb8] sm:$0xff]  ;;  %v2297_v33 = vmul.f32 %v10941_v3, %v11256_v34  ;;  %v1593_v3 = vld [vmem:[%s17034_s23 + $0x4] sm:$0xff]  ;;  %v1991_v34 = vld [vmem:[%s17034_s23 + $0xd] sm:$0xff] }
 0x20b   :  { %v11589_v53 = vpop.permute.xlu1 %107  ;;  %v11593_v37 = vpop.permute.xlu2 %2063 }
 0x20c   :  { %17097 = vst [vmem:[#allocation15_spill] sm:$0xff] %v11589_v53  ;;  %v11591_v25 = vpop.permute.xlu0 %2555  ;;  %v1155_v9 = vadd.f32 %v1106_v1, %v758_v47  ;;  %v2694_v1 = vmul.f32 %v10964_v55, %v11300_v23  ;;  %v11738_v53 = vld [vmem:[%s16955_s1 + $0x5] ss:$0 sm:$0xff] }
 0x20e   :  { %v1552_v56 = vadd.f32 %v1503_v38, %v1155_v9  ;;  %v3488_v38 = vmul.f32 %v10987_v18, %v3275_v14  ;;  %v2389_v9 = vld [vmem:[%s17034_s23 + $0x16] sm:$0xff]  ;;  %v2406_v14 = vld [vmem:[%s17034_s23 + $0x9e] sm:$0xff] }
 0x20f   :  { %v2008_v18 = vld [vmem:[%s17034_s23 + $0x95] sm:$0xff] }
 0x210   :  { %v1949_v12 = vadd.f32 %v1900_v21, %v1552_v56 }
 0x211   :  { %3661 = vperm.xlu1 %10232, %v3584_v41   ;;  %3746 = vperm.xlu2 %10233, %v3601_v61   ;;  %v3091_v41 = vmul.f32 %v10974_v63, %v11452_v28 }
 0x212   :  { %3344 = vperm.xlu0 %10231, %v3203_v29   ;;  %v2346_v19 = vadd.f32 %v2297_v33, %v1949_v12  ;;  %v17104_v33 = vrot.slane %v11537_v30, 1  ;;  %v3185_v30 = vld [vmem:[%s17034_s23 + $0x28] sm:$0xff] }
 0x213   :  { %v11614_v49 = vpop.permute.xlu1 %540  ;;  %v11618_v31 = vpop.permute.xlu2 %2550 }
 0x214   :  { %17100 = vst [vmem:[#allocation12_spill] sm:$0xff] %v11614_v49  ;;  %v11616_v7 = vpop.permute.xlu0 %455  ;;  %v2743_v47 = vadd.f32 %v2694_v1, %v2346_v19 }
 0x215   :  { %17101 = vst [vmem:[#allocation20_spill] sm:$0xff] %v11616_v7 }
 0x216   :  { %v3140_v55 = vadd.f32 %v3091_v41, %v2743_v47  ;;  %v2804_v41 = vld [vmem:[%s17034_s23 + $0xa7] sm:$0xff] }
 0x218   :  { %v3537_v28 = vadd.f32 %v3488_v38, %v3140_v55  ;;  %v3583_v55 = vld [vmem:[%s17034_s23 + $0x31] sm:$0xff] }
 0x219   :  { %1731 = vperm.xlu1 %10232, %v1610_v43   ;;  %2048 = vperm.xlu2 %10233, %v1991_v34  }
 0x21a   :  { %1646 = vperm.xlu0 %10231, %v1593_v3   ;;  %v2787_v3 = vld [vmem:[%s17034_s23 + $0x1f] sm:$0xff] }
 0x21b   :  { %v11634_v23 = vpop.permute.xlu1 %1259  ;;  %v3672_v63 = vpop.permute.xlu2 %3671 }
 0x21c   :  { %17102 = vst [vmem:[#allocation41_spill] sm:$0xff] %v11634_v23  ;;  %v11636_v29 = vpop.permute.xlu0 %942  ;;  %v3885_v61 = vmul.f32 %v11012_v62, %v3672_v63  ;;  %v3202_v63 = vld [vmem:[%s17034_s23 + $0xb0] sm:$0xff] }
 0x21d   :  { %17103 = vst [vmem:[#allocation42_spill] sm:$0xff] %v11636_v29 }
 0x21e   :  { %v11648_v21 = vadd.f32 %v3885_v61, %v3537_v28  ;;  %v3600_v28 = vld [vmem:[%s17034_s23 + $0xb9] sm:$0xff]  ;;  %v11690_v61 = vld [vmem:[%s16955_s1 + $0x1] ss:$0 sm:$0xff] }
 0x220   :  { %v16980_v56 = vrot.slane %v11648_v21, 1 }
 0x221   :  { %2450 = vperm.xlu1 %10232, %v2389_v9   ;;  %2535 = vperm.xlu2 %10233, %v2406_v14   ;;  %v17108_v9 = vld [vmem:[#allocation21_spill] sm:$0xff] }
 0x222   :  { %2133 = vperm.xlu0 %10231, %v2008_v18   ;;  %v4095_v12 = vsel %vm4076_vm0, %v16980_v56, %v17104_v33  ;;  %v708_v18 = vmul.f32 %v11690_v61, %v17108_v9  ;;  %v11718_v9 = vld [vmem:[%s16955_s1 + $0x3] ss:$0 sm:$0xff]  ;;  %v1990_v56 = vld [vmem:[%s17034_s23 + $0x5] sm:$0xff] }
 0x223   :  { %v11651_v62 = vpop.permute.xlu1 %1746  ;;  %v11660_v43 = vpop.permute.xlu2 %937  ;;  %v4156_v19 = vmax.f32 %v11648_v21, %v4095_v12 }
 0x224   :  { %v11658_v1 = vpop.permute.xlu0 %1661  ;;  %17106 = vst [vmem:[#allocation44_spill] sm:$0xff] %v11660_v43 }
 0x225   :  { %17105 = vst [vmem:[#allocation43_spill] sm:$0xff] %v11658_v1  ;;  %4222 = vmatpush.msra.mxu0 %v4156_v19  ;;  %v11701_v19 = vld [vmem:[%s16955_s1] ss:$0 sm:$0xff] }
 0x229   :  { %2937 = vperm.xlu1 %10232, %v2804_v41   ;;  %3254 = vperm.xlu2 %10233, %v3185_v30   ;;  %v17109_v41 = vld [vmem:[#allocation16_spill] sm:$0xff] }
 0x22a   :  { %2852 = vperm.xlu0 %10231, %v2787_v3   ;;  %v360_v3 = vmul.f32 %v11701_v19, %v17109_v41  ;;  %v11708_v30 = vld [vmem:[%s16955_s1 + $0x2] ss:$0 sm:$0xff]  ;;  %v1502_v41 = vmul.f32 %v11718_v9, %v11143_v15 }
 0x22b   :  { %v11672_v34 = vpop.permute.xlu1 %2465  ;;  %v11676_v38 = vpop.permute.xlu2 %1656 }
 0x22c   :  { %v11674_v47 = vpop.permute.xlu0 %2148  ;;  %17107 = vst [vmem:[#allocation45_spill] sm:$0xff] %v11676_v38 }
 0x231   :  { %3656 = vperm.xlu1 %10232, %v3583_v55   ;;  %3741 = vperm.xlu2 %10233, %v3600_v28   ;;  %v1105_v55 = vmul.f32 %v11708_v30, %v11054_v26  ;;  %v757_v28 = vadd.f32 %v708_v18, %v360_v3  ;;  %v2388_v26 = vld [vmem:[%s17034_s23 + $0xe] sm:$0xff]  ;;  %v11731_v18 = vld [vmem:[%s16955_s1 + $0x4] ss:$0 sm:$0xff] }
 0x232   :  { %3339 = vperm.xlu0 %10231, %v3202_v63   ;;  %v2007_v63 = vld [vmem:[%s17034_s23 + $0x8d] sm:$0xff]  ;;  %v1899_v3 = vmul.f32 %v11731_v18, %v11258_v59  ;;  %v11751_v59 = vld [vmem:[%s16955_s1 + $0x6] ss:$0 sm:$0xff] }
 0x233   :  { %v3270_v14 = vpop.permute.xlu1 %3269  ;;  %v11696_v12 = vpop.permute.xlu2 %2143  ;;  %v1154_v29 = vadd.f32 %v1105_v55, %v757_v28  ;;  %v2296_v55 = vmul.f32 %v11738_v53, %v11350_v11  ;;  %v2709_v45 = vmul.f32 %v11751_v59, %v11591_v25 }
 0x234   :  { %v11694_v33 = vpop.permute.xlu0 %2867 }
 0x235   :  { %v1551_v15 = vadd.f32 %v1502_v41, %v1154_v29  ;;  %v2693_v29 = vmul.f32 %v11751_v59, %v11454_v36  ;;  %v2803_v36 = vld [vmem:[%s17034_s23 + $0x9f] sm:$0xff] }
 0x237   :  { %v1948_v49 = vadd.f32 %v1899_v3, %v1551_v15 }
 0x239   :  { %2128 = vperm.xlu1 %10232, %v2007_v63   ;;  %2445 = vperm.xlu2 %10233, %v2388_v26   ;;  %v2345_v11 = vadd.f32 %v2296_v55, %v1948_v49  ;;  %v11761_v63 = vld [vmem:[%s16955_s1 + $0x7] ss:$0 sm:$0xff]  ;;  %v2405_v26 = vld [vmem:[%s17034_s23 + $0x96] sm:$0xff]  ;;  %v11774_v49 = vld [vmem:[%s16955_s1 + $0x8] ss:$0 sm:$0xff] }
 0x23a   :  { %2043 = vperm.xlu0 %10231, %v1990_v56   ;;  %v2786_v56 = vld [vmem:[%s17034_s23 + $0x17] sm:$0xff]  ;;  %v3090_v41 = vmul.f32 %v11761_v63, %v11574_v17  ;;  %v3487_v15 = vmul.f32 %v11774_v49, %v3270_v14  ;;  %v3201_v14 = vld [vmem:[%s17034_s23 + $0xa8] sm:$0xff] }
 0x23b   :  { %v11742_v28 = vpop.permute.xlu1 %852  ;;  %v11746_v43 = vpop.permute.xlu2 %2862  ;;  %v2742_v3 = vadd.f32 %v2693_v29, %v2345_v11  ;;  %v11784_v29 = vld [vmem:[%s16955_s1 + $0x9] ss:$0 sm:$0xff] }
 0x23c   :  { %17110 = vst [vmem:[#allocation21_spill] sm:$0xff] %v11742_v28  ;;  %v11744_v7 = vpop.permute.xlu0 %2952 }
 0x23d   :  { %v3139_v17 = vadd.f32 %v3090_v41, %v2742_v3  ;;  %v3582_v41 = vld [vmem:[%s17034_s23 + $0x29] sm:$0xff]  ;;  %v17114_v3 = vrot.slane %v11648_v21, 1 }
 0x23e   :  { %v2404_v21 = vld [vmem:[%s17034_s23 + $0x8e] sm:$0xff] }
 0x23f   :  { %v3536_v23 = vadd.f32 %v3487_v15, %v3139_v17 }
 0x241   :  { %2847 = vperm.xlu1 %10232, %v2786_v56   ;;  %2932 = vperm.xlu2 %10233, %v2803_v36   ;;  %v3184_v56 = vld [vmem:[%s17034_s23 + $0x20] sm:$0xff] }
 0x242   :  { %2530 = vperm.xlu0 %10231, %v2405_v26  }
 0x243   :  { %v11777_v55 = vpop.permute.xlu1 %1339  ;;  %v3667_v38 = vpop.permute.xlu2 %3666 }
 0x244   :  { %17111 = vst [vmem:[#allocation16_spill] sm:$0xff] %v11777_v55  ;;  %v11779_v28 = vpop.permute.xlu0 %1254  ;;  %v3884_v11 = vmul.f32 %v11784_v29, %v3667_v38 }
 0x245   :  { %17112 = vst [vmem:[#allocation46_spill] sm:$0xff] %v11779_v28  ;;  %v1121_v28 = vmul.f32 %v11708_v30, %v11197_v60  ;;  %v1915_v60 = vmul.f32 %v11731_v18, %v11382_v32  ;;  %v2801_v32 = vld [vmem:[%s17034_s23 + $0x8f] sm:$0xff] }
 0x246   :  { %v11796_v26 = vadd.f32 %v3884_v11, %v3536_v23  ;;  %v2387_v11 = vld [vmem:[%s17034_s23 + $0x6] sm:$0xff] }
 0x248   :  { %v16981_v36 = vrot.slane %v11796_v26, 1 }
 0x249   :  { %3334 = vperm.xlu1 %10232, %v3201_v14   ;;  %3651 = vperm.xlu2 %10233, %v3582_v41   ;;  %v3599_v14 = vld [vmem:[%s17034_s23 + $0xb1] sm:$0xff] }
 0x24a   :  { %3249 = vperm.xlu0 %10231, %v3184_v56   ;;  %v4093_v15 = vsel %vm4076_vm0, %v16981_v36, %v17114_v3 }
 0x24b   :  { %v11799_v38 = vpop.permute.xlu1 %2058  ;;  %v11808_v55 = vpop.permute.xlu2 %1334  ;;  %v4155_v23 = vmax.f32 %v11796_v26, %v4093_v15  ;;  %v2802_v15 = vld [vmem:[%s17034_s23 + $0x97] sm:$0xff] }
 0x24c   :  { %17113 = vst [vmem:[#allocation47_spill] sm:$0xff] %v11799_v38  ;;  %v11806_v17 = vpop.permute.xlu0 %1741 }
 0x24d   :  { %17115 = vst [vmem:[#allocation48_spill] sm:$0xff] %v11806_v17  ;;  %4223 = vmatpush.msra.mxu0 %v4155_v23  ;;  %v2785_v23 = vld [vmem:[%s17034_s23 + $0xf] sm:$0xff] }
 0x24e   :  { %17116 = vst [vmem:[#allocation49_spill] sm:$0xff] %v11808_v55  ;;  %v3598_v17 = vld [vmem:[%s17034_s23 + $0xa9] sm:$0xff] }
 0x251   :  { %2440 = vperm.xlu1 %10232, %v2387_v11   ;;  %2525 = vperm.xlu2 %10233, %v2404_v21   ;;  %v3183_v11 = vld [vmem:[%s17034_s23 + $0x18] sm:$0xff] }
 0x252   :  { %3736 = vperm.xlu0 %10231, %v3599_v14   ;;  %v724_v14 = vmul.f32 %v11690_v61, %v11111_v35  ;;  %v1518_v35 = vmul.f32 %v11718_v9, %v11298_v46 }
 0x253   :  { %v11820_v56 = vpop.permute.xlu1 %2545  ;;  %v11824_v3 = vpop.permute.xlu2 %2053 }
 0x254   :  { %v11822_v41 = vpop.permute.xlu0 %2460  ;;  %17117 = vst [vmem:[#allocation50_spill] sm:$0xff] %v11824_v3  ;;  %v376_v3 = vmul.f32 %v11701_v19, %v11026_v50 }
 0x259   :  { %2927 = vperm.xlu1 %10232, %v2802_v15   ;;  %3244 = vperm.xlu2 %10233, %v3183_v11   ;;  %v3581_v15 = vld [vmem:[%s17034_s23 + $0x21] sm:$0xff] }
 0x25a   :  { %2842 = vperm.xlu0 %10231, %v2785_v23   ;;  %v773_v23 = vadd.f32 %v724_v14, %v376_v3  ;;  %v3200_v11 = vld [vmem:[%s17034_s23 + $0xa0] sm:$0xff]  ;;  %v2312_v3 = vmul.f32 %v11738_v53, %v11479_v4 }
 0x25b   :  { %v11837_v21 = vpop.permute.xlu1 %3264  ;;  %v11841_v55 = vpop.permute.xlu2 %2540  ;;  %v2784_v4 = vld [vmem:[%s17034_s23 + $0x7] sm:$0xff] }
 0x25c   :  { %v11839_v36 = vpop.permute.xlu0 %2947  ;;  %v1170_v50 = vadd.f32 %v1121_v28, %v773_v23 }
 0x25e   :  { %v1567_v38 = vadd.f32 %v1518_v35, %v1170_v50 }
 0x260   :  { %v1964_v1 = vadd.f32 %v1915_v60, %v1567_v38  ;;  %v3580_v60 = vld [vmem:[%s17034_s23 + $0x19] sm:$0xff] }
 0x261   :  { %3646 = vperm.xlu1 %10232, %v3581_v15   ;;  %3731 = vperm.xlu2 %10233, %v3598_v17   ;;  %v3106_v17 = vmul.f32 %v11761_v63, %v11744_v7  ;;  %v3182_v15 = vld [vmem:[%s17034_s23 + $0x10] sm:$0xff] }
 0x262   :  { %3329 = vperm.xlu0 %10231, %v3200_v11   ;;  %v2361_v28 = vadd.f32 %v2312_v3, %v1964_v1  ;;  %v3597_v3 = vld [vmem:[%s17034_s23 + $0xa1] sm:$0xff] }
 0x263   :  { %v11862_v46 = vpop.permute.xlu1 %1249  ;;  %v11864_v6 = vpop.permute.xlu2 %3259 }
 0x264   :  { %v3350_v14 = vpop.permute.xlu0 %3349  ;;  %v2758_v38 = vadd.f32 %v2709_v45, %v2361_v28  ;;  %v3199_v45 = vld [vmem:[%s17034_s23 + $0x98] sm:$0xff]  ;;  %v359_v28 = vmul.f32 %v11701_v19, %v11024_v13 }
 0x265   :  { %v3503_v23 = vmul.f32 %v11774_v49, %v3350_v14 }
 0x266   :  { %v3155_v25 = vadd.f32 %v3106_v17, %v2758_v38 }
 0x268   :  { %v3552_v11 = vadd.f32 %v3503_v23, %v3155_v25  ;;  %v1104_v23 = vmul.f32 %v11708_v30, %v11077_v16  ;;  %v3579_v16 = vld [vmem:[%s17034_s23 + $0x11] sm:$0xff] }
 0x269   :  { %2922 = vperm.xlu1 %10232, %v2801_v32   ;;  %3239 = vperm.xlu2 %10233, %v3182_v15   ;;  %v17119_v15 = vld [vmem:[#allocation22_spill] sm:$0xff] }
 0x26a   :  { %2837 = vperm.xlu0 %10231, %v2784_v4   ;;  %v707_v38 = vmul.f32 %v11690_v61, %v17119_v15 }
 0x26b   :  { %v11880_v35 = vpop.permute.xlu1 %1736  ;;  %v3747_v7 = vpop.permute.xlu2 %3746 }
 0x26c   :  { %17118 = vst [vmem:[#allocation51_spill] sm:$0xff] %v11880_v35  ;;  %v11882_v1 = vpop.permute.xlu0 %1651  ;;  %v3900_v50 = vmul.f32 %v11784_v29, %v3747_v7  ;;  %v756_v13 = vadd.f32 %v707_v38, %v359_v28 }
 0x26e   :  { %v11894_v14 = vadd.f32 %v3900_v50, %v3552_v11  ;;  %v1501_v11 = vmul.f32 %v11718_v9, %v11176_v57  ;;  %v3198_v50 = vld [vmem:[%s17034_s23 + $0x90] sm:$0xff]  ;;  %v2295_v57 = vmul.f32 %v11738_v53, %v11384_v27  ;;  %v1120_v27 = vmul.f32 %v11708_v30, %v11237_v5 }
 0x270   :  { %v16982_v32 = vrot.slane %v11894_v14, 1 }
 0x271   :  { %3641 = vperm.xlu1 %10232, %v3580_v60   ;;  %3726 = vperm.xlu2 %10233, %v3597_v3   ;;  %v3181_v60 = vld [vmem:[%s17034_s23 + $0x8] sm:$0xff]  ;;  %v1898_v3 = vmul.f32 %v11731_v18, %v11352_v40  ;;  %v375_v40 = vmul.f32 %v11701_v19, %v11056_v8  ;;  %v3595_v8 = vld [vmem:[%s17034_s23 + $0x91] sm:$0xff] }
 0x272   :  { %3324 = vperm.xlu0 %10231, %v3199_v45   ;;  %v4171_v4 = vmax.f32 %v11894_v14, %v16982_v32  ;;  %v1153_v45 = vadd.f32 %v1104_v23, %v756_v13  ;;  %v2692_v32 = vmul.f32 %v11751_v59, %v11506_v22  ;;  %v1517_v22 = vmul.f32 %v11718_v9, %v11279_v42 }
 0x273   :  { %v11899_v17 = vpop.permute.xlu1 %2455  ;;  %v11910_v7 = vpop.permute.xlu2 %2048 }
 0x274   :  { %v11908_v25 = vpop.permute.xlu0 %2138  ;;  %9540 = vmatpush.msk.msra.mxu1 %vm4076_vm0, %v4171_v4  ;;  %v1550_v28 = vadd.f32 %v1501_v11, %v1153_v45  ;;  %v723_v4 = vmul.f32 %v11690_v61, %v11124_v58  ;;  %v3089_v58 = vmul.f32 %v11761_v63, %v11694_v33  ;;  %v3486_v33 = vmul.f32 %v11774_v49, %v11837_v21 }
 0x276   :  { %v1947_v38 = vadd.f32 %v1898_v3, %v1550_v28  ;;  %v1914_v3 = vmul.f32 %v11731_v18, %v11427_v48  ;;  %v103_v48 = vld [vmem:[%s17034_s23 + $0x188] sm:$0x7] }
 0x278   :  { %v2344_v11 = vadd.f32 %v2295_v57, %v1947_v38  ;;  %v2311_v57 = vmul.f32 %v11738_v53, %v11559_v2  ;;  %v3105_v2 = vmul.f32 %v11761_v63, %v11839_v36  ;;  %v17120_v36 = vrot.slane %v11796_v26, 1  ;;  %v12001_v26 = vld [vmem:[%s17034_s23 + $0x178] sm:$0xff] }
 0x279   :  { %3319 = vperm.xlu1 %10232, %v3198_v50   ;;  %3636 = vperm.xlu2 %10233, %v3579_v16   ;;  %v3578_v50 = vld [vmem:[%s17034_s23 + $0x9] sm:$0xff]  ;;  %v3596_v16 = vld [vmem:[%s17034_s23 + $0x99] sm:$0xff] }
 0x27a   :  { %3234 = vperm.xlu0 %10231, %v3181_v60   ;;  %v772_v60 = vadd.f32 %v723_v4, %v375_v40  ;;  %v2741_v5 = vadd.f32 %v2692_v32, %v2344_v11 }
 0x27b   :  { %v11930_v15 = vpop.permute.xlu1 %2942  ;;  %v11936_v13 = vpop.permute.xlu2 %2535 }
 0x27c   :  { %v11934_v23 = vpop.permute.xlu0 %2857  ;;  %v1169_v45 = vadd.f32 %v1120_v27, %v772_v60  ;;  %v3138_v28 = vadd.f32 %v3089_v58, %v2741_v5  ;;  %v2708_v27 = vmul.f32 %v11751_v59, %v11618_v31  ;;  %v11981_v60 = vld [vmem:[%s17034_s23 + $0x181] sm:$0xff] }
 0x27e   :  { %v1566_v42 = vadd.f32 %v1517_v22, %v1169_v45  ;;  %v3535_v38 = vadd.f32 %v3486_v33, %v3138_v28 }
 0x280   :  { %v1963_v21 = vadd.f32 %v1914_v3, %v1566_v42 }
 0x281   :  { %3631 = vperm.xlu1 %10232, %v3578_v50   ;;  %3716 = vperm.xlu2 %10233, %v3595_v8   ;;  %v11976_v50 = vld [vmem:[%s17034_s23 + $0x180] sm:$0xff] }
 0x282   :  { %3721 = vperm.xlu0 %10231, %v3596_v16   ;;  %v2360_v58 = vadd.f32 %v2311_v57, %v1963_v21  ;;  %v706_v21 = vmul.f32 %v11690_v61, %v11126_v44  ;;  %v1103_v44 = vmul.f32 %v11708_v30, %v11242_v54 }
 0x283   :  { %v3662_v4 = vpop.permute.xlu1 %3661  ;;  %v11961_v35 = vpop.permute.xlu2 %3254 }
 0x284   :  { %v3345_v40 = vpop.permute.xlu0 %3344  ;;  %v3883_v32 = vmul.f32 %v11784_v29, %v3662_v4  ;;  %v2757_v22 = vadd.f32 %v2708_v27, %v2360_v58  ;;  %v450_v4 = vld [vmem:[%s17034_s23 + $0x189] sm:$0x7]  ;;  %v705_v27 = vmul.f32 %v11690_v61, %v11217_v10  ;;  %v17122_v58 = vrot.slane %v11894_v14, 1  ;;  %v17123_v14 = vld [vmem:[#allocation28_spill] sm:$0xff] }
 0x285   :  { %v3502_v16 = vmul.f32 %v11774_v49, %v3345_v40 }
 0x286   :  { %v11969_v11 = vadd.f32 %v3883_v32, %v3535_v38  ;;  %v3154_v5 = vadd.f32 %v3105_v2, %v2757_v22  ;;  %v12009_v38 = vld [vmem:[%s17034_s23 + $0x179] sm:$0xff]  ;;  %v358_v22 = vmul.f32 %v11701_v19, %v11108_v52  ;;  %v847_v52 = vld [vmem:[%s17034_s23 + $0x18a] sm:$0x7] }
 0x287   :  { %17121 = vst [vmem:[#allocation22_spill] sm:$0xff] %v12009_v38 }
 0x288   :  { %v4088_v31 = vrot.slane %v11969_v11, 1  ;;  %v3551_v42 = vadd.f32 %v3502_v16, %v3154_v5  ;;  %v1102_v5 = vmul.f32 %v11708_v30, %v17123_v14  ;;  %v2294_v14 = vmul.f32 %v11738_v53, %v11561_v51 }
 0x289   :  { %347 = vperm.xlu1 %10232, %v103_v48   ;;  %690 = vperm.xlu2 %10233, %v11981_v60   ;;  %v2690_v51 = vmul.f32 %v11751_v59, %v11822_v41  ;;  %v1243_v41 = vld [vmem:[%s17034_s23 + $0x183] sm:$0xff] }
 0x28a   :  { %342 = vperm.xlu0 %10231, %v11976_v50   ;;  %v4091_v8 = vsel %vm4076_vm0, %v4088_v31, %v17120_v36 }
 0x28b   :  { %v11992_v33 = vpop.permute.xlu1 %1731  ;;  %v4154_v45 = vmax.f32 %v11969_v11, %v4091_v8  ;;  %v3742_v28 = vpop.permute.xlu2 %3741  ;;  %v357_v8 = vmul.f32 %v11701_v19, %v11128_v0  ;;  %v846_v0 = vld [vmem:[%s17034_s23 + $0x182] sm:$0xff] }
 0x28c   :  { %v11995_v3 = vpop.permute.xlu0 %1646  ;;  %v3899_v57 = vmul.f32 %v11784_v29, %v3742_v28  ;;  %v17124_v28 = vld [vmem:[#allocation6_spill] sm:$0xff]  ;;  %v1242_v11 = vld [vmem:[%s17034_s23 + $0x17b] sm:$0xff] }
 0x28d   :  { %4224 = vmatpush.msra.mxu0 %v4154_v45  ;;  %v755_v45 = vadd.f32 %v706_v21, %v358_v22  ;;  %v754_v54 = vadd.f32 %v705_v27, %v357_v8  ;;  %v12053_v21 = vld [vmem:[%s17034_s23 + $0x170] sm:$0xff]  ;;  %v1896_v27 = vmul.f32 %v11731_v18, %v11540_v24 }
 0x28e   :  { %v12011_v40 = vadd.f32 %v3899_v57, %v3551_v42  ;;  %v1500_v42 = vmul.f32 %v11718_v9, %v17124_v28  ;;  %v17125_v57 = vld [vmem:[#allocation37_spill] sm:$0xff] }
 0x290   :  { %v16984_v32 = vrot.slane %v12011_v40, 1 }
 0x291   :  { %337 = vperm.xlu1 %10232, %v12001_v26   ;;  %685 = vperm.xlu2 %10233, %v12009_v38  }
 0x292   :  { %695 = vperm.xlu0 %10231, %v450_v4   ;;  %v4123_v2 = vsel %vm4076_vm0, %v16984_v32, %v17122_v58  ;;  %v1499_v4 = vmul.f32 %v11718_v9, %v17125_v57  ;;  %v1152_v58 = vadd.f32 %v1103_v44, %v755_v45  ;;  %v2293_v57 = vmul.f32 %v11738_v53, %v11593_v37  ;;  %v845_v37 = vld [vmem:[%s17034_s23 + $0x17a] sm:$0xff] }
 0x293   :  { %v12020_v48 = vpop.permute.xlu1 %2450  ;;  %v12033_v36 = vpop.permute.xlu2 %2445  ;;  %v4170_v10 = vmax.f32 %v12011_v40, %v4123_v2  ;;  %v17126_v2 = vld [vmem:[#allocation10_spill] sm:$0xff]  ;;  %v17145_v32 = vld [vmem:[#allocation11_spill] sm:$0xff] }
 0x294   :  { %v12031_v16 = vpop.permute.xlu0 %2133  ;;  %v1897_v22 = vmul.f32 %v11731_v18, %v17126_v2  ;;  %v1549_v8 = vadd.f32 %v1500_v42, %v1152_v58  ;;  %v12084_v58 = vld [vmem:[%s17034_s23 + $0x171] sm:$0xff] }
 0x295   :  { %4277 = vmatpush.msra.mxu1 %v4170_v10  ;;  %v1151_v10 = vadd.f32 %v1102_v5, %v754_v54  ;;  %v2691_v5 = vmul.f32 %v11751_v59, %v11672_v34  ;;  %v3087_v34 = vmul.f32 %v11761_v63, %v11934_v23  ;;  %17127 = vst [vmem:[#allocation28_spill] sm:$0xff] %v12084_v58 }
 0x296   :  { %v1946_v45 = vadd.f32 %v1897_v22, %v1549_v8 }
 0x297   :  { %v1548_v28 = vadd.f32 %v1499_v4, %v1151_v10  ;;  %v3088_v4 = vmul.f32 %v11761_v63, %v11746_v43  ;;  %v3485_v43 = vmul.f32 %v11774_v49, %v11864_v6  ;;  %v3484_v10 = vmul.f32 %v11774_v49, %v11961_v35  ;;  %v12101_v35 = vld [vmem:[%s17034_s23 + $0x168] sm:$0xff] }
 0x298   :  { %17128 = vst [vmem:[#allocation6_spill] sm:$0xff] %v12101_v35 }
 0x299   :  { %1092 = vperm.xlu1 %10232, %v847_v52   ;;  %332 = vperm.xlu2 %10233, %v12053_v21   ;;  %v1945_v42 = vadd.f32 %v1896_v27, %v1548_v28  ;;  %v2343_v52 = vadd.f32 %v2294_v14, %v1946_v45 }
 0x29a   :  { %1087 = vperm.xlu0 %10231, %v846_v0  }
 0x29b   :  { %v12064_v44 = vpop.permute.xlu1 %2937  ;;  %v12070_v24 = vpop.permute.xlu2 %2932  ;;  %v2342_v0 = vadd.f32 %v2293_v57, %v1945_v42  ;;  %v2740_v2 = vadd.f32 %v2691_v5, %v2343_v52  ;;  %v12109_v52 = vld [vmem:[%s17034_s23 + $0x169] sm:$0xff] }
 0x29c   :  { %v12068_v54 = vpop.permute.xlu0 %2852  ;;  %17129 = vst [vmem:[#allocation37_spill] sm:$0xff] %v12109_v52 }
 0x29d   :  { %v2739_v22 = vadd.f32 %v2690_v51, %v2342_v0  ;;  %v3137_v27 = vadd.f32 %v3088_v4, %v2740_v2  ;;  %v1244_v51 = vld [vmem:[%s17034_s23 + $0x18b] sm:$0x7] }
 0x29f   :  { %v3136_v23 = vadd.f32 %v3087_v34, %v2739_v22  ;;  %v3534_v14 = vadd.f32 %v3485_v43, %v3137_v27 }
 0x2a1   :  { %1082 = vperm.xlu1 %10232, %v845_v37   ;;  %1484 = vperm.xlu2 %10233, %v1243_v41   ;;  %v3533_v5 = vadd.f32 %v3484_v10, %v3136_v23  ;;  %v17130_v23 = vld [vmem:[#allocation29_spill] sm:$0xff] }
 0x2a2   :  { %680 = vperm.xlu0 %10231, %v12084_v58  }
 0x2a3   :  { %v3657_v8 = vpop.permute.xlu1 %3656  ;;  %v3652_v57 = vpop.permute.xlu2 %3651 }
 0x2a4   :  { %v12094_v28 = vpop.permute.xlu0 %3339  ;;  %v3882_v45 = vmul.f32 %v11784_v29, %v3657_v8  ;;  %v3881_v6 = vmul.f32 %v11784_v29, %v3652_v57  ;;  %v844_v8 = vld [vmem:[%s17034_s23 + $0x172] sm:$0xff] }
 0x2a5   :  { %v17131_v57 = vld [vmem:[#allocation27_spill] sm:$0xff] }
 0x2a6   :  { %v3931_v42 = vadd.f32 %v3882_v45, %v3534_v14  ;;  %v12111_v4 = vadd.f32 %v3881_v6, %v3533_v5  ;;  %v1640_v14 = vld [vmem:[%s17034_s23 + $0x184] sm:$0xff]  ;;  %v373_v45 = vmul.f32 %v11701_v19, %v17131_v57  ;;  %v17132_v5 = vld [vmem:[#allocation38_spill] sm:$0xff] }
 0x2a7   :  { %v1118_v6 = vmul.f32 %v11708_v30, %v17132_v5  ;;  %v17135_v5 = vld [vmem:[#allocation31_spill] sm:$0xff] }
 0x2a8   :  { %v4086_v37 = vrot.slane %v3931_v42, 1  ;;  %v16983_v0 = vrot.slane %v12111_v4, 1 }
 0x2a9   :  { %327 = vperm.xlu1 %10232, %v12101_v35   ;;  %675 = vperm.xlu2 %10233, %v12109_v52  }
 0x2aa   :  { %1489 = vperm.xlu0 %10231, %v1244_v51   ;;  %v4089_v34 = vsel %vm4076_vm0, %v4086_v37, %v4088_v31  ;;  %v4087_v43 = vsel %vm4076_vm0, %v16983_v0, %v4086_v37  ;;  %v721_v31 = vmul.f32 %v11690_v61, %v17130_v23  ;;  %v17134_v23 = vld [vmem:[#allocation25_spill] sm:$0xff] }
 0x2ab   :  { %v12119_v41 = vpop.permute.xlu1 %2128  ;;  %v4153_v2 = vmax.f32 %v3931_v42, %v4089_v34  ;;  %v12126_v10 = vpop.permute.xlu2 %2525  ;;  %v4152_v27 = vmax.f32 %v12111_v4, %v4087_v43  ;;  %v17133_v42 = vld [vmem:[#allocation26_spill] sm:$0xff]  ;;  %v1515_v34 = vmul.f32 %v11718_v9, %v11545_v39  ;;  %v722_v57 = vmul.f32 %v11690_v61, %v17134_v23  ;;  %v12163_v39 = vld [vmem:[%s17034_s23 + $0x160] sm:$0xff] }
 0x2ac   :  { %v12124_v22 = vpop.permute.xlu0 %2043  ;;  %v374_v51 = vmul.f32 %v11701_v19, %v17133_v42  ;;  %v770_v37 = vadd.f32 %v721_v31, %v373_v45  ;;  %17136 = vst [vmem:[#allocation10_spill] sm:$0xff] %v12163_v39  ;;  %v17137_v45 = vld [vmem:[#allocation33_spill] sm:$0xff]  ;;  %v2309_v23 = vmul.f32 %v11738_v53, %v11696_v12 }
 0x2ad   :  { %4225 = vmatpush.msra.mxu0 %v4153_v2  ;;  %v1516_v42 = vmul.f32 %v11718_v9, %v17137_v45 }
 0x2ae   :  { %v771_v31 = vadd.f32 %v722_v57, %v374_v51  ;;  %v1913_v51 = vmul.f32 %v11731_v18, %v11481_v20 }
 0x2af   :  { %4226 = vmatpush.msra.mxu0 %v4152_v27 }
 0x2b1   :  { %1479 = vperm.xlu1 %10232, %v1242_v11   ;;  %1881 = vperm.xlu2 %10233, %v1640_v14   ;;  %v1119_v11 = vmul.f32 %v11708_v30, %v17135_v5  ;;  %v1912_v14 = vmul.f32 %v11731_v18, %v11651_v62  ;;  %v12175_v62 = vld [vmem:[%s17034_s23 + $0x161] sm:$0xff]  ;;  %v2310_v5 = vmul.f32 %v11738_v53, %v11674_v47 }
 0x2b2   :  { %1077 = vperm.xlu0 %10231, %v844_v8   ;;  %v1167_v8 = vadd.f32 %v1118_v6, %v770_v37  ;;  %v1641_v6 = vld [vmem:[%s17034_s23 + $0x18c] sm:$0x7]  ;;  %17138 = vst [vmem:[#allocation29_spill] sm:$0xff] %v12175_v62 }
 0x2b3   :  { %v12148_v2 = vpop.permute.xlu1 %2847  ;;  %v12152_v27 = vpop.permute.xlu2 %3244  ;;  %v1168_v37 = vadd.f32 %v1119_v11, %v771_v31  ;;  %v3103_v11 = vmul.f32 %v11761_v63, %v12064_v44 }
 0x2b4   :  { %v12150_v43 = vpop.permute.xlu0 %2530  ;;  %v1564_v0 = vadd.f32 %v1515_v34, %v1167_v8  ;;  %v2706_v34 = vmul.f32 %v11751_v59, %v11841_v55  ;;  %v2707_v55 = vmul.f32 %v11751_v59, %v11820_v56  ;;  %v1639_v56 = vld [vmem:[%s17034_s23 + $0x17c] sm:$0xff] }
 0x2b5   :  { %v1565_v12 = vadd.f32 %v1516_v42, %v1168_v37  ;;  %v1241_v42 = vld [vmem:[%s17034_s23 + $0x173] sm:$0xff]  ;;  %v843_v37 = vld [vmem:[%s17034_s23 + $0x16a] sm:$0xff] }
 0x2b6   :  { %v1961_v57 = vadd.f32 %v1912_v14, %v1564_v0 }
 0x2b7   :  { %v1962_v0 = vadd.f32 %v1913_v51, %v1565_v12  ;;  %v17139_v12 = vld [vmem:[#allocation30_spill] sm:$0xff] }
 0x2b8   :  { %v2358_v8 = vadd.f32 %v2309_v23, %v1961_v57  ;;  %v3104_v23 = vmul.f32 %v11761_v63, %v11930_v15  ;;  %v3501_v57 = vmul.f32 %v11774_v49, %v12094_v28 }
 0x2b9   :  { %322 = vperm.xlu1 %10232, %v12163_v39   ;;  %670 = vperm.xlu2 %10233, %v12175_v62   ;;  %v2359_v47 = vadd.f32 %v2310_v5, %v1962_v0  ;;  %v704_v5 = vmul.f32 %v11690_v61, %v17139_v12  ;;  %v2038_v12 = vld [vmem:[%s17034_s23 + $0x18d] sm:$0x7]  ;;  %v1117_v62 = vmul.f32 %v11708_v30, %v17145_v32  ;;  %v17149_v39 = vld [vmem:[#allocation47_spill] sm:$0xff] }
 0x2ba   :  { %1886 = vperm.xlu0 %10231, %v1641_v6   ;;  %v2755_v14 = vadd.f32 %v2706_v34, %v2358_v8  ;;  %v2292_v35 = vmul.f32 %v11738_v53, %v17149_v39  ;;  %v2689_v39 = vmul.f32 %v11751_v59, %v11899_v17 }
 0x2bb   :  { %v3335_v31 = vpop.permute.xlu1 %3334  ;;  %v3732_v20 = vpop.permute.xlu2 %3731  ;;  %v2756_v51 = vadd.f32 %v2707_v55, %v2359_v47 }
 0x2bc   :  { %v12187_v45 = vpop.permute.xlu0 %3249  ;;  %v3500_v6 = vmul.f32 %v11774_v49, %v3335_v31  ;;  %v3152_v44 = vadd.f32 %v3103_v11, %v2755_v14  ;;  %v3897_v8 = vmul.f32 %v11784_v29, %v3732_v20  ;;  %v17140_v31 = vld [vmem:[#allocation14_spill] sm:$0xff]  ;;  %v17141_v14 = vld [vmem:[#allocation8_spill] sm:$0xff] }
 0x2bd   :  { %v3153_v15 = vadd.f32 %v3104_v23, %v2756_v51  ;;  %v356_v0 = vmul.f32 %v11701_v19, %v17140_v31  ;;  %v1101_v55 = vmul.f32 %v11708_v30, %v17141_v14  ;;  %v17144_v31 = vld [vmem:[#allocation32_spill] sm:$0xff] }
 0x2be   :  { %v3549_v34 = vadd.f32 %v3500_v6, %v3152_v44  ;;  %v17142_v6 = vld [vmem:[#allocation35_spill] sm:$0xff]  ;;  %v372_v14 = vmul.f32 %v11701_v19, %v17144_v31 }
 0x2bf   :  { %v3550_v44 = vadd.f32 %v3501_v57, %v3153_v15  ;;  %v753_v20 = vadd.f32 %v704_v5, %v356_v0  ;;  %v2037_v57 = vld [vmem:[%s17034_s23 + $0x185] sm:$0xff] }
 0x2c0   :  { %v12219_v23 = vadd.f32 %v3897_v8, %v3549_v34  ;;  %v12236_v34 = vld [vmem:[%s17034_s23 + $0x158] sm:$0xff] }
 0x2c1   :  { %1474 = vperm.xlu1 %10232, %v1241_v42   ;;  %1876 = vperm.xlu2 %10233, %v1639_v56   ;;  %v720_v42 = vmul.f32 %v11690_v61, %v17142_v6  ;;  %v17143_v56 = vld [vmem:[#allocation7_spill] sm:$0xff]  ;;  %17146 = vst [vmem:[#allocation27_spill] sm:$0xff] %v12236_v34  ;;  %v1150_v15 = vadd.f32 %v1101_v55, %v753_v20  ;;  %v17150_v55 = vld [vmem:[#allocation48_spill] sm:$0xff] }
 0x2c2   :  { %1072 = vperm.xlu0 %10231, %v843_v37   ;;  %v1498_v51 = vmul.f32 %v11718_v9, %v17143_v56  ;;  %v17147_v8 = vld [vmem:[#allocation43_spill] sm:$0xff]  ;;  %v16990_v31 = vrot.slane %v12219_v23, 1 }
 0x2c3   :  { %v12208_v11 = vpop.permute.xlu1 %2440  ;;  %v12214_v28 = vpop.permute.xlu2 %3239  ;;  %v1895_v0 = vmul.f32 %v11731_v18, %v17147_v8  ;;  %v17148_v6 = vld [vmem:[#allocation23_spill] sm:$0xff]  ;;  %v17152_v8 = vld [vmem:[#allocation13_spill] sm:$0xff] }
 0x2c4   :  { %v3737_v47 = vpop.permute.xlu0 %3736  ;;  %v1514_v56 = vmul.f32 %v11718_v9, %v17148_v6  ;;  %v1547_v52 = vadd.f32 %v1498_v51, %v1150_v15 }
 0x2c5   :  { %v3898_v37 = vmul.f32 %v11784_v29, %v3737_v47  ;;  %v769_v47 = vadd.f32 %v720_v42, %v372_v14  ;;  %v17151_v42 = vrot.slane %v12011_v40, 1  ;;  %v2308_v40 = vmul.f32 %v11738_v53, %v11908_v25 }
 0x2c6   :  { %v1944_v14 = vadd.f32 %v1895_v0, %v1547_v52  ;;  %v3086_v52 = vmul.f32 %v11761_v63, %v12068_v54  ;;  %v17154_v0 = vld [vmem:[#allocation39_spill] sm:$0xff] }
 0x2c7   :  { %v3947_v5 = vadd.f32 %v3898_v37, %v3550_v44  ;;  %v1166_v44 = vadd.f32 %v1117_v62, %v769_v47  ;;  %v1911_v37 = vmul.f32 %v11731_v18, %v17150_v55  ;;  %v702_v47 = vmul.f32 %v11690_v61, %v17152_v8  ;;  %v17153_v55 = vld [vmem:[#allocation36_spill] sm:$0xff]  ;;  %v12281_v54 = vld [vmem:[%s17034_s23 + $0x159] sm:$0xff] }
 0x2c9   :  { %2283 = vperm.xlu1 %10232, %v2038_v12   ;;  %v4118_v32 = vrot.slane %v3947_v5, 1  ;;  %317 = vperm.xlu2 %10233, %v12236_v34   ;;  %v1563_v6 = vadd.f32 %v1514_v56, %v1166_v44  ;;  %v2341_v34 = vadd.f32 %v2292_v35, %v1944_v14  ;;  %v354_v56 = vmul.f32 %v11701_v19, %v17154_v0 }
 0x2ca   :  { %2278 = vperm.xlu0 %10231, %v2037_v57   ;;  %v2705_v35 = vmul.f32 %v11751_v59, %v11936_v13 }
 0x2cb   :  { %v12248_v20 = vpop.permute.xlu1 %2927  ;;  %v4121_v12 = vsel %vm4076_vm0, %v4118_v32, %v17151_v42  ;;  %v4119_v51 = vsel %vm4076_vm0, %v16990_v31, %v4118_v32  ;;  %v3727_v62 = vpop.permute.xlu2 %3726  ;;  %v703_v42 = vmul.f32 %v11690_v61, %v17153_v55  ;;  %v17155_v32 = vld [vmem:[#allocation19_spill] sm:$0xff]  ;;  %v1960_v44 = vadd.f32 %v1911_v37, %v1563_v6  ;;  %v17158_v6 = vld [vmem:[#allocation46_spill] sm:$0xff] }
 0x2cc   :  { %v12258_v57 = vpop.permute.xlu0 %2842  ;;  %v4169_v15 = vmax.f32 %v3947_v5, %v4121_v12  ;;  %v4168_v17 = vmax.f32 %v12219_v23, %v4119_v51  ;;  %v842_v5 = vld [vmem:[%s17034_s23 + $0x162] sm:$0xff]  ;;  %v1099_v25 = vmul.f32 %v11708_v30, %v17155_v32  ;;  %v1240_v12 = vld [vmem:[%s17034_s23 + $0x16b] sm:$0xff]  ;;  %v2738_v55 = vadd.f32 %v2689_v39, %v2341_v34 }
 0x2cd   :  { %v17156_v51 = vld [vmem:[#allocation34_spill] sm:$0xff]  ;;  %v3483_v37 = vmul.f32 %v11774_v49, %v12187_v45  ;;  %v751_v13 = vadd.f32 %v702_v47, %v354_v56  ;;  %v1496_v0 = vmul.f32 %v11718_v9, %v17158_v6  ;;  %v2357_v32 = vadd.f32 %v2308_v40, %v1960_v44  ;;  %v17159_v34 = vld [vmem:[#allocation41_spill] sm:$0xff] }
 0x2ce   :  { %4278 = vmatpush.msra.mxu1 %v4169_v15  ;;  %v355_v14 = vmul.f32 %v11701_v19, %v17156_v51  ;;  %v17157_v15 = vld [vmem:[#allocation9_spill] sm:$0xff]  ;;  %v3102_v31 = vmul.f32 %v11761_v63, %v12070_v24  ;;  %v3135_v38 = vadd.f32 %v3086_v52, %v2738_v55  ;;  %v1497_v39 = vmul.f32 %v11718_v9, %v17159_v34 }
 0x2cf   :  { %v1100_v8 = vmul.f32 %v11708_v30, %v17157_v15  ;;  %v1148_v51 = vadd.f32 %v1099_v25, %v751_v13  ;;  %v1893_v45 = vmul.f32 %v11731_v18, %v11882_v1  ;;  %v2754_v47 = vadd.f32 %v2705_v35, %v2357_v32  ;;  %v17160_v40 = vld [vmem:[#allocation45_spill] sm:$0xff]  ;;  %v2036_v1 = vld [vmem:[%s17034_s23 + $0x17d] sm:$0xff] }
 0x2d0   :  { %4279 = vmatpush.msra.mxu1 %v4168_v17  ;;  %v752_v58 = vadd.f32 %v703_v42, %v355_v14  ;;  %v1894_v44 = vmul.f32 %v11731_v18, %v17160_v40  ;;  %v3532_v24 = vadd.f32 %v3483_v37, %v3135_v38  ;;  %v2290_v25 = vmul.f32 %v11738_v53, %v11910_v7  ;;  %v1638_v37 = vld [vmem:[%s17034_s23 + $0x174] sm:$0xff]  ;;  %v2434_v7 = vld [vmem:[%s17034_s23 + $0x186] sm:$0xff] }
 0x2d1   :  { %1067 = vperm.xlu1 %10232, %v842_v5   ;;  %1469 = vperm.xlu2 %10233, %v1240_v12   ;;  %v1545_v14 = vadd.f32 %v1496_v0, %v1148_v51  ;;  %v3151_v12 = vadd.f32 %v3102_v31, %v2754_v47  ;;  %v3896_v38 = vmul.f32 %v11784_v29, %v3727_v62  ;;  %v17161_v31 = vld [vmem:[#allocation50_spill] sm:$0xff] }
 0x2d2   :  { %665 = vperm.xlu0 %10231, %v12281_v54   ;;  %v1149_v56 = vadd.f32 %v1100_v8, %v752_v58  ;;  %v2291_v13 = vmul.f32 %v11738_v53, %v17161_v31  ;;  %v2687_v6 = vmul.f32 %v11751_v59, %v12033_v36  ;;  %v2688_v34 = vmul.f32 %v11751_v59, %v12020_v48  ;;  %v2435_v31 = vld [vmem:[%s17034_s23 + $0x18e] sm:$0x7] }
 0x2d3   :  { %v3647_v17 = vpop.permute.xlu1 %3646  ;;  %v3637_v42 = vpop.permute.xlu2 %3636  ;;  %v1942_v8 = vadd.f32 %v1893_v45, %v1545_v14  ;;  %v17162_v45 = vrot.slane %v12111_v4, 1  ;;  %v3085_v48 = vmul.f32 %v11761_v63, %v12148_v2  ;;  %v17163_v4 = vld [vmem:[#allocation17_spill] sm:$0xff] }
 0x2d4   :  { %v3330_v5 = vpop.permute.xlu0 %3329  ;;  %v3880_v52 = vmul.f32 %v11784_v29, %v3647_v17  ;;  %v1546_v35 = vadd.f32 %v1497_v39, %v1149_v56  ;;  %v3084_v39 = vmul.f32 %v11761_v63, %v12258_v57 }
 0x2d5   :  { %v3499_v15 = vmul.f32 %v11774_v49, %v3330_v5  ;;  %v2339_v51 = vadd.f32 %v2290_v25, %v1942_v8  ;;  %v371_v5 = vmul.f32 %v11701_v19, %v17163_v4  ;;  %v17165_v25 = vrot.slane %v12219_v23, 1  ;;  %v17166_v8 = vld [vmem:[#allocation40_spill] sm:$0xff] }
 0x2d6   :  { %v12310_v58 = vadd.f32 %v3880_v52, %v3532_v24  ;;  %v1943_v32 = vadd.f32 %v1894_v44, %v1546_v35  ;;  %v17164_v52 = vld [vmem:[#allocation12_spill] sm:$0xff]  ;;  %v12358_v35 = vld [vmem:[%s17034_s23 + $0x150] sm:$0xff] }
 0x2d7   :  { %v3548_v55 = vadd.f32 %v3499_v15, %v3151_v12  ;;  %v2736_v44 = vadd.f32 %v2687_v6, %v2339_v51  ;;  %v718_v14 = vmul.f32 %v11690_v61, %v17164_v52  ;;  %v17168_v23 = vld [vmem:[#allocation44_spill] sm:$0xff]  ;;  %v17173_v52 = vld [vmem:[#allocation21_spill] sm:$0xff] }
 0x2d8   :  { %v4082_v0 = vrot.slane %v12310_v58, 1  ;;  %v2340_v40 = vadd.f32 %v2291_v13, %v1943_v32  ;;  %v12372_v13 = vld [vmem:[%s17034_s23 + $0x151] sm:$0xff]  ;;  %v17169_v6 = vld [vmem:[#allocation20_spill] sm:$0xff] }
 0x2d9   :  { %2273 = vperm.xlu1 %10232, %v2036_v1   ;;  %v12324_v62 = vadd.f32 %v3896_v38, %v3548_v55  ;;  %2675 = vperm.xlu2 %10233, %v2434_v7   ;;  %v3133_v1 = vadd.f32 %v3084_v39, %v2736_v44  ;;  %v719_v38 = vmul.f32 %v11690_v61, %v17166_v8  ;;  %v17167_v55 = vld [vmem:[#allocation18_spill] sm:$0xff]  ;;  %v17171_v44 = vld [vmem:[#allocation15_spill] sm:$0xff] }
 0x2da   :  { %1871 = vperm.xlu0 %10231, %v1638_v37   ;;  %v4085_v36 = vsel %vm4076_vm0, %v4082_v0, %v17162_v45  ;;  %v2737_v15 = vadd.f32 %v2688_v34, %v2340_v40  ;;  %v370_v37 = vmul.f32 %v11701_v19, %v17167_v55  ;;  %v1115_v7 = vmul.f32 %v11708_v30, %v17168_v23  ;;  %v1239_v23 = vld [vmem:[%s17034_s23 + $0x163] sm:$0xff] }
 0x2db   :  { %v12335_v47 = vpop.permute.xlu1 %2922  ;;  %v4151_v17 = vmax.f32 %v12310_v58, %v4085_v36  ;;  %v4114_v56 = vrot.slane %v12324_v62, 1  ;;  %v12343_v24 = vpop.permute.xlu2 %3716  ;;  %v701_v32 = vmul.f32 %v11690_v61, %v17169_v6  ;;  %v3481_v34 = vmul.f32 %v11774_v49, %v12214_v28 }
 0x2dc   :  { %v12341_v57 = vpop.permute.xlu0 %2837  ;;  %v3134_v51 = vadd.f32 %v3085_v48, %v2737_v15  ;;  %v3878_v39 = vmul.f32 %v11784_v29, %v3637_v42  ;;  %v768_v45 = vadd.f32 %v719_v38, %v371_v5  ;;  %v767_v36 = vadd.f32 %v718_v14, %v370_v37  ;;  %v17172_v48 = vld [vmem:[#allocation42_spill] sm:$0xff] }
 0x2dd   :  { %4227 = vmatpush.msra.mxu0 %v4151_v17  ;;  %v4117_v12 = vsel %vm4076_vm0, %v4114_v56, %v17165_v25  ;;  %v17170_v17 = vld [vmem:[#allocation49_spill] sm:$0xff]  ;;  %v353_v4 = vmul.f32 %v11701_v19, %v17171_v44  ;;  %v3482_v61 = vmul.f32 %v11774_v49, %v12152_v27  ;;  %v3530_v28 = vadd.f32 %v3481_v34, %v3133_v1  ;;  %v17174_v1 = vld [vmem:[#allocation16_spill] sm:$0xff] }
 0x2de   :  { %v4167_v2 = vmax.f32 %v12324_v62, %v4117_v12  ;;  %v1512_v40 = vmul.f32 %v11718_v9, %v17170_v17  ;;  %v1116_v42 = vmul.f32 %v11708_v30, %v17172_v48  ;;  %v1164_v5 = vadd.f32 %v1115_v7, %v767_v36  ;;  %v1637_v34 = vld [vmem:[%s17034_s23 + $0x16c] sm:$0xff] }
 0x2df   :  { %v1098_v14 = vmul.f32 %v11708_v30, %v17173_v52  ;;  %v1909_v25 = vmul.f32 %v11731_v18, %v11992_v33  ;;  %v750_v15 = vadd.f32 %v701_v32, %v353_v4  ;;  %v3531_v8 = vadd.f32 %v3482_v61, %v3134_v51  ;;  %v841_v51 = vld [vmem:[%s17034_s23 + $0x15a] sm:$0xff] }
 0x2e0   :  { %4280 = vmatpush.msra.mxu1 %v4167_v2  ;;  %v12396_v38 = vadd.f32 %v3878_v39, %v3530_v28  ;;  %v1513_v55 = vmul.f32 %v11718_v9, %v17174_v1  ;;  %v1561_v37 = vadd.f32 %v1512_v40, %v1164_v5  ;;  %v1495_v30 = vmul.f32 %v11718_v9, %v11862_v46  ;;  %v17175_v9 = vld [vmem:[#allocation51_spill] sm:$0xff] }
 0x2e1   :  { %312 = vperm.xlu1 %10232, %v12358_v35   ;;  %660 = vperm.xlu2 %10233, %v12372_v13   ;;  %v2306_v33 = vmul.f32 %v11738_v53, %v12119_v41  ;;  %v1147_v6 = vadd.f32 %v1098_v14, %v750_v15  ;;  %v1910_v46 = vmul.f32 %v11731_v18, %v17175_v9  ;;  %v442_v9 = vld [vmem:[%s17034_s23 + $0x149] sm:$0xff] }
 0x2e2   :  { %2680 = vperm.xlu0 %10231, %v2435_v31   ;;  %v1165_v31 = vadd.f32 %v1116_v42, %v768_v45  ;;  %v1958_v32 = vadd.f32 %v1909_v25, %v1561_v37  ;;  %v1892_v41 = vmul.f32 %v11731_v18, %v11995_v3  ;;  %v4078_v36 = vrot.slane %v12396_v38, 1 }
 0x2e3   :  { %v3642_v12 = vpop.permute.xlu1 %3641  ;;  %v12393_v2 = vpop.permute.xlu2 %690  ;;  %v1544_v17 = vadd.f32 %v1495_v30, %v1147_v6  ;;  %v2289_v44 = vmul.f32 %v11738_v53, %v12124_v22  ;;  %v2307_v3 = vmul.f32 %v11738_v53, %v12031_v16  ;;  %v2703_v61 = vmul.f32 %v11751_v59, %v12126_v10 }
 0x2e4   :  { %v3325_v19 = vpop.permute.xlu0 %3324  ;;  %v3879_v27 = vmul.f32 %v11784_v29, %v3642_v12  ;;  %v1562_v45 = vadd.f32 %v1513_v55, %v1165_v31  ;;  %v2355_v40 = vadd.f32 %v2306_v33, %v1958_v32  ;;  %v3100_v28 = vmul.f32 %v11761_v63, %v12335_v47 }
 0x2e5   :  { %v1941_v5 = vadd.f32 %v1892_v41, %v1544_v17  ;;  %v2686_v58 = vmul.f32 %v11751_v59, %v12208_v11  ;;  %v2704_v14 = vmul.f32 %v11751_v59, %v12150_v43  ;;  %v3083_v25 = vmul.f32 %v11761_v63, %v12341_v57  ;;  %v2433_v11 = vld [vmem:[%s17034_s23 + $0x17e] sm:$0xff]  ;;  %v2035_v59 = vld [vmem:[%s17034_s23 + $0x175] sm:$0xff]  ;;  %v2831_v43 = vld [vmem:[%s17034_s23 + $0x187] sm:$0xff] }
 0x2e6   :  { %v3928_v7 = vadd.f32 %v3879_v27, %v3531_v8  ;;  %v1959_v42 = vadd.f32 %v1910_v46, %v1562_v45  ;;  %v2752_v53 = vadd.f32 %v2703_v61, %v2355_v40  ;;  %v3101_v15 = vmul.f32 %v11761_v63, %v12248_v20 }
 0x2e7   :  { %v2338_v47 = vadd.f32 %v2289_v44, %v1941_v5  ;;  %v3498_v55 = vmul.f32 %v11774_v49, %v3325_v19  ;;  %v3894_v20 = vmul.f32 %v11784_v29, %v12343_v24  ;;  %v12464_v19 = vld [vmem:[%s17034_s23 + $0x148] sm:$0xff] }
 0x2e8   :  { %v4080_v39 = vrot.slane %v3928_v7, 1  ;;  %v2356_v12 = vadd.f32 %v2307_v3, %v1959_v42  ;;  %v3149_v27 = vadd.f32 %v3100_v28, %v2752_v53  ;;  %17176 = vst [vmem:[#allocation38_spill] sm:$0xff] %v12464_v19  ;;  %v2832_v24 = vld [vmem:[%s17034_s23 + $0x18f] sm:$0x7] }
 0x2e9   :  { %1464 = vperm.xlu1 %10232, %v1239_v23   ;;  %1866 = vperm.xlu2 %10233, %v1637_v34   ;;  %v2735_v8 = vadd.f32 %v2686_v58, %v2338_v47  ;;  %v2034_v53 = vld [vmem:[%s17034_s23 + $0x16d] sm:$0xff] }
 0x2ea   :  { %1062 = vperm.xlu0 %10231, %v841_v51   ;;  %v4083_v4 = vsel %vm4076_vm0, %v4080_v39, %v4082_v0  ;;  %v4081_v18 = vsel %vm4076_vm0, %v4078_v36, %v4080_v39  ;;  %v2753_v1 = vadd.f32 %v2704_v14, %v2356_v12  ;;  %v2432_v14 = vld [vmem:[%s17034_s23 + $0x176] sm:$0xff]  ;;  %v3228_v12 = vld [vmem:[%s17034_s23 + $0x188] sm:$0xff] }
 0x2eb   :  { %v3320_v22 = vpop.permute.xlu1 %3319  ;;  %v4150_v48 = vmax.f32 %v3928_v7, %v4083_v4  ;;  %v12434_v52 = vpop.permute.xlu2 %685  ;;  %v4149_v10 = vmax.f32 %v12396_v38, %v4081_v18  ;;  %v3132_v30 = vadd.f32 %v3083_v25, %v2735_v8  ;;  %v1238_v38 = vld [vmem:[%s17034_s23 + $0x15b] sm:$0xff] }
 0x2ec   :  { %v3235_v0 = vpop.permute.xlu0 %3234  ;;  %v3497_v16 = vmul.f32 %v11774_v49, %v3320_v22  ;;  %v3150_v63 = vadd.f32 %v3101_v15, %v2753_v1  ;;  %v839_v15 = vld [vmem:[%s17034_s23 + $0x14a] sm:$0xff]  ;;  %v1635_v8 = vld [vmem:[%s17034_s23 + $0x15c] sm:$0xff] }
 0x2ed   :  { %4228 = vmatpush.msra.mxu0 %v4150_v48  ;;  %v3480_v57 = vmul.f32 %v11774_v49, %v3235_v0  ;;  %v1636_v48 = vld [vmem:[%s17034_s23 + $0x164] sm:$0xff] }
 0x2ee   :  { %v3546_v37 = vadd.f32 %v3497_v16, %v3149_v27  ;;  %v3547_v32 = vadd.f32 %v3498_v55, %v3150_v63  ;;  %v2830_v16 = vld [vmem:[%s17034_s23 + $0x17f] sm:$0xff]  ;;  %v2829_v63 = vld [vmem:[%s17034_s23 + $0x177] sm:$0xff] }
 0x2ef   :  { %4229 = vmatpush.msra.mxu0 %v4149_v10  ;;  %v3529_v23 = vadd.f32 %v3480_v57, %v3132_v30  ;;  %v1237_v57 = vld [vmem:[%s17034_s23 + $0x153] sm:$0xff]  ;;  %v2033_v1 = vld [vmem:[%s17034_s23 + $0x165] sm:$0xff] }
 0x2f0   :  { %v3943_v49 = vadd.f32 %v3894_v20, %v3546_v37  ;;  %v2431_v20 = vld [vmem:[%s17034_s23 + $0x16e] sm:$0xff] }
 0x2f1   :  { %2670 = vperm.xlu1 %10232, %v2433_v11   ;;  %3072 = vperm.xlu2 %10233, %v2831_v43   ;;  %v3229_v11 = vld [vmem:[%s17034_s23 + $0x190] sm:$0x7] }
 0x2f2   :  { %2268 = vperm.xlu0 %10231, %v2035_v59   ;;  %v4110_v39 = vrot.slane %v3943_v49, 1 }
 0x2f3   :  { %v3632_v33 = vpop.permute.xlu1 %3631  ;;  %v12457_v31 = vpop.permute.xlu2 %332 }
 0x2f4   :  { %v3722_v7 = vpop.permute.xlu0 %3721  ;;  %v3877_v6 = vmul.f32 %v11784_v29, %v3632_v33 }
 0x2f5   :  { %v3895_v51 = vmul.f32 %v11784_v29, %v3722_v7 }
 0x2f6   :  { %v3926_v34 = vadd.f32 %v3877_v6, %v3529_v23  ;;  %v3626_v6 = vld [vmem:[%s17034_s23 + $0x191] sm:$0x7] }
 0x2f7   :  { %v3944_v46 = vadd.f32 %v3895_v51, %v3547_v32  ;;  %v3625_v32 = vld [vmem:[%s17034_s23 + $0x189] sm:$0xff] }
 0x2f8   :  { %v4077_v41 = vrot.slane %v3926_v34, 1  ;;  %v1236_v51 = vld [vmem:[%s17034_s23 + $0x14b] sm:$0xff] }
 0x2f9   :  { %307 = vperm.xlu1 %10232, %v12464_v19   ;;  %v4112_v29 = vrot.slane %v3944_v46, 1  ;;  %655 = vperm.xlu2 %10233, %v442_v9   ;;  %v1634_v9 = vld [vmem:[%s17034_s23 + $0x154] sm:$0xff] }
 0x2fa   :  { %3077 = vperm.xlu0 %10231, %v2832_v24   ;;  %v4079_v45 = vsel %vm4076_vm0, %v4077_v41, %v4078_v36  ;;  %v17177_v36 = vld [vmem:[#allocation24_spill] sm:$0xff] }
 0x2fb   :  { %v12476_v17 = vpop.permute.xlu1 %347  ;;  %v4148_v40 = vmax.f32 %v3926_v34, %v4079_v45  ;;  %v4115_v44 = vsel %vm4076_vm0, %v4112_v29, %v4114_v56  ;;  %v4113_v4 = vsel %vm4076_vm0, %v4110_v39, %v4112_v29  ;;  %v12484_v3 = vpop.permute.xlu2 %1484  ;;  %v17178_v22 = vrot.slane %v17177_v36, 1  ;;  %v840_v56 = vld [vmem:[%s17034_s23 + $0x152] sm:$0xff]  ;;  %v2032_v24 = vld [vmem:[%s17034_s23 + $0x15d] sm:$0xff] }
 0x2fc   :  { %v12482_v18 = vpop.permute.xlu0 %342  ;;  %v4166_v61 = vmax.f32 %v3944_v46, %v4115_v44  ;;  %v4165_v28 = vmax.f32 %v3943_v49, %v4113_v4  ;;  %v2430_v46 = vld [vmem:[%s17034_s23 + $0x166] sm:$0xff]  ;;  %v2828_v45 = vld [vmem:[%s17034_s23 + $0x16f] sm:$0xff] }
 0x2fd   :  { %4230 = vmatpush.msra.mxu0 %v4148_v40  ;;  %v4111_v62 = vsel %vm4076_vm0, %v17178_v22, %v4110_v39  ;;  %v2827_v22 = vld [vmem:[%s17034_s23 + $0x167] sm:$0xff] }
 0x2fe   :  { %4281 = vmatpush.msra.mxu1 %v4166_v61  ;;  %v4164_v42 = vmax.f32 %v17177_v36, %v4111_v62  ;;  %v2031_v61 = vld [vmem:[%s17034_s23 + $0x155] sm:$0xff] }
 0x2ff   :  { %v17180_v62 = vld [vmem:[#allocation22_spill] sm:$0xff] }
 0x300   :  { %4282 = vmatpush.msra.mxu1 %v4165_v28  ;;  %v1633_v28 = vld [vmem:[%s17034_s23 + $0x14c] sm:$0xff] }
 0x301   :  { %1459 = vperm.xlu1 %10232, %v1238_v38   ;;  %1861 = vperm.xlu2 %10233, %v1636_v48  }
 0x302   :  { %1057 = vperm.xlu0 %10231, %v840_v56   ;;  %4283 = vmatpush.msra.mxu1 %v4164_v42 }
 0x303   :  { %v12499_v5 = vpop.permute.xlu1 %337  ;;  %v12503_v0 = vpop.permute.xlu2 %675 }
 0x304   :  { %v12501_v58 = vpop.permute.xlu0 %695 }
 0x309   :  { %2665 = vperm.xlu1 %10232, %v2432_v14   ;;  %3067 = vperm.xlu2 %10233, %v2830_v16   ;;  %v2428_v14 = vld [vmem:[%s17034_s23 + $0x156] sm:$0xff] }
 0x30a   :  { %2263 = vperm.xlu0 %10231, %v2034_v53   ;;  %v2030_v53 = vld [vmem:[%s17034_s23 + $0x14d] sm:$0xff] }
 0x30b   :  { %v12514_v10 = vpop.permute.xlu1 %1092  ;;  %v12518_v25 = vpop.permute.xlu2 %1881 }
 0x30c   :  { %v12516_v47 = vpop.permute.xlu0 %1087 }
 0x311   :  { %3474 = vperm.xlu1 %10232, %v3229_v11   ;;  %1052 = vperm.xlu2 %10233, %v839_v15   ;;  %v2427_v15 = vld [vmem:[%s17034_s23 + $0x14e] sm:$0xff] }
 0x312   :  { %3469 = vperm.xlu0 %10231, %v3228_v12  }
 0x313   :  { %v12529_v27 = vpop.permute.xlu1 %1082  ;;  %v12533_v43 = vpop.permute.xlu2 %670 }
 0x314   :  { %v12531_v59 = vpop.permute.xlu0 %680 }
 0x319   :  { %1856 = vperm.xlu1 %10232, %v1635_v8   ;;  %2258 = vperm.xlu2 %10233, %v2033_v1   ;;  %v17183_v8 = vld [vmem:[#allocation28_spill] sm:$0xff] }
 0x31a   :  { %1454 = vperm.xlu0 %10231, %v1237_v57   ;;  %v17184_v57 = vld [vmem:[#allocation6_spill] sm:$0xff] }
 0x31b   :  { %v12544_v55 = vpop.permute.xlu1 %327  ;;  %v12548_v30 = vpop.permute.xlu2 %1876 }
 0x31c   :  { %v12546_v37 = vpop.permute.xlu0 %1489 }
 0x321   :  { %3062 = vperm.xlu1 %10232, %v2829_v63   ;;  %3464 = vperm.xlu2 %10233, %v11976_v50  }
 0x322   :  { %2660 = vperm.xlu0 %10231, %v2431_v20  }
 0x323   :  { %v12557_v33 = vpop.permute.xlu1 %1479  ;;  %v12561_v7 = vpop.permute.xlu2 %317 }
 0x324   :  { %v12559_v23 = vpop.permute.xlu0 %1077 }
 0x329   :  { %3871 = vperm.xlu1 %10232, %v3626_v6   ;;  %1449 = vperm.xlu2 %10233, %v1236_v51   ;;  %v2825_v6 = vld [vmem:[%s17034_s23 + $0x157] sm:$0xff]  ;;  %v17186_v51 = vld [vmem:[#allocation37_spill] sm:$0xff] }
 0x32a   :  { %3866 = vperm.xlu0 %10231, %v3625_v32   ;;  %v17185_v32 = vld [vmem:[#allocation10_spill] sm:$0xff] }
 0x32b   :  { %v12572_v50 = vpop.permute.xlu1 %322  ;;  %v12576_v34 = vpop.permute.xlu2 %1469 }
 0x32c   :  { %v12574_v49 = vpop.permute.xlu0 %1886 }
 0x331   :  { %2253 = vperm.xlu1 %10232, %v2032_v24   ;;  %2655 = vperm.xlu2 %10233, %v2430_v46  }
 0x332   :  { %1851 = vperm.xlu0 %10231, %v1634_v9  }
 0x333   :  { %v12587_v41 = vpop.permute.xlu1 %1474  ;;  %v12591_v39 = vpop.permute.xlu2 %2675 }
 0x334   :  { %v12589_v29 = vpop.permute.xlu0 %1072 }
 0x339   :  { %3459 = vperm.xlu1 %10232, %v12001_v26   ;;  %3861 = vperm.xlu2 %10233, %v11981_v60   ;;  %v2429_v26 = vld [vmem:[%s17034_s23 + $0x15e] sm:$0xff] }
 0x33a   :  { %3057 = vperm.xlu0 %10231, %v2828_v45   ;;  %v2824_v45 = vld [vmem:[%s17034_s23 + $0x14f] sm:$0xff] }
 0x33b   :  { %v12598_v40 = vpop.permute.xlu1 %2283  ;;  %v12602_v4 = vpop.permute.xlu2 %660 }
 0x33c   :  { %v12600_v44 = vpop.permute.xlu0 %2278  ;;  %17179 = vst [vmem:[#allocation26_spill] sm:$0xff] %v12602_v4 }
 0x341   :  { %2248 = vperm.xlu1 %10232, %v2031_v61   ;;  %2650 = vperm.xlu2 %10233, %v2429_v26   ;;  %v17187_v61 = vld [vmem:[#allocation27_spill] sm:$0xff] }
 0x342   :  { %1846 = vperm.xlu0 %10231, %v1633_v28   ;;  %v17188_v28 = vld [vmem:[#allocation29_spill] sm:$0xff] }
 0x343   :  { %v12613_v60 = vpop.permute.xlu1 %1067  ;;  %v12617_v36 = vpop.permute.xlu2 %1866 }
 0x344   :  { %v12615_v38 = vpop.permute.xlu0 %665 }
 0x349   :  { %3454 = vperm.xlu1 %10232, %v12053_v21   ;;  %3856 = vperm.xlu2 %10233, %v17180_v62   ;;  %v2826_v21 = vld [vmem:[%s17034_s23 + $0x15f] sm:$0xff] }
 0x34a   :  { %3052 = vperm.xlu0 %10231, %v2827_v22  }
 0x34b   :  { %v12624_v56 = vpop.permute.xlu1 %2273  ;;  %v12628_v42 = vpop.permute.xlu2 %3072 }
 0x34c   :  { %v12626_v48 = vpop.permute.xlu0 %1871 }
 0x351   :  { %2645 = vperm.xlu1 %10232, %v2428_v14   ;;  %3047 = vperm.xlu2 %10233, %v2826_v21   ;;  %v12681_v14 = vld [vmem:[%s17034_s23 + $0x140] sm:$0xff] }
 0x352   :  { %2243 = vperm.xlu0 %10231, %v2030_v53   ;;  %17191 = vst [vmem:[#allocation14_spill] sm:$0xff] %v12681_v14 }
 0x353   :  { %v12639_v16 = vpop.permute.xlu1 %312  ;;  %v12643_v12 = vpop.permute.xlu2 %655 }
 0x354   :  { %17181 = vst [vmem:[#allocation25_spill] sm:$0xff] %v12639_v16  ;;  %v12641_v11 = vpop.permute.xlu0 %2680 }
 0x355   :  { %17182 = vst [vmem:[#allocation31_spill] sm:$0xff] %v12643_v12 }
 0x359   :  { %3851 = vperm.xlu1 %10232, %v17183_v8   ;;  %2640 = vperm.xlu2 %10233, %v2427_v15   ;;  %v12695_v8 = vld [vmem:[%s17034_s23 + $0x141] sm:$0xff] }
 0x35a   :  { %3449 = vperm.xlu0 %10231, %v17184_v57   ;;  %17193 = vst [vmem:[#allocation35_spill] sm:$0xff] %v12695_v8  ;;  %v12700_v57 = vld [vmem:[%s17034_s23 + $0x138] sm:$0xff] }
 0x35b   :  { %v12650_v1 = vpop.permute.xlu1 %1464  ;;  %v12654_v20 = vpop.permute.xlu2 %1861  ;;  %17194 = vst [vmem:[#allocation7_spill] sm:$0xff] %v12700_v57 }
 0x35c   :  { %v12652_v63 = vpop.permute.xlu0 %1062 }
 0x361   :  { %3444 = vperm.xlu1 %10232, %v17185_v32   ;;  %3846 = vperm.xlu2 %10233, %v17186_v51   ;;  %v838_v32 = vld [vmem:[%s17034_s23 + $0x142] sm:$0xff]  ;;  %v12717_v51 = vld [vmem:[%s17034_s23 + $0x139] sm:$0xff] }
 0x362   :  { %3042 = vperm.xlu0 %10231, %v2825_v6   ;;  %17195 = vst [vmem:[#allocation32_spill] sm:$0xff] %v12717_v51 }
 0x363   :  { %v12661_v24 = vpop.permute.xlu1 %2670  ;;  %v12665_v46 = vpop.permute.xlu2 %3067 }
 0x364   :  { %v12663_v9 = vpop.permute.xlu0 %2268 }
 0x369   :  { %3439 = vperm.xlu1 %10232, %v17187_v61   ;;  %3841 = vperm.xlu2 %10233, %v17188_v28  }
 0x36a   :  { %3037 = vperm.xlu0 %10231, %v2824_v45  }
 0x36b   :  { %v12672_v26 = vpop.permute.xlu1 %307  ;;  %v12676_v62 = vpop.permute.xlu2 %1052 }
 0x36c   :  { %17189 = vst [vmem:[#allocation33_spill] sm:$0xff] %v12672_v26  ;;  %v12674_v22 = vpop.permute.xlu0 %3077  ;;  %v12773_v26 = vld [vmem:[%s16955_s1 + $0x3] ss:$0 sm:$0xff] }
 0x36d   :  { %17190 = vst [vmem:[#allocation30_spill] sm:$0xff] %v12676_v62  ;;  %v12765_v62 = vld [vmem:[%s17034_s23 + $0x131] sm:$0xff] }
 0x36e   :  { %17198 = vst [vmem:[#allocation23_spill] sm:$0xff] %v12765_v62 }
 0x371   :  { %3836 = vperm.xlu1 %10232, %v12281_v54   ;;  %302 = vperm.xlu2 %10233, %v12681_v14  }
 0x372   :  { %3434 = vperm.xlu0 %10231, %v12358_v35  }
 0x373   :  { %v12686_v53 = vpop.permute.xlu1 %1459  ;;  %v12690_v15 = vpop.permute.xlu2 %2258 }
 0x374   :  { %v12688_v21 = vpop.permute.xlu0 %1057 }
 0x375   :  { %17192 = vst [vmem:[#allocation8_spill] sm:$0xff] %v12688_v21 }
 0x379   :  { %3831 = vperm.xlu1 %10232, %v12372_v13   ;;  %297 = vperm.xlu2 %10233, %v12700_v57   ;;  %v12722_v13 = vld [vmem:[%s17034_s23 + $0x130] sm:$0xff] }
 0x37a   :  { %650 = vperm.xlu0 %10231, %v12695_v8   ;;  %17196 = vst [vmem:[#allocation11_spill] sm:$0xff] %v12722_v13  ;;  %v12735_v8 = vld [vmem:[%s16955_s1] ss:$0 sm:$0xff] }
 0x37b   :  { %v12705_v54 = vpop.permute.xlu1 %2665  ;;  %v12709_v6 = vpop.permute.xlu2 %3464  ;;  %v400_v57 = vmul.f32 %v12735_v8, %v12482_v18  ;;  %v12756_v18 = vld [vmem:[%s16955_s1 + $0x2] ss:$0 sm:$0xff] }
 0x37c   :  { %v12707_v35 = vpop.permute.xlu0 %2263 }
 0x381   :  { %1047 = vperm.xlu1 %10232, %v838_v32   ;;  %292 = vperm.xlu2 %10233, %v12722_v13   ;;  %v399_v32 = vmul.f32 %v12735_v8, %v12499_v5  ;;  %v837_v13 = vld [vmem:[%s17034_s23 + $0x13a] sm:$0xff]  ;;  %v1145_v5 = vmul.f32 %v12756_v18, %v12516_v47  ;;  %v1541_v47 = vmul.f32 %v12773_v26, %v12557_v33 }
 0x382   :  { %645 = vperm.xlu0 %10231, %v12717_v51   ;;  %v12747_v51 = vld [vmem:[%s16955_s1 + $0x1] ss:$0 sm:$0xff] }
 0x383   :  { %v12726_v45 = vpop.permute.xlu1 %3474  ;;  %v12730_v28 = vpop.permute.xlu2 %1449  ;;  %v748_v14 = vmul.f32 %v12747_v51, %v12393_v2  ;;  %v747_v19 = vmul.f32 %v12747_v51, %v12434_v52  ;;  %v1235_v2 = vld [vmem:[%s17034_s23 + $0x143] sm:$0xff] }
 0x384   :  { %v12728_v61 = vpop.permute.xlu0 %3469  ;;  %17197 = vst [vmem:[#allocation43_spill] sm:$0xff] %v12730_v28  ;;  %v1144_v28 = vmul.f32 %v12756_v18, %v12529_v27  ;;  %v749_v27 = vmul.f32 %v12747_v51, %v12501_v58  ;;  %v1542_v58 = vmul.f32 %v12773_v26, %v12484_v3  ;;  %v12809_v3 = vld [vmem:[%s16955_s1 + $0x5] ss:$0 sm:$0xff] }
 0x385   :  { %v797_v52 = vadd.f32 %v748_v14, %v400_v57  ;;  %v796_v12 = vadd.f32 %v747_v19, %v399_v32  ;;  %v401_v19 = vmul.f32 %v12735_v8, %v12476_v17  ;;  %v1146_v14 = vmul.f32 %v12756_v18, %v12514_v10  ;;  %v12802_v10 = vld [vmem:[%s16955_s1 + $0x4] ss:$0 sm:$0xff] }
 0x387   :  { %v1194_v21 = vadd.f32 %v1145_v5, %v797_v52  ;;  %v1193_v4 = vadd.f32 %v1144_v28, %v796_v12  ;;  %v798_v32 = vadd.f32 %v749_v27, %v401_v19  ;;  %v1543_v12 = vmul.f32 %v12773_v26, %v12546_v37  ;;  %v12797_v28 = vld [vmem:[%s17034_s23 + $0x129] sm:$0xff]  ;;  %v12830_v27 = vld [vmem:[%s16955_s1 + $0x6] ss:$0 sm:$0xff] }
 0x388   :  { %17199 = vst [vmem:[#allocation47_spill] sm:$0xff] %v12797_v28  ;;  %v1938_v5 = vmul.f32 %v12802_v10, %v12548_v30  ;;  %v2335_v37 = vmul.f32 %v12809_v3, %v12624_v56  ;;  %v1940_v30 = vmul.f32 %v12802_v10, %v12574_v49  ;;  %v1939_v52 = vmul.f32 %v12802_v10, %v12518_v25 }
 0x389   :  { %1042 = vperm.xlu1 %10232, %v837_v13   ;;  %1444 = vperm.xlu2 %10233, %v1235_v2   ;;  %v1590_v13 = vadd.f32 %v1541_v47, %v1193_v4  ;;  %v1591_v17 = vadd.f32 %v1542_v58, %v1194_v21  ;;  %v12816_v4 = vld [vmem:[%s17034_s23 + $0x128] sm:$0xff]  ;;  %v836_v21 = vld [vmem:[%s17034_s23 + $0x132] sm:$0xff]  ;;  %v1195_v2 = vadd.f32 %v1146_v14, %v798_v32 }
 0x38a   :  { %640 = vperm.xlu0 %10231, %v12765_v62   ;;  %v2336_v47 = vmul.f32 %v12809_v3, %v12600_v44  ;;  %v2732_v19 = vmul.f32 %v12830_v27, %v12661_v24  ;;  %v2337_v49 = vmul.f32 %v12809_v3, %v12598_v40  ;;  %v2734_v32 = vmul.f32 %v12830_v27, %v12641_v11  ;;  %v12847_v40 = vld [vmem:[%s16955_s1 + $0x7] ss:$0 sm:$0xff] }
 0x38b   :  { %v12780_v16 = vpop.permute.xlu1 %1856  ;;  %v12788_v33 = vpop.permute.xlu2 %2655  ;;  %v1987_v56 = vadd.f32 %v1938_v5, %v1590_v13  ;;  %v1592_v14 = vadd.f32 %v1543_v12, %v1195_v2  ;;  %v1988_v25 = vadd.f32 %v1939_v52, %v1591_v17  ;;  %v3131_v17 = vmul.f32 %v12847_v40, %v12674_v22  ;;  %v1234_v52 = vld [vmem:[%s17034_s23 + $0x13b] sm:$0xff] }
 0x38c   :  { %v12786_v57 = vpop.permute.xlu0 %1454  ;;  %v2733_v11 = vmul.f32 %v12830_v27, %v12591_v39  ;;  %v3129_v2 = vmul.f32 %v12847_v40, %v12665_v46  ;;  %v12873_v39 = vld [vmem:[%s17034_s23 + $0x120] sm:$0xff] }
 0x38d   :  { %v2384_v44 = vadd.f32 %v2335_v37, %v1987_v56  ;;  %v1989_v13 = vadd.f32 %v1940_v30, %v1592_v14  ;;  %v2385_v62 = vadd.f32 %v2336_v47, %v1988_v25  ;;  %v1632_v37 = vld [vmem:[%s17034_s23 + $0x144] sm:$0xff] }
 0x38e   :  { %v12863_v30 = vld [vmem:[%s16955_s1 + $0x8] ss:$0 sm:$0xff] }
 0x38f   :  { %v2386_v12 = vadd.f32 %v2337_v49, %v1989_v13  ;;  %v3526_v22 = vmul.f32 %v12863_v30, %v12709_v6  ;;  %v3528_v46 = vmul.f32 %v12863_v30, %v12726_v45  ;;  %v2782_v47 = vadd.f32 %v2733_v11, %v2385_v62  ;;  %v12882_v6 = vld [vmem:[%s16955_s1 + $0x9] ss:$0 sm:$0xff] }
 0x390   :  { %v746_v45 = vmul.f32 %v12747_v51, %v12531_v59 }
 0x391   :  { %635 = vperm.xlu1 %10232, %v12797_v28   ;;  %1037 = vperm.xlu2 %10233, %v836_v21   ;;  %v2781_v28 = vadd.f32 %v2732_v19, %v2384_v44  ;;  %v3130_v21 = vmul.f32 %v12847_v40, %v12628_v42  ;;  %v2783_v42 = vadd.f32 %v2734_v32, %v2386_v12 }
 0x392   :  { %287 = vperm.xlu0 %10231, %v12816_v4   ;;  %v3527_v19 = vmul.f32 %v12863_v30, %v12728_v61  ;;  %v398_v61 = vmul.f32 %v12735_v8, %v12457_v31  ;;  %v1143_v12 = vmul.f32 %v12756_v18, %v12559_v23  ;;  %v1233_v23 = vld [vmem:[%s17034_s23 + $0x133] sm:$0xff] }
 0x393   :  { %v12838_v58 = vpop.permute.xlu1 %3062  ;;  %v3862_v24 = vpop.permute.xlu2 %3861  ;;  %v3178_v56 = vadd.f32 %v3129_v2, %v2781_v28  ;;  %v3180_v49 = vadd.f32 %v3131_v17, %v2783_v42  ;;  %v3179_v62 = vadd.f32 %v3130_v21, %v2782_v47  ;;  %v835_v21 = vld [vmem:[%s17034_s23 + $0x12a] sm:$0xff]  ;;  %v1540_v2 = vmul.f32 %v12773_v26, %v12587_v41 }
 0x394   :  { %v12842_v5 = vpop.permute.xlu0 %2660  ;;  %v3923_v14 = vmul.f32 %v12882_v6, %v3862_v24  ;;  %v795_v31 = vadd.f32 %v746_v45, %v398_v61 }
 0x395   :  { %v3575_v28 = vadd.f32 %v3526_v22, %v3178_v56  ;;  %v3577_v44 = vadd.f32 %v3528_v46, %v3180_v49  ;;  %v3576_v17 = vadd.f32 %v3527_v19, %v3179_v62  ;;  %v1937_v19 = vmul.f32 %v12802_v10, %v12626_v48 }
 0x396   :  { %v1192_v46 = vadd.f32 %v1143_v12, %v795_v31  ;;  %v2731_v12 = vmul.f32 %v12830_v27, %v12705_v54  ;;  %v3128_v31 = vmul.f32 %v12847_v40, %v12838_v58 }
 0x399   :  { %1841 = vperm.xlu1 %10232, %v1632_v37   ;;  %282 = vperm.xlu2 %10233, %v12873_v39   ;;  %v12895_v37 = vadd.f32 %v3923_v14, %v3575_v28  ;;  %v1589_v14 = vadd.f32 %v1540_v2, %v1192_v46  ;;  %v2334_v28 = vmul.f32 %v12809_v3, %v12663_v9  ;;  %v1631_v9 = vld [vmem:[%s17034_s23 + $0x13c] sm:$0xff] }
 0x39a   :  { %1439 = vperm.xlu0 %10231, %v1234_v52   ;;  %v12906_v52 = vld [vmem:[%s17034_s23 + $0x121] sm:$0xff] }
 0x39b   :  { %v3872_v25 = vpop.permute.xlu1 %3871  ;;  %v12890_v32 = vpop.permute.xlu2 %2650  ;;  %v4401_v47 = vrot.slane %v12895_v37, 1 }
 0x39c   :  { %v3867_v13 = vpop.permute.xlu0 %3866  ;;  %v3925_v24 = vmul.f32 %v12882_v6, %v3872_v25 }
 0x39d   :  { %v3924_v59 = vmul.f32 %v12882_v6, %v3867_v13 }
 0x39e   :  { %v3974_v11 = vadd.f32 %v3925_v24, %v3577_v44  ;;  %v1986_v24 = vadd.f32 %v1937_v19, %v1589_v14  ;;  %v834_v14 = vld [vmem:[%s17034_s23 + $0x122] sm:$0xff] }
 0x39f   :  { %v3973_v22 = vadd.f32 %v3924_v59, %v3576_v17  ;;  %v2029_v59 = vld [vmem:[%s17034_s23 + $0x145] sm:$0xff] }
 0x3a0   :  { %v4405_v42 = vrot.slane %v3974_v11, 1 }
 0x3a1   :  { %v4403_v56 = vrot.slane %v3973_v22, 1  ;;  %1032 = vperm.xlu1 %10232, %v835_v21   ;;  %1434 = vperm.xlu2 %10233, %v1233_v23   ;;  %v12935_v21 = vld [vmem:[%s17034_s23 + $0x118] sm:$0xff] }
 0x3a2   :  { %630 = vperm.xlu0 %10231, %v12906_v52   ;;  %v4456_v41 = vmax.f32 %v3974_v11, %v4405_v42 }
 0x3a3   :  { %v12915_v49 = vpop.permute.xlu1 %2253  ;;  %v4406_v45 = vsel %vm4076_vm0, %v4403_v56, %v4405_v42  ;;  %v4404_v62 = vsel %vm4076_vm0, %v4401_v47, %v4403_v56  ;;  %v3857_v61 = vpop.permute.xlu2 %3856 }
 0x3a4   :  { %v12921_v25 = vpop.permute.xlu0 %1851  ;;  %v4455_v44 = vmax.f32 %v3973_v22, %v4406_v45  ;;  %v4530_v13 = vrot.slane %v4456_v41, 2  ;;  %v4454_v48 = vmax.f32 %v12895_v37, %v4404_v62  ;;  %v2383_v37 = vadd.f32 %v2334_v28, %v1986_v24  ;;  %v436_v45 = vld [vmem:[%s17034_s23 + $0x119] sm:$0xff]  ;;  %v1232_v62 = vld [vmem:[%s17034_s23 + $0x12b] sm:$0xff] }
 0x3a5   :  { %v3922_v19 = vmul.f32 %v12882_v6, %v3857_v61 }
 0x3a6   :  { %v4528_v17 = vrot.slane %v4455_v44, 2  ;;  %v4526_v11 = vrot.slane %v4454_v48, 2  ;;  %v2780_v2 = vadd.f32 %v2731_v12, %v2383_v37 }
 0x3a8   :  { %v4531_v54 = vsel %vm4482_vm1, %v4528_v17, %v4530_v13  ;;  %v4529_v22 = vsel %vm4482_vm1, %v4526_v11, %v4528_v17  ;;  %v3177_v42 = vadd.f32 %v3128_v31, %v2780_v2  ;;  %v2028_v17 = vld [vmem:[%s17034_s23 + $0x13d] sm:$0xff]  ;;  %v397_v31 = vmul.f32 %v12735_v8, %v12544_v55 }
 0x3a9   :  { %9565 = vmatpush.msk.msra.mxu3 %vm4076_vm0, %v4531_v54  ;;  %2238 = vperm.xlu1 %10232, %v2029_v59   ;;  %v1630_v59 = vld [vmem:[%s17034_s23 + $0x134] sm:$0xff]  ;;  %v745_v54 = vmul.f32 %v12747_v51, %v12503_v0  ;;  %v1142_v2 = vmul.f32 %v12756_v18, %v12589_v29 }
 0x3aa   :  { %1836 = vperm.xlu0 %10231, %v1631_v9   ;;  %277 = vperm.xlu2 %10233, %v12935_v21   ;;  %v2426_v9 = vld [vmem:[%s17034_s23 + $0x146] sm:$0xff]  ;;  %v435_v29 = vld [vmem:[%s17034_s23 + $0x111] sm:$0xff] }
 0x3ab   :  { %4619 = vmatpush.msra.mxu3 %v4529_v22  ;;  %v3460_v23 = vpop.permute.xlu1 %3459  ;;  %v12945_v56 = vpop.permute.xlu2 %3047  ;;  %v396_v22 = vmul.f32 %v12735_v8, %v12572_v50  ;;  %v1538_v50 = vmul.f32 %v12773_v26, %v12650_v1  ;;  %v743_v1 = vmul.f32 %v12747_v51, %v12615_v38  ;;  %v2730_v38 = vmul.f32 %v12830_v27, %v12842_v5  ;;  %v1629_v5 = vld [vmem:[%s17034_s23 + $0x12c] sm:$0xff] }
 0x3ac   :  { %v12943_v46 = vpop.permute.xlu0 %3057  ;;  %v3525_v58 = vmul.f32 %v12863_v30, %v3460_v23 }
 0x3ae   :  { %v3574_v41 = vadd.f32 %v3525_v58, %v3177_v42  ;;  %v794_v42 = vadd.f32 %v745_v54, %v397_v31  ;;  %v2332_v54 = vmul.f32 %v12809_v3, %v12690_v15 }
 0x3b0   :  { %v12958_v28 = vadd.f32 %v3922_v19, %v3574_v41  ;;  %v744_v19 = vmul.f32 %v12747_v51, %v12533_v43  ;;  %v1191_v0 = vadd.f32 %v1142_v2, %v794_v42  ;;  %v833_v43 = vld [vmem:[%s17034_s23 + $0x11a] sm:$0xff] }
 0x3b1   :  { %1027 = vperm.xlu1 %10232, %v834_v14   ;;  %v13004_v14 = vld [vmem:[%s17034_s23 + $0x110] sm:$0xff] }
 0x3b2   :  { %v4399_v44 = vrot.slane %v12958_v28, 1  ;;  %625 = vperm.xlu0 %10231, %v436_v45   ;;  %1429 = vperm.xlu2 %10233, %v1232_v62   ;;  %v793_v41 = vadd.f32 %v744_v19, %v396_v22  ;;  %17200 = vst [vmem:[#allocation48_spill] sm:$0xff] %v13004_v14  ;;  %v1936_v45 = vmul.f32 %v12802_v10, %v12617_v36 }
 0x3b3   :  { %v12961_v61 = vpop.permute.xlu1 %2248  ;;  %v12965_v48 = vpop.permute.xlu2 %2640  ;;  %v1140_v36 = vmul.f32 %v12756_v18, %v12652_v63  ;;  %v3127_v63 = vmul.f32 %v12847_v40, %v12943_v46  ;;  %v2729_v19 = vmul.f32 %v12830_v27, %v12788_v33  ;;  %v1934_v46 = vmul.f32 %v12802_v10, %v12780_v16 }
 0x3b4   :  { %v12963_v13 = vpop.permute.xlu0 %1846  ;;  %v4402_v24 = vsel %vm4076_vm0, %v4399_v44, %v4401_v47 }
 0x3b5   :  { %v4453_v12 = vmax.f32 %v12958_v28, %v4402_v24 }
 0x3b7   :  { %v12980_v37 = vrot.slane %v4453_v12, 2  ;;  %v2333_v12 = vmul.f32 %v12809_v3, %v12707_v35  ;;  %v1935_v35 = vmul.f32 %v12802_v10, %v12654_v20  ;;  %v1231_v20 = vld [vmem:[%s17034_s23 + $0x123] sm:$0xff] }
 0x3b9   :  { %2233 = vperm.xlu1 %10232, %v2028_v17   ;;  %v4527_v47 = vsel %vm4482_vm1, %v12980_v37, %v4526_v11  ;;  %v1141_v11 = vmul.f32 %v12756_v18, %v12613_v60  ;;  %v1539_v60 = vmul.f32 %v12773_v26, %v12576_v34  ;;  %v395_v34 = vmul.f32 %v12735_v8, %v12561_v7 }
 0x3ba   :  { %1831 = vperm.xlu0 %10231, %v1630_v59   ;;  %2635 = vperm.xlu2 %10233, %v2426_v9   ;;  %v1537_v7 = vmul.f32 %v12773_v26, %v12686_v53  ;;  %v2027_v53 = vld [vmem:[%s17034_s23 + $0x135] sm:$0xff] }
 0x3bb   :  { %4620 = vmatpush.msra.mxu3 %v4527_v47  ;;  %v3455_v23 = vpop.permute.xlu1 %3454  ;;  %v3847_v55 = vpop.permute.xlu2 %3846  ;;  %v1190_v62 = vadd.f32 %v1141_v11, %v793_v41  ;;  %v1588_v24 = vadd.f32 %v1539_v60, %v1191_v0  ;;  %v792_v2 = vadd.f32 %v743_v1, %v395_v34 }
 0x3bc   :  { %v3053_v58 = vpop.permute.xlu0 %3052  ;;  %v3524_v0 = vmul.f32 %v12863_v30, %v3455_v23 }
 0x3bd   :  { %v1587_v17 = vadd.f32 %v1538_v50, %v1190_v62  ;;  %v1985_v9 = vadd.f32 %v1936_v45, %v1588_v24  ;;  %v1189_v15 = vadd.f32 %v1140_v36, %v792_v2  ;;  %v3126_v41 = vmul.f32 %v12847_v40, %v3053_v58 }
 0x3be   :  { %v2331_v50 = vmul.f32 %v12809_v3, %v12915_v49  ;;  %v2823_v49 = vld [vmem:[%s17034_s23 + $0x147] sm:$0xff]  ;;  %v3125_v2 = vmul.f32 %v12847_v40, %v12945_v56 }
 0x3bf   :  { %v2382_v22 = vadd.f32 %v2333_v12, %v1985_v9  ;;  %v1984_v42 = vadd.f32 %v1935_v35, %v1587_v17  ;;  %v1586_v33 = vadd.f32 %v1537_v7, %v1189_v15  ;;  %v3920_v9 = vmul.f32 %v12882_v6, %v3847_v55  ;;  %v13069_v35 = vld [vmem:[%s17034_s23 + $0x108] sm:$0xff] }
 0x3c0   :  { %17201 = vst [vmem:[#allocation13_spill] sm:$0xff] %v13069_v35  ;;  %v17204_v15 = vld [vmem:[#allocation8_spill] sm:$0xff] }
 0x3c1   :  { %620 = vperm.xlu1 %10232, %v435_v29   ;;  %v2779_v11 = vadd.f32 %v2730_v38, %v2382_v22  ;;  %v2381_v29 = vadd.f32 %v2332_v54, %v1984_v42  ;;  %v1983_v62 = vadd.f32 %v1934_v46, %v1586_v33  ;;  %v2425_v38 = vld [vmem:[%s17034_s23 + $0x13e] sm:$0xff]  ;;  %v2728_v54 = vmul.f32 %v12830_v27, %v12890_v32  ;;  %v17202_v22 = vld [vmem:[#allocation25_spill] sm:$0xff] }
 0x3c2   :  { %272 = vperm.xlu0 %10231, %v13004_v14   ;;  %1022 = vperm.xlu2 %10233, %v833_v43   ;;  %v394_v55 = vmul.f32 %v12735_v8, %v17202_v22  ;;  %v1139_v46 = vmul.f32 %v12756_v18, %v17204_v15  ;;  %v1932_v15 = vmul.f32 %v12802_v10, %v12963_v13 }
 0x3c3   :  { %v13018_v59 = vpop.permute.xlu1 %2645  ;;  %v13028_v47 = vpop.permute.xlu2 %3841  ;;  %v3176_v43 = vadd.f32 %v3127_v63, %v2779_v11  ;;  %v2778_v60 = vadd.f32 %v2729_v19, %v2381_v29  ;;  %v2380_v17 = vadd.f32 %v2331_v50, %v1983_v62  ;;  %v17203_v19 = vld [vmem:[#allocation26_spill] sm:$0xff]  ;;  %v17205_v50 = vld [vmem:[#allocation33_spill] sm:$0xff] }
 0x3c4   :  { %v13026_v31 = vpop.permute.xlu0 %2243  ;;  %v742_v32 = vmul.f32 %v12747_v51, %v17203_v19  ;;  %v393_v28 = vmul.f32 %v12735_v8, %v17205_v50 }
 0x3c5   :  { %v3573_v1 = vadd.f32 %v3524_v0, %v3176_v43  ;;  %v3175_v12 = vadd.f32 %v3126_v41, %v2778_v60  ;;  %v1536_v60 = vmul.f32 %v12773_v26, %v12786_v57  ;;  %v1230_v57 = vld [vmem:[%s17034_s23 + $0x11b] sm:$0xff]  ;;  %v2329_v13 = vmul.f32 %v12809_v3, %v13026_v31 }
 0x3c6   :  { %v791_v33 = vadd.f32 %v742_v32, %v394_v55  ;;  %v17209_v55 = vld [vmem:[#allocation43_spill] sm:$0xff]  ;;  %v2726_v31 = vmul.f32 %v12830_v27, %v12965_v48 }
 0x3c9   :  { %1826 = vperm.xlu1 %10232, %v1629_v5   ;;  %v2777_v5 = vadd.f32 %v2728_v54, %v2380_v17  ;;  %v13105_v17 = vld [vmem:[%s17034_s23 + $0x109] sm:$0xff] }
 0x3ca   :  { %1424 = vperm.xlu0 %10231, %v1231_v20   ;;  %2228 = vperm.xlu2 %10233, %v2027_v53   ;;  %17207 = vst [vmem:[#allocation36_spill] sm:$0xff] %v13105_v17 }
 0x3cb   :  { %v3852_v45 = vpop.permute.xlu1 %3851  ;;  %v13055_v16 = vpop.permute.xlu2 %302  ;;  %v3174_v11 = vadd.f32 %v3125_v2, %v2777_v5 }
 0x3cc   :  { %v3450_v24 = vpop.permute.xlu0 %3449  ;;  %v3921_v23 = vmul.f32 %v12882_v6, %v3852_v45  ;;  %v3919_v45 = vmul.f32 %v12882_v6, %v13028_v47  ;;  %v1188_v47 = vadd.f32 %v1139_v46, %v791_v33 }
 0x3cd   :  { %v3523_v58 = vmul.f32 %v12863_v30, %v3450_v24 }
 0x3ce   :  { %v3970_v34 = vadd.f32 %v3921_v23, %v3573_v1  ;;  %v832_v1 = vld [vmem:[%s17034_s23 + $0x112] sm:$0xff] }
 0x3cf   :  { %v3572_v36 = vadd.f32 %v3523_v58, %v3175_v12  ;;  %v17206_v23 = vld [vmem:[#allocation31_spill] sm:$0xff] }
 0x3d0   :  { %v4397_v7 = vrot.slane %v3970_v34, 1  ;;  %v741_v12 = vmul.f32 %v12747_v51, %v17206_v23 }
 0x3d1   :  { %v3969_v63 = vadd.f32 %v3920_v9, %v3572_v36  ;;  %3032 = vperm.xlu1 %10232, %v2823_v49  }
 0x3d2   :  { %2630 = vperm.xlu0 %10231, %v2425_v38   ;;  %267 = vperm.xlu2 %10233, %v13069_v35   ;;  %v4400_v42 = vsel %vm4076_vm0, %v4397_v7, %v4399_v44  ;;  %v790_v36 = vadd.f32 %v741_v12, %v393_v28  ;;  %v1585_v38 = vadd.f32 %v1536_v60, %v1188_v47  ;;  %v2822_v47 = vld [vmem:[%s17034_s23 + $0x13f] sm:$0xff] }
 0x3d3   :  { %v4395_v20 = vrot.slane %v3969_v63, 1  ;;  %v3445_v53 = vpop.permute.xlu1 %3444  ;;  %v4452_v56 = vmax.f32 %v3970_v34, %v4400_v42  ;;  %v13085_v29 = vpop.permute.xlu2 %297  ;;  %v1933_v34 = vmul.f32 %v12802_v10, %v12921_v25  ;;  %v2727_v42 = vmul.f32 %v12830_v27, %v13018_v59  ;;  %v1628_v59 = vld [vmem:[%s17034_s23 + $0x124] sm:$0xff] }
 0x3d4   :  { %v3043_v0 = vpop.permute.xlu0 %3042  ;;  %v3522_v41 = vmul.f32 %v12863_v30, %v3445_v53 }
 0x3d5   :  { %v4522_v44 = vrot.slane %v4452_v56, 2  ;;  %v4398_v43 = vsel %vm4076_vm0, %v4395_v20, %v4397_v7  ;;  %v17208_v7 = vld [vmem:[#allocation30_spill] sm:$0xff]  ;;  %v1982_v5 = vadd.f32 %v1933_v34, %v1585_v38  ;;  %v13153_v34 = vld [vmem:[%s17034_s23 + $0x100] sm:$0xff] }
 0x3d6   :  { %v3571_v62 = vadd.f32 %v3522_v41, %v3174_v11  ;;  %v4451_v24 = vmax.f32 %v3969_v63, %v4398_v43  ;;  %v1138_v22 = vmul.f32 %v12756_v18, %v17208_v7  ;;  %v1535_v63 = vmul.f32 %v12773_v26, %v17209_v55  ;;  %v2026_v41 = vld [vmem:[%s17034_s23 + $0x12d] sm:$0xff]  ;;  %17210 = vst [vmem:[#allocation39_spill] sm:$0xff] %v13153_v34 }
 0x3d7   :  { %v4525_v58 = vsel %vm4482_vm1, %v4522_v44, %v12980_v37  ;;  %v2330_v37 = vmul.f32 %v12809_v3, %v12961_v61  ;;  %v3124_v11 = vmul.f32 %v12847_v40, %v3043_v0  ;;  %v17211_v38 = vld [vmem:[#allocation38_spill] sm:$0xff] }
 0x3d8   :  { %v3968_v49 = vadd.f32 %v3919_v45, %v3571_v62  ;;  %4621 = vmatpush.msra.mxu3 %v4525_v58  ;;  %v4520_v9 = vrot.slane %v4451_v24, 2  ;;  %v1187_v56 = vadd.f32 %v1138_v22, %v790_v36 }
 0x3d9   :  { %1017 = vperm.xlu1 %10232, %v832_v1   ;;  %v2379_v46 = vadd.f32 %v2330_v37, %v1982_v5 }
 0x3da   :  { %v4393_v54 = vrot.slane %v3968_v49, 1  ;;  %615 = vperm.xlu0 %10231, %v13105_v17   ;;  %1419 = vperm.xlu2 %10233, %v1230_v57   ;;  %v4523_v2 = vsel %vm4482_vm1, %v4520_v9, %v4522_v44  ;;  %v1584_v50 = vadd.f32 %v1535_v63, %v1187_v56 }
 0x3db   :  { %4622 = vmatpush.msra.mxu3 %v4523_v2  ;;  %v3440_v25 = vpop.permute.xlu1 %3439  ;;  %v13122_v61 = vpop.permute.xlu2 %292  ;;  %v2776_v28 = vadd.f32 %v2727_v42, %v2379_v46 }
 0x3dc   :  { %v3038_v19 = vpop.permute.xlu0 %3037  ;;  %v4396_v32 = vsel %vm4076_vm0, %v4393_v54, %v4395_v20  ;;  %v2424_v20 = vld [vmem:[%s17034_s23 + $0x136] sm:$0xff]  ;;  %v3521_v0 = vmul.f32 %v12863_v30, %v3440_v25  ;;  %v1981_v43 = vadd.f32 %v1932_v15, %v1584_v50 }
 0x3dd   :  { %v4450_v53 = vmax.f32 %v3968_v49, %v4396_v32  ;;  %v3173_v60 = vadd.f32 %v3124_v11, %v2776_v28  ;;  %v3123_v58 = vmul.f32 %v12847_v40, %v3038_v19  ;;  %v831_v19 = vld [vmem:[%s17034_s23 + $0x10a] sm:$0xff] }
 0x3de   :  { %v2378_v62 = vadd.f32 %v2329_v13, %v1981_v43  ;;  %v1627_v13 = vld [vmem:[%s17034_s23 + $0x11c] sm:$0xff]  ;;  %v2423_v28 = vld [vmem:[%s17034_s23 + $0x12e] sm:$0xff] }
 0x3df   :  { %v4518_v33 = vrot.slane %v4450_v53, 2  ;;  %v3570_v1 = vadd.f32 %v3521_v0, %v3173_v60  ;;  %v1229_v53 = vld [vmem:[%s17034_s23 + $0x113] sm:$0xff] }
 0x3e0   :  { %v2775_v49 = vadd.f32 %v2726_v31, %v2378_v62  ;;  %v2821_v60 = vld [vmem:[%s17034_s23 + $0x137] sm:$0xff] }
 0x3e1   :  { %2223 = vperm.xlu1 %10232, %v2026_v41   ;;  %v4521_v44 = vsel %vm4482_vm1, %v4518_v33, %v4520_v9  ;;  %v17213_v62 = vld [vmem:[#allocation14_spill] sm:$0xff]  ;;  %v13225_v31 = vld [vmem:[%s17034_s23 + $0xf9] sm:$0xff] }
 0x3e2   :  { %1821 = vperm.xlu0 %10231, %v1628_v59   ;;  %2625 = vperm.xlu2 %10233, %v2424_v20   ;;  %v3172_v37 = vadd.f32 %v3123_v58, %v2775_v49  ;;  %17214 = vst [vmem:[#allocation34_spill] sm:$0xff] %v13225_v31  ;;  %v13230_v58 = vld [vmem:[%s17034_s23 + $0xf8] sm:$0xff] }
 0x3e3   :  { %4623 = vmatpush.msra.mxu3 %v4521_v44  ;;  %v3837_v45 = vpop.permute.xlu1 %3836  ;;  %v13141_v23 = vpop.permute.xlu2 %1444  ;;  %17215 = vst [vmem:[#allocation9_spill] sm:$0xff] %v13230_v58 }
 0x3e4   :  { %v3435_v24 = vpop.permute.xlu0 %3434  ;;  %v3918_v12 = vmul.f32 %v12882_v6, %v3837_v45  ;;  %v3617_v45 = vld [vmem:[%s17034_s23 + $0x149] sm:$0xff] }
 0x3e5   :  { %v3520_v9 = vmul.f32 %v12863_v30, %v3435_v24 }
 0x3e6   :  { %v3967_v57 = vadd.f32 %v3918_v12, %v3570_v1 }
 0x3e7   :  { %v3569_v22 = vadd.f32 %v3520_v9, %v3172_v37  ;;  %v2024_v37 = vld [vmem:[%s17034_s23 + $0x11d] sm:$0xff] }
 0x3e8   :  { %v4391_v36 = vrot.slane %v3967_v57, 1 }
 0x3e9   :  { %3429 = vperm.xlu1 %10232, %v17211_v38   ;;  %v1228_v38 = vld [vmem:[%s17034_s23 + $0x10b] sm:$0xff] }
 0x3ea   :  { %3027 = vperm.xlu0 %10231, %v2822_v47   ;;  %262 = vperm.xlu2 %10233, %v13153_v34   ;;  %v4394_v48 = vsel %vm4076_vm0, %v4391_v36, %v4393_v54  ;;  %v13173_v54 = vld [vmem:[%s17034_s23 + $0x101] sm:$0xff] }
 0x3eb   :  { %v3832_v2 = vpop.permute.xlu1 %3831  ;;  %v4449_v7 = vmax.f32 %v3967_v57, %v4394_v48  ;;  %v13161_v55 = vpop.permute.xlu2 %1037  ;;  %17212 = vst [vmem:[#allocation19_spill] sm:$0xff] %v13173_v54  ;;  %v830_v57 = vld [vmem:[%s17034_s23 + $0x102] sm:$0xff] }
 0x3ec   :  { %v13159_v25 = vpop.permute.xlu0 %650  ;;  %v3917_v63 = vmul.f32 %v12882_v6, %v3832_v2 }
 0x3ed   :  { %v4516_v5 = vrot.slane %v4449_v7, 2 }
 0x3ee   :  { %v13164_v42 = vadd.f32 %v3917_v63, %v3569_v22  ;;  %v2820_v22 = vld [vmem:[%s17034_s23 + $0x12f] sm:$0xff]  ;;  %v2422_v63 = vld [vmem:[%s17034_s23 + $0x126] sm:$0xff] }
 0x3ef   :  { %v4519_v32 = vsel %vm4482_vm1, %v4516_v5, %v4518_v33  ;;  %v2025_v33 = vld [vmem:[%s17034_s23 + $0x125] sm:$0xff] }
 0x3f0   :  { %v17001_v56 = vrot.slane %v13164_v42, 1  ;;  %4624 = vmatpush.msra.mxu3 %v4519_v32 }
 0x3f1   :  { %1012 = vperm.xlu1 %10232, %v831_v19  }
 0x3f2   :  { %610 = vperm.xlu0 %10231, %v13173_v54   ;;  %1414 = vperm.xlu2 %10233, %v1229_v53   ;;  %v4392_v15 = vsel %vm4076_vm0, %v17001_v56, %v4391_v36  ;;  %v1626_v36 = vld [vmem:[%s17034_s23 + $0x114] sm:$0xff] }
 0x3f3   :  { %v13183_v46 = vpop.permute.xlu1 %1047  ;;  %v4448_v11 = vmax.f32 %v13164_v42, %v4392_v15  ;;  %v13188_v59 = vpop.permute.xlu2 %282  ;;  %v13274_v15 = vld [vmem:[%s17034_s23 + $0xf0] sm:$0xff]  ;;  %v17223_v56 = vld [vmem:[#allocation11_spill] sm:$0xff] }
 0x3f4   :  { %v13186_v41 = vpop.permute.xlu0 %645  ;;  %17217 = vst [vmem:[#allocation46_spill] sm:$0xff] %v13274_v15  ;;  %v2022_v54 = vld [vmem:[%s17034_s23 + $0x10d] sm:$0xff]  ;;  %v1137_v17 = vmul.f32 %v12756_v18, %v13183_v46 }
 0x3f5   :  { %v13190_v20 = vrot.slane %v4448_v11, 2  ;;  %v13279_v11 = vld [vmem:[%s17034_s23 + $0xf1] sm:$0xff] }
 0x3f6   :  { %17218 = vst [vmem:[#allocation41_spill] sm:$0xff] %v13279_v11 }
 0x3f7   :  { %v4517_v50 = vsel %vm4482_vm1, %v13190_v20, %v4516_v5  ;;  %v17216_v5 = vld [vmem:[#allocation7_spill] sm:$0xff] }
 0x3f8   :  { %4625 = vmatpush.msra.mxu3 %v4517_v50 }
 0x3f9   :  { %2218 = vperm.xlu1 %10232, %v2025_v33   ;;  %v17219_v33 = vld [vmem:[#allocation35_spill] sm:$0xff] }
 0x3fa   :  { %1816 = vperm.xlu0 %10231, %v1627_v13   ;;  %2620 = vperm.xlu2 %10233, %v2423_v28  }
 0x3fb   :  { %v13203_v0 = vpop.permute.xlu1 %1042  ;;  %v13207_v43 = vpop.permute.xlu2 %1434 }
 0x3fc   :  { %v13205_v44 = vpop.permute.xlu0 %640 }
 0x401   :  { %3424 = vperm.xlu1 %10232, %v17213_v62   ;;  %v1625_v62 = vld [vmem:[%s17034_s23 + $0x10c] sm:$0xff] }
 0x402   :  { %3022 = vperm.xlu0 %10231, %v2821_v60   ;;  %3826 = vperm.xlu2 %10233, %v3617_v45   ;;  %v1227_v60 = vld [vmem:[%s17034_s23 + $0x103] sm:$0xff]  ;;  %v829_v45 = vld [vmem:[%s17034_s23 + $0xfa] sm:$0xff] }
 0x403   :  { %v13216_v1 = vpop.permute.xlu1 %635 }
 0x404   :  { %v13218_v24 = vpop.permute.xlu0 %287  ;;  %v13220_v12 = vpop.permute.xlu2 %277 }
 0x409   :  { %605 = vperm.xlu1 %10232, %v13225_v31   ;;  %v13340_v31 = vld [vmem:[%s17034_s23 + $0xe9] sm:$0xff] }
 0x40a   :  { %257 = vperm.xlu0 %10231, %v13230_v58   ;;  %1007 = vperm.xlu2 %10233, %v830_v57   ;;  %17225 = vst [vmem:[#allocation12_spill] sm:$0xff] %v13340_v31  ;;  %v1624_v58 = vld [vmem:[%s17034_s23 + $0x104] sm:$0xff] }
 0x40b   :  { %v13237_v47 = vpop.permute.xlu1 %1841 }
 0x40c   :  { %v13239_v49 = vpop.permute.xlu0 %1439  ;;  %v13241_v9 = vpop.permute.xlu2 %1429  ;;  %v1931_v18 = vmul.f32 %v12802_v10, %v13237_v47  ;;  %v13391_v10 = vld [vmem:[%s17034_s23 + $0xe1] sm:$0xff] }
 0x40d   :  { %17228 = vst [vmem:[#allocation18_spill] sm:$0xff] %v13391_v10 }
 0x411   :  { %1811 = vperm.xlu1 %10232, %v1626_v36  }
 0x412   :  { %1409 = vperm.xlu0 %10231, %v1228_v38   ;;  %2213 = vperm.xlu2 %10233, %v2024_v37   ;;  %v2421_v37 = vld [vmem:[%s17034_s23 + $0x11e] sm:$0xff] }
 0x413   :  { %v13252_v48 = vpop.permute.xlu1 %1032 }
 0x414   :  { %v13254_v2 = vpop.permute.xlu0 %630  ;;  %v13256_v7 = vpop.permute.xlu2 %2635 }
 0x419   :  { %3017 = vperm.xlu1 %10232, %v2820_v22   ;;  %v2023_v22 = vld [vmem:[%s17034_s23 + $0x115] sm:$0xff] }
 0x41a   :  { %2615 = vperm.xlu0 %10231, %v2422_v63   ;;  %3419 = vperm.xlu2 %10233, %v17216_v5   ;;  %v2819_v63 = vld [vmem:[%s17034_s23 + $0x127] sm:$0xff] }
 0x41b   :  { %v13265_v19 = vpop.permute.xlu1 %2238 }
 0x41c   :  { %v13267_v32 = vpop.permute.xlu0 %1836  ;;  %v13269_v53 = vpop.permute.xlu2 %1022 }
 0x421   :  { %252 = vperm.xlu1 %10232, %v13274_v15  }
 0x422   :  { %3821 = vperm.xlu0 %10231, %v17219_v33   ;;  %600 = vperm.xlu2 %10233, %v13279_v11   ;;  %v828_v11 = vld [vmem:[%s17034_s23 + $0xf2] sm:$0xff] }
 0x423   :  { %v13284_v50 = vpop.permute.xlu1 %1027 }
 0x424   :  { %v13286_v13 = vpop.permute.xlu0 %625  ;;  %v13288_v28 = vpop.permute.xlu2 %2228 }
 0x425   :  { %17220 = vst [vmem:[#allocation45_spill] sm:$0xff] %v13288_v28 }
 0x429   :  { %1404 = vperm.xlu1 %10232, %v1227_v60  }
 0x42a   :  { %1002 = vperm.xlu0 %10231, %v829_v45   ;;  %1806 = vperm.xlu2 %10233, %v1625_v62   ;;  %v13323_v45 = vld [vmem:[%s17034_s23 + $0xe8] sm:$0xff] }
 0x42b   :  { %v13299_v57 = vpop.permute.xlu1 %2233  ;;  %17221 = vst [vmem:[#allocation50_spill] sm:$0xff] %v13323_v45  ;;  %v17222_v62 = vld [vmem:[#allocation32_spill] sm:$0xff] }
 0x42c   :  { %v13301_v36 = vpop.permute.xlu0 %1831  ;;  %v13303_v38 = vpop.permute.xlu2 %267 }
 0x431   :  { %2610 = vperm.xlu1 %10232, %v2421_v37  }
 0x432   :  { %2208 = vperm.xlu0 %10231, %v2023_v22   ;;  %3012 = vperm.xlu2 %10233, %v2819_v63  }
 0x433   :  { %v13314_v5 = vpop.permute.xlu1 %620 }
 0x434   :  { %v13316_v33 = vpop.permute.xlu0 %272  ;;  %v13318_v60 = vpop.permute.xlu2 %1419 }
 0x439   :  { %3816 = vperm.xlu1 %10232, %v17222_v62  }
 0x43a   :  { %3414 = vperm.xlu0 %10231, %v17223_v56   ;;  %247 = vperm.xlu2 %10233, %v13323_v45   ;;  %v1226_v56 = vld [vmem:[%s17034_s23 + $0xfb] sm:$0xff] }
 0x43b   :  { %v13328_v37 = vpop.permute.xlu1 %1826 }
 0x43c   :  { %v13330_v22 = vpop.permute.xlu0 %1424  ;;  %v13332_v63 = vpop.permute.xlu2 %2625 }
 0x43d   :  { %17224 = vst [vmem:[#allocation17_spill] sm:$0xff] %v13332_v63 }
 0x441   :  { %997 = vperm.xlu1 %10232, %v828_v11   ;;  %v2420_v11 = vld [vmem:[%s17034_s23 + $0x116] sm:$0xff] }
 0x442   :  { %595 = vperm.xlu0 %10231, %v13340_v31   ;;  %1399 = vperm.xlu2 %10233, %v1226_v56   ;;  %v740_v56 = vmul.f32 %v12747_v51, %v13159_v25  ;;  %v392_v31 = vmul.f32 %v12735_v8, %v13055_v16  ;;  %v2818_v51 = vld [vmem:[%s17034_s23 + $0x11f] sm:$0xff]  ;;  %v1534_v8 = vmul.f32 %v12773_v26, %v13141_v23 }
 0x443   :  { %v3033_v62 = vpop.permute.xlu1 %3032  ;;  %v2328_v25 = vmul.f32 %v12809_v3, %v13265_v19  ;;  %v13396_v3 = vld [vmem:[%s17034_s23 + $0xe0] sm:$0xff] }
 0x444   :  { %v13346_v45 = vpop.permute.xlu0 %2630  ;;  %v13348_v15 = vpop.permute.xlu2 %262  ;;  %v789_v35 = vadd.f32 %v740_v56, %v392_v31  ;;  %17229 = vst [vmem:[#allocation44_spill] sm:$0xff] %v13396_v3  ;;  %v3122_v23 = vmul.f32 %v12847_v40, %v3033_v62  ;;  %v1225_v40 = vld [vmem:[%s17034_s23 + $0xf3] sm:$0xff] }
 0x446   :  { %v1186_v14 = vadd.f32 %v1137_v17, %v789_v35 }
 0x448   :  { %v1583_v16 = vadd.f32 %v1534_v8, %v1186_v14  ;;  %v2725_v14 = vmul.f32 %v12830_v27, %v13256_v7  ;;  %v1623_v27 = vld [vmem:[%s17034_s23 + $0xfc] sm:$0xff]  ;;  %v2021_v7 = vld [vmem:[%s17034_s23 + $0x105] sm:$0xff] }
 0x449   :  { %2203 = vperm.xlu1 %10232, %v2022_v54   ;;  %v17226_v54 = vld [vmem:[#allocation23_spill] sm:$0xff] }
 0x44a   :  { %1801 = vperm.xlu0 %10231, %v1624_v58   ;;  %2605 = vperm.xlu2 %10233, %v2420_v11   ;;  %v1980_v17 = vadd.f32 %v1931_v18, %v1583_v16 }
 0x44b   :  { %v13365_v34 = vpop.permute.xlu1 %1017 }
 0x44c   :  { %v13367_v63 = vpop.permute.xlu0 %615  ;;  %v13369_v28 = vpop.permute.xlu2 %1414  ;;  %v2377_v26 = vadd.f32 %v2328_v25, %v1980_v17 }
 0x44e   :  { %v2774_v58 = vadd.f32 %v2725_v14, %v2377_v26  ;;  %v2419_v14 = vld [vmem:[%s17034_s23 + $0x10e] sm:$0xff] }
 0x450   :  { %v3171_v19 = vadd.f32 %v3122_v23, %v2774_v58 }
 0x451   :  { %3409 = vperm.xlu1 %10232, %v12816_v4   ;;  %v827_v4 = vld [vmem:[%s17034_s23 + $0xea] sm:$0xff] }
 0x452   :  { %3007 = vperm.xlu0 %10231, %v2818_v51   ;;  %3811 = vperm.xlu2 %10233, %v17226_v54   ;;  %v17230_v54 = vrot.slane %v13164_v42, 1 }
 0x453   :  { %v13382_v35 = vpop.permute.xlu1 %2223 }
 0x454   :  { %v13384_v46 = vpop.permute.xlu0 %1821  ;;  %v13386_v31 = vpop.permute.xlu2 %2620 }
 0x455   :  { %17227 = vst [vmem:[#allocation40_spill] sm:$0xff] %v13386_v31 }
 0x459   :  { %590 = vperm.xlu1 %10232, %v13391_v10  }
 0x45a   :  { %242 = vperm.xlu0 %10231, %v13396_v3   ;;  %992 = vperm.xlu2 %10233, %v827_v4   ;;  %v2817_v4 = vld [vmem:[%s17034_s23 + $0x117] sm:$0xff] }
 0x45b   :  { %v3430_v47 = vpop.permute.xlu1 %3429 }
 0x45c   :  { %v13406_v11 = vpop.permute.xlu0 %3027  ;;  %v3827_v56 = vpop.permute.xlu2 %3826  ;;  %v3519_v51 = vmul.f32 %v12863_v30, %v3430_v47 }
 0x45d   :  { %v3916_v8 = vmul.f32 %v12882_v6, %v3827_v56  ;;  %v13451_v56 = vld [vmem:[%s17034_s23 + $0xd8] sm:$0xff] }
 0x45e   :  { %v3568_v18 = vadd.f32 %v3519_v51, %v3171_v19  ;;  %17231 = vst [vmem:[#allocation20_spill] sm:$0xff] %v13451_v56  ;;  %v13456_v51 = vld [vmem:[%s17034_s23 + $0xd9] sm:$0xff] }
 0x45f   :  { %17232 = vst [vmem:[#allocation49_spill] sm:$0xff] %v13456_v51 }
 0x460   :  { %v13419_v62 = vadd.f32 %v3916_v8, %v3568_v18 }
 0x461   :  { %1796 = vperm.xlu1 %10232, %v1623_v27   ;;  %v1224_v27 = vld [vmem:[%s17034_s23 + $0xeb] sm:$0xff] }
 0x462   :  { %v17013_v30 = vrot.slane %v13419_v62, 1  ;;  %1394 = vperm.xlu0 %10231, %v1225_v40   ;;  %2198 = vperm.xlu2 %10233, %v2021_v7   ;;  %v826_v40 = vld [vmem:[%s17034_s23 + $0xe2] sm:$0xff]  ;;  %v1622_v7 = vld [vmem:[%s17034_s23 + $0xf4] sm:$0xff] }
 0x463   :  { %v1013_v6 = vpop.permute.xlu1 %1012 }
 0x464   :  { %v13422_v16 = vpop.permute.xlu0 %610  ;;  %v13424_v25 = vpop.permute.xlu2 %1007  ;;  %v4390_v17 = vsel %vm4076_vm0, %v17013_v30, %v17230_v54  ;;  %v2816_v30 = vld [vmem:[%s17034_s23 + $0x10f] sm:$0xff] }
 0x465   :  { %v4447_v26 = vmax.f32 %v13419_v62, %v4390_v17 }
 0x467   :  { %v13438_v23 = vrot.slane %v4447_v26, 2 }
 0x469   :  { %3002 = vperm.xlu1 %10232, %v2817_v4   ;;  %v4515_v42 = vsel %vm4482_vm1, %v13438_v23, %v13190_v20  ;;  %v17233_v20 = vld [vmem:[#allocation47_spill] sm:$0xff]  ;;  %v13481_v4 = vld [vmem:[%s16955_s1 + $0x1] ss:$0 sm:$0xff] }
 0x46a   :  { %2600 = vperm.xlu0 %10231, %v2419_v14   ;;  %3404 = vperm.xlu2 %10233, %v12873_v39  }
 0x46b   :  { %4557 = vmatpush.msra.mxu2 %v4515_v42  ;;  %v2219_v58 = vpop.permute.xlu1 %2218  ;;  %v13487_v42 = vld [vmem:[%s16955_s1] ss:$0 sm:$0xff] }
 0x46c   :  { %v13444_v47 = vpop.permute.xlu0 %1816  ;;  %v13446_v19 = vpop.permute.xlu2 %2213  ;;  %v388_v10 = vmul.f32 %v13487_v42, %v13188_v59  ;;  %v391_v3 = vmul.f32 %v13487_v42, %v13085_v29 }
 0x471   :  { %237 = vperm.xlu1 %10232, %v13451_v56  }
 0x472   :  { %3806 = vperm.xlu0 %10231, %v17233_v20   ;;  %585 = vperm.xlu2 %10233, %v13456_v51   ;;  %v385_v51 = vmul.f32 %v13487_v42, %v13303_v38 }
 0x473   :  { %v13461_v39 = vpop.permute.xlu1 %3424 }
 0x474   :  { %v13463_v8 = vpop.permute.xlu0 %3022  ;;  %v13465_v18 = vpop.permute.xlu2 %3419 }
 0x475   :  { %17234 = vst [vmem:[#allocation15_spill] sm:$0xff] %v13465_v18 }
 0x479   :  { %1389 = vperm.xlu1 %10232, %v1224_v27   ;;  %v2418_v27 = vld [vmem:[%s17034_s23 + $0x106] sm:$0xff] }
 0x47a   :  { %987 = vperm.xlu0 %10231, %v826_v40   ;;  %1791 = vperm.xlu2 %10233, %v1622_v7   ;;  %v733_v40 = vmul.f32 %v13481_v4, %v13367_v63  ;;  %v13510_v63 = vld [vmem:[%s16955_s1 + $0x2] ss:$0 sm:$0xff] }
 0x47b   :  { %v606_v54 = vpop.permute.xlu1 %605 }
 0x47c   :  { %v258_v17 = vpop.permute.xlu0 %257  ;;  %v13476_v26 = vpop.permute.xlu2 %600  ;;  %v731_v14 = vmul.f32 %v13481_v4, %v606_v54  ;;  %v2020_v54 = vld [vmem:[%s17034_s23 + $0xfd] sm:$0xff]  ;;  %v782_v38 = vadd.f32 %v733_v40, %v385_v51 }
 0x47d   :  { %v383_v20 = vmul.f32 %v13487_v42, %v258_v17  ;;  %v736_v17 = vmul.f32 %v13481_v4, %v13254_v2  ;;  %v1133_v2 = vmul.f32 %v13510_v63, %v13284_v50 }
 0x47f   :  { %v13495_v7 = vadd.f32 %v731_v14, %v383_v20  ;;  %v1130_v14 = vmul.f32 %v13510_v63, %v1013_v6  ;;  %v739_v20 = vmul.f32 %v13481_v4, %v13186_v41  ;;  %v1136_v6 = vmul.f32 %v13510_v63, %v13203_v0  ;;  %v13538_v0 = vld [vmem:[%s16955_s1 + $0x4] ss:$0 sm:$0xff] }
 0x480   :  { %v785_v41 = vadd.f32 %v736_v17, %v388_v10  ;;  %v1927_v10 = vmul.f32 %v13538_v0, %v13384_v46 }
 0x481   :  { %2595 = vperm.xlu1 %10232, %v2418_v27   ;;  %v1179_v50 = vadd.f32 %v1130_v14, %v782_v38  ;;  %v788_v40 = vadd.f32 %v739_v20, %v391_v3  ;;  %v13553_v20 = vld [vmem:[%s16955_s1 + $0x5] ss:$0 sm:$0xff] }
 0x482   :  { %2193 = vperm.xlu0 %10231, %v2020_v54   ;;  %2997 = vperm.xlu2 %10233, %v2816_v30   ;;  %v13528_v30 = vld [vmem:[%s16955_s1 + $0x3] ss:$0 sm:$0xff]  ;;  %v1182_v54 = vadd.f32 %v1133_v2, %v785_v41  ;;  %v2324_v46 = vmul.f32 %v13553_v20, %v2219_v58 }
 0x483   :  { %v13519_v56 = vpop.permute.xlu1 %1811  ;;  %v1530_v59 = vmul.f32 %v13528_v30, %v13330_v22  ;;  %v1533_v29 = vmul.f32 %v13528_v30, %v13239_v49  ;;  %v13546_v22 = vld [vmem:[%s17034_s23 + $0xd0] sm:$0xff]  ;;  %v1185_v3 = vadd.f32 %v1136_v6, %v788_v40  ;;  %v1930_v49 = vmul.f32 %v13538_v0, %v13267_v32 }
 0x484   :  { %v1410_v27 = vpop.permute.xlu0 %1409  ;;  %v1807_v18 = vpop.permute.xlu2 %1806  ;;  %v2327_v32 = vmul.f32 %v13553_v20, %v13299_v57  ;;  %v825_v57 = vld [vmem:[%s17034_s23 + $0xda] sm:$0xff] }
 0x485   :  { %v1527_v51 = vmul.f32 %v13528_v30, %v1410_v27  ;;  %v1924_v31 = vmul.f32 %v13538_v0, %v1807_v18  ;;  %v1579_v14 = vadd.f32 %v1530_v59, %v1182_v54  ;;  %v1582_v18 = vadd.f32 %v1533_v29, %v1185_v3 }
 0x487   :  { %v1576_v17 = vadd.f32 %v1527_v51, %v1179_v50  ;;  %v1976_v38 = vadd.f32 %v1927_v10, %v1579_v14  ;;  %v1979_v59 = vadd.f32 %v1930_v49, %v1582_v18  ;;  %v13579_v51 = vld [vmem:[%s16955_s1 + $0x7] ss:$0 sm:$0xff] }
 0x488   :  { %v3121_v40 = vmul.f32 %v13579_v51, %v13406_v11  ;;  %v1223_v10 = vld [vmem:[%s17034_s23 + $0xe3] sm:$0xff] }
 0x489   :  { %v13556_v2 = vadd.f32 %v1924_v31, %v1576_v17  ;;  %3801 = vperm.xlu1 %10232, %v12906_v52   ;;  %v13568_v31 = vld [vmem:[%s16955_s1 + $0x6] ss:$0 sm:$0xff]  ;;  %v2376_v50 = vadd.f32 %v2327_v32, %v1979_v59  ;;  %v738_v17 = vmul.f32 %v13481_v4, %v13205_v44  ;;  %v13597_v11 = vld [vmem:[%s16955_s1 + $0x8] ss:$0 sm:$0xff]  ;;  %v735_v44 = vmul.f32 %v13481_v4, %v13286_v13  ;;  %v13620_v13 = vld [vmem:[%s16955_s1 + $0x9] ss:$0 sm:$0xff] }
 0x48a   :  { %3399 = vperm.xlu0 %10231, %v12935_v21   ;;  %232 = vperm.xlu2 %10233, %v13546_v22   ;;  %v2724_v52 = vmul.f32 %v13568_v31, %v13346_v45  ;;  %v2373_v21 = vadd.f32 %v2324_v46, %v1976_v38  ;;  %v13587_v45 = vld [vmem:[%s17034_s23 + $0xd1] sm:$0xff]  ;;  %v3518_v49 = vmul.f32 %v13597_v11, %v13461_v39 }
 0x48b   :  { %v13563_v6 = vpop.permute.xlu1 %3017  ;;  %v390_v46 = vmul.f32 %v13487_v42, %v13122_v61  ;;  %v730_v39 = vmul.f32 %v13481_v4, %v13476_v26  ;;  %v384_v26 = vmul.f32 %v13487_v42, %v13348_v15 }
 0x48c   :  { %v2616_v27 = vpop.permute.xlu0 %2615  ;;  %v3013_v41 = vpop.permute.xlu2 %3012  ;;  %v2773_v3 = vadd.f32 %v2724_v52, %v2376_v50  ;;  %v387_v52 = vmul.f32 %v13487_v42, %v13220_v12  ;;  %v2019_v12 = vld [vmem:[%s17034_s23 + $0xf5] sm:$0xff]  ;;  %v1532_v50 = vmul.f32 %v13528_v30, %v13207_v43  ;;  %v1132_v43 = vmul.f32 %v13510_v63, %v13269_v53 }
 0x48d   :  { %v2721_v58 = vmul.f32 %v13568_v31, %v2616_v27  ;;  %v3118_v54 = vmul.f32 %v13579_v51, %v3013_v41  ;;  %v787_v38 = vadd.f32 %v738_v17, %v390_v46  ;;  %v732_v27 = vmul.f32 %v13481_v4, %v13422_v16 }
 0x48e   :  { %v3170_v18 = vadd.f32 %v3121_v40, %v2773_v3  ;;  %v1135_v16 = vmul.f32 %v13510_v63, %v13161_v55  ;;  %v784_v40 = vadd.f32 %v735_v44, %v387_v52  ;;  %v2417_v55 = vld [vmem:[%s17034_s23 + $0xfe] sm:$0xff]  ;;  %v737_v17 = vmul.f32 %v13481_v4, %v13216_v1 }
 0x48f   :  { %v2770_v29 = vadd.f32 %v2721_v58, %v2373_v21  ;;  %v781_v3 = vadd.f32 %v732_v27, %v384_v26  ;;  %v734_v46 = vmul.f32 %v13481_v4, %v13314_v5  ;;  %v1129_v1 = vmul.f32 %v13510_v63, %v13424_v25 }
 0x490   :  { %v3567_v21 = vadd.f32 %v3518_v49, %v3170_v18  ;;  %v1184_v15 = vadd.f32 %v1135_v16, %v787_v38  ;;  %v386_v49 = vmul.f32 %v13487_v42, %v13316_v33  ;;  %v1134_v18 = vmul.f32 %v13510_v63, %v13252_v48 }
 0x491   :  { %v13601_v14 = vadd.f32 %v3118_v54, %v2770_v29  ;;  %982 = vperm.xlu1 %10232, %v825_v57   ;;  %v1621_v54 = vld [vmem:[%s17034_s23 + $0xec] sm:$0xff]  ;;  %v1929_v53 = vmul.f32 %v13538_v0, %v13301_v36  ;;  %v1181_v33 = vadd.f32 %v1132_v43, %v784_v40  ;;  %v1131_v5 = vmul.f32 %v13510_v63, %v13365_v34  ;;  %v17236_v43 = vld [vmem:[#allocation48_spill] sm:$0xff] }
 0x492   :  { %580 = vperm.xlu0 %10231, %v13587_v45   ;;  %1384 = vperm.xlu2 %10233, %v1223_v10   ;;  %v389_v10 = vmul.f32 %v13487_v42, %v13218_v24  ;;  %v1529_v24 = vmul.f32 %v13528_v30, %v13318_v60  ;;  %v1178_v60 = vadd.f32 %v1129_v1, %v781_v3 }
 0x493   :  { %v253_v32 = vpop.permute.xlu1 %252  ;;  %v1926_v25 = vmul.f32 %v13538_v0, %v13444_v47  ;;  %v783_v34 = vadd.f32 %v734_v46, %v386_v49  ;;  %v17237_v49 = vld [vmem:[#allocation45_spill] sm:$0xff] }
 0x494   :  { %v3822_v41 = vpop.permute.xlu0 %3821  ;;  %v13612_v59 = vpop.permute.xlu2 %247  ;;  %v382_v61 = vmul.f32 %v13487_v42, %v253_v32  ;;  %v17235_v32 = vrot.slane %v13419_v62, 1  ;;  %v786_v52 = vadd.f32 %v737_v17, %v389_v10  ;;  %v1528_v17 = vmul.f32 %v13528_v30, %v13369_v28  ;;  %v10361_v28 = vld [vmem:[%s17034_s23 + $0x119] sm:$0xff] }
 0x495   :  { %v3915_v58 = vmul.f32 %v13620_v13, %v3822_v41  ;;  %v2326_v46 = vmul.f32 %v13553_v20, %v17237_v49 }
 0x496   :  { %v13627_v57 = vadd.f32 %v730_v39, %v382_v61  ;;  %v1581_v61 = vadd.f32 %v1532_v50, %v1184_v15  ;;  %v1183_v47 = vadd.f32 %v1134_v18, %v786_v52  ;;  %v2815_v50 = vld [vmem:[%s17034_s23 + $0x107] sm:$0xff]  ;;  %v1928_v15 = vmul.f32 %v13538_v0, %v13328_v37 }
 0x497   :  { %v13634_v29 = vadd.f32 %v3915_v58, %v3567_v21  ;;  %v1531_v21 = vmul.f32 %v13528_v30, %v13241_v9  ;;  %v1578_v58 = vadd.f32 %v1529_v24, %v1181_v33  ;;  %v17238_v37 = vld [vmem:[#allocation17_spill] sm:$0xff]  ;;  %v2325_v24 = vmul.f32 %v13553_v20, %v13382_v35 }
 0x498   :  { %v2723_v18 = vmul.f32 %v13568_v31, %v17238_v37  ;;  %v426_v35 = vld [vmem:[%s17034_s23 + $0xc9] sm:$0xff] }
 0x499   :  { %v4385_v44 = vrot.slane %v13634_v29, 1  ;;  %2188 = vperm.xlu1 %10232, %v2019_v12   ;;  %v1180_v12 = vadd.f32 %v1131_v5, %v783_v34  ;;  %v1975_v9 = vadd.f32 %v1926_v25, %v1578_v58  ;;  %v824_v34 = vld [vmem:[%s17034_s23 + $0xd2] sm:$0xff] }
 0x49a   :  { %1786 = vperm.xlu0 %10231, %v1621_v54   ;;  %2590 = vperm.xlu2 %10233, %v2417_v55   ;;  %v1978_v55 = vadd.f32 %v1929_v53, %v1581_v61 }
 0x49b   :  { %v4388_v48 = vsel %vm4076_vm0, %v4385_v44, %v17235_v32  ;;  %v1405_v38 = vpop.permute.xlu1 %1404  ;;  %v1577_v1 = vadd.f32 %v1528_v17, %v1180_v12  ;;  %v3120_v32 = vmul.f32 %v13579_v51, %v13463_v8  ;;  %v79_v8 = vld [vmem:[%s17034_s23 + $0xc8] sm:$0xff] }
 0x49c   :  { %v4446_v27 = vmax.f32 %v13634_v29, %v4388_v48  ;;  %v1003_v39 = vpop.permute.xlu0 %1002  ;;  %v1400_v41 = vpop.permute.xlu2 %1399  ;;  %v1526_v36 = vmul.f32 %v13528_v30, %v1405_v38  ;;  %v2375_v33 = vadd.f32 %v2326_v46, %v1978_v55 }
 0x49d   :  { %v1128_v62 = vmul.f32 %v13510_v63, %v1003_v39  ;;  %v1525_v54 = vmul.f32 %v13528_v30, %v1400_v41 }
 0x49e   :  { %v13675_v16 = vadd.f32 %v1526_v36, %v1178_v60  ;;  %v13677_v26 = vrot.slane %v4446_v27, 2  ;;  %v2772_v39 = vadd.f32 %v2723_v18, %v2375_v33  ;;  %v1222_v18 = vld [vmem:[%s17034_s23 + $0xdb] sm:$0xff] }
 0x49f   :  { %v1177_v40 = vadd.f32 %v1128_v62, %v13495_v7  ;;  %v1925_v7 = vmul.f32 %v13538_v0, %v13519_v56  ;;  %v1580_v56 = vadd.f32 %v1531_v21, %v1183_v47  ;;  %v17239_v21 = vld [vmem:[#allocation40_spill] sm:$0xff]  ;;  %v3119_v47 = vmul.f32 %v13579_v51, %v13563_v6 }
 0x4a0   :  { %v4513_v10 = vsel %vm4482_vm1, %v13677_v26, %v13438_v23  ;;  %v2323_v23 = vmul.f32 %v13553_v20, %v13446_v19  ;;  %v3169_v62 = vadd.f32 %v3120_v32, %v2772_v39  ;;  %v2722_v58 = vmul.f32 %v13568_v31, %v17239_v21  ;;  %v1620_v6 = vld [vmem:[%s17034_s23 + $0xe4] sm:$0xff] }
 0x4a1   :  { %v13693_v3 = vadd.f32 %v1525_v54, %v1177_v40  ;;  %4558 = vmatpush.msra.mxu2 %v4513_v10  ;;  %3394 = vperm.xlu1 %10232, %v17236_v43   ;;  %v1977_v60 = vadd.f32 %v1928_v15, %v1580_v56  ;;  %v1974_v25 = vadd.f32 %v1925_v7, %v1577_v1  ;;  %v17240_v40 = vld [vmem:[#allocation15_spill] sm:$0xff] }
 0x4a2   :  { %2992 = vperm.xlu0 %10231, %v2815_v50   ;;  %3796 = vperm.xlu2 %10233, %v10361_v28   ;;  %v2372_v5 = vadd.f32 %v2323_v23, %v1975_v9  ;;  %v3517_v54 = vmul.f32 %v13597_v11, %v17240_v40  ;;  %v2018_v23 = vld [vmem:[%s17034_s23 + $0xed] sm:$0xff] }
 0x4a3   :  { %v2611_v53 = vpop.permute.xlu1 %2610  ;;  %v2374_v36 = vadd.f32 %v2325_v24, %v1977_v60  ;;  %v823_v40 = vld [vmem:[%s17034_s23 + $0xca] sm:$0xff] }
 0x4a4   :  { %v2209_v48 = vpop.permute.xlu0 %2208  ;;  %v2606_v38 = vpop.permute.xlu2 %2605  ;;  %v2720_v19 = vmul.f32 %v13568_v31, %v2611_v53  ;;  %v3566_v15 = vadd.f32 %v3517_v54, %v3169_v62 }
 0x4a5   :  { %v2322_v27 = vmul.f32 %v13553_v20, %v2209_v48  ;;  %v2719_v52 = vmul.f32 %v13568_v31, %v2606_v38  ;;  %v2771_v50 = vadd.f32 %v2722_v58, %v2374_v36  ;;  %v381_v38 = vmul.f32 %v13487_v42, %v13612_v59  ;;  %v2416_v36 = vld [vmem:[%s17034_s23 + $0xf6] sm:$0xff] }
 0x4a6   :  { %v13711_v41 = vadd.f32 %v2720_v19, %v2372_v5 }
 0x4a7   :  { %v2371_v61 = vadd.f32 %v2322_v27, %v1974_v25  ;;  %v3168_v7 = vadd.f32 %v3119_v47, %v2771_v50  ;;  %v2814_v25 = vld [vmem:[%s17034_s23 + $0xff] sm:$0xff] }
 0x4a9   :  { %v13727_v12 = vadd.f32 %v2719_v52, %v2371_v61  ;;  %575 = vperm.xlu1 %10232, %v426_v35   ;;  %v17241_v52 = vld [vmem:[#allocation13_spill] sm:$0xff] }
 0x4aa   :  { %227 = vperm.xlu0 %10231, %v79_v8   ;;  %977 = vperm.xlu2 %10233, %v824_v34  }
 0x4ab   :  { %v3817_v55 = vpop.permute.xlu1 %3816 }
 0x4ac   :  { %v3415_v9 = vpop.permute.xlu0 %3414  ;;  %v3812_v10 = vpop.permute.xlu2 %3811  ;;  %v3914_v17 = vmul.f32 %v13620_v13, %v3817_v55  ;;  %v3610_v55 = vld [vmem:[%s17034_s23 + $0x111] sm:$0xff] }
 0x4ad   :  { %v3516_v43 = vmul.f32 %v13597_v11, %v3415_v9  ;;  %v3913_v37 = vmul.f32 %v13620_v13, %v3812_v10 }
 0x4ae   :  { %v3963_v49 = vadd.f32 %v3914_v17, %v3566_v15  ;;  %v1221_v15 = vld [vmem:[%s17034_s23 + $0xd3] sm:$0xff] }
 0x4af   :  { %v3565_v46 = vadd.f32 %v3516_v43, %v3168_v7  ;;  %v1619_v7 = vld [vmem:[%s17034_s23 + $0xdc] sm:$0xff]  ;;  %v2415_v43 = vld [vmem:[%s17034_s23 + $0xee] sm:$0xff] }
 0x4b0   :  { %v4383_v28 = vrot.slane %v3963_v49, 1 }
 0x4b1   :  { %v13743_v56 = vadd.f32 %v3913_v37, %v3565_v46  ;;  %1781 = vperm.xlu1 %10232, %v1620_v6  }
 0x4b2   :  { %v4386_v24 = vsel %vm4076_vm0, %v4383_v28, %v4385_v44  ;;  %1379 = vperm.xlu0 %10231, %v1222_v18   ;;  %2183 = vperm.xlu2 %10233, %v2018_v23  }
 0x4b3   :  { %v4381_v1 = vrot.slane %v13743_v56, 1  ;;  %v4445_v53 = vmax.f32 %v3963_v49, %v4386_v24  ;;  %v998_v33 = vpop.permute.xlu1 %997  ;;  %v17242_v24 = vld [vmem:[#allocation39_spill] sm:$0xff] }
 0x4b4   :  { %v596_v5 = vpop.permute.xlu0 %595  ;;  %v993_v32 = vpop.permute.xlu2 %992  ;;  %v1127_v48 = vmul.f32 %v13510_v63, %v998_v33 }
 0x4b5   :  { %v729_v19 = vmul.f32 %v13481_v4, %v596_v5  ;;  %v4508_v60 = vrot.slane %v4445_v53, 2  ;;  %v4384_v29 = vsel %vm4076_vm0, %v4381_v1, %v4383_v28  ;;  %v1126_v35 = vmul.f32 %v13510_v63, %v993_v32  ;;  %v2813_v28 = vld [vmem:[%s17034_s23 + $0xf7] sm:$0xff]  ;;  %v17243_v53 = vld [vmem:[#allocation36_spill] sm:$0xff] }
 0x4b6   :  { %v1176_v44 = vadd.f32 %v1127_v48, %v13627_v57  ;;  %v4444_v27 = vmax.f32 %v13743_v56, %v4384_v29 }
 0x4b7   :  { %v778_v39 = vadd.f32 %v729_v19, %v381_v38  ;;  %v4511_v59 = vsel %vm4482_vm1, %v4508_v60, %v13677_v26 }
 0x4b8   :  { %4559 = vmatpush.msra.mxu2 %v4511_v59  ;;  %v13767_v61 = vrot.slane %v4444_v27, 2  ;;  %v1220_v27 = vld [vmem:[%s17034_s23 + $0xcb] sm:$0xff] }
 0x4b9   :  { %v13769_v57 = vadd.f32 %v1126_v35, %v778_v39  ;;  %2987 = vperm.xlu1 %10232, %v2814_v25   ;;  %v2016_v39 = vld [vmem:[%s17034_s23 + $0xdd] sm:$0xff] }
 0x4ba   :  { %2585 = vperm.xlu0 %10231, %v2416_v36   ;;  %3389 = vperm.xlu2 %10233, %v17241_v52   ;;  %v4509_v8 = vsel %vm4482_vm1, %v13767_v61, %v4508_v60  ;;  %v1618_v60 = vld [vmem:[%s17034_s23 + $0xd4] sm:$0xff] }
 0x4bb   :  { %4560 = vmatpush.msra.mxu2 %v4509_v8  ;;  %v2204_v34 = vpop.permute.xlu1 %2203  ;;  %v2812_v52 = vld [vmem:[%s17034_s23 + $0xef] sm:$0xff] }
 0x4bc   :  { %v1802_v62 = vpop.permute.xlu0 %1801  ;;  %v2199_v26 = vpop.permute.xlu2 %2198  ;;  %v2321_v21 = vmul.f32 %v13553_v20, %v2204_v34 }
 0x4bd   :  { %v1923_v58 = vmul.f32 %v13538_v0, %v1802_v62  ;;  %v2320_v50 = vmul.f32 %v13553_v20, %v2199_v26  ;;  %v2414_v62 = vld [vmem:[%s17034_s23 + $0xe6] sm:$0xff] }
 0x4be   :  { %v2370_v47 = vadd.f32 %v2321_v21, %v13556_v2 }
 0x4bf   :  { %v1972_v54 = vadd.f32 %v1923_v58, %v13675_v16  ;;  %v2017_v16 = vld [vmem:[%s17034_s23 + $0xe5] sm:$0xff] }
 0x4c0   :  { %v17244_v58 = vld [vmem:[#allocation9_spill] sm:$0xff] }
 0x4c1   :  { %v13788_v9 = vadd.f32 %v2320_v50, %v1972_v54  ;;  %972 = vperm.xlu1 %10232, %v823_v40  }
 0x4c2   :  { %3791 = vperm.xlu0 %10231, %v3610_v55   ;;  %1374 = vperm.xlu2 %10233, %v1221_v15  }
 0x4c3   :  { %v3410_v2 = vpop.permute.xlu1 %3409 }
 0x4c4   :  { %v13790_v10 = vpop.permute.xlu0 %3007  ;;  %v13792_v17 = vpop.permute.xlu2 %3404  ;;  %v3515_v26 = vmul.f32 %v13597_v11, %v3410_v2  ;;  %v1617_v2 = vld [vmem:[%s17034_s23 + $0xcc] sm:$0xff] }
 0x4c6   :  { %v3564_v15 = vadd.f32 %v3515_v26, %v13601_v14  ;;  %v17247_v26 = vld [vmem:[#allocation34_spill] sm:$0xff] }
 0x4c9   :  { %2178 = vperm.xlu1 %10232, %v2017_v16  }
 0x4ca   :  { %1776 = vperm.xlu0 %10231, %v1619_v7   ;;  %2580 = vperm.xlu2 %10233, %v2415_v43  }
 0x4cb   :  { %v591_v49 = vpop.permute.xlu1 %590 }
 0x4cc   :  { %v243_v6 = vpop.permute.xlu0 %242  ;;  %v586_v46 = vpop.permute.xlu2 %585  ;;  %v728_v37 = vmul.f32 %v13481_v4, %v591_v49  ;;  %v2015_v49 = vld [vmem:[%s17034_s23 + $0xd5] sm:$0xff] }
 0x4cd   :  { %v380_v18 = vmul.f32 %v13487_v42, %v243_v6  ;;  %v727_v54 = vmul.f32 %v13481_v4, %v586_v46  ;;  %v17245_v46 = vld [vmem:[#allocation19_spill] sm:$0xff] }
 0x4cf   :  { %v777_v23 = vadd.f32 %v728_v37, %v380_v18 }
 0x4d1   :  { %3384 = vperm.xlu1 %10232, %v17242_v24  }
 0x4d2   :  { %2982 = vperm.xlu0 %10231, %v2813_v28   ;;  %3786 = vperm.xlu2 %10233, %v17243_v53  }
 0x4d3   :  { %v1797_v33 = vpop.permute.xlu1 %1796 }
 0x4d4   :  { %v1395_v5 = vpop.permute.xlu0 %1394  ;;  %v1792_v32 = vpop.permute.xlu2 %1791  ;;  %v1922_v48 = vmul.f32 %v13538_v0, %v1797_v33 }
 0x4d5   :  { %v1524_v38 = vmul.f32 %v13528_v30, %v1395_v5  ;;  %v1921_v25 = vmul.f32 %v13538_v0, %v1792_v32 }
 0x4d6   :  { %v13813_v19 = vadd.f32 %v1922_v48, %v13693_v3  ;;  %v2811_v48 = vld [vmem:[%s17034_s23 + $0xe7] sm:$0xff] }
 0x4d7   :  { %v1573_v29 = vadd.f32 %v1524_v38, %v1176_v44 }
 0x4d9   :  { %v13825_v35 = vadd.f32 %v1921_v25, %v1573_v29  ;;  %1771 = vperm.xlu1 %10232, %v1618_v60  }
 0x4da   :  { %1369 = vperm.xlu0 %10231, %v1220_v27   ;;  %2173 = vperm.xlu2 %10233, %v2016_v39  }
 0x4db   :  { %v3003_v3 = vpop.permute.xlu1 %3002 }
 0x4dc   :  { %v2601_v59 = vpop.permute.xlu0 %2600  ;;  %v2998_v36 = vpop.permute.xlu2 %2997 }
 0x4dd   :  { %v2718_v44 = vmul.f32 %v13568_v31, %v2601_v59  ;;  %v3115_v34 = vmul.f32 %v13579_v51, %v2998_v36 }
 0x4df   :  { %v2767_v8 = vadd.f32 %v2718_v44, %v2370_v47 }
 0x4e1   :  { %v13836_v21 = vadd.f32 %v3115_v34, %v2767_v8  ;;  %2977 = vperm.xlu1 %10232, %v2812_v52   ;;  %v2412_v52 = vld [vmem:[%s17034_s23 + $0xd6] sm:$0xff] }
 0x4e2   :  { %2575 = vperm.xlu0 %10231, %v2414_v62   ;;  %3379 = vperm.xlu2 %10233, %v17244_v58   ;;  %v3514_v62 = vmul.f32 %v13597_v11, %v13792_v17  ;;  %v2810_v17 = vld [vmem:[%s17034_s23 + $0xdf] sm:$0xff] }
 0x4e3   :  { %v238_v40 = vpop.permute.xlu1 %237 }
 0x4e4   :  { %v3807_v50 = vpop.permute.xlu0 %3806  ;;  %v13840_v55 = vpop.permute.xlu2 %232  ;;  %v379_v47 = vmul.f32 %v13487_v42, %v238_v40 }
 0x4e5   :  { %v3912_v16 = vmul.f32 %v13620_v13, %v3807_v50 }
 0x4e6   :  { %v13845_v7 = vadd.f32 %v727_v54, %v379_v47 }
 0x4e7   :  { %v3961_v43 = vadd.f32 %v3912_v16, %v3564_v15 }
 0x4e9   :  { %v4379_v6 = vrot.slane %v3961_v43, 1  ;;  %1766 = vperm.xlu1 %10232, %v1617_v2  }
 0x4ea   :  { %3781 = vperm.xlu0 %10231, %v17245_v46   ;;  %2168 = vperm.xlu2 %10233, %v2015_v49   ;;  %v17248_v49 = vld [vmem:[#allocation50_spill] sm:$0xff] }
 0x4eb   :  { %v4382_v14 = vsel %vm4076_vm0, %v4379_v6, %v4381_v1  ;;  %v1390_v37 = vpop.permute.xlu1 %1389  ;;  %v2413_v1 = vld [vmem:[%s17034_s23 + $0xde] sm:$0xff] }
 0x4ec   :  { %v4443_v18 = vmax.f32 %v3961_v43, %v4382_v14  ;;  %v988_v28 = vpop.permute.xlu0 %987  ;;  %v1385_v24 = vpop.permute.xlu2 %1384  ;;  %v1523_v53 = vmul.f32 %v13528_v30, %v1390_v37  ;;  %v17249_v14 = vld [vmem:[#allocation41_spill] sm:$0xff] }
 0x4ed   :  { %v1125_v33 = vmul.f32 %v13510_v63, %v988_v28  ;;  %v1522_v56 = vmul.f32 %v13528_v30, %v1385_v24 }
 0x4ee   :  { %v13860_v5 = vadd.f32 %v1523_v53, %v13769_v57  ;;  %v4504_v32 = vrot.slane %v4443_v18, 2  ;;  %v17246_v57 = vld [vmem:[#allocation46_spill] sm:$0xff] }
 0x4ef   :  { %v1174_v38 = vadd.f32 %v1125_v33, %v777_v23  ;;  %v3117_v23 = vmul.f32 %v13579_v51, %v13790_v10  ;;  %v3116_v10 = vmul.f32 %v13579_v51, %v3003_v3  ;;  %v378_v33 = vmul.f32 %v13487_v42, %v13840_v55 }
 0x4f0   :  { %v4507_v60 = vsel %vm4482_vm1, %v4504_v32, %v13767_v61  ;;  %v2014_v61 = vld [vmem:[%s17034_s23 + $0xcd] sm:$0xff] }
 0x4f1   :  { %v13871_v29 = vadd.f32 %v1522_v56, %v1174_v38  ;;  %4561 = vmatpush.msra.mxu2 %v4507_v60  ;;  %2972 = vperm.xlu1 %10232, %v2811_v48   ;;  %v3166_v8 = vadd.f32 %v3117_v23, %v13711_v41  ;;  %v3165_v47 = vadd.f32 %v3116_v10, %v13727_v12 }
 0x4f2   :  { %2570 = vperm.xlu0 %10231, %v2413_v1   ;;  %3374 = vperm.xlu2 %10233, %v17246_v57   ;;  %v2809_v1 = vld [vmem:[%s17034_s23 + $0xd7] sm:$0xff] }
 0x4f3   :  { %v13874_v25 = vpop.permute.xlu1 %2595  ;;  %v3563_v58 = vadd.f32 %v3514_v62, %v3166_v8  ;;  %v2808_v62 = vld [vmem:[%s17034_s23 + $0xcf] sm:$0xff] }
 0x4f4   :  { %v2194_v27 = vpop.permute.xlu0 %2193  ;;  %v2591_v39 = vpop.permute.xlu2 %2590 }
 0x4f5   :  { %v2319_v59 = vmul.f32 %v13553_v20, %v2194_v27  ;;  %v2716_v44 = vmul.f32 %v13568_v31, %v2591_v39  ;;  %v2411_v27 = vld [vmem:[%s17034_s23 + $0xce] sm:$0xff] }
 0x4f7   :  { %v2368_v36 = vadd.f32 %v2319_v59, %v13813_v19  ;;  %v17250_v59 = vld [vmem:[#allocation44_spill] sm:$0xff] }
 0x4f9   :  { %v13889_v34 = vadd.f32 %v2716_v44, %v2368_v36  ;;  %2163 = vperm.xlu1 %10232, %v2014_v61  }
 0x4fa   :  { %3776 = vperm.xlu0 %10231, %v17247_v26   ;;  %2565 = vperm.xlu2 %10233, %v2412_v52  }
 0x4fb   :  { %v3802_v19 = vpop.permute.xlu1 %3801 }
 0x4fc   :  { %v3400_v40 = vpop.permute.xlu0 %3399  ;;  %v3797_v54 = vpop.permute.xlu2 %3796  ;;  %v3911_v50 = vmul.f32 %v13620_v13, %v3802_v19 }
 0x4fd   :  { %v3513_v41 = vmul.f32 %v13597_v11, %v3400_v40  ;;  %v3910_v16 = vmul.f32 %v13620_v13, %v3797_v54  ;;  %v17251_v40 = vld [vmem:[#allocation12_spill] sm:$0xff] }
 0x4fe   :  { %v3960_v3 = vadd.f32 %v3911_v50, %v3563_v58  ;;  %v17252_v54 = vld [vmem:[#allocation20_spill] sm:$0xff] }
 0x4ff   :  { %v3562_v15 = vadd.f32 %v3513_v41, %v3165_v47  ;;  %v17253_v41 = vld [vmem:[#allocation18_spill] sm:$0xff] }
 0x500   :  { %v4377_v2 = vrot.slane %v3960_v3, 1 }
 0x501   :  { %v13901_v43 = vadd.f32 %v3910_v16, %v3562_v15  ;;  %3369 = vperm.xlu1 %10232, %v17248_v49  }
 0x502   :  { %v4380_v46 = vsel %vm4076_vm0, %v4377_v2, %v4379_v6  ;;  %2967 = vperm.xlu0 %10231, %v2810_v17   ;;  %3771 = vperm.xlu2 %10233, %v17249_v14  }
 0x503   :  { %v4375_v12 = vrot.slane %v13901_v43, 1  ;;  %v4442_v37 = vmax.f32 %v3960_v3, %v4380_v46  ;;  %v983_v18 = vpop.permute.xlu1 %982  ;;  %v17254_v3 = vld [vmem:[#allocation49_spill] sm:$0xff] }
 0x504   :  { %v581_v28 = vpop.permute.xlu0 %580  ;;  %v978_v24 = vpop.permute.xlu2 %977  ;;  %v1124_v53 = vmul.f32 %v13510_v63, %v983_v18 }
 0x505   :  { %v726_v48 = vmul.f32 %v13481_v4, %v581_v28  ;;  %v4502_v38 = vrot.slane %v4442_v37, 2  ;;  %v4378_v6 = vsel %vm4076_vm0, %v4375_v12, %v4377_v2  ;;  %v1123_v23 = vmul.f32 %v13510_v63, %v978_v24 }
 0x506   :  { %v13915_v56 = vadd.f32 %v1124_v53, %v13845_v7  ;;  %v4441_v60 = vmax.f32 %v13901_v43, %v4378_v6  ;;  %v17255_v28 = vmov 0  ;;  %v17018_v24 = vmov 0.0  }
 0x507   :  { %v775_v57 = vadd.f32 %v726_v48, %v378_v33  ;;  %v4505_v55 = vsel %vm4482_vm1, %v4502_v38, %v4504_v32  ;;  %7086 = vst [vmem:[#allocation3] sm:$0x1] %v17018_v24 }
 0x508   :  { %4562 = vmatpush.msra.mxu2 %v4505_v55  ;;  %v13926_v39 = vrot.slane %v4441_v60, 2  ;;  %7093 = vst [vmem:[#allocation3 + $0x2d] sm:$0x1] %v17018_v24  ;;  %v17258_v55 = vmov 0 }
 0x509   :  { %v1172_v7 = vadd.f32 %v1123_v23, %v775_v57  ;;  %2962 = vperm.xlu1 %10232, %v2809_v1   ;;  %7094 = vst [vmem:[#allocation3 + $0x2e] sm:$0x1] %v17018_v24 }
 0x50a   :  { %2560 = vperm.xlu0 %10231, %v2411_v27   ;;  %3364 = vperm.xlu2 %10233, %v17250_v59   ;;  %v4503_v61 = vsel %vm4482_vm1, %v13926_v39, %v4502_v38  ;;  %7101 = vst [vmem:[#allocation3 + $0x5b] sm:$0x1] %v17018_v24 }
 0x50b   :  { %4563 = vmatpush.msra.mxu2 %v4503_v61  ;;  %v2189_v36 = vpop.permute.xlu1 %2188  ;;  %8119 = vst [vmem:[#allocation4] sm:$0x1] %v17018_v24 }
 0x50c   :  { %v1787_v44 = vpop.permute.xlu0 %1786  ;;  %v2184_v52 = vpop.permute.xlu2 %2183  ;;  %v2318_v32 = vmul.f32 %v13553_v20, %v2189_v36  ;;  %8123 = vst [vmem:[#allocation4 + $0x13] sm:$0x1] %v17018_v24 }
 0x50d   :  { %v1920_v8 = vmul.f32 %v13538_v0, %v1787_v44  ;;  %v2317_v19 = vmul.f32 %v13553_v20, %v2184_v52  ;;  %8124 = vst [vmem:[#allocation4 + $0x14] sm:$0x1] %v17018_v24  ;;  %v17261_v52 = vmov 0 }
 0x50e   :  { %v13934_v10 = vadd.f32 %v2318_v32, %v13825_v35  ;;  %8128 = vst [vmem:[#allocation4 + $0x27] sm:$0x1] %v17018_v24 }
 0x50f   :  { %v1969_v26 = vadd.f32 %v1920_v8, %v13860_v5  ;;  %v3975_v5 = vlaneseq }
 0x511   :  { %v13941_v58 = vadd.f32 %v2317_v19, %v1969_v26  ;;  %2957 = vperm.xlu1 %10232, %v2808_v62   ;;  %v13951_v2 = vshrl.u32 %v3975_v5, 7  ;;  %v13955_v14 = vand.u32 127, %v3975_v5 }
 0x512   :  { %3766 = vperm.xlu0 %10231, %v17251_v40   ;;  %3359 = vperm.xlu2 %10233, %v17252_v54  }
 0x513   :  { %v13945_v50 = vpop.permute.xlu1 %3394  ;;  %v3978_v61 = vadd.s32 16, %v13951_v2 }
 0x514   :  { %v2993_v47 = vpop.permute.xlu0 %2992  ;;  %v3390_v35 = vpop.permute.xlu2 %3389  ;;  %v3512_v8 = vmul.f32 %v13597_v11, %v13945_v50 }
 0x515   :  { %v3993_v36 = vmul.u32 2, %v3978_v61  ;;  %v3511_v32 = vmul.f32 %v13597_v11, %v3390_v35  ;;  %v3979_v35 = vadd.s32 24, %v13951_v2 }
 0x516   :  { %v3561_v50 = vadd.f32 %v3512_v8, %v13836_v21 }
 0x517   :  { %vm14015_vm7 = vcmp.eq.s32.totalorder %v13955_v14, %v3993_v36 }
 0x518   :  { %v17262_v52 = vsel %vm14015_vm7, 4294967295, %v17261_v52 }
 0x519   :  { %3354 = vperm.xlu1 %10232, %v13546_v22   ;;  %v3991_v22 = vmul.u32 2, %v13951_v2  ;;  %17263 = vst [vmem:[#allocation16_spill] sm:$0xff] %v17262_v52 }
 0x51a   :  { %3761 = vperm.xlu0 %10231, %v17253_v41   ;;  %3756 = vperm.xlu2 %10233, %v17254_v3  }
 0x51b   :  { %v576_v15 = vpop.permute.xlu1 %575  ;;  %vm13961_vm2 = vcmp.eq.s32.totalorder %v13955_v14, %v3991_v22 }
 0x51c   :  { %v228_v20 = vpop.permute.xlu0 %227  ;;  %v1375_v16 = vpop.permute.xlu2 %1374  ;;  %v725_v17 = vmul.f32 %v13481_v4, %v576_v15  ;;  %v17256_v28 = vsel %vm13961_vm2, 4294967295, %v17255_v28  ;;  %v13967_v4 = vadd.s32 128, %v13955_v14  ;;  %v3994_v15 = vmul.u32 2, %v3979_v35 }
 0x51d   :  { %v377_v49 = vmul.f32 %v13487_v42, %v228_v20  ;;  %v1520_v46 = vmul.f32 %v13528_v30, %v1375_v16  ;;  %17257 = vst [vmem:[#allocation42_spill] sm:$0xff] %v17256_v28  ;;  %v10371_v42 = vmov 1.0   ;;  %v17264_v16 = vmov 0 }
 0x51e   :  { %9528 = vmatmul.msk.f32.vlgmr.msra.gmra.mxu0 %vm13961_vm2, %v10371_v42  ;;  %vm4004_vm4 = vcmp.eq.s32.totalorder %v13967_v4, %v3991_v22  ;;  %vm4008_vm8 = vcmp.eq.s32.totalorder %v13967_v4, %v3993_v36  ;;  %vm14041_vm9 = vcmp.eq.s32.totalorder %v13955_v14, %v3994_v15  ;;  %vm4010_vm10 = vcmp.eq.s32.totalorder %v13967_v4, %v3994_v15 }
 0x51f   :  { %v13958_v37 = vadd.f32 %v1520_v46, %v1172_v7  ;;  %v774_v18 = vadd.f32 %v725_v17, %v377_v49  ;;  %v4028_v33 = vsel %vm4004_vm4, 1.0, %v17018_v24  ;;  %v17265_v16 = vsel %vm14041_vm9, 4294967295, %v17264_v16 }
 0x520   :  { %9541 = vmatmul.msk.f32.vlgmr.msra.gmra.mxu1 %vm4175_vm3, %v4028_v33  ;;  %9566 = vmatmul.msk.f32.vlgmr.msra.gmra.mxu3 %vm4175_vm3, %v4028_v33  ;;  %17266 = vst [vmem:[#allocation51_spill] sm:$0xff] %v17265_v16  ;;  %v4034_v21 = vsel %vm4010_vm10, 1.0, %v17018_v24  ;;  %v17270_v36 = vmov 0 }
 0x522   :  { %3751 = vperm.xlu0 %10231, %v13587_v45   ;;  %v3977_v45 = vadd.s32 8, %v13951_v2 }
 0x523   :  { %v1782_v53 = vpop.permute.xlu1 %1781 }
 0x524   :  { %v1380_v48 = vpop.permute.xlu0 %1379  ;;  %v13978_v38 = vpop.permute.xlu2 %2580  ;;  %v1919_v6 = vmul.f32 %v13538_v0, %v1782_v53  ;;  %v3992_v57 = vmul.u32 2, %v3977_v45 }
 0x525   :  { %v1521_v1 = vmul.f32 %v13528_v30, %v1380_v48  ;;  %v2717_v30 = vmul.f32 %v13568_v31, %v13874_v25  ;;  %v3980_v48 = vadd.s32 32, %v13951_v2 }
 0x526   :  { %v13988_v60 = vadd.f32 %v1919_v6, %v13871_v29  ;;  %vm13994_vm5 = vcmp.eq.s32.totalorder %v13955_v14, %v3992_v57  ;;  %vm4006_vm6 = vcmp.eq.s32.totalorder %v13967_v4, %v3992_v57 }
 0x527   :  { %v1570_v23 = vadd.f32 %v1521_v1, %v13915_v56  ;;  %v17259_v55 = vsel %vm13994_vm5, 4294967295, %v17258_v55  ;;  %9529 = vmatmul.msk.f32.gmra.mxu0 %vm13994_vm5, %v10371_v42  ;;  %v4030_v29 = vsel %vm4006_vm6, 1.0, %v17018_v24  ;;  %v3114_v56 = vmul.f32 %v13579_v51, %v2993_v47 }
 0x528   :  { %17260 = vst [vmem:[#allocation21_spill] sm:$0xff] %v17259_v55  ;;  %9542 = vmatmul.msk.f32.gmra.mxu1 %vm4175_vm3, %v4030_v29  ;;  %9567 = vmatmul.msk.f32.gmra.mxu3 %vm4175_vm3, %v4030_v29  ;;  %v2766_v25 = vadd.f32 %v2717_v30, %v13788_v9  ;;  %v4032_v9 = vsel %vm4008_vm8, 1.0, %v17018_v24  ;;  %v3995_v1 = vmul.u32 2, %v3980_v48 }
 0x52a   :  { %v3163_v44 = vadd.f32 %v3114_v56, %v2766_v25  ;;  %vm14075_vm11 = vcmp.eq.s32.totalorder %v13955_v14, %v3995_v1  ;;  %v17267_v56 = vmov 0  ;;  %vm4012_vm12 = vcmp.eq.s32.totalorder %v13967_v4, %v3995_v1 }
 0x52b   :  { %v14006_v27 = vpop.permute.xlu1 %2987  ;;  %v17268_v56 = vsel %vm14075_vm11, 4294967295, %v17267_v56 }
 0x52c   :  { %v14008_v7 = vpop.permute.xlu0 %2585  ;;  %v3787_v59 = vpop.permute.xlu2 %3786  ;;  %v3560_v26 = vadd.f32 %v3511_v32, %v3163_v44  ;;  %17269 = vst [vmem:[#allocation24_spill] sm:$0xff] %v17268_v56  ;;  %v3113_v15 = vmul.f32 %v13579_v51, %v14006_v27 }
 0x52d   :  { %v3908_v62 = vmul.f32 %v13620_v13, %v3787_v59  ;;  %v3981_v59 = vadd.s32 40, %v13951_v2 }
 0x52f   :  { %9530 = vmatmul.msk.f32.gmra.mxu0 %vm14015_vm7, %v10371_v42  ;;  %v14035_v41 = vadd.f32 %v3908_v62, %v3560_v26  ;;  %v3996_v61 = vmul.u32 2, %v3981_v59  ;;  %v3982_v62 = vadd.s32 48, %v13951_v2  ;;  %v9671_v26 = vld [vmem:[%s16957_s3 + $0xe8] sm:$0xff] }
 0x530   :  { %9543 = vmatmul.msk.f32.gmra.mxu1 %vm4175_vm3, %v4032_v9  ;;  %9568 = vmatmul.msk.f32.gmra.mxu3 %vm4175_vm3, %v4032_v9 }
 0x531   :  { %vm14090_vm13 = vcmp.eq.s32.totalorder %v13955_v14, %v3996_v61  ;;  %vm4014_vm14 = vcmp.eq.s32.totalorder %v13967_v4, %v3996_v61  ;;  %v3997_v9 = vmul.u32 2, %v3982_v62 }
 0x532   :  { %v17271_v36 = vsel %vm14090_vm13, 4294967295, %v17270_v36  ;;  %v4038_v44 = vsel %vm4014_vm14, 1.0, %v17018_v24 }
 0x533   :  { %v973_v19 = vpop.permute.xlu1 %972  ;;  %17272 = vst [vmem:[#allocation22_spill] sm:$0xff] %v17271_v36  ;;  %vm14107_vm15 = vcmp.eq.s32.totalorder %v13955_v14, %v3997_v9  ;;  %vm4016_vm4 = vcmp.eq.s32.totalorder %v13967_v4, %v3997_v9  ;;  %v3985_v9 = vadd.s32 72, %v13951_v2 }
 0x534   :  { %v3792_v40 = vpop.permute.xlu0 %3791  ;;  %v14028_v54 = vpop.permute.xlu2 %2173  ;;  %v1122_v47 = vmul.f32 %v13510_v63, %v973_v19  ;;  %v4371_v63 = vrot.slane %v14035_v41, 1 }
 0x535   :  { %v3909_v3 = vmul.f32 %v13620_v13, %v3792_v40  ;;  %v4040_v40 = vsel %vm4016_vm4, 1.0, %v17018_v24 }
 0x536   :  { %v14038_v5 = vadd.f32 %v1122_v47, %v774_v18 }
 0x537   :  { %v3958_v20 = vadd.f32 %v3909_v3, %v3561_v50  ;;  %9531 = vmatmul.msk.f32.gmra.mxu0 %vm14041_vm9, %v10371_v42  ;;  %v3983_v50 = vadd.s32 56, %v13951_v2 }
 0x538   :  { %9544 = vmatmul.msk.f32.gmra.mxu1 %vm4175_vm3, %v4034_v21  ;;  %9569 = vmatmul.msk.f32.gmra.mxu3 %vm4175_vm3, %v4034_v21 }
 0x539   :  { %v4373_v17 = vrot.slane %v3958_v20, 1  ;;  %v3998_v3 = vmul.u32 2, %v3983_v50 }
 0x53b   :  { %v4376_v49 = vsel %vm4076_vm0, %v4373_v17, %v4375_v12  ;;  %v14054_v46 = vpop.permute.xlu1 %2178  ;;  %v4374_v22 = vsel %vm4076_vm0, %v4371_v63, %v4373_v17  ;;  %vm14124_vm6 = vcmp.eq.s32.totalorder %v13955_v14, %v3998_v3  ;;  %vm4018_vm8 = vcmp.eq.s32.totalorder %v13967_v4, %v3998_v3 }
 0x53c   :  { %v4440_v18 = vmax.f32 %v3958_v20, %v4376_v49  ;;  %v1777_v53 = vpop.permute.xlu0 %1776  ;;  %v4439_v33 = vmax.f32 %v14035_v41, %v4374_v22  ;;  %v14064_v6 = vpop.permute.xlu2 %3379  ;;  %v4042_v21 = vsel %vm4018_vm8, 1.0, %v17018_v24  ;;  %v3162_v49 = vadd.f32 %v3113_v15, %v13889_v34  ;;  %v9667_v20 = vld [vmem:[%s16957_s3 + $0xc8] sm:$0xff] }
 0x53d   :  { %v1918_v43 = vmul.f32 %v13538_v0, %v1777_v53  ;;  %v4036_v0 = vsel %vm4012_vm12, 1.0, %v17018_v24  ;;  %v3984_v53 = vadd.s32 64, %v13951_v2  ;;  %v2714_v34 = vmul.f32 %v13568_v31, %v13978_v38 }
 0x53e   :  { %v4498_v12 = vrot.slane %v4440_v18, 2  ;;  %v14066_v45 = vrot.slane %v4439_v33, 2 }
 0x53f   :  { %v14068_v57 = vadd.f32 %v1918_v43, %v1570_v23  ;;  %9532 = vmatmul.msk.f32.gmra.mxu0 %vm14075_vm11, %v10371_v42  ;;  %v3999_v43 = vmul.u32 2, %v3984_v53 }
 0x540   :  { %v4501_v30 = vsel %vm4482_vm1, %v4498_v12, %v13926_v39  ;;  %v4499_v29 = vsel %vm4482_vm1, %v14066_v45, %v4498_v12  ;;  %9545 = vmatmul.msk.f32.gmra.mxu1 %vm4175_vm3, %v4036_v0  ;;  %9570 = vmatmul.msk.f32.gmra.mxu3 %vm4175_vm3, %v4036_v0 }
 0x541   :  { %4564 = vmatpush.msra.mxu2 %v4501_v30  ;;  %vm14144_vm10 = vcmp.eq.s32.totalorder %v13955_v14, %v3999_v43  ;;  %vm4020_vm12 = vcmp.eq.s32.totalorder %v13967_v4, %v3999_v43 }
 0x542   :  { %v4044_v0 = vsel %vm4020_vm12, 1.0, %v17018_v24 }
 0x543   :  { %4565 = vmatpush.msra.mxu2 %v4499_v29  ;;  %v3385_v23 = vpop.permute.xlu1 %3384  ;;  %v2715_v29 = vmul.f32 %v13568_v31, %v14008_v7  ;;  %v2763_v31 = vadd.f32 %v2714_v34, %v13941_v58  ;;  %v3509_v58 = vmul.f32 %v13597_v11, %v14064_v6 }
 0x544   :  { %v2983_v39 = vpop.permute.xlu0 %2982  ;;  %v14087_v25 = vpop.permute.xlu2 %2168  ;;  %v3510_v17 = vmul.f32 %v13597_v11, %v3385_v23 }
 0x545   :  { %v3112_v38 = vmul.f32 %v13579_v51, %v2983_v39  ;;  %v2764_v7 = vadd.f32 %v2715_v29, %v13934_v10 }
 0x546   :  { %v3559_v33 = vadd.f32 %v3510_v17, %v3162_v49 }
 0x547   :  { %9533 = vmatmul.msk.f32.gmra.mxu0 %vm14090_vm13, %v10371_v42  ;;  %v3161_v50 = vadd.f32 %v3112_v38, %v2764_v7 }
 0x548   :  { %9546 = vmatmul.msk.f32.gmra.mxu1 %vm4175_vm3, %v4038_v44  ;;  %9571 = vmatmul.msk.f32.gmra.mxu3 %vm4175_vm3, %v4038_v44 }
 0x54b   :  { %v14099_v32 = vpop.permute.xlu1 %1771 }
 0x54c   :  { %v14101_v8 = vpop.permute.xlu0 %1369  ;;  %v3375_v19 = vpop.permute.xlu2 %3374 }
 0x54d   :  { %v3508_v3 = vmul.f32 %v13597_v11, %v3375_v19  ;;  %v3986_v19 = vadd.s32 80, %v13951_v2 }
 0x54f   :  { %9534 = vmatmul.msk.f32.gmra.mxu0 %vm14107_vm15, %v10371_v42 }
 0x550   :  { %9547 = vmatmul.msk.f32.gmra.mxu1 %vm4175_vm3, %v4040_v40  ;;  %9572 = vmatmul.msk.f32.gmra.mxu3 %vm4175_vm3, %v4040_v40 }
 0x553   :  { %v2978_v47 = vpop.permute.xlu1 %2977 }
 0x554   :  { %v14116_v35 = vpop.permute.xlu0 %2575  ;;  %v14137_v27 = vpop.permute.xlu2 %2565  ;;  %v3111_v23 = vmul.f32 %v13579_v51, %v2978_v47 }
 0x556   :  { %v3160_v47 = vadd.f32 %v3111_v23, %v2763_v31 }
 0x557   :  { %9535 = vmatmul.msk.f32.gmra.mxu0 %vm14124_vm6, %v10371_v42 }
 0x558   :  { %9548 = vmatmul.msk.f32.gmra.mxu1 %vm4175_vm3, %v4042_v21  ;;  %9573 = vmatmul.msk.f32.gmra.mxu3 %vm4175_vm3, %v4042_v21 }
 0x55b   :  { %v14135_v22 = vpop.permute.xlu1 %1766 }
 0x55c   :  { %v3782_v18 = vpop.permute.xlu0 %3781  ;;  %v3772_v41 = vpop.permute.xlu2 %3771 }
 0x55d   :  { %v3907_v48 = vmul.f32 %v13620_v13, %v3782_v18  ;;  %v3905_v15 = vmul.f32 %v13620_v13, %v3772_v41  ;;  %v3558_v18 = vadd.f32 %v3509_v58, %v3161_v50 }
 0x55f   :  { %v3956_v12 = vadd.f32 %v3907_v48, %v3559_v33  ;;  %9536 = vmatmul.msk.f32.gmra.mxu0 %vm14144_vm10, %v10371_v42  ;;  %v4001_v33 = vmul.u32 2, %v3986_v19 }
 0x560   :  { %9549 = vmatmul.msk.f32.gmra.mxu1 %vm4175_vm3, %v4044_v0  ;;  %9574 = vmatmul.msk.f32.gmra.mxu3 %vm4175_vm3, %v4044_v0 }
 0x561   :  { %v4369_v30 = vrot.slane %v3956_v12, 1  ;;  %vm14196_vm8 = vcmp.eq.s32.totalorder %v13955_v14, %v4001_v33  ;;  %vm4024_vm12 = vcmp.eq.s32.totalorder %v13967_v4, %v4001_v33 }
 0x563   :  { %v4372_v59 = vsel %vm4076_vm0, %v4369_v30, %v4371_v63  ;;  %v14161_v61 = vpop.permute.xlu1 %2972  ;;  %v4000_v63 = vmul.u32 2, %v3985_v9 }
 0x564   :  { %v4438_v44 = vmax.f32 %v3956_v12, %v4372_v59  ;;  %v14164_v62 = vpop.permute.xlu0 %2570  ;;  %v4048_v12 = vsel %vm4024_vm12, 1.0, %v17018_v24  ;;  %v14210_v0 = vpop.permute.xlu2 %3364 }
 0x565   :  { %vm14174_vm14 = vcmp.eq.s32.totalorder %v13955_v14, %v4000_v63  ;;  %vm4022_vm4 = vcmp.eq.s32.totalorder %v13967_v4, %v4000_v63 }
 0x566   :  { %v4494_v40 = vrot.slane %v4438_v44, 2  ;;  %v4046_v10 = vsel %vm4022_vm4, 1.0, %v17018_v24  ;;  %v3987_v44 = vadd.s32 88, %v13951_v2  ;;  %v10362_v2 = vld [vmem:[%s16955_s1 + $0x4] ss:$0 sm:$0xff] }
 0x567   :  { %9537 = vmatmul.msk.f32.gmra.mxu0 %vm14174_vm14, %v10371_v42 }
 0x568   :  { %v4497_v51 = vsel %vm4482_vm1, %v4494_v40, %v14066_v45  ;;  %v3557_v45 = vadd.f32 %v3508_v3, %v3160_v47  ;;  %9550 = vmatmul.msk.f32.gmra.mxu1 %vm4175_vm3, %v4046_v10  ;;  %9575 = vmatmul.msk.f32.gmra.mxu3 %vm4175_vm3, %v4046_v10  ;;  %v1917_v47 = vmul.f32 %v10362_v2, %v14099_v32 }
 0x569   :  { %4566 = vmatpush.msra.mxu2 %v4497_v51 }
 0x56a   :  { %v14192_v49 = vadd.f32 %v3905_v15, %v3557_v45  ;;  %v1966_v32 = vadd.f32 %v1917_v47, %v13958_v37 }
 0x56b   :  { %v14187_v17 = vpop.permute.xlu1 %2163 }
 0x56c   :  { %v3777_v21 = vpop.permute.xlu0 %3776  ;;  %v4365_v6 = vrot.slane %v14192_v49, 1  ;;  %v3360_v10 = vpop.permute.xlu2 %3359 }
 0x56d   :  { %v3906_v53 = vmul.f32 %v13620_v13, %v3777_v21  ;;  %v10365_v21 = vld [vmem:[%s16955_s1 + $0x7] ss:$0 sm:$0xff] }
 0x56e   :  { %v3110_v19 = vmul.f32 %v10365_v21, %v14161_v61 }
 0x56f   :  { %v3955_v48 = vadd.f32 %v3906_v53, %v3558_v18  ;;  %9538 = vmatmul.msk.f32.gmra.mxu0 %vm14196_vm8, %v10371_v42  ;;  %v10366_v53 = vld [vmem:[%s16955_s1 + $0x8] ss:$0 sm:$0xff] }
 0x570   :  { %9551 = vmatmul.msk.f32.gmra.mxu1 %vm4175_vm3, %v4048_v12  ;;  %9576 = vmatmul.msk.f32.gmra.mxu3 %vm4175_vm3, %v4048_v12 }
 0x571   :  { %v4367_v43 = vrot.slane %v3955_v48, 1 }
 0x573   :  { %v4370_v13 = vsel %vm4076_vm0, %v4367_v43, %v4369_v30  ;;  %v3370_v34 = vpop.permute.xlu1 %3369  ;;  %v4368_v29 = vsel %vm4076_vm0, %v4365_v6, %v4367_v43  ;;  %v4002_v30 = vmul.u32 2, %v3987_v44 }
 0x574   :  { %v4437_v23 = vmax.f32 %v3955_v48, %v4370_v13  ;;  %v2968_v59 = vpop.permute.xlu0 %2967  ;;  %v4436_v38 = vmax.f32 %v14192_v49, %v4368_v29 }
 0x575   :  { %vm14222_vm4 = vcmp.eq.s32.totalorder %v13955_v14, %v4002_v30  ;;  %vm4026_vm12 = vcmp.eq.s32.totalorder %v13967_v4, %v4002_v30  ;;  %v10363_v14 = vld [vmem:[%s16955_s1 + $0x5] ss:$0 sm:$0xff]  ;;  %v10364_v4 = vld [vmem:[%s16955_s1 + $0x6] ss:$0 sm:$0xff]  ;;  %v3109_v29 = vmul.f32 %v10365_v21, %v2968_v59 }
 0x576   :  { %v4492_v9 = vrot.slane %v4437_v23, 2  ;;  %v14216_v31 = vrot.slane %v4436_v38, 2  ;;  %v2316_v50 = vmul.f32 %v10363_v14, %v14054_v46  ;;  %v2713_v15 = vmul.f32 %v10364_v4, %v14116_v35  ;;  %v10367_v38 = vld [vmem:[%s16955_s1 + $0x9] ss:$0 sm:$0xff] }
 0x577   :  { %9539 = vmatmul.msk.f32.gmra.mxu0 %vm14222_vm4, %v10371_v42  ;;  %v2314_v46 = vmul.f32 %v10363_v14, %v14087_v25  ;;  %v2711_v45 = vmul.f32 %v10364_v4, %v14137_v27  ;;  %v3507_v35 = vmul.f32 %v10366_v53, %v3370_v34  ;;  %v2712_v25 = vmul.f32 %v10364_v4, %v14164_v62 }
 0x578   :  { %v4495_v7 = vsel %vm4482_vm1, %v4492_v9, %v4494_v40  ;;  %v4493_v41 = vsel %vm4482_vm1, %v14216_v31, %v4492_v9  ;;  %v4050_v40 = vsel %vm4026_vm12, 1.0, %v17018_v24  ;;  %v2365_v58 = vadd.f32 %v2316_v50, %v13988_v60 }
 0x579   :  { %4567 = vmatpush.msra.mxu2 %v4495_v7  ;;  %9552 = vmatmul.msk.f32.gmra.mxu1 %vm4175_vm3, %v4050_v40  ;;  %v2363_v18 = vadd.f32 %v2314_v46, %v1966_v32  ;;  %v2315_v60 = vmul.f32 %v10363_v14, %v14028_v54  ;;  %v10368_v54 = vld [vmem:[%s16955_s1 + $0x3] ss:$0 sm:$0xff]  ;;  %v3505_v9 = vmul.f32 %v10366_v53, %v3360_v10  ;;  %v3757_v7 = vpop.permute.xlu2 %3756  ;;  %vm4675_vm12 = vcmask 516096  }
 0x57a   :  { %9577 = vmatmul.msk.f32.gmra.mxu3 %vm4175_vm3, %v4050_v40  ;;  %v2762_v37 = vadd.f32 %v2713_v15, %v2365_v58  ;;  %v1519_v34 = vmul.f32 %v10368_v54, %v14101_v8  ;;  %v3506_v50 = vmul.f32 %v10366_v53, %v14210_v0  ;;  %v3902_v32 = vmul.f32 %v10367_v38, %v3757_v7 }
 0x57b   :  { %4568 = vmatpush.msra.mxu2 %v4493_v41  ;;  %v2963_v51 = vpop.permute.xlu1 %2962  ;;  %v2760_v48 = vadd.f32 %v2711_v45, %v2363_v18  ;;  %v2364_v43 = vadd.f32 %v2315_v60, %v14068_v57  ;;  %v1916_v57 = vmul.f32 %v10362_v2, %v14135_v22  ;;  %vm4677_vm3 = vcmask 523264   ;;  %4676 = vst.msk [vmem:[#allocation2] sm:$0x1] %vm4675_vm12, %v17018_v24 }
 0x57c   :  { %v2561_v3 = vpop.permute.xlu0 %2560  ;;  %v3108_v33 = vmul.f32 %v10365_v21, %v2963_v51  ;;  %v3159_v27 = vadd.f32 %v3110_v19, %v2762_v37  ;;  %v1568_v40 = vadd.f32 %v1519_v34, %v14038_v5  ;;  %v2313_v51 = vmul.f32 %v10363_v14, %v14187_v17  ;;  %v4734_v34 = vld [vmem:[%s16957_s3 + $0x28] sm:$0xff]  ;;  %4690 = vst.msk [vmem:[#allocation2 + $0x61] sm:$0x1] %vm4675_vm12, %v17018_v24 }
 0x57d   :  { %v2761_v62 = vadd.f32 %v2712_v25, %v2364_v43  ;;  %v2710_v46 = vmul.f32 %v10364_v4, %v2561_v3  ;;  %4691 = vst.msk [vmem:[#allocation2 + $0x62] sm:$0x1] %vm4675_vm12, %v17018_v24 }
 0x57e   :  { %v3556_v61 = vadd.f32 %v3507_v35, %v3159_v27  ;;  %v3157_v23 = vadd.f32 %v3108_v33, %v2760_v48  ;;  %v1965_v15 = vadd.f32 %v1916_v57, %v1568_v40  ;;  %v9584_v40 = vld [vmem:[%s16957_s3 + $0x70] sm:$0xff]  ;;  %4704 = vst.msk [vmem:[#allocation2 + $0xc3] sm:$0x1] %vm4675_vm12, %v17018_v24 }
 0x57f   :  { %v3158_v59 = vadd.f32 %v3109_v29, %v2761_v62 }
 0x580   :  { %v3554_v41 = vadd.f32 %v3505_v9, %v3157_v23  ;;  %v2362_v18 = vadd.f32 %v2313_v51, %v1965_v15  ;;  %v4735_v23 = vld [vmem:[%s16957_s3 + $0x30] sm:$0xff]  ;;  %v9641_v51 = vld [vmem:[%s16957_s3 + $0xb8] sm:$0xff] }
 0x581   :  { %v3555_v2 = vadd.f32 %v3506_v50, %v3158_v59  ;;  %v4732_v50 = vld [vmem:[%s16957_s3 + $0x18] sm:$0xff]  ;;  %5203 = vmatpush.msrb.mxu0 %v9641_v51  ;;  %v4731_v15 = vld [vmem:[%s16957_s3 + $0x10] sm:$0xff] }
 0x582   :  { %v3951_v22 = vadd.f32 %v3902_v32, %v3554_v41  ;;  %v2759_v0 = vadd.f32 %v2710_v46, %v2362_v18  ;;  %v9585_v41 = vld [vmem:[%s16957_s3 + $0x78] sm:$0xff] }
 0x583   :  { %v2958_v13 = vpop.permute.xlu1 %2957  ;;  %4850 = vmatpush.msrb.mxu1 %v9585_v41  ;;  %v9581_v18 = vld [vmem:[%s16957_s3 + $0x58] sm:$0xff] }
 0x584   :  { %v3767_v12 = vpop.permute.xlu0 %3766  ;;  %v3107_v5 = vmul.f32 %v10365_v21, %v2958_v13  ;;  %v4359_v14 = vrot.slane %v3951_v22, 1 }
 0x585   :  { %v3904_v44 = vmul.f32 %v10367_v38, %v3767_v12  ;;  %4851 = vmatpush.msrb.mxu1 %v9584_v40 }
 0x587   :  { %v3953_v30 = vadd.f32 %v3904_v44, %v3556_v61 }
 0x589   :  { %v4363_v47 = vrot.slane %v3953_v30, 1 }
 0x58b   :  { %v4366_v8 = vsel %vm4076_vm0, %v4363_v47, %v4365_v6  ;;  %v3355_v19 = vpop.permute.xlu1 %3354  ;;  %v3156_v6 = vadd.f32 %v3107_v5, %v2759_v0  ;;  %v4729_v5 = vld [vmem:[%s16957_s3] sm:$0xff]  ;;  %v9637_v0 = vld [vmem:[%s16957_s3 + $0x98] sm:$0xff] }
 0x58c   :  { %v4435_v10 = vmax.f32 %v3953_v30, %v4366_v8  ;;  %v3762_v58 = vpop.permute.xlu0 %3761  ;;  %v3504_v33 = vmul.f32 %v10366_v53, %v3355_v19  ;;  %v4736_v53 = vld [vmem:[%s16957_s3 + $0x38] sm:$0xff]  ;;  %v9583_v8 = vld [vmem:[%s16957_s3 + $0x68] sm:$0xff] }
 0x58d   :  { %v3903_v45 = vmul.f32 %v10367_v38, %v3762_v58  ;;  %5010 = vmatpush.msrb.mxu3 %v4736_v53  ;;  %v9639_v58 = vld [vmem:[%s16957_s3 + $0xa8] sm:$0xff]  ;;  %4852 = vmatpush.msrb.mxu1 %v9583_v8 }
 0x58e   :  { %v4488_v37 = vrot.slane %v4435_v10, 2  ;;  %v3553_v27 = vadd.f32 %v3504_v33, %v3156_v6  ;;  %v9640_v10 = vld [vmem:[%s16957_s3 + $0xb0] sm:$0xff] }
 0x58f   :  { %v3952_v35 = vadd.f32 %v3903_v45, %v3555_v2  ;;  %5011 = vmatpush.msrb.mxu3 %v4735_v23  ;;  %5204 = vmatpush.msrb.mxu0 %v9640_v10  ;;  %v4730_v2 = vld [vmem:[%s16957_s3 + $0x8] sm:$0xff]  ;;  %v9636_v6 = vld [vmem:[%s16957_s3 + $0x90] sm:$0xff] }
 0x590   :  { %v4491_v17 = vsel %vm4482_vm1, %v4488_v37, %v14216_v31 }
 0x591   :  { %v4361_v49 = vrot.slane %v3952_v35, 1  ;;  %4569 = vmatpush.msra.mxu2 %v4491_v17  ;;  %5012 = vmatpush.msrb.mxu3 %v4734_v34  ;;  %v9580_v17 = vld [vmem:[%s16957_s3 + $0x50] sm:$0xff] }
 0x592   :  { %5205 = vmatpush.msrb.mxu0 %v9639_v58 }
 0x593   :  { %v4364_v60 = vsel %vm4076_vm0, %v4361_v49, %v4363_v47  ;;  %v4362_v3 = vsel %vm4076_vm0, %v4359_v14, %v4361_v49  ;;  %v4733_v47 = vld [vmem:[%s16957_s3 + $0x20] sm:$0xff]  ;;  %v9579_v49 = vld [vmem:[%s16957_s3 + $0x48] sm:$0xff] }
 0x594   :  { %v4434_v4 = vmax.f32 %v3952_v35, %v4364_v60  ;;  %v3752_v48 = vpop.permute.xlu0 %3751  ;;  %v4433_v25 = vmax.f32 %v3951_v22, %v4362_v3  ;;  %5013 = vmatpush.msrb.mxu3 %v4733_v47  ;;  %v9582_v22 = vld [vmem:[%s16957_s3 + $0x60] sm:$0xff] }
 0x595   :  { %v3901_v43 = vmul.f32 %v10367_v38, %v3752_v48  ;;  %v14289_v38 = vld [vmem:[%s16956_s2] ss:$0 sm:$0xff]  ;;  %4853 = vmatpush.msrb.mxu1 %v9582_v22  ;;  %v9635_v48 = vld [vmem:[%s16957_s3 + $0x88] sm:$0xff] }
 0x596   :  { %v4486_v21 = vrot.slane %v4434_v4, 2  ;;  %v4484_v12 = vrot.slane %v4433_v25, 2  ;;  %5014 = vmatpush.msrb.mxu3 %v4732_v50  ;;  %v9638_v35 = vld [vmem:[%s16957_s3 + $0xa0] sm:$0xff] }
 0x597   :  { %v3950_v13 = vadd.f32 %v3901_v43, %v3553_v27  ;;  %4854 = vmatpush.msrb.mxu1 %v9581_v18  ;;  %5206 = vmatpush.msrb.mxu0 %v9638_v35  ;;  %v9578_v3 = vld [vmem:[%s16957_s3 + $0x40] sm:$0xff]  ;;  %v9672_v35 = vld [vmem:[%s16957_s3 + $0xf0] sm:$0xff] }
 0x598   :  { %v4489_v31 = vsel %vm4482_vm1, %v4486_v21, %v4488_v37  ;;  %v4487_v29 = vsel %vm4482_vm1, %v4484_v12, %v4486_v21  ;;  %5015 = vmatpush.msrb.mxu3 %v4731_v15  ;;  %v9634_v21 = vld [vmem:[%s16957_s3 + $0x80] sm:$0xff] }
 0x599   :  { %v4358_v61 = vrot.slane %v3950_v13, 1  ;;  %4570 = vmatpush.msra.mxu2 %v4489_v31  ;;  %4855 = vmatpush.msrb.mxu1 %v9580_v17 }
 0x59a   :  { %5016 = vmatpush.msrb.mxu3 %v4730_v2  ;;  %5207 = vmatpush.msrb.mxu0 %v9637_v0 }
 0x59b   :  { %v4360_v44 = vsel %vm4076_vm0, %v4358_v61, %v4359_v14  ;;  %4571 = vmatpush.msra.mxu2 %v4487_v29  ;;  %v4232_v9 = vpop.f32.mrf.mxu0  ;;  %4856 = vmatpush.msrb.mxu1 %v9579_v49 }
 0x59c   :  { %v4432_v54 = vmax.f32 %v3950_v13, %v4360_v44  ;;  %v4233_v30 = vadd.f32 %v14289_v38, %v4232_v9  ;;  %5017 = vmatpush.msrb.mxu3 %v4729_v5  ;;  %5208 = vmatpush.msrb.mxu0 %v9636_v6  ;;  %v9673_v5 = vld [vmem:[%s16957_s3 + $0xf8] sm:$0xff]  ;;  %v9670_v6 = vld [vmem:[%s16957_s3 + $0xe0] sm:$0xff] }
 0x59d   :  { %v4285_v7 = vpop.f32.mrf.mxu1  ;;  %4857 = vmatpush.msrb.mxu1 %v9578_v3 }
 0x59e   :  { %v4483_v62 = vrot.slane %v4432_v54, 2  ;;  %v4286_v59 = vadd.f32 %v4285_v7, %v4233_v30  ;;  %5209 = vmatpush.msrb.mxu0 %v9635_v48 }
 0x5a0   :  { %v4485_v57 = vsel %vm4482_vm1, %v4483_v62, %v4484_v12  ;;  %v4321_v32 = vmax.f32 %v4286_v59, 0.0  ;;  %5210 = vmatpush.msrb.mxu0 %v9634_v21 }
 0x5a1   :  { %4572 = vmatpush.msra.mxu2 %v4485_v57 }
 0x5a2   :  { %9553 = vmatmul.msk.f32.vlgmr.msra.gmra.mxu2 %vm13961_vm2, %v10371_v42  ;;  %4678 = vst.msk [vmem:[#allocation2 + $0x1] sm:$0xff] %vm4677_vm3, %v4321_v32 }
 0x5a3   :  { %v14405_v10 = vpop.f32.mrf.mxu3  ;;  %5419 = vmatpush.msrb.mxu2 %v9673_v5 }
 0x5a4   :  { %v4235_v46 = vpop.f32.mrf.mxu0 }
 0x5a5   :  { %v4236_v45 = vadd.f32 %v14289_v38, %v4235_v46  ;;  %v4288_v19 = vpop.f32.mrf.mxu1  ;;  %5420 = vmatpush.msrb.mxu2 %v9672_v35 }
 0x5a7   :  { %v4289_v37 = vadd.f32 %v4288_v19, %v4236_v45  ;;  %5421 = vmatpush.msrb.mxu2 %v9671_v26 }
 0x5a9   :  { %v4322_v14 = vmax.f32 %v4289_v37, 0.0  ;;  %v4705_v33 = vld [vmem:[#allocation2] sm:$0xff]  ;;  %5422 = vmatpush.msrb.mxu2 %v9670_v6 }
 0x5aa   :  { %9554 = vmatmul.msk.f32.gmra.mxu2 %vm13994_vm5, %v10371_v42  ;;  %9610 = vmatmul.msk.f32.vlgmr.msrb.gmra.mxu3 %vm4677_vm3, %v4705_v33  ;;  %v4737_v43 = vld [vmem:[#allocation2 + $0x1] sm:$0xff] }
 0x5ab   :  { %4679 = vst.msk [vmem:[#allocation2 + $0x9] sm:$0xff] %vm4677_vm3, %v4322_v14  ;;  %9586 = vmatmul.msk.f32.vlgmr.msrb.gmra.mxu1 %vm4677_vm3, %v4737_v43  ;;  %v14421_v17 = vpop.f32.mrf.mxu3 }
 0x5ac   :  { %v4238_v60 = vpop.f32.mrf.mxu0 }
 0x5ad   :  { %v4239_v4 = vadd.f32 %v14289_v38, %v4238_v60  ;;  %v4291_v25 = vpop.f32.mrf.mxu1 }
 0x5af   :  { %v4292_v27 = vadd.f32 %v4291_v25, %v4239_v4  ;;  %v9669_v25 = vld [vmem:[%s16957_s3 + $0xd8] sm:$0xff] }
 0x5b0   :  { %5423 = vmatpush.msrb.mxu2 %v9669_v25 }
 0x5b1   :  { %v4323_v12 = vmax.f32 %v4292_v27, 0.0  ;;  %v9668_v27 = vld [vmem:[%s16957_s3 + $0xd0] sm:$0xff] }
 0x5b2   :  { %9555 = vmatmul.msk.f32.gmra.mxu2 %vm14015_vm7, %v10371_v42  ;;  %v4706_v13 = vld [vmem:[#allocation2 + $0x8] sm:$0xff] }
 0x5b3   :  { %v5090_v31 = vld [vmem:[#allocation2 + $0x2] sm:$0xff]  ;;  %4680 = vst.msk [vmem:[#allocation2 + $0x11] sm:$0xff] %vm4677_vm3, %v4323_v12  ;;  %9611 = vmatmul.msk.f32.gmra.mxu3 %vm4677_vm3, %v4706_v13  ;;  %v14443_v43 = vpop.f32.mrf.mxu3  ;;  %5424 = vmatpush.msrb.mxu2 %v9668_v27 }
 0x5b4   :  { %9642 = vmatmul.msk.f32.vlgmr.msrb.gmra.mxu0 %vm4677_vm3, %v5090_v31  ;;  %v4241_v29 = vpop.f32.mrf.mxu0  ;;  %v4738_v44 = vld [vmem:[#allocation2 + $0x9] sm:$0xff] }
 0x5b5   :  { %v4242_v61 = vadd.f32 %v14289_v38, %v4241_v29  ;;  %v4294_v53 = vpop.f32.mrf.mxu1  ;;  %9587 = vmatmul.msk.f32.gmra.mxu1 %vm4677_vm3, %v4738_v44  ;;  %v9666_v29 = vld [vmem:[%s16957_s3 + $0xc0] sm:$0xff]  ;;  %5425 = vmatpush.msrb.mxu2 %v9667_v20 }
 0x5b7   :  { %v4295_v23 = vadd.f32 %v4294_v53, %v4242_v61  ;;  %5426 = vmatpush.msrb.mxu2 %v9666_v29 }
 0x5b9   :  { %v4324_v54 = vmax.f32 %v4295_v23, 0.0 }
 0x5ba   :  { %9556 = vmatmul.msk.f32.gmra.mxu2 %vm14041_vm9, %v10371_v42  ;;  %v4707_v34 = vld [vmem:[#allocation2 + $0x10] sm:$0xff] }
 0x5bb   :  { %v5091_v62 = vld [vmem:[#allocation2 + $0xa] sm:$0xff]  ;;  %4681 = vst.msk [vmem:[#allocation2 + $0x19] sm:$0xff] %vm4677_vm3, %v4324_v54  ;;  %9612 = vmatmul.msk.f32.gmra.mxu3 %vm4677_vm3, %v4707_v34  ;;  %v14459_v54 = vpop.f32.mrf.mxu3 }
 0x5bc   :  { %9643 = vmatmul.msk.f32.gmra.mxu0 %vm4677_vm3, %v5091_v62  ;;  %v4244_v9 = vpop.f32.mrf.mxu0  ;;  %v4739_v59 = vld [vmem:[#allocation2 + $0x11] sm:$0xff] }
 0x5bd   :  { %v4245_v30 = vadd.f32 %v14289_v38, %v4244_v9  ;;  %v4297_v57 = vpop.f32.mrf.mxu1  ;;  %9588 = vmatmul.msk.f32.gmra.mxu1 %vm4677_vm3, %v4739_v59  ;;  %v5307_v6 = vld [vmem:[#allocation2 + $0xb] sm:$0xff] }
 0x5bf   :  { %v4298_v7 = vadd.f32 %v4297_v57, %v4245_v30 }
 0x5c1   :  { %v4325_v41 = vmax.f32 %v4298_v7, 0.0 }
 0x5c2   :  { %9557 = vmatmul.msk.f32.gmra.mxu2 %vm14075_vm11, %v10371_v42  ;;  %v4708_v47 = vld [vmem:[#allocation2 + $0x18] sm:$0xff] }
 0x5c3   :  { %v5092_v40 = vld [vmem:[#allocation2 + $0x12] sm:$0xff]  ;;  %4682 = vst.msk [vmem:[#allocation2 + $0x21] sm:$0xff] %vm4677_vm3, %v4325_v41  ;;  %9613 = vmatmul.msk.f32.gmra.mxu3 %vm4677_vm3, %v4708_v47  ;;  %v14469_v41 = vpop.f32.mrf.mxu3 }
 0x5c4   :  { %9644 = vmatmul.msk.f32.gmra.mxu0 %vm4677_vm3, %v5092_v40  ;;  %v4247_v50 = vpop.f32.mrf.mxu0  ;;  %v4740_v15 = vld [vmem:[#allocation2 + $0x19] sm:$0xff] }
 0x5c5   :  { %v4248_v51 = vadd.f32 %v14289_v38, %v4247_v50  ;;  %v4300_v32 = vpop.f32.mrf.mxu1  ;;  %9589 = vmatmul.msk.f32.gmra.mxu1 %vm4677_vm3, %v4740_v15  ;;  %v6172_v24 = vld [vmem:[#allocation2 + $0x17] sm:$0xff] }
 0x5c7   :  { %v4301_v8 = vadd.f32 %v4300_v32, %v4248_v51 }
 0x5c9   :  { %v4326_v58 = vmax.f32 %v4301_v8, 0.0 }
 0x5ca   :  { %9558 = vmatmul.msk.f32.gmra.mxu2 %vm14090_vm13, %v10371_v42  ;;  %v4709_v46 = vld [vmem:[#allocation2 + $0x20] sm:$0xff] }
 0x5cb   :  { %v5093_v22 = vld [vmem:[#allocation2 + $0x1a] sm:$0xff]  ;;  %4683 = vst.msk [vmem:[#allocation2 + $0x29] sm:$0xff] %vm4677_vm3, %v4326_v58  ;;  %9614 = vmatmul.msk.f32.gmra.mxu3 %vm4677_vm3, %v4709_v46  ;;  %v14480_v46 = vpop.f32.mrf.mxu3 }
 0x5cc   :  { %9645 = vmatmul.msk.f32.gmra.mxu0 %vm4677_vm3, %v5093_v22  ;;  %v4250_v2 = vpop.f32.mrf.mxu0  ;;  %v4741_v18 = vld [vmem:[#allocation2 + $0x21] sm:$0xff] }
 0x5cd   :  { %v4251_v45 = vadd.f32 %v14289_v38, %v4250_v2  ;;  %v4303_v19 = vpop.f32.mrf.mxu1  ;;  %9590 = vmatmul.msk.f32.gmra.mxu1 %vm4677_vm3, %v4741_v18  ;;  %v5309_v27 = vld [vmem:[#allocation2 + $0x1b] sm:$0xff] }
 0x5ce   :  { %v6173_v56 = vld [vmem:[#allocation2 + $0x1f] sm:$0xff] }
 0x5cf   :  { %v4304_v37 = vadd.f32 %v4303_v19, %v4251_v45 }
 0x5d1   :  { %v4327_v0 = vmax.f32 %v4304_v37, 0.0 }
 0x5d2   :  { %9559 = vmatmul.msk.f32.gmra.mxu2 %vm14107_vm15, %v10371_v42  ;;  %v4710_v14 = vld [vmem:[#allocation2 + $0x28] sm:$0xff]  ;;  %vm6876_vm15 = vcmask 711680  }
 0x5d3   :  { %v5094_v49 = vld [vmem:[#allocation2 + $0x22] sm:$0xff]  ;;  %4684 = vst.msk [vmem:[#allocation2 + $0x31] sm:$0xff] %vm4677_vm3, %v4327_v0  ;;  %9615 = vmatmul.msk.f32.gmra.mxu3 %vm4677_vm3, %v4710_v14  ;;  %v14493_v26 = vpop.f32.mrf.mxu3 }
 0x5d4   :  { %9646 = vmatmul.msk.f32.gmra.mxu0 %vm4677_vm3, %v5094_v49  ;;  %v4253_v33 = vpop.f32.mrf.mxu0  ;;  %v4742_v48 = vld [vmem:[#allocation2 + $0x29] sm:$0xff] }
 0x5d5   :  { %v4254_v60 = vadd.f32 %v14289_v38, %v4253_v33  ;;  %v4306_v3 = vpop.f32.mrf.mxu1  ;;  %9591 = vmatmul.msk.f32.gmra.mxu1 %vm4677_vm3, %v4742_v48  ;;  %v5306_v49 = vld [vmem:[#allocation2 + $0x3] sm:$0xff]  ;;  %v5308_v48 = vld [vmem:[#allocation2 + $0x13] sm:$0xff] }
 0x5d6   :  { %v5310_v20 = vld [vmem:[#allocation2 + $0x23] sm:$0xff] }
 0x5d7   :  { %v4307_v4 = vadd.f32 %v4306_v3, %v4254_v60 }
 0x5d9   :  { %v4328_v21 = vmax.f32 %v4307_v4, 0.0 }
 0x5da   :  { %9560 = vmatmul.msk.f32.gmra.mxu2 %vm14124_vm6, %v10371_v42  ;;  %v4711_v12 = vld [vmem:[#allocation2 + $0x30] sm:$0xff] }
 0x5db   :  { %v5095_v13 = vld [vmem:[#allocation2 + $0x2a] sm:$0xff]  ;;  %4685 = vst.msk [vmem:[#allocation2 + $0x39] sm:$0xff] %vm4677_vm3, %v4328_v21  ;;  %9616 = vmatmul.msk.f32.gmra.mxu3 %vm4677_vm3, %v4711_v12  ;;  %v14499_v33 = vpop.f32.mrf.mxu3 }
 0x5dc   :  { %9647 = vmatmul.msk.f32.gmra.mxu0 %vm4677_vm3, %v5095_v13  ;;  %v4256_v31 = vpop.f32.mrf.mxu0  ;;  %v4743_v53 = vld [vmem:[#allocation2 + $0x31] sm:$0xff] }
 0x5dd   :  { %v4257_v61 = vadd.f32 %v14289_v38, %v4256_v31  ;;  %v4309_v23 = vpop.f32.mrf.mxu1  ;;  %9592 = vmatmul.msk.f32.gmra.mxu1 %vm4677_vm3, %v4743_v53  ;;  %v6175_v28 = vld [vmem:[#allocation2 + $0x2f] sm:$0xff] }
 0x5df   :  { %v4310_v44 = vadd.f32 %v4309_v23, %v4257_v61  ;;  %v5311_v61 = vld [vmem:[#allocation2 + $0x2b] sm:$0xff] }
 0x5e1   :  { %v4329_v34 = vmax.f32 %v4310_v44, 0.0 }
 0x5e2   :  { %9561 = vmatmul.msk.f32.gmra.mxu2 %vm14144_vm10, %v10371_v42  ;;  %v4712_v62 = vld [vmem:[#allocation2 + $0x38] sm:$0xff] }
 0x5e3   :  { %v5096_v9 = vld [vmem:[#allocation2 + $0x32] sm:$0xff]  ;;  %4686 = vst.msk [vmem:[#allocation2 + $0x41] sm:$0xff] %vm4677_vm3, %v4329_v34  ;;  %9617 = vmatmul.msk.f32.gmra.mxu3 %vm4677_vm3, %v4712_v62  ;;  %v14504_v4 = vpop.f32.mrf.mxu3 }
 0x5e4   :  { %9648 = vmatmul.msk.f32.gmra.mxu0 %vm4677_vm3, %v5096_v9  ;;  %v4259_v30 = vpop.f32.mrf.mxu0  ;;  %v4744_v7 = vld [vmem:[#allocation2 + $0x39] sm:$0xff] }
 0x5e5   :  { %v4260_v57 = vadd.f32 %v14289_v38, %v4259_v30  ;;  %v4312_v1 = vpop.f32.mrf.mxu1  ;;  %9593 = vmatmul.msk.f32.gmra.mxu1 %vm4677_vm3, %v4744_v7  ;;  %v5312_v9 = vld [vmem:[#allocation2 + $0x33] sm:$0xff] }
 0x5e7   :  { %v4313_v59 = vadd.f32 %v4312_v1, %v4260_v57 }
 0x5e9   :  { %v4330_v47 = vmax.f32 %v4313_v59, 0.0 }
 0x5ea   :  { %9562 = vmatmul.msk.f32.gmra.mxu2 %vm14174_vm14, %v10371_v42  ;;  %v4713_v40 = vld [vmem:[#allocation2 + $0x40] sm:$0xff]  ;;  %vm8815_vm14 = vcmask 261120  }
 0x5eb   :  { %v5097_v50 = vld [vmem:[#allocation2 + $0x3a] sm:$0xff]  ;;  %4687 = vst.msk [vmem:[#allocation2 + $0x49] sm:$0xff] %vm4677_vm3, %v4330_v47  ;;  %9618 = vmatmul.msk.f32.gmra.mxu3 %vm4677_vm3, %v4713_v40  ;;  %v14507_v25 = vpop.f32.mrf.mxu3 }
 0x5ec   :  { %9649 = vmatmul.msk.f32.gmra.mxu0 %vm4677_vm3, %v5097_v50  ;;  %v4262_v51 = vpop.f32.mrf.mxu0  ;;  %v4745_v8 = vld [vmem:[#allocation2 + $0x41] sm:$0xff] }
 0x5ed   :  { %v4263_v32 = vadd.f32 %v14289_v38, %v4262_v51  ;;  %v4315_v39 = vpop.f32.mrf.mxu1  ;;  %9594 = vmatmul.msk.f32.gmra.mxu1 %vm4677_vm3, %v4745_v8  ;;  %v5313_v51 = vld [vmem:[#allocation2 + $0x3b] sm:$0xff] }
 0x5ef   :  { %v4316_v15 = vadd.f32 %v4315_v39, %v4263_v32 }
 0x5f1   :  { %v4331_v58 = vmax.f32 %v4316_v15, 0.0 }
 0x5f2   :  { %9563 = vmatmul.msk.f32.gmra.mxu2 %vm14196_vm8, %v10371_v42  ;;  %v4714_v22 = vld [vmem:[#allocation2 + $0x48] sm:$0xff] }
 0x5f3   :  { %v5098_v2 = vld [vmem:[#allocation2 + $0x42] sm:$0xff]  ;;  %4688 = vst.msk [vmem:[#allocation2 + $0x51] sm:$0xff] %vm4677_vm3, %v4331_v58  ;;  %9619 = vmatmul.msk.f32.gmra.mxu3 %vm4677_vm3, %v4714_v22  ;;  %v14510_v21 = vpop.f32.mrf.mxu3 }
 0x5f4   :  { %9650 = vmatmul.msk.f32.gmra.mxu0 %vm4677_vm3, %v5098_v2  ;;  %v4265_v45 = vpop.f32.mrf.mxu0  ;;  %v4746_v37 = vld [vmem:[#allocation2 + $0x49] sm:$0xff] }
 0x5f5   :  { %v4266_v19 = vadd.f32 %v14289_v38, %v4265_v45  ;;  %9595 = vmatmul.msk.f32.gmra.mxu1 %vm4677_vm3, %v4746_v37  ;;  %v5314_v37 = vld [vmem:[#allocation2 + $0x43] sm:$0xff] }
 0x5f6   :  { %v4318_v11 = vpop.f32.mrf.mxu1 }
 0x5f7   :  { %v4319_v18 = vadd.f32 %v4318_v11, %v4266_v19 }
 0x5f9   :  { %v4332_v5 = vmax.f32 %v4319_v18, 0.0 }
 0x5fa   :  { %9564 = vmatmul.msk.f32.gmra.mxu2 %vm14222_vm4, %v10371_v42  ;;  %v4715_v35 = vld [vmem:[#allocation2 + $0x50] sm:$0xff] }
 0x5fb   :  { %v5099_v0 = vld [vmem:[#allocation2 + $0x4a] sm:$0xff]  ;;  %4689 = vst.msk [vmem:[#allocation2 + $0x59] sm:$0xff] %vm4677_vm3, %v4332_v5  ;;  %9620 = vmatmul.msk.f32.gmra.mxu3 %vm4677_vm3, %v4715_v35 }
 0x5fc   :  { %9651 = vmatmul.msk.f32.gmra.mxu0 %vm4677_vm3, %v5099_v0  ;;  %v4747_v14 = vld [vmem:[#allocation2 + $0x51] sm:$0xff] }
 0x5fd   :  { %9596 = vmatmul.msk.f32.gmra.mxu1 %vm4677_vm3, %v4747_v14  ;;  %v14515_v29 = vpop.f32.mrf.mxu3 }
 0x602   :  { %9674 = vmatmul.msk.f32.vlgmr.msrb.gmra.mxu2 %vm4677_vm3, %v5306_v49  ;;  %v4716_v42 = vld [vmem:[#allocation2 + $0x58] sm:$0xff] }
 0x603   :  { %v5100_v63 = vld [vmem:[#allocation2 + $0x52] sm:$0xff]  ;;  %9621 = vmatmul.msk.f32.gmra.mxu3 %vm4677_vm3, %v4716_v42  ;;  %v5101_v3 = vld [vmem:[#allocation2 + $0x5a] sm:$0xff] }
 0x604   :  { %9652 = vmatmul.msk.f32.gmra.mxu0 %vm4677_vm3, %v5100_v63  ;;  %v4748_v60 = vld [vmem:[#allocation2 + $0x59] sm:$0xff] }
 0x605   :  { %9597 = vmatmul.msk.f32.gmra.mxu1 %vm4677_vm3, %v4748_v60 }
 0x60a   :  { %9675 = vmatmul.msk.f32.gmra.mxu2 %vm4677_vm3, %v5307_v6  ;;  %v5315_v6 = vld [vmem:[#allocation2 + $0x4b] sm:$0xff] }
 0x60c   :  { %9653 = vmatmul.msk.f32.gmra.mxu0 %vm4677_vm3, %v5101_v3 }
 0x612   :  { %9676 = vmatmul.msk.f32.gmra.mxu2 %vm4677_vm3, %v5308_v48 }
 0x61a   :  { %9677 = vmatmul.msk.f32.gmra.mxu2 %vm4677_vm3, %v5309_v27 }
 0x622   :  { %9678 = vmatmul.msk.f32.gmra.mxu2 %vm4677_vm3, %v5310_v20 }
 0x625   :  { %v4574_v12 = vpop.f32.mrf.mxu2 }
 0x626   :  { %v4575_v13 = vadd.f32 %v14289_v38, %v4574_v12 }
 0x628   :  { %v4628_v31 = vadd.f32 %v14405_v10, %v4575_v13  ;;  %v14521_v62 = vpop.f32.mrf.mxu1 }
 0x62a   :  { %v4663_v53 = vmax.f32 %v4628_v31, 0.0  ;;  %9679 = vmatmul.msk.f32.gmra.mxu2 %vm4677_vm3, %v5311_v61 }
 0x62c   :  { %4692 = vst.msk [vmem:[#allocation2 + $0x63] sm:$0xff] %vm4677_vm3, %v4663_v53  ;;  %v5316_v53 = vld [vmem:[#allocation2 + $0x53] sm:$0xff] }
 0x62d   :  { %v4577_v23 = vpop.f32.mrf.mxu2  ;;  %v14523_v30 = vpop.f32.mrf.mxu3 }
 0x62e   :  { %v4578_v44 = vadd.f32 %v14289_v38, %v4577_v23 }
 0x630   :  { %v4631_v34 = vadd.f32 %v14421_v17, %v4578_v44 }
 0x631   :  { %v14526_v59 = vpop.f32.mrf.mxu0 }
 0x632   :  { %v4664_v57 = vmax.f32 %v4631_v34, 0.0  ;;  %9680 = vmatmul.msk.f32.gmra.mxu2 %vm4677_vm3, %v5312_v9  ;;  %v14534_v50 = vpop.f32.mrf.mxu1 }
 0x633   :  { %v4749_v10 = vld [vmem:[#allocation2 + $0x61] sm:$0xff] }
 0x634   :  { %v4717_v7 = vld [vmem:[#allocation2 + $0x60] sm:$0xff]  ;;  %4693 = vst.msk [vmem:[#allocation2 + $0x6b] sm:$0xff] %vm4677_vm3, %v4664_v57  ;;  %9598 = vmatmul.msk.f32.gmra.mxu1 %vm4677_vm3, %v4749_v10 }
 0x635   :  { %v5102_v1 = vld [vmem:[#allocation2 + $0x62] sm:$0xff]  ;;  %9622 = vmatmul.msk.f32.gmra.mxu3 %vm4677_vm3, %v4717_v7  ;;  %v4580_v17 = vpop.f32.mrf.mxu2 }
 0x636   :  { %9654 = vmatmul.msk.f32.gmra.mxu0 %vm4677_vm3, %v5102_v1  ;;  %v4581_v47 = vadd.f32 %v14289_v38, %v4580_v17  ;;  %v14536_v32 = vpop.f32.mrf.mxu3 }
 0x638   :  { %v4634_v40 = vadd.f32 %v14443_v43, %v4581_v47  ;;  %v5317_v47 = vld [vmem:[#allocation2 + $0x5b] sm:$0xff] }
 0x639   :  { %v14539_v22 = vpop.f32.mrf.mxu0 }
 0x63a   :  { %v4665_v8 = vmax.f32 %v4634_v40, 0.0  ;;  %9681 = vmatmul.msk.f32.gmra.mxu2 %vm4677_vm3, %v5313_v51  ;;  %v14547_v19 = vpop.f32.mrf.mxu1 }
 0x63b   :  { %v4750_v39 = vld [vmem:[#allocation2 + $0x69] sm:$0xff] }
 0x63c   :  { %v4718_v15 = vld [vmem:[#allocation2 + $0x68] sm:$0xff]  ;;  %4694 = vst.msk [vmem:[#allocation2 + $0x73] sm:$0xff] %vm4677_vm3, %v4665_v8  ;;  %9599 = vmatmul.msk.f32.gmra.mxu1 %vm4677_vm3, %v4750_v39 }
 0x63d   :  { %v5103_v58 = vld [vmem:[#allocation2 + $0x6a] sm:$0xff]  ;;  %9623 = vmatmul.msk.f32.gmra.mxu3 %vm4677_vm3, %v4718_v15  ;;  %v4583_v43 = vpop.f32.mrf.mxu2 }
 0x63e   :  { %9655 = vmatmul.msk.f32.gmra.mxu0 %vm4677_vm3, %v5103_v58  ;;  %v4584_v2 = vadd.f32 %v14289_v38, %v4583_v43  ;;  %v14549_v11 = vpop.f32.mrf.mxu3 }
 0x640   :  { %v4637_v45 = vadd.f32 %v14459_v54, %v4584_v2 }
 0x641   :  { %v14552_v14 = vpop.f32.mrf.mxu0 }
 0x642   :  { %v4666_v18 = vmax.f32 %v4637_v45, 0.0  ;;  %9682 = vmatmul.msk.f32.gmra.mxu2 %vm4677_vm3, %v5314_v37  ;;  %v14560_v63 = vpop.f32.mrf.mxu1  ;;  %v5318_v37 = vld [vmem:[#allocation2 + $0x63] sm:$0xff] }
 0x643   :  { %v4751_v5 = vld [vmem:[#allocation2 + $0x71] sm:$0xff] }
 0x644   :  { %v4719_v35 = vld [vmem:[#allocation2 + $0x70] sm:$0xff]  ;;  %4695 = vst.msk [vmem:[#allocation2 + $0x7b] sm:$0xff] %vm4677_vm3, %v4666_v18  ;;  %9600 = vmatmul.msk.f32.gmra.mxu1 %vm4677_vm3, %v4751_v5 }
 0x645   :  { %v5104_v0 = vld [vmem:[#allocation2 + $0x72] sm:$0xff]  ;;  %9624 = vmatmul.msk.f32.gmra.mxu3 %vm4677_vm3, %v4719_v35  ;;  %v4586_v54 = vpop.f32.mrf.mxu2 }
 0x646   :  { %9656 = vmatmul.msk.f32.gmra.mxu0 %vm4677_vm3, %v5104_v0  ;;  %v4587_v49 = vadd.f32 %v14289_v38, %v4586_v54  ;;  %v14562_v60 = vpop.f32.mrf.mxu3 }
 0x648   :  { %v4640_v42 = vadd.f32 %v14469_v41, %v4587_v49 }
 0x649   :  { %v14565_v12 = vpop.f32.mrf.mxu0 }
 0x64a   :  { %v4667_v3 = vmax.f32 %v4640_v42, 0.0  ;;  %9683 = vmatmul.msk.f32.gmra.mxu2 %vm4677_vm3, %v5315_v6  ;;  %v14573_v61 = vpop.f32.mrf.mxu1  ;;  %v9705_v42 = vld [vmem:[%s16957_s3 + $0x138] sm:$0xff] }
 0x64b   :  { %v4752_v48 = vld [vmem:[#allocation2 + $0x79] sm:$0xff]  ;;  %5635 = vmatpush.msra.mxu1 %v9705_v42  ;;  %v9699_v42 = vld [vmem:[%s16957_s3 + $0x108] sm:$0xff] }
 0x64c   :  { %v4720_v27 = vld [vmem:[#allocation2 + $0x78] sm:$0xff]  ;;  %4696 = vst.msk [vmem:[#allocation2 + $0x83] sm:$0xff] %vm4677_vm3, %v4667_v3  ;;  %9601 = vmatmul.msk.f32.gmra.mxu1 %vm4677_vm3, %v4752_v48 }
 0x64d   :  { %v5105_v20 = vld [vmem:[#allocation2 + $0x7a] sm:$0xff]  ;;  %9625 = vmatmul.msk.f32.gmra.mxu3 %vm4677_vm3, %v4720_v27  ;;  %v4589_v41 = vpop.f32.mrf.mxu2  ;;  %v9704_v27 = vld [vmem:[%s16957_s3 + $0x130] sm:$0xff] }
 0x64e   :  { %9657 = vmatmul.msk.f32.gmra.mxu0 %vm4677_vm3, %v5105_v20  ;;  %v4590_v13 = vadd.f32 %v14289_v38, %v4589_v41  ;;  %v14575_v23 = vpop.f32.mrf.mxu3  ;;  %v9769_v3 = vld [vmem:[%s16957_s3 + $0x1b8] sm:$0xff]  ;;  %v9736_v20 = vld [vmem:[%s16957_s3 + $0x170] sm:$0xff]  ;;  %5636 = vmatpush.msra.mxu1 %v9704_v27 }
 0x64f   :  { %6067 = vmatpush.msra.mxu0 %v9769_v3  ;;  %v9768_v41 = vld [vmem:[%s16957_s3 + $0x1b0] sm:$0xff] }
 0x650   :  { %v4643_v31 = vadd.f32 %v14480_v46, %v4590_v13  ;;  %v9703_v13 = vld [vmem:[%s16957_s3 + $0x128] sm:$0xff]  ;;  %v5320_v3 = vld [vmem:[#allocation2 + $0x73] sm:$0xff] }
 0x651   :  { %v14578_v10 = vpop.f32.mrf.mxu0  ;;  %6068 = vmatpush.msra.mxu0 %v9768_v41  ;;  %5637 = vmatpush.msra.mxu1 %v9703_v13  ;;  %v9730_v41 = vld [vmem:[%s16957_s3 + $0x140] sm:$0xff] }
 0x652   :  { %v4668_v44 = vmax.f32 %v4643_v31, 0.0  ;;  %9684 = vmatmul.msk.f32.gmra.mxu2 %vm4677_vm3, %v5316_v53  ;;  %v14586_v17 = vpop.f32.mrf.mxu1  ;;  %v9735_v31 = vld [vmem:[%s16957_s3 + $0x168] sm:$0xff] }
 0x653   :  { %v4753_v34 = vld [vmem:[#allocation2 + $0x81] sm:$0xff] }
 0x654   :  { %v4721_v9 = vld [vmem:[#allocation2 + $0x80] sm:$0xff]  ;;  %4697 = vst.msk [vmem:[#allocation2 + $0x8b] sm:$0xff] %vm4677_vm3, %v4668_v44  ;;  %9602 = vmatmul.msk.f32.gmra.mxu1 %vm4677_vm3, %v4753_v34  ;;  %v9767_v34 = vld [vmem:[%s16957_s3 + $0x1a8] sm:$0xff] }
 0x655   :  { %v5106_v57 = vld [vmem:[#allocation2 + $0x82] sm:$0xff]  ;;  %9626 = vmatmul.msk.f32.gmra.mxu3 %vm4677_vm3, %v4721_v9  ;;  %v4592_v46 = vpop.f32.mrf.mxu2  ;;  %v5319_v9 = vld [vmem:[#allocation2 + $0x6b] sm:$0xff]  ;;  %6069 = vmatpush.msra.mxu0 %v9767_v34 }
 0x656   :  { %9658 = vmatmul.msk.f32.gmra.mxu0 %vm4677_vm3, %v5106_v57  ;;  %v4593_v7 = vadd.f32 %v14289_v38, %v4592_v46  ;;  %v14588_v40 = vpop.f32.mrf.mxu3 }
 0x658   :  { %v4646_v1 = vadd.f32 %v14493_v26, %v4593_v7  ;;  %v9734_v7 = vld [vmem:[%s16957_s3 + $0x160] sm:$0xff] }
 0x659   :  { %v14591_v58 = vpop.f32.mrf.mxu0 }
 0x65a   :  { %v4669_v51 = vmax.f32 %v4646_v1, 0.0  ;;  %9685 = vmatmul.msk.f32.gmra.mxu2 %vm4677_vm3, %v5317_v47  ;;  %v14599_v45 = vpop.f32.mrf.mxu1  ;;  %v9766_v1 = vld [vmem:[%s16957_s3 + $0x1a0] sm:$0xff] }
 0x65b   :  { %v4754_v8 = vld [vmem:[#allocation2 + $0x89] sm:$0xff]  ;;  %6070 = vmatpush.msra.mxu0 %v9766_v1 }
 0x65c   :  { %v4722_v39 = vld [vmem:[#allocation2 + $0x88] sm:$0xff]  ;;  %4698 = vst.msk [vmem:[#allocation2 + $0x93] sm:$0xff] %vm4677_vm3, %v4669_v51  ;;  %9603 = vmatmul.msk.f32.gmra.mxu1 %vm4677_vm3, %v4754_v8 }
 0x65d   :  { %v5107_v15 = vld [vmem:[#allocation2 + $0x8a] sm:$0xff]  ;;  %9627 = vmatmul.msk.f32.gmra.mxu3 %vm4677_vm3, %v4722_v39  ;;  %v4595_v26 = vpop.f32.mrf.mxu2 }
 0x65e   :  { %9659 = vmatmul.msk.f32.gmra.mxu0 %vm4677_vm3, %v5107_v15  ;;  %v4596_v43 = vadd.f32 %v14289_v38, %v4595_v26  ;;  %v14601_v18 = vpop.f32.mrf.mxu3  ;;  %v9701_v26 = vld [vmem:[%s16957_s3 + $0x118] sm:$0xff] }
 0x660   :  { %v4649_v2 = vadd.f32 %v14499_v33, %v4596_v43  ;;  %v9737_v33 = vld [vmem:[%s16957_s3 + $0x178] sm:$0xff] }
 0x661   :  { %v14604_v49 = vpop.f32.mrf.mxu0  ;;  %5851 = vmatpush.msra.mxu3 %v9737_v33  ;;  %v9733_v43 = vld [vmem:[%s16957_s3 + $0x158] sm:$0xff] }
 0x662   :  { %v4670_v5 = vmax.f32 %v4649_v2, 0.0  ;;  %9686 = vmatmul.msk.f32.gmra.mxu2 %vm4677_vm3, %v5318_v37  ;;  %v14636_v44 = vpop.f32.mrf.mxu1  ;;  %v9765_v2 = vld [vmem:[%s16957_s3 + $0x198] sm:$0xff] }
 0x663   :  { %v4755_v35 = vld [vmem:[#allocation2 + $0x91] sm:$0xff]  ;;  %5852 = vmatpush.msra.mxu3 %v9736_v20  ;;  %6071 = vmatpush.msra.mxu0 %v9765_v2  ;;  %v9698_v20 = vld [vmem:[%s16957_s3 + $0x100] sm:$0xff] }
 0x664   :  { %v4723_v0 = vld [vmem:[#allocation2 + $0x90] sm:$0xff]  ;;  %4699 = vst.msk [vmem:[#allocation2 + $0x9b] sm:$0xff] %vm4677_vm3, %v4670_v5  ;;  %9604 = vmatmul.msk.f32.gmra.mxu1 %vm4677_vm3, %v4755_v35 }
 0x665   :  { %v5108_v54 = vld [vmem:[#allocation2 + $0x92] sm:$0xff]  ;;  %9628 = vmatmul.msk.f32.gmra.mxu3 %vm4677_vm3, %v4723_v0  ;;  %v4598_v6 = vpop.f32.mrf.mxu2 }
 0x666   :  { %9660 = vmatmul.msk.f32.gmra.mxu0 %vm4677_vm3, %v5108_v54  ;;  %v4599_v48 = vadd.f32 %v14289_v38, %v4598_v6  ;;  %v14641_v57 = vpop.f32.mrf.mxu3  ;;  %5853 = vmatpush.msra.mxu3 %v9735_v31  ;;  %v9700_v5 = vld [vmem:[%s16957_s3 + $0x110] sm:$0xff]  ;;  %v9731_v6 = vld [vmem:[%s16957_s3 + $0x148] sm:$0xff] }
 0x667   :  { %v9732_v35 = vld [vmem:[%s16957_s3 + $0x150] sm:$0xff] }
 0x668   :  { %v4652_v53 = vadd.f32 %v14504_v4, %v4599_v48  ;;  %v9702_v4 = vld [vmem:[%s16957_s3 + $0x120] sm:$0xff]  ;;  %5854 = vmatpush.msra.mxu3 %v9734_v7  ;;  %v9764_v0 = vld [vmem:[%s16957_s3 + $0x190] sm:$0xff] }
 0x669   :  { %v14653_v39 = vpop.f32.mrf.mxu0  ;;  %5638 = vmatpush.msra.mxu1 %v9702_v4  ;;  %6072 = vmatpush.msra.mxu0 %v9764_v0 }
 0x66a   :  { %v4671_v46 = vmax.f32 %v4652_v53, 0.0  ;;  %9687 = vmatmul.msk.f32.gmra.mxu2 %vm4677_vm3, %v5319_v9  ;;  %5855 = vmatpush.msra.mxu3 %v9733_v43  ;;  %v14679_v33 = vpop.f32.mrf.mxu1 }
 0x66b   :  { %v4756_v47 = vld [vmem:[#allocation2 + $0x99] sm:$0xff]  ;;  %5639 = vmatpush.msra.mxu1 %v9701_v26 }
 0x66c   :  { %v4724_v51 = vld [vmem:[#allocation2 + $0x98] sm:$0xff]  ;;  %4700 = vst.msk [vmem:[#allocation2 + $0xa3] sm:$0xff] %vm4677_vm3, %v4671_v46  ;;  %9605 = vmatmul.msk.f32.gmra.mxu1 %vm4677_vm3, %v4756_v47  ;;  %5856 = vmatpush.msra.mxu3 %v9732_v35  ;;  %v9762_v46 = vld [vmem:[%s16957_s3 + $0x180] sm:$0xff] }
 0x66d   :  { %v5109_v8 = vld [vmem:[#allocation2 + $0x9a] sm:$0xff]  ;;  %9629 = vmatmul.msk.f32.gmra.mxu3 %vm4677_vm3, %v4724_v51  ;;  %v4601_v15 = vpop.f32.mrf.mxu2  ;;  %5640 = vmatpush.msra.mxu1 %v9700_v5  ;;  %v5322_v35 = vld [vmem:[#allocation2 + $0x83] sm:$0xff] }
 0x66e   :  { %9661 = vmatmul.msk.f32.gmra.mxu0 %vm4677_vm3, %v5109_v8  ;;  %v4602_v37 = vadd.f32 %v14289_v38, %v4601_v15  ;;  %v14687_v48 = vpop.f32.mrf.mxu3  ;;  %5857 = vmatpush.msra.mxu3 %v9731_v6  ;;  %v5321_v47 = vld [vmem:[#allocation2 + $0x7b] sm:$0xff] }
 0x66f   :  { %5641 = vmatpush.msra.mxu1 %v9699_v42 }
 0x670   :  { %v4655_v54 = vadd.f32 %v14507_v25, %v4602_v37  ;;  %v9763_v25 = vld [vmem:[%s16957_s3 + $0x188] sm:$0xff]  ;;  %5858 = vmatpush.msra.mxu3 %v9730_v41 }
 0x671   :  { %v14699_v34 = vpop.f32.mrf.mxu0  ;;  %5642 = vmatpush.msra.mxu1 %v9698_v20  ;;  %6073 = vmatpush.msra.mxu0 %v9763_v25 }
 0x672   :  { %v4672_v27 = vmax.f32 %v4655_v54, 0.0  ;;  %9688 = vmatmul.msk.f32.gmra.mxu2 %vm4677_vm3, %v5320_v3  ;;  %v14710_v1 = vpop.f32.mrf.mxu1 }
 0x673   :  { %v4757_v13 = vld [vmem:[#allocation2 + $0xa1] sm:$0xff]  ;;  %6074 = vmatpush.msra.mxu0 %v9762_v46 }
 0x674   :  { %v4725_v31 = vld [vmem:[#allocation2 + $0xa0] sm:$0xff]  ;;  %4701 = vst.msk [vmem:[#allocation2 + $0xab] sm:$0xff] %vm4677_vm3, %v4672_v27  ;;  %9606 = vmatmul.msk.f32.gmra.mxu1 %vm4677_vm3, %v4757_v13 }
 0x675   :  { %v5110_v53 = vld [vmem:[#allocation2 + $0xa2] sm:$0xff]  ;;  %9630 = vmatmul.msk.f32.gmra.mxu3 %vm4677_vm3, %v4725_v31  ;;  %v4604_v9 = vpop.f32.mrf.mxu2 }
 0x676   :  { %9662 = vmatmul.msk.f32.gmra.mxu0 %vm4677_vm3, %v5110_v53  ;;  %v4605_v4 = vadd.f32 %v14289_v38, %v4604_v9  ;;  %v14712_v51 = vpop.f32.mrf.mxu3 }
 0x678   :  { %v4658_v7 = vadd.f32 %v14510_v21, %v4605_v4  ;;  %v5324_v4 = vld [vmem:[#allocation2 + $0x93] sm:$0xff] }
 0x679   :  { %v14715_v2 = vpop.f32.mrf.mxu0 }
 0x67a   :  { %v4673_v8 = vmax.f32 %v4658_v7, 0.0  ;;  %9689 = vmatmul.msk.f32.gmra.mxu2 %vm4677_vm3, %v5321_v47  ;;  %v14726_v42 = vpop.f32.mrf.mxu1  ;;  %v9801_v7 = vld [vmem:[%s16957_s3 + $0x1f8] sm:$0xff]  ;;  %v5522_v47 = vld [vmem:[#allocation2 + $0x4] sm:$0xff] }
 0x67b   :  { %v4758_v15 = vld [vmem:[#allocation2 + $0xa9] sm:$0xff]  ;;  %6283 = vmatpush.msra.mxu2 %v9801_v7 }
 0x67c   :  { %v4726_v26 = vld [vmem:[#allocation2 + $0xa8] sm:$0xff]  ;;  %4702 = vst.msk [vmem:[#allocation2 + $0xb3] sm:$0xff] %vm4677_vm3, %v4673_v8  ;;  %9607 = vmatmul.msk.f32.gmra.mxu1 %vm4677_vm3, %v4758_v15 }
 0x67d   :  { %v5111_v43 = vld [vmem:[#allocation2 + $0xaa] sm:$0xff]  ;;  %9631 = vmatmul.msk.f32.gmra.mxu3 %vm4677_vm3, %v4726_v26  ;;  %v4607_v21 = vpop.f32.mrf.mxu2 }
 0x67e   :  { %9663 = vmatmul.msk.f32.gmra.mxu0 %vm4677_vm3, %v5111_v43  ;;  %v4608_v37 = vadd.f32 %v14289_v38, %v4607_v21  ;;  %v14723_v0 = vpop.f32.mrf.mxu3  ;;  %v5738_v8 = vld [vmem:[#allocation2 + $0x5] sm:$0xff]  ;;  %v9800_v43 = vld [vmem:[%s16957_s3 + $0x1f0] sm:$0xff] }
 0x67f   :  { %v5954_v15 = vld [vmem:[#allocation2 + $0x6] sm:$0xff]  ;;  %6284 = vmatpush.msra.mxu2 %v9800_v43 }
 0x680   :  { %v4661_v5 = vadd.f32 %v14515_v29, %v4608_v37  ;;  %v5323_v29 = vld [vmem:[#allocation2 + $0x8b] sm:$0xff]  ;;  %v5325_v37 = vld [vmem:[#allocation2 + $0x9b] sm:$0xff] }
 0x681   :  { %v14728_v25 = vpop.f32.mrf.mxu0  ;;  %v9799_v21 = vld [vmem:[%s16957_s3 + $0x1e8] sm:$0xff] }
 0x682   :  { %v4674_v54 = vmax.f32 %v4661_v5, 0.0  ;;  %9690 = vmatmul.msk.f32.gmra.mxu2 %vm4677_vm3, %v5322_v35  ;;  %v4892_v41 = vpop.f32.mrf.mxu1  ;;  %v9798_v5 = vld [vmem:[%s16957_s3 + $0x1e0] sm:$0xff]  ;;  %v9797_v35 = vld [vmem:[%s16957_s3 + $0x1d8] sm:$0xff]  ;;  %v5327_v7 = vld [vmem:[#allocation2 + $0xab] sm:$0xff] }
 0x683   :  { %v4759_v6 = vld [vmem:[#allocation2 + $0xb1] sm:$0xff]  ;;  %6285 = vmatpush.msra.mxu2 %v9799_v21  ;;  %v5326_v41 = vld [vmem:[#allocation2 + $0xa3] sm:$0xff] }
 0x684   :  { %v4727_v3 = vld [vmem:[#allocation2 + $0xb0] sm:$0xff]  ;;  %4703 = vst.msk [vmem:[#allocation2 + $0xbb] sm:$0xff] %vm4677_vm3, %v4674_v54  ;;  %9608 = vmatmul.msk.f32.gmra.mxu1 %vm4677_vm3, %v4759_v6  ;;  %v4728_v31 = vld [vmem:[#allocation2 + $0xb8] sm:$0x7] }
 0x685   :  { %v5112_v27 = vld [vmem:[#allocation2 + $0xb2] sm:$0xff]  ;;  %9632 = vmatmul.msk.f32.gmra.mxu3 %vm4677_vm3, %v4727_v3  ;;  %v14734_v38 = vpop.f32.mrf.mxu2  ;;  %6286 = vmatpush.msra.mxu2 %v9798_v5 }
 0x686   :  { %9664 = vmatmul.msk.f32.gmra.mxu0 %vm4677_vm3, %v5112_v27  ;;  %v5052_v20 = vpop.f32.mrf.mxu3  ;;  %v5523_v54 = vld [vmem:[#allocation2 + $0xc] sm:$0xff] }
 0x687   :  { %v5739_v6 = vld [vmem:[#allocation2 + $0xd] sm:$0xff]  ;;  %6287 = vmatpush.msra.mxu2 %v9797_v35  ;;  %v5526_v35 = vld [vmem:[#allocation2 + $0x24] sm:$0xff] }
 0x688   :  { %v5955_v3 = vld [vmem:[#allocation2 + $0xe] sm:$0xff] }
 0x689   :  { %v5245_v9 = vpop.f32.mrf.mxu0  ;;  %v9795_v20 = vld [vmem:[%s16957_s3 + $0x1c8] sm:$0xff] }
 0x68a   :  { %9691 = vmatmul.msk.f32.gmra.mxu2 %vm4677_vm3, %v5323_v29  ;;  %v9796_v29 = vld [vmem:[%s16957_s3 + $0x1d0] sm:$0xff] }
 0x68b   :  { %v4760_v13 = vld [vmem:[#allocation2 + $0xb9] sm:$0x7]  ;;  %6288 = vmatpush.msra.mxu2 %v9796_v29 }
 0x68c   :  { %v5113_v53 = vld [vmem:[#allocation2 + $0xba] sm:$0x7]  ;;  %9609 = vmatmul.msk.f32.gmra.mxu1 %vm4677_vm3, %v4760_v13  ;;  %v9794_v13 = vld [vmem:[%s16957_s3 + $0x1c0] sm:$0xff] }
 0x68d   :  { %9633 = vmatmul.msk.f32.gmra.mxu3 %vm4677_vm3, %v4728_v31  ;;  %v14740_v46 = vpop.f32.mrf.mxu2  ;;  %6289 = vmatpush.msra.mxu2 %v9795_v20  ;;  %v5524_v31 = vld [vmem:[#allocation2 + $0x14] sm:$0xff] }
 0x68e   :  { %9665 = vmatmul.msk.f32.gmra.mxu0 %vm4677_vm3, %v5113_v53  ;;  %v5740_v53 = vld [vmem:[#allocation2 + $0x15] sm:$0xff] }
 0x68f   :  { %6290 = vmatpush.msra.mxu2 %v9794_v13  ;;  %v5956_v9 = vld [vmem:[#allocation2 + $0x16] sm:$0xff] }
 0x690   :  { %v5329_v13 = vld [vmem:[#allocation2 + $0xbb] sm:$0x7] }
 0x692   :  { %9692 = vmatmul.msk.f32.gmra.mxu2 %vm4677_vm3, %v5324_v4 }
 0x694   :  { %9706 = vmatmul.msk.f32.vlgmr.msra.gmra.mxu1 %vm4677_vm3, %v5522_v47  ;;  %v5525_v47 = vld [vmem:[#allocation2 + $0x1c] sm:$0xff] }
 0x695   :  { %9738 = vmatmul.msk.f32.vlgmr.msra.gmra.mxu3 %vm4677_vm3, %v5738_v8  ;;  %v14749_v26 = vpop.f32.mrf.mxu2  ;;  %v5741_v8 = vld [vmem:[#allocation2 + $0x1d] sm:$0xff] }
 0x696   :  { %9770 = vmatmul.msk.f32.vlgmr.msra.gmra.mxu0 %vm4677_vm3, %v5954_v15  ;;  %v5957_v15 = vld [vmem:[#allocation2 + $0x1e] sm:$0xff] }
 0x69a   :  { %9693 = vmatmul.msk.f32.gmra.mxu2 %vm4677_vm3, %v5325_v37  ;;  %v5328_v37 = vld [vmem:[#allocation2 + $0xb3] sm:$0xff] }
 0x69c   :  { %9707 = vmatmul.msk.f32.gmra.mxu1 %vm4677_vm3, %v5523_v54  ;;  %v5742_v54 = vld [vmem:[#allocation2 + $0x25] sm:$0xff] }
 0x69d   :  { %9739 = vmatmul.msk.f32.gmra.mxu3 %vm4677_vm3, %v5739_v6  ;;  %v14767_v27 = vpop.f32.mrf.mxu2  ;;  %v5958_v6 = vld [vmem:[#allocation2 + $0x26] sm:$0xff] }
 0x69e   :  { %9771 = vmatmul.msk.f32.gmra.mxu0 %vm4677_vm3, %v5955_v3 }
 0x6a2   :  { %9694 = vmatmul.msk.f32.gmra.mxu2 %vm4677_vm3, %v5326_v41 }
 0x6a4   :  { %9708 = vmatmul.msk.f32.gmra.mxu1 %vm4677_vm3, %v5524_v31 }
 0x6a5   :  { %9740 = vmatmul.msk.f32.gmra.mxu3 %vm4677_vm3, %v5740_v53  ;;  %v14782_v4 = vpop.f32.mrf.mxu2 }
 0x6a6   :  { %9772 = vmatmul.msk.f32.gmra.mxu0 %vm4677_vm3, %v5956_v9  ;;  %v5527_v9 = vld [vmem:[#allocation2 + $0x2c] sm:$0xff] }
 0x6aa   :  { %9695 = vmatmul.msk.f32.gmra.mxu2 %vm4677_vm3, %v5327_v7  ;;  %v5743_v7 = vld [vmem:[#allocation2 + $0x2d] sm:$0xff] }
 0x6ac   :  { %9709 = vmatmul.msk.f32.gmra.mxu1 %vm4677_vm3, %v5525_v47  ;;  %v5959_v47 = vld [vmem:[#allocation2 + $0x2e] sm:$0xff] }
 0x6ad   :  { %9741 = vmatmul.msk.f32.gmra.mxu3 %vm4677_vm3, %v5741_v8  ;;  %v14788_v43 = vpop.f32.mrf.mxu2 }
 0x6ae   :  { %9773 = vmatmul.msk.f32.gmra.mxu0 %vm4677_vm3, %v5957_v15 }
 0x6b1   :  { %v4894_v21 = vpop.f32.mrf.mxu1 }
 0x6b2   :  { %9696 = vmatmul.msk.f32.gmra.mxu2 %vm4677_vm3, %v5328_v37 }
 0x6b3   :  { %v5247_v5 = vpop.f32.mrf.mxu0 }
 0x6b4   :  { %9710 = vmatmul.msk.f32.gmra.mxu1 %vm4677_vm3, %v5526_v35  ;;  %v6170_v35 = vld [vmem:[#allocation2 + $0x7] sm:$0xff] }
 0x6b5   :  { %9742 = vmatmul.msk.f32.gmra.mxu3 %vm4677_vm3, %v5742_v54  ;;  %v14794_v3 = vpop.f32.mrf.mxu2 }
 0x6b6   :  { %9774 = vmatmul.msk.f32.gmra.mxu0 %vm4677_vm3, %v5958_v6  ;;  %v5528_v6 = vld [vmem:[#allocation2 + $0x34] sm:$0xff] }
 0x6b8   :  { %v5054_v29 = vpop.f32.mrf.mxu3 }
 0x6b9   :  { %v5055_v20 = vadd.f32 %v5054_v29, %v4894_v21  ;;  %v4897_v41 = vpop.f32.mrf.mxu1  ;;  %v5744_v29 = vld [vmem:[#allocation2 + $0x35] sm:$0xff] }
 0x6ba   :  { %9697 = vmatmul.msk.f32.gmra.mxu2 %vm4677_vm3, %v5329_v13 }
 0x6bb   :  { %v5250_v31 = vpop.f32.mrf.mxu0  ;;  %v14797_v53 = vadd.f32 %v5247_v5, %v5055_v20  ;;  %v5960_v20 = vld [vmem:[#allocation2 + $0x36] sm:$0xff] }
 0x6bc   :  { %9711 = vmatmul.msk.f32.gmra.mxu1 %vm4677_vm3, %v5527_v9 }
 0x6bd   :  { %9743 = vmatmul.msk.f32.gmra.mxu3 %vm4677_vm3, %v5743_v7  ;;  %v14802_v8 = vpop.f32.mrf.mxu2 }
 0x6be   :  { %9775 = vmatmul.msk.f32.gmra.mxu0 %vm4677_vm3, %v5959_v47  ;;  %v6171_v47 = vld [vmem:[#allocation2 + $0xf] sm:$0xff] }
 0x6c0   :  { %v5057_v15 = vpop.f32.mrf.mxu3 }
 0x6c1   :  { %v5058_v21 = vadd.f32 %v5057_v15, %v4897_v41  ;;  %v4900_v37 = vpop.f32.mrf.mxu1 }
 0x6c2   :  { %9802 = vmatmul.msk.f32.vlgmr.msra.gmra.mxu2 %vm4677_vm3, %v6170_v35  ;;  %v5745_v35 = vld [vmem:[#allocation2 + $0x3d] sm:$0xff] }
 0x6c3   :  { %v5253_v54 = vpop.f32.mrf.mxu0  ;;  %v14805_v5 = vadd.f32 %v5250_v31, %v5058_v21  ;;  %v5529_v21 = vld [vmem:[#allocation2 + $0x3c] sm:$0xff] }
 0x6c4   :  { %9712 = vmatmul.msk.f32.gmra.mxu1 %vm4677_vm3, %v5528_v6  ;;  %v5961_v6 = vld [vmem:[#allocation2 + $0x3e] sm:$0xff] }
 0x6c5   :  { %9744 = vmatmul.msk.f32.gmra.mxu3 %vm4677_vm3, %v5744_v29  ;;  %v14810_v13 = vpop.f32.mrf.mxu2 }
 0x6c6   :  { %9776 = vmatmul.msk.f32.gmra.mxu0 %vm4677_vm3, %v5960_v20 }
 0x6c8   :  { %v5060_v9 = vpop.f32.mrf.mxu3 }
 0x6c9   :  { %v5061_v41 = vadd.f32 %v5060_v9, %v4900_v37  ;;  %v4903_v7 = vpop.f32.mrf.mxu1 }
 0x6ca   :  { %9803 = vmatmul.msk.f32.gmra.mxu2 %vm4677_vm3, %v6171_v47  ;;  %v5746_v47 = vld [vmem:[#allocation2 + $0x45] sm:$0xff] }
 0x6cb   :  { %v5256_v15 = vpop.f32.mrf.mxu0  ;;  %v14813_v31 = vadd.f32 %v5253_v54, %v5061_v41  ;;  %v5530_v41 = vld [vmem:[#allocation2 + $0x44] sm:$0xff] }
 0x6cc   :  { %9713 = vmatmul.msk.f32.gmra.mxu1 %vm4677_vm3, %v5529_v21  ;;  %v5962_v21 = vld [vmem:[#allocation2 + $0x46] sm:$0xff] }
 0x6cd   :  { %9745 = vmatmul.msk.f32.gmra.mxu3 %vm4677_vm3, %v5745_v35  ;;  %v14818_v29 = vpop.f32.mrf.mxu2 }
 0x6ce   :  { %9777 = vmatmul.msk.f32.gmra.mxu0 %vm4677_vm3, %v5961_v6 }
 0x6d0   :  { %v5063_v20 = vpop.f32.mrf.mxu3 }
 0x6d1   :  { %v5064_v37 = vadd.f32 %v5063_v20, %v4903_v7  ;;  %v4906_v9 = vpop.f32.mrf.mxu1 }
 0x6d2   :  { %9804 = vmatmul.msk.f32.gmra.mxu2 %vm4677_vm3, %v6172_v24 }
 0x6d3   :  { %v5259_v36 = vpop.f32.mrf.mxu0  ;;  %v14821_v54 = vadd.f32 %v5256_v15, %v5064_v37  ;;  %v5531_v15 = vld [vmem:[#allocation2 + $0x4c] sm:$0xff] }
 0x6d4   :  { %9714 = vmatmul.msk.f32.gmra.mxu1 %vm4677_vm3, %v5530_v41  ;;  %v5747_v37 = vld [vmem:[#allocation2 + $0x4d] sm:$0xff] }
 0x6d5   :  { %9746 = vmatmul.msk.f32.gmra.mxu3 %vm4677_vm3, %v5746_v47  ;;  %v14826_v35 = vpop.f32.mrf.mxu2  ;;  %v5963_v41 = vld [vmem:[#allocation2 + $0x4e] sm:$0xff] }
 0x6d6   :  { %9778 = vmatmul.msk.f32.gmra.mxu0 %vm4677_vm3, %v5962_v21  ;;  %17285 = vst [vmem:[#allocation28_spill] sm:$0xff] %v14826_v35 }
 0x6d8   :  { %v5066_v6 = vpop.f32.mrf.mxu3 }
 0x6d9   :  { %v5067_v7 = vadd.f32 %v5066_v6, %v4906_v9  ;;  %v4909_v20 = vpop.f32.mrf.mxu1  ;;  %v6174_v6 = vld [vmem:[#allocation2 + $0x27] sm:$0xff] }
 0x6da   :  { %9805 = vmatmul.msk.f32.gmra.mxu2 %vm4677_vm3, %v6173_v56 }
 0x6db   :  { %v5262_v16 = vpop.f32.mrf.mxu0  ;;  %v14829_v24 = vadd.f32 %v5259_v36, %v5067_v7  ;;  %v5532_v36 = vld [vmem:[#allocation2 + $0x54] sm:$0xff] }
 0x6dc   :  { %9715 = vmatmul.msk.f32.gmra.mxu1 %vm4677_vm3, %v5531_v15  ;;  %v5748_v7 = vld [vmem:[#allocation2 + $0x55] sm:$0xff] }
 0x6dd   :  { %9747 = vmatmul.msk.f32.gmra.mxu3 %vm4677_vm3, %v5747_v37  ;;  %v5461_v47 = vpop.f32.mrf.mxu2  ;;  %v5964_v15 = vld [vmem:[#allocation2 + $0x56] sm:$0xff] }
 0x6de   :  { %9779 = vmatmul.msk.f32.gmra.mxu0 %vm4677_vm3, %v5963_v41 }
 0x6e0   :  { %v5069_v21 = vpop.f32.mrf.mxu3 }
 0x6e1   :  { %v5070_v52 = vadd.f32 %v5069_v21, %v4909_v20  ;;  %v4912_v9 = vpop.f32.mrf.mxu1 }
 0x6e2   :  { %9806 = vmatmul.msk.f32.gmra.mxu2 %vm4677_vm3, %v6174_v6 }
 0x6e3   :  { %v5265_v55 = vpop.f32.mrf.mxu0  ;;  %v14835_v56 = vadd.f32 %v5262_v16, %v5070_v52  ;;  %v5533_v16 = vld [vmem:[#allocation2 + $0x5c] sm:$0xff] }
 0x6e4   :  { %9716 = vmatmul.msk.f32.gmra.mxu1 %vm4677_vm3, %v5532_v36  ;;  %v5749_v36 = vld [vmem:[#allocation2 + $0x5d] sm:$0xff] }
 0x6e5   :  { %9748 = vmatmul.msk.f32.gmra.mxu3 %vm4677_vm3, %v5748_v7  ;;  %v5463_v37 = vpop.f32.mrf.mxu2  ;;  %v5965_v7 = vld [vmem:[#allocation2 + $0x5e] sm:$0xff] }
 0x6e6   :  { %9780 = vmatmul.msk.f32.gmra.mxu0 %vm4677_vm3, %v5964_v15  ;;  %v14841_v41 = vadd.f32 %v5463_v37, %v14797_v53 }
 0x6e8   :  { %17286 = vst [vmem:[#allocation6_spill] sm:$0xff] %v14841_v41  ;;  %v5072_v20 = vpop.f32.mrf.mxu3  ;;  %v6176_v41 = vld [vmem:[#allocation2 + $0x37] sm:$0xff] }
 0x6e9   :  { %v5073_v47 = vadd.f32 %v5072_v20, %v4912_v9  ;;  %v4915_v21 = vpop.f32.mrf.mxu1 }
 0x6ea   :  { %9807 = vmatmul.msk.f32.gmra.mxu2 %vm4677_vm3, %v6175_v28 }
 0x6eb   :  { %v5268_v6 = vpop.f32.mrf.mxu0  ;;  %v14844_v52 = vadd.f32 %v5265_v55, %v5073_v47  ;;  %v5534_v47 = vld [vmem:[#allocation2 + $0x64] sm:$0xff] }
 0x6ec   :  { %9717 = vmatmul.msk.f32.gmra.mxu1 %vm4677_vm3, %v5533_v16  ;;  %v5750_v16 = vld [vmem:[#allocation2 + $0x65] sm:$0xff] }
 0x6ed   :  { %9749 = vmatmul.msk.f32.gmra.mxu3 %vm4677_vm3, %v5749_v36  ;;  %v5466_v53 = vpop.f32.mrf.mxu2  ;;  %v5966_v36 = vld [vmem:[#allocation2 + $0x66] sm:$0xff] }
 0x6ee   :  { %9781 = vmatmul.msk.f32.gmra.mxu0 %vm4677_vm3, %v5965_v7  ;;  %v14850_v15 = vadd.f32 %v5466_v53, %v14805_v5 }
 0x6f0   :  { %17287 = vst [vmem:[#allocation10_spill] sm:$0xff] %v14850_v15  ;;  %v5075_v9 = vpop.f32.mrf.mxu3  ;;  %v6177_v15 = vld [vmem:[#allocation2 + $0x3f] sm:$0xff] }
 0x6f1   :  { %v5076_v37 = vadd.f32 %v5075_v9, %v4915_v21  ;;  %v4918_v20 = vpop.f32.mrf.mxu1 }
 0x6f2   :  { %9808 = vmatmul.msk.f32.gmra.mxu2 %vm4677_vm3, %v6176_v41 }
 0x6f3   :  { %v5271_v28 = vpop.f32.mrf.mxu0  ;;  %v14853_v55 = vadd.f32 %v5268_v6, %v5076_v37  ;;  %v5535_v37 = vld [vmem:[#allocation2 + $0x6c] sm:$0xff] }
 0x6f4   :  { %9718 = vmatmul.msk.f32.gmra.mxu1 %vm4677_vm3, %v5534_v47  ;;  %v5751_v47 = vld [vmem:[#allocation2 + $0x6d] sm:$0xff] }
 0x6f5   :  { %9750 = vmatmul.msk.f32.gmra.mxu3 %vm4677_vm3, %v5750_v16  ;;  %v5469_v5 = vpop.f32.mrf.mxu2  ;;  %v5967_v16 = vld [vmem:[#allocation2 + $0x6e] sm:$0xff] }
 0x6f6   :  { %9782 = vmatmul.msk.f32.gmra.mxu0 %vm4677_vm3, %v5966_v36  ;;  %v14859_v7 = vadd.f32 %v5469_v5, %v14813_v31 }
 0x6f8   :  { %17288 = vst [vmem:[#allocation37_spill] sm:$0xff] %v14859_v7  ;;  %v5078_v21 = vpop.f32.mrf.mxu3  ;;  %v6178_v7 = vld [vmem:[#allocation2 + $0x47] sm:$0xff] }
 0x6f9   :  { %v5079_v53 = vadd.f32 %v5078_v21, %v4918_v20  ;;  %v4921_v9 = vpop.f32.mrf.mxu1 }
 0x6fa   :  { %9809 = vmatmul.msk.f32.gmra.mxu2 %vm4677_vm3, %v6177_v15 }
 0x6fb   :  { %v5274_v41 = vpop.f32.mrf.mxu0  ;;  %v14862_v6 = vadd.f32 %v5271_v28, %v5079_v53  ;;  %v5536_v53 = vld [vmem:[#allocation2 + $0x74] sm:$0xff] }
 0x6fc   :  { %9719 = vmatmul.msk.f32.gmra.mxu1 %vm4677_vm3, %v5535_v37  ;;  %v5752_v37 = vld [vmem:[#allocation2 + $0x75] sm:$0xff] }
 0x6fd   :  { %9751 = vmatmul.msk.f32.gmra.mxu3 %vm4677_vm3, %v5751_v47  ;;  %v5472_v31 = vpop.f32.mrf.mxu2  ;;  %v5968_v47 = vld [vmem:[#allocation2 + $0x76] sm:$0xff] }
 0x6fe   :  { %9783 = vmatmul.msk.f32.gmra.mxu0 %vm4677_vm3, %v5967_v16  ;;  %v14868_v36 = vadd.f32 %v5472_v31, %v14821_v54 }
 0x700   :  { %17289 = vst [vmem:[#allocation27_spill] sm:$0xff] %v14868_v36  ;;  %v5081_v20 = vpop.f32.mrf.mxu3  ;;  %v6179_v36 = vld [vmem:[#allocation2 + $0x4f] sm:$0xff] }
 0x701   :  { %v5082_v5 = vadd.f32 %v5081_v20, %v4921_v9  ;;  %v4924_v21 = vpop.f32.mrf.mxu1 }
 0x702   :  { %9810 = vmatmul.msk.f32.gmra.mxu2 %vm4677_vm3, %v6178_v7 }
 0x703   :  { %v5277_v15 = vpop.f32.mrf.mxu0  ;;  %v14871_v28 = vadd.f32 %v5274_v41, %v5082_v5  ;;  %v5537_v5 = vld [vmem:[#allocation2 + $0x7c] sm:$0xff] }
 0x704   :  { %9720 = vmatmul.msk.f32.gmra.mxu1 %vm4677_vm3, %v5536_v53  ;;  %v5753_v53 = vld [vmem:[#allocation2 + $0x7d] sm:$0xff] }
 0x705   :  { %9752 = vmatmul.msk.f32.gmra.mxu3 %vm4677_vm3, %v5752_v37  ;;  %v5475_v54 = vpop.f32.mrf.mxu2  ;;  %v5969_v37 = vld [vmem:[#allocation2 + $0x7e] sm:$0xff] }
 0x706   :  { %9784 = vmatmul.msk.f32.gmra.mxu0 %vm4677_vm3, %v5968_v47  ;;  %v14877_v16 = vadd.f32 %v5475_v54, %v14829_v24 }
 0x708   :  { %17290 = vst [vmem:[#allocation29_spill] sm:$0xff] %v14877_v16  ;;  %v5084_v9 = vpop.f32.mrf.mxu3 }
 0x709   :  { %v5085_v31 = vadd.f32 %v5084_v9, %v4924_v21  ;;  %v4927_v20 = vpop.f32.mrf.mxu1  ;;  %v5020_v21 = vadd.f32 %v14523_v30, %v14521_v62  ;;  %v6180_v9 = vld [vmem:[#allocation2 + $0x57] sm:$0xff]  ;;  %v5970_v62 = vld [vmem:[#allocation2 + $0x86] sm:$0xff] }
 0x70a   :  { %9811 = vmatmul.msk.f32.gmra.mxu2 %vm4677_vm3, %v6179_v36 }
 0x70b   :  { %v5280_v7 = vpop.f32.mrf.mxu0  ;;  %v14880_v41 = vadd.f32 %v5277_v15, %v5085_v31  ;;  %v5283_v31 = vadd.f32 %v14526_v59, %v5020_v21  ;;  %v5023_v59 = vadd.f32 %v14536_v32, %v14534_v50  ;;  %v5971_v50 = vld [vmem:[#allocation2 + $0x8e] sm:$0xff] }
 0x70c   :  { %9721 = vmatmul.msk.f32.gmra.mxu1 %vm4677_vm3, %v5537_v5 }
 0x70d   :  { %9753 = vmatmul.msk.f32.gmra.mxu3 %vm4677_vm3, %v5753_v53  ;;  %v5478_v24 = vpop.f32.mrf.mxu2  ;;  %v5538_v53 = vld [vmem:[#allocation2 + $0x84] sm:$0xff]  ;;  %v5499_v35 = vadd.f32 %v14734_v38, %v5283_v31  ;;  %v5755_v31 = vld [vmem:[#allocation2 + $0x8d] sm:$0xff] }
 0x70e   :  { %9785 = vmatmul.msk.f32.gmra.mxu0 %vm4677_vm3, %v5969_v37  ;;  %v14888_v47 = vadd.f32 %v5478_v24, %v14835_v56  ;;  %v5754_v37 = vld [vmem:[#allocation2 + $0x85] sm:$0xff] }
 0x70f   :  { %v6181_v38 = vld [vmem:[#allocation2 + $0x5f] sm:$0xff] }
 0x710   :  { %v5087_v54 = vpop.f32.mrf.mxu3 }
 0x711   :  { %v5088_v36 = vadd.f32 %v5087_v54, %v4927_v20  ;;  %v5644_v15 = vpop.f32.mrf.mxu1  ;;  %v5284_v54 = vadd.f32 %v14539_v22, %v5023_v59 }
 0x712   :  { %9812 = vmatmul.msk.f32.gmra.mxu2 %vm4677_vm3, %v6180_v9  ;;  %v5715_v56 = vadd.f32 %v5644_v15, %v5499_v35  ;;  %v5539_v9 = vld [vmem:[#allocation2 + $0x8c] sm:$0xff]  ;;  %v5026_v35 = vadd.f32 %v14549_v11, %v14547_v19  ;;  %v9833_v19 = vld [vmem:[%s16957_s3 + $0x238] sm:$0xff] }
 0x713   :  { %v14891_v16 = vpop.f32.mrf.mxu0  ;;  %v14894_v5 = vadd.f32 %v5280_v7, %v5088_v36  ;;  %v5540_v11 = vld [vmem:[#allocation2 + $0x94] sm:$0xff]  ;;  %6499 = vmatpush.msrb.mxu1 %v9833_v19 }
 0x714   :  { %9722 = vmatmul.msk.f32.gmra.mxu1 %vm4677_vm3, %v5538_v53  ;;  %v5500_v53 = vadd.f32 %v14740_v46, %v5284_v54  ;;  %v9865_v46 = vld [vmem:[%s16957_s3 + $0x278] sm:$0xff]  ;;  %v5285_v59 = vadd.f32 %v14552_v14, %v5026_v35  ;;  %v6183_v35 = vld [vmem:[#allocation2 + $0x6f] sm:$0xff] }
 0x715   :  { %9754 = vmatmul.msk.f32.gmra.mxu3 %vm4677_vm3, %v5754_v37  ;;  %v5481_v30 = vpop.f32.mrf.mxu2 }
 0x716   :  { %9786 = vmatmul.msk.f32.gmra.mxu0 %vm4677_vm3, %v5970_v62  ;;  %v14903_v20 = vadd.f32 %v5481_v30, %v14844_v52  ;;  %v6182_v30 = vld [vmem:[#allocation2 + $0x67] sm:$0xff]  ;;  %6715 = vmatpush.msrb.mxu3 %v9865_v46  ;;  %v5541_v46 = vld [vmem:[#allocation2 + $0x9c] sm:$0xff] }
 0x718   :  { %v5860_v7 = vpop.f32.mrf.mxu3 }
 0x719   :  { %v14905_v24 = vadd.f32 %v5860_v7, %v5715_v56  ;;  %v5647_v21 = vpop.f32.mrf.mxu1  ;;  %v5501_v7 = vadd.f32 %v14749_v26, %v5285_v59  ;;  %v9832_v26 = vld [vmem:[%s16957_s3 + $0x230] sm:$0xff]  ;;  %v5973_v59 = vld [vmem:[#allocation2 + $0x9e] sm:$0xff] }
 0x71a   :  { %9813 = vmatmul.msk.f32.gmra.mxu2 %vm4677_vm3, %v6181_v38  ;;  %v5716_v22 = vadd.f32 %v5647_v21, %v5500_v53  ;;  %v5972_v21 = vld [vmem:[#allocation2 + $0x96] sm:$0xff]  ;;  %v5029_v38 = vadd.f32 %v14562_v60, %v14560_v63  ;;  %6500 = vmatpush.msrb.mxu1 %v9832_v26 }
 0x71b   :  { %v14908_v36 = vpop.f32.mrf.mxu0 }
 0x71c   :  { %9723 = vmatmul.msk.f32.gmra.mxu1 %vm4677_vm3, %v5539_v9  ;;  %v5286_v63 = vadd.f32 %v14565_v12, %v5029_v38  ;;  %v9862_v12 = vld [vmem:[%s16957_s3 + $0x260] sm:$0xff] }
 0x71d   :  { %9755 = vmatmul.msk.f32.gmra.mxu3 %vm4677_vm3, %v5755_v31  ;;  %v5484_v32 = vpop.f32.mrf.mxu2 }
 0x71e   :  { %9787 = vmatmul.msk.f32.gmra.mxu0 %vm4677_vm3, %v5971_v50  ;;  %v14918_v52 = vadd.f32 %v5484_v32, %v14853_v55  ;;  %v5756_v55 = vld [vmem:[#allocation2 + $0x95] sm:$0xff] }
 0x71f   :  { %v9864_v50 = vld [vmem:[%s16957_s3 + $0x270] sm:$0xff] }
 0x720   :  { %v5863_v15 = vpop.f32.mrf.mxu3  ;;  %6716 = vmatpush.msrb.mxu3 %v9864_v50  ;;  %v9827_v50 = vld [vmem:[%s16957_s3 + $0x208] sm:$0xff] }
 0x721   :  { %v14920_v37 = vadd.f32 %v5863_v15, %v5716_v22  ;;  %v5650_v62 = vpop.f32.mrf.mxu1  ;;  %v9863_v22 = vld [vmem:[%s16957_s3 + $0x268] sm:$0xff]  ;;  %v9830_v15 = vld [vmem:[%s16957_s3 + $0x220] sm:$0xff] }
 0x722   :  { %9814 = vmatmul.msk.f32.gmra.mxu2 %vm4677_vm3, %v6182_v30  ;;  %v5717_v54 = vadd.f32 %v5650_v62, %v5501_v7  ;;  %v5757_v62 = vld [vmem:[#allocation2 + $0x9d] sm:$0xff]  ;;  %6717 = vmatpush.msrb.mxu3 %v9863_v22  ;;  %v5502_v30 = vadd.f32 %v14767_v27, %v5286_v63  ;;  %v5758_v63 = vld [vmem:[#allocation2 + $0xa5] sm:$0xff] }
 0x723   :  { %v14926_v56 = vpop.f32.mrf.mxu0  ;;  %v9829_v27 = vld [vmem:[%s16957_s3 + $0x218] sm:$0xff]  ;;  %v5974_v22 = vld [vmem:[#allocation2 + $0xa6] sm:$0xff] }
 0x724   :  { %9724 = vmatmul.msk.f32.gmra.mxu1 %vm4677_vm3, %v5540_v11  ;;  %v5032_v11 = vadd.f32 %v14575_v23, %v14573_v61  ;;  %6718 = vmatpush.msrb.mxu3 %v9862_v12  ;;  %v9828_v61 = vld [vmem:[%s16957_s3 + $0x210] sm:$0xff] }
 0x725   :  { %9756 = vmatmul.msk.f32.gmra.mxu3 %vm4677_vm3, %v5756_v55  ;;  %v5487_v14 = vpop.f32.mrf.mxu2  ;;  %v9860_v23 = vld [vmem:[%s16957_s3 + $0x250] sm:$0xff] }
 0x726   :  { %9788 = vmatmul.msk.f32.gmra.mxu0 %vm4677_vm3, %v5972_v21  ;;  %v14939_v9 = vadd.f32 %v5487_v14, %v14862_v6  ;;  %v9831_v6 = vld [vmem:[%s16957_s3 + $0x228] sm:$0xff]  ;;  %v9861_v21 = vld [vmem:[%s16957_s3 + $0x258] sm:$0xff] }
 0x727   :  { %6501 = vmatpush.msrb.mxu1 %v9831_v6  ;;  %6719 = vmatpush.msrb.mxu3 %v9861_v21  ;;  %v5543_v21 = vld [vmem:[#allocation2 + $0xac] sm:$0xff] }
 0x728   :  { %v5866_v31 = vpop.f32.mrf.mxu3 }
 0x729   :  { %v14941_v53 = vadd.f32 %v5866_v31, %v5717_v54  ;;  %v5653_v32 = vpop.f32.mrf.mxu1  ;;  %6502 = vmatpush.msrb.mxu1 %v9830_v15  ;;  %v6184_v54 = vld [vmem:[#allocation2 + $0x77] sm:$0xff]  ;;  %v5287_v31 = vadd.f32 %v14578_v10, %v5032_v11  ;;  %6720 = vmatpush.msrb.mxu3 %v9860_v23  ;;  %v9826_v10 = vld [vmem:[%s16957_s3 + $0x200] sm:$0xff] }
 0x72a   :  { %9815 = vmatmul.msk.f32.gmra.mxu2 %vm4677_vm3, %v6183_v35  ;;  %v5718_v55 = vadd.f32 %v5653_v32, %v5502_v30  ;;  %v9859_v32 = vld [vmem:[%s16957_s3 + $0x248] sm:$0xff]  ;;  %v9858_v15 = vld [vmem:[%s16957_s3 + $0x240] sm:$0xff] }
 0x72b   :  { %v14950_v60 = vpop.f32.mrf.mxu0  ;;  %6503 = vmatpush.msrb.mxu1 %v9829_v27  ;;  %v5542_v35 = vld [vmem:[#allocation2 + $0xa4] sm:$0xff]  ;;  %v5503_v6 = vadd.f32 %v14782_v4, %v5287_v31  ;;  %6721 = vmatpush.msrb.mxu3 %v9859_v32 }
 0x72c   :  { %9725 = vmatmul.msk.f32.gmra.mxu1 %vm4677_vm3, %v5541_v46  ;;  %v6185_v11 = vld [vmem:[#allocation2 + $0x7f] sm:$0xff] }
 0x72d   :  { %9757 = vmatmul.msk.f32.gmra.mxu3 %vm4677_vm3, %v5757_v62  ;;  %v5490_v19 = vpop.f32.mrf.mxu2  ;;  %6504 = vmatpush.msrb.mxu1 %v9828_v61  ;;  %v5035_v62 = vadd.f32 %v14588_v40, %v14586_v17  ;;  %v5975_v40 = vld [vmem:[#allocation2 + $0xae] sm:$0xff]  ;;  %v5038_v61 = vadd.f32 %v14601_v18, %v14599_v45  ;;  %v5976_v45 = vld [vmem:[#allocation2 + $0xb6] sm:$0xff] }
 0x72e   :  { %9789 = vmatmul.msk.f32.gmra.mxu0 %vm4677_vm3, %v5973_v59  ;;  %v14972_v7 = vadd.f32 %v5490_v19, %v14871_v28  ;;  %6722 = vmatpush.msrb.mxu3 %v9858_v15 }
 0x72f   :  { %6505 = vmatpush.msrb.mxu1 %v9827_v50  ;;  %v5289_v50 = vadd.f32 %v14604_v49, %v5038_v61  ;;  %v5041_v49 = vadd.f32 %v14641_v57, %v14636_v44  ;;  %v5977_v44 = vld [vmem:[#allocation2 + $0xbe] sm:$0x7]  ;;  %v6602_v61 = vld [vmem:[#allocation2 + $0x9] sm:$0xff] }
 0x730   :  { %v5869_v14 = vpop.f32.mrf.mxu3 }
 0x731   :  { %v14980_v38 = vadd.f32 %v5869_v14, %v5718_v55  ;;  %v5656_v28 = vpop.f32.mrf.mxu1  ;;  %6506 = vmatpush.msrb.mxu1 %v9826_v10  ;;  %v5288_v55 = vadd.f32 %v14591_v58, %v5035_v62  ;;  %v5759_v14 = vld [vmem:[#allocation2 + $0xad] sm:$0xff]  ;;  %v5505_v10 = vadd.f32 %v14794_v3, %v5289_v50  ;;  %v5290_v3 = vadd.f32 %v14653_v39, %v5041_v49  ;;  %v6189_v50 = vld [vmem:[#allocation2 + $0x9f] sm:$0xff] }
 0x732   :  { %9816 = vmatmul.msk.f32.gmra.mxu2 %vm4677_vm3, %v6184_v54  ;;  %v5719_v12 = vadd.f32 %v5656_v28, %v5503_v6  ;;  %v5044_v39 = vadd.f32 %v14687_v48, %v14679_v33  ;;  %v5047_v48 = vadd.f32 %v14712_v51, %v14710_v1  ;;  %v5050_v51 = vadd.f32 %v14723_v0, %v14726_v42 }
 0x733   :  { %v14989_v26 = vpop.f32.mrf.mxu0  ;;  %v5504_v17 = vadd.f32 %v14788_v43, %v5288_v55  ;;  %v6186_v43 = vld [vmem:[#allocation2 + $0x87] sm:$0xff] }
 0x734   :  { %9726 = vmatmul.msk.f32.gmra.mxu1 %vm4677_vm3, %v5542_v35  ;;  %v5544_v35 = vld [vmem:[#allocation2 + $0xb4] sm:$0xff] }
 0x735   :  { %9758 = vmatmul.msk.f32.gmra.mxu3 %vm4677_vm3, %v5758_v63  ;;  %v5493_v46 = vpop.f32.mrf.mxu2  ;;  %v5760_v63 = vld [vmem:[#allocation2 + $0xb5] sm:$0xff] }
 0x736   :  { %9790 = vmatmul.msk.f32.gmra.mxu0 %vm4677_vm3, %v5974_v22  ;;  %v15011_v30 = vadd.f32 %v5493_v46, %v14880_v41  ;;  %v6187_v46 = vld [vmem:[#allocation2 + $0x8f] sm:$0xff] }
 0x738   :  { %v5872_v4 = vpop.f32.mrf.mxu3 }
 0x739   :  { %v15013_v59 = vadd.f32 %v5872_v4, %v5719_v12  ;;  %v5659_v19 = vpop.f32.mrf.mxu1  ;;  %v5545_v12 = vld [vmem:[#allocation2 + $0xbc] sm:$0x7] }
 0x73a   :  { %9817 = vmatmul.msk.f32.gmra.mxu2 %vm4677_vm3, %v6185_v11  ;;  %v5720_v58 = vadd.f32 %v5659_v19, %v5504_v17  ;;  %v5761_v4 = vld [vmem:[#allocation2 + $0xbd] sm:$0x7]  ;;  %v5506_v19 = vadd.f32 %v14802_v8, %v5290_v3  ;;  %v5291_v8 = vadd.f32 %v14699_v34, %v5044_v39 }
 0x73b   :  { %v15016_v27 = vpop.f32.mrf.mxu0  ;;  %v6188_v17 = vld [vmem:[#allocation2 + $0x97] sm:$0xff] }
 0x73c   :  { %9727 = vmatmul.msk.f32.gmra.mxu1 %vm4677_vm3, %v5543_v21 }
 0x73d   :  { %9759 = vmatmul.msk.f32.gmra.mxu3 %vm4677_vm3, %v5759_v14  ;;  %v5496_v41 = vpop.f32.mrf.mxu2 }
 0x73e   :  { %9791 = vmatmul.msk.f32.gmra.mxu0 %vm4677_vm3, %v5975_v40  ;;  %v15026_v23 = vadd.f32 %v5496_v41, %v14894_v5  ;;  %v6386_v41 = vld [vmem:[#allocation2 + $0x8] sm:$0xff] }
 0x740   :  { %v5875_v28 = vpop.f32.mrf.mxu3 }
 0x741   :  { %v15028_v54 = vadd.f32 %v5875_v28, %v5720_v58  ;;  %v5662_v31 = vpop.f32.mrf.mxu1  ;;  %v5507_v58 = vadd.f32 %v14810_v13, %v5291_v8  ;;  %v6387_v13 = vld [vmem:[#allocation2 + $0x10] sm:$0xff] }
 0x742   :  { %9818 = vmatmul.msk.f32.gmra.mxu2 %vm4677_vm3, %v6186_v43  ;;  %v5721_v5 = vadd.f32 %v5662_v31, %v5505_v10  ;;  %v6603_v10 = vld [vmem:[#allocation2 + $0x11] sm:$0xff] }
 0x743   :  { %v15031_v32 = vpop.f32.mrf.mxu0 }
 0x744   :  { %9728 = vmatmul.msk.f32.gmra.mxu1 %vm4677_vm3, %v5544_v35  ;;  %v5292_v35 = vadd.f32 %v14715_v2, %v5047_v48  ;;  %v6390_v48 = vld [vmem:[#allocation2 + $0x28] sm:$0xff] }
 0x745   :  { %9760 = vmatmul.msk.f32.gmra.mxu3 %vm4677_vm3, %v5760_v63  ;;  %v15038_v18 = vpop.f32.mrf.mxu2 }
 0x746   :  { %9792 = vmatmul.msk.f32.gmra.mxu0 %vm4677_vm3, %v5976_v45  ;;  %v5508_v45 = vadd.f32 %v14818_v29, %v5292_v35  ;;  %v6388_v29 = vld [vmem:[#allocation2 + $0x18] sm:$0xff] }
 0x748   :  { %v5878_v6 = vpop.f32.mrf.mxu3 }
 0x749   :  { %v15042_v22 = vadd.f32 %v5878_v6, %v5721_v5  ;;  %v5665_v15 = vpop.f32.mrf.mxu1 }
 0x74a   :  { %9819 = vmatmul.msk.f32.gmra.mxu2 %vm4677_vm3, %v6187_v46  ;;  %v5722_v11 = vadd.f32 %v5665_v15, %v5506_v19  ;;  %v6190_v15 = vld [vmem:[#allocation2 + $0xa7] sm:$0xff]  ;;  %v5293_v46 = vadd.f32 %v14728_v25, %v5050_v51  ;;  %v6191_v25 = vld [vmem:[#allocation2 + $0xaf] sm:$0xff] }
 0x74b   :  { %v15045_v62 = vpop.f32.mrf.mxu0  ;;  %v6391_v51 = vld [vmem:[#allocation2 + $0x30] sm:$0xff] }
 0x74c   :  { %9729 = vmatmul.msk.f32.gmra.mxu1 %vm4677_vm3, %v5545_v12  ;;  %v6604_v12 = vld [vmem:[#allocation2 + $0x19] sm:$0xff] }
 0x74d   :  { %9761 = vmatmul.msk.f32.gmra.mxu3 %vm4677_vm3, %v5761_v4  ;;  %v15052_v57 = vpop.f32.mrf.mxu2  ;;  %v17291_v4 = vld [vmem:[#allocation28_spill] sm:$0xff] }
 0x74e   :  { %9793 = vmatmul.msk.f32.gmra.mxu0 %vm4677_vm3, %v5977_v44  ;;  %v5509_v19 = vadd.f32 %v17291_v4, %v5293_v46  ;;  %v6392_v4 = vld [vmem:[#allocation2 + $0x38] sm:$0xff] }
 0x750   :  { %v5881_v55 = vpop.f32.mrf.mxu3 }
 0x751   :  { %v15056_v21 = vadd.f32 %v5881_v55, %v5722_v11  ;;  %v5668_v14 = vpop.f32.mrf.mxu1 }
 0x752   :  { %9820 = vmatmul.msk.f32.gmra.mxu2 %vm4677_vm3, %v6188_v17  ;;  %v5723_v28 = vadd.f32 %v5668_v14, %v5507_v58  ;;  %v6389_v14 = vld [vmem:[#allocation2 + $0x20] sm:$0xff]  ;;  %v6192_v58 = vld [vmem:[#allocation2 + $0xb7] sm:$0xff] }
 0x753   :  { %v15059_v40 = vpop.f32.mrf.mxu0  ;;  %v6605_v17 = vld [vmem:[#allocation2 + $0x21] sm:$0xff] }
 0x754   :  { %9834 = vmatmul.msk.f32.vlgmr.msrb.gmra.mxu1 %vm4677_vm3, %v6386_v41 }
 0x755   :  { %9866 = vmatmul.msk.f32.vlgmr.msrb.gmra.mxu3 %vm4677_vm3, %v6602_v61  ;;  %v15065_v33 = vpop.f32.mrf.mxu2 }
 0x758   :  { %v5884_v31 = vpop.f32.mrf.mxu3 }
 0x759   :  { %v15069_v34 = vadd.f32 %v5884_v31, %v5723_v28  ;;  %v5671_v43 = vpop.f32.mrf.mxu1  ;;  %v6606_v28 = vld [vmem:[#allocation2 + $0x29] sm:$0xff] }
 0x75a   :  { %9821 = vmatmul.msk.f32.gmra.mxu2 %vm4677_vm3, %v6189_v50  ;;  %v5724_v49 = vadd.f32 %v5671_v43, %v5508_v45  ;;  %v17292_v43 = vld [vmem:[#allocation6_spill] sm:$0xff]  ;;  %v6193_v45 = vld [vmem:[#allocation2 + $0xbf] sm:$0x7] }
 0x75b   :  { %v15072_v63 = vpop.f32.mrf.mxu0 }
 0x75c   :  { %9835 = vmatmul.msk.f32.gmra.mxu1 %vm4677_vm3, %v6387_v13 }
 0x75d   :  { %9867 = vmatmul.msk.f32.gmra.mxu3 %vm4677_vm3, %v6603_v10  ;;  %v15078_v1 = vpop.f32.mrf.mxu2 }
 0x760   :  { %v5887_v5 = vpop.f32.mrf.mxu3 }
 0x761   :  { %v15082_v2 = vadd.f32 %v5887_v5, %v5724_v49  ;;  %v5674_v6 = vpop.f32.mrf.mxu1  ;;  %v6607_v49 = vld [vmem:[#allocation2 + $0x31] sm:$0xff] }
 0x762   :  { %9822 = vmatmul.msk.f32.gmra.mxu2 %vm4677_vm3, %v6190_v15  ;;  %v5725_v42 = vadd.f32 %v5674_v6, %v5509_v19  ;;  %v17293_v6 = vld [vmem:[#allocation10_spill] sm:$0xff]  ;;  %v6608_v19 = vld [vmem:[#allocation2 + $0x39] sm:$0xff] }
 0x763   :  { %v15085_v3 = vpop.f32.mrf.mxu0 }
 0x764   :  { %9836 = vmatmul.msk.f32.gmra.mxu1 %vm4677_vm3, %v6388_v29 }
 0x765   :  { %9868 = vmatmul.msk.f32.gmra.mxu3 %vm4677_vm3, %v6604_v12  ;;  %v15091_v0 = vpop.f32.mrf.mxu2 }
 0x768   :  { %v5890_v44 = vpop.f32.mrf.mxu3 }
 0x769   :  { %v15093_v39 = vadd.f32 %v5890_v44, %v5725_v42  ;;  %v5677_v11 = vpop.f32.mrf.mxu1  ;;  %v17294_v44 = vld [vmem:[#allocation37_spill] sm:$0xff] }
 0x76a   :  { %9823 = vmatmul.msk.f32.gmra.mxu2 %vm4677_vm3, %v6191_v25 }
 0x76b   :  { %v6109_v55 = vpop.f32.mrf.mxu0 }
 0x76c   :  { %9837 = vmatmul.msk.f32.gmra.mxu1 %vm4677_vm3, %v6389_v14 }
 0x76d   :  { %9869 = vmatmul.msk.f32.gmra.mxu3 %vm4677_vm3, %v6605_v17  ;;  %v15098_v8 = vpop.f32.mrf.mxu2  ;;  %v6393_v17 = vld [vmem:[#allocation2 + $0x40] sm:$0xff] }
 0x770   :  { %v5893_v41 = vpop.f32.mrf.mxu3 }
 0x771   :  { %v5679_v61 = vpop.f32.mrf.mxu1  ;;  %v6609_v41 = vld [vmem:[#allocation2 + $0x41] sm:$0xff] }
 0x772   :  { %9824 = vmatmul.msk.f32.gmra.mxu2 %vm4677_vm3, %v6192_v58  ;;  %v5726_v50 = vadd.f32 %v5679_v61, %v17292_v43  ;;  %v17295_v58 = vld [vmem:[#allocation27_spill] sm:$0xff] }
 0x774   :  { %9838 = vmatmul.msk.f32.gmra.mxu1 %vm4677_vm3, %v6390_v48 }
 0x775   :  { %9870 = vmatmul.msk.f32.gmra.mxu3 %vm4677_vm3, %v6606_v28  ;;  %v15103_v31 = vpop.f32.mrf.mxu2 }
 0x778   :  { %v5895_v35 = vpop.f32.mrf.mxu3 }
 0x779   :  { %v15106_v13 = vadd.f32 %v5895_v35, %v5726_v50  ;;  %v5682_v10 = vpop.f32.mrf.mxu1  ;;  %v6394_v35 = vld [vmem:[#allocation2 + $0x48] sm:$0xff] }
 0x77a   :  { %9825 = vmatmul.msk.f32.gmra.mxu2 %vm4677_vm3, %v6193_v45  ;;  %v5727_v15 = vadd.f32 %v5682_v10, %v17293_v6  ;;  %v6610_v10 = vld [vmem:[#allocation2 + $0x49] sm:$0xff] }
 0x77c   :  { %9839 = vmatmul.msk.f32.gmra.mxu1 %vm4677_vm3, %v6391_v51  ;;  %v17296_v51 = vld [vmem:[#allocation29_spill] sm:$0xff] }
 0x77d   :  { %9871 = vmatmul.msk.f32.gmra.mxu3 %vm4677_vm3, %v6607_v49  ;;  %v15111_v5 = vpop.f32.mrf.mxu2 }
 0x780   :  { %v5898_v46 = vpop.f32.mrf.mxu3 }
 0x781   :  { %v15114_v29 = vadd.f32 %v5898_v46, %v5727_v15  ;;  %v5685_v12 = vpop.f32.mrf.mxu1 }
 0x782   :  { %v5728_v11 = vadd.f32 %v5685_v12, %v17294_v44  ;;  %v6395_v12 = vld [vmem:[#allocation2 + $0x50] sm:$0xff] }
 0x784   :  { %9840 = vmatmul.msk.f32.gmra.mxu1 %vm4677_vm3, %v6392_v4  ;;  %v6611_v4 = vld [vmem:[#allocation2 + $0x51] sm:$0xff] }
 0x785   :  { %9872 = vmatmul.msk.f32.gmra.mxu3 %vm4677_vm3, %v6608_v19  ;;  %v15118_v42 = vpop.f32.mrf.mxu2 }
 0x788   :  { %v5901_v25 = vpop.f32.mrf.mxu3 }
 0x789   :  { %v15121_v55 = vadd.f32 %v5901_v25, %v5728_v11  ;;  %v5688_v14 = vpop.f32.mrf.mxu1 }
 0x78a   :  { %v5729_v48 = vadd.f32 %v5688_v14, %v17295_v58 }
 0x78c   :  { %9841 = vmatmul.msk.f32.gmra.mxu1 %vm4677_vm3, %v6393_v17  ;;  %v6396_v17 = vld [vmem:[#allocation2 + $0x58] sm:$0xff] }
 0x78d   :  { %9873 = vmatmul.msk.f32.gmra.mxu3 %vm4677_vm3, %v6609_v41  ;;  %v15125_v61 = vpop.f32.mrf.mxu2  ;;  %v6612_v41 = vld [vmem:[#allocation2 + $0x59] sm:$0xff] }
 0x790   :  { %v5904_v28 = vpop.f32.mrf.mxu3 }
 0x791   :  { %v15128_v43 = vadd.f32 %v5904_v28, %v5729_v48  ;;  %v5691_v50 = vpop.f32.mrf.mxu1 }
 0x792   :  { %v5730_v49 = vadd.f32 %v5691_v50, %v17296_v51 }
 0x794   :  { %9842 = vmatmul.msk.f32.gmra.mxu1 %vm4677_vm3, %v6394_v35  ;;  %v6397_v35 = vld [vmem:[#allocation2 + $0x60] sm:$0xff] }
 0x795   :  { %9874 = vmatmul.msk.f32.gmra.mxu3 %vm4677_vm3, %v6610_v10  ;;  %v15132_v45 = vpop.f32.mrf.mxu2  ;;  %v6613_v10 = vld [vmem:[#allocation2 + $0x61] sm:$0xff] }
 0x798   :  { %v5907_v6 = vpop.f32.mrf.mxu3 }
 0x799   :  { %v15135_v15 = vadd.f32 %v5907_v6, %v5730_v49  ;;  %v5694_v46 = vpop.f32.mrf.mxu1 }
 0x79a   :  { %v5731_v44 = vadd.f32 %v5694_v46, %v14888_v47  ;;  %v6398_v46 = vld [vmem:[#allocation2 + $0x68] sm:$0xff] }
 0x79c   :  { %9843 = vmatmul.msk.f32.gmra.mxu1 %vm4677_vm3, %v6395_v12  ;;  %v6614_v12 = vld [vmem:[#allocation2 + $0x69] sm:$0xff] }
 0x79d   :  { %9875 = vmatmul.msk.f32.gmra.mxu3 %vm4677_vm3, %v6611_v4  ;;  %v6325_v19 = vpop.f32.mrf.mxu2 }
 0x7a0   :  { %v5910_v11 = vpop.f32.mrf.mxu3 }
 0x7a1   :  { %v15140_v25 = vadd.f32 %v5910_v11, %v5731_v44  ;;  %v5697_v14 = vpop.f32.mrf.mxu1  ;;  %v6399_v11 = vld [vmem:[#allocation2 + $0x70] sm:$0xff] }
 0x7a2   :  { %v5732_v58 = vadd.f32 %v5697_v14, %v14903_v20  ;;  %v6615_v14 = vld [vmem:[#allocation2 + $0x71] sm:$0xff] }
 0x7a4   :  { %9844 = vmatmul.msk.f32.gmra.mxu1 %vm4677_vm3, %v6396_v17 }
 0x7a5   :  { %9876 = vmatmul.msk.f32.gmra.mxu3 %vm4677_vm3, %v6612_v41 }
 0x7a8   :  { %v5913_v48 = vpop.f32.mrf.mxu3 }
 0x7a9   :  { %v15145_v28 = vadd.f32 %v5913_v48, %v5732_v58  ;;  %v5700_v50 = vpop.f32.mrf.mxu1  ;;  %v6400_v48 = vld [vmem:[#allocation2 + $0x78] sm:$0xff] }
 0x7aa   :  { %v5733_v47 = vadd.f32 %v5700_v50, %v14918_v52  ;;  %v6616_v50 = vld [vmem:[#allocation2 + $0x79] sm:$0xff] }
 0x7ac   :  { %9845 = vmatmul.msk.f32.gmra.mxu1 %vm4677_vm3, %v6397_v35 }
 0x7ad   :  { %9877 = vmatmul.msk.f32.gmra.mxu3 %vm4677_vm3, %v6613_v10 }
 0x7b0   :  { %v5916_v51 = vpop.f32.mrf.mxu3 }
 0x7b1   :  { %v15150_v49 = vadd.f32 %v5916_v51, %v5733_v47  ;;  %v5703_v6 = vpop.f32.mrf.mxu1  ;;  %v6401_v51 = vld [vmem:[#allocation2 + $0x80] sm:$0xff] }
 0x7b2   :  { %v5734_v20 = vadd.f32 %v5703_v6, %v14939_v9  ;;  %v6617_v6 = vld [vmem:[#allocation2 + $0x81] sm:$0xff] }
 0x7b4   :  { %9846 = vmatmul.msk.f32.gmra.mxu1 %vm4677_vm3, %v6398_v46 }
 0x7b5   :  { %9878 = vmatmul.msk.f32.gmra.mxu3 %vm4677_vm3, %v6614_v12 }
 0x7b8   :  { %v5919_v4 = vpop.f32.mrf.mxu3 }
 0x7b9   :  { %v15155_v19 = vadd.f32 %v5919_v4, %v5734_v20  ;;  %v5706_v44 = vpop.f32.mrf.mxu1  ;;  %v6402_v4 = vld [vmem:[#allocation2 + $0x88] sm:$0xff] }
 0x7ba   :  { %v5735_v52 = vadd.f32 %v5706_v44, %v14972_v7  ;;  %v6618_v44 = vld [vmem:[#allocation2 + $0x89] sm:$0xff] }
 0x7bc   :  { %9847 = vmatmul.msk.f32.gmra.mxu1 %vm4677_vm3, %v6399_v11  ;;  %v6147_v11 = vadd.f32 %v14891_v16, %v14905_v24 }
 0x7bd   :  { %9879 = vmatmul.msk.f32.gmra.mxu3 %vm4677_vm3, %v6615_v14 }
 0x7c0   :  { %v5922_v17 = vpop.f32.mrf.mxu3 }
 0x7c1   :  { %v15160_v41 = vadd.f32 %v5922_v17, %v5735_v52  ;;  %v5709_v58 = vpop.f32.mrf.mxu1  ;;  %v6363_v52 = vadd.f32 %v15038_v18, %v6147_v11  ;;  %v6403_v17 = vld [vmem:[#allocation2 + $0x90] sm:$0xff]  ;;  %v6149_v18 = vadd.f32 %v14926_v56, %v14941_v53  ;;  %v6621_v11 = vld [vmem:[#allocation2 + $0xa1] sm:$0xff] }
 0x7c2   :  { %v5736_v9 = vadd.f32 %v5709_v58, %v15011_v30  ;;  %v6619_v58 = vld [vmem:[#allocation2 + $0x91] sm:$0xff] }
 0x7c4   :  { %9848 = vmatmul.msk.f32.gmra.mxu1 %vm4677_vm3, %v6400_v48 }
 0x7c5   :  { %9880 = vmatmul.msk.f32.gmra.mxu3 %vm4677_vm3, %v6616_v50 }
 0x7c8   :  { %v5925_v35 = vpop.f32.mrf.mxu3 }
 0x7c9   :  { %v15165_v10 = vadd.f32 %v5925_v35, %v5736_v9  ;;  %v5712_v47 = vpop.f32.mrf.mxu1 }
 0x7ca   :  { %v5737_v7 = vadd.f32 %v5712_v47, %v15026_v23  ;;  %v6148_v23 = vadd.f32 %v14908_v36, %v14920_v37 }
 0x7cc   :  { %9849 = vmatmul.msk.f32.gmra.mxu1 %vm4677_vm3, %v6401_v51  ;;  %v6364_v48 = vadd.f32 %v15052_v57, %v6148_v23  ;;  %v6404_v57 = vld [vmem:[#allocation2 + $0x98] sm:$0xff] }
 0x7cd   :  { %9881 = vmatmul.msk.f32.gmra.mxu3 %vm4677_vm3, %v6617_v6  ;;  %v6620_v51 = vld [vmem:[#allocation2 + $0x99] sm:$0xff]  ;;  %v6365_v6 = vadd.f32 %v15065_v33, %v6149_v18 }
 0x7d0   :  { %v5928_v46 = vpop.f32.mrf.mxu3 }
 0x7d1   :  { %v15170_v12 = vadd.f32 %v5928_v46, %v5737_v7  ;;  %v6508_v20 = vpop.f32.mrf.mxu1 }
 0x7d2   :  { %v6579_v50 = vadd.f32 %v6508_v20, %v6363_v52 }
 0x7d4   :  { %9850 = vmatmul.msk.f32.gmra.mxu1 %vm4677_vm3, %v6402_v4 }
 0x7d5   :  { %9882 = vmatmul.msk.f32.gmra.mxu3 %vm4677_vm3, %v6618_v44  ;;  %v6150_v44 = vadd.f32 %v14950_v60, %v14980_v38  ;;  %v6151_v38 = vadd.f32 %v14989_v26, %v15013_v59  ;;  %v6152_v59 = vadd.f32 %v15016_v27, %v15028_v54  ;;  %v6153_v54 = vadd.f32 %v15031_v32, %v15042_v22 }
 0x7d6   :  { %v6154_v22 = vadd.f32 %v15045_v62, %v15056_v21  ;;  %v6155_v62 = vadd.f32 %v15059_v40, %v15069_v34 }
 0x7d8   :  { %v6724_v30 = vpop.f32.mrf.mxu3 }
 0x7d9   :  { %v6511_v14 = vpop.f32.mrf.mxu1  ;;  %v15182_v9 = vadd.f32 %v6724_v30, %v6579_v50  ;;  %v6405_v30 = vld [vmem:[#allocation2 + $0xa0] sm:$0xff]  ;;  %v6406_v50 = vld [vmem:[#allocation2 + $0xa8] sm:$0xff] }
 0x7da   :  { %v6580_v35 = vadd.f32 %v6511_v14, %v6364_v48  ;;  %v6366_v14 = vadd.f32 %v15078_v1, %v6150_v44 }
 0x7db   :  { %v6830_v36 = vrot.slane %v15182_v9, 1 }
 0x7dc   :  { %9851 = vmatmul.msk.f32.gmra.mxu1 %vm4677_vm3, %v6403_v17 }
 0x7dd   :  { %9883 = vmatmul.msk.f32.gmra.mxu3 %vm4677_vm3, %v6619_v58 }
 0x7e0   :  { %v6727_v47 = vpop.f32.mrf.mxu3 }
 0x7e1   :  { %v15184_v16 = vadd.f32 %v6727_v47, %v6580_v35  ;;  %v6514_v24 = vpop.f32.mrf.mxu1  ;;  %v6622_v35 = vld [vmem:[#allocation2 + $0xa9] sm:$0xff]  ;;  %v6367_v47 = vadd.f32 %v15091_v0, %v6151_v38 }
 0x7e2   :  { %v6581_v20 = vadd.f32 %v6514_v24, %v6365_v6  ;;  %v6623_v6 = vld [vmem:[#allocation2 + $0xb1] sm:$0xff] }
 0x7e3   :  { %v6831_v37 = vrot.slane %v15184_v16, 1 }
 0x7e4   :  { %9852 = vmatmul.msk.f32.gmra.mxu1 %vm4677_vm3, %v6404_v57 }
 0x7e5   :  { %9884 = vmatmul.msk.f32.gmra.mxu3 %vm4677_vm3, %v6620_v51  ;;  %v15194_v7 = vsel %vm4076_vm0, %v6830_v36, %v6831_v37  ;;  %v6407_v51 = vld [vmem:[#allocation2 + $0xb0] sm:$0xff] }
 0x7e6   :  { %v6862_v46 = vmax.f32 %v15182_v9, %v15194_v7 }
 0x7e8   :  { %v6730_v56 = vpop.f32.mrf.mxu3 }
 0x7e9   :  { %v15198_v53 = vadd.f32 %v6730_v56, %v6581_v20  ;;  %v6517_v4 = vpop.f32.mrf.mxu1  ;;  %v6368_v20 = vadd.f32 %v15098_v8, %v6152_v59 }
 0x7ea   :  { %v6582_v17 = vadd.f32 %v6517_v4, %v6366_v14  ;;  %v6624_v14 = vld [vmem:[#allocation2 + $0xb9] sm:$0xff] }
 0x7eb   :  { %v6833_v33 = vrot.slane %v15198_v53, 1 }
 0x7ec   :  { %9853 = vmatmul.msk.f32.gmra.mxu1 %vm4677_vm3, %v6405_v30 }
 0x7ed   :  { %9885 = vmatmul.msk.f32.gmra.mxu3 %vm4677_vm3, %v6621_v11  ;;  %v15207_v52 = vsel %vm4076_vm0, %v6831_v37, %v6833_v33  ;;  %v6408_v11 = vld [vmem:[#allocation2 + $0xb8] sm:$0xff] }
 0x7ee   :  { %v6863_v23 = vmax.f32 %v15184_v16, %v15207_v52 }
 0x7f0   :  { %v6733_v58 = vpop.f32.mrf.mxu3 }
 0x7f1   :  { %v15211_v48 = vadd.f32 %v6733_v58, %v6582_v17  ;;  %v6520_v60 = vpop.f32.mrf.mxu1  ;;  %v6369_v17 = vadd.f32 %v15103_v31, %v6153_v54  ;;  %v6625_v31 = vld [vmem:[#allocation2 + $0xc1] sm:$0x7] }
 0x7f2   :  { %v6583_v36 = vadd.f32 %v6520_v60, %v6367_v47  ;;  %v6409_v47 = vld [vmem:[#allocation2 + $0xc0] sm:$0x7] }
 0x7f3   :  { %v6835_v1 = vrot.slane %v15211_v48, 1 }
 0x7f4   :  { %9854 = vmatmul.msk.f32.gmra.mxu1 %vm4677_vm3, %v6406_v50 }
 0x7f5   :  { %9886 = vmatmul.msk.f32.gmra.mxu3 %vm4677_vm3, %v6622_v35  ;;  %v15220_v24 = vsel %vm4076_vm0, %v6833_v33, %v6835_v1 }
 0x7f6   :  { %v6864_v18 = vmax.f32 %v15198_v53, %v15220_v24 }
 0x7f8   :  { %v6736_v37 = vpop.f32.mrf.mxu3 }
 0x7f9   :  { %v15224_v57 = vadd.f32 %v6736_v37, %v6583_v36  ;;  %v6523_v26 = vpop.f32.mrf.mxu1  ;;  %v6370_v36 = vadd.f32 %v15111_v5, %v6154_v22 }
 0x7fa   :  { %v6584_v44 = vadd.f32 %v6523_v26, %v6368_v20  ;;  %v6371_v20 = vadd.f32 %v15118_v42, %v6155_v62 }
 0x7fb   :  { %v6837_v0 = vrot.slane %v15224_v57, 1 }
 0x7fc   :  { %9855 = vmatmul.msk.f32.gmra.mxu1 %vm4677_vm3, %v6407_v51 }
 0x7fd   :  { %9887 = vmatmul.msk.f32.gmra.mxu3 %vm4677_vm3, %v6623_v6  ;;  %v15233_v56 = vsel %vm4076_vm0, %v6835_v1, %v6837_v0 }
 0x7fe   :  { %v6865_v4 = vmax.f32 %v15211_v48, %v15233_v56 }
 0x800   :  { %v6739_v33 = vpop.f32.mrf.mxu3 }
 0x801   :  { %v15237_v30 = vadd.f32 %v6739_v33, %v6584_v44  ;;  %v6526_v27 = vpop.f32.mrf.mxu1 }
 0x802   :  { %v6585_v38 = vadd.f32 %v6526_v27, %v6369_v17  ;;  %v6327_v17 = vpop.f32.mrf.mxu2 }
 0x803   :  { %v6839_v8 = vrot.slane %v15237_v30, 1 }
 0x804   :  { %9856 = vmatmul.msk.f32.gmra.mxu1 %vm4677_vm3, %v6408_v11 }
 0x805   :  { %9888 = vmatmul.msk.f32.gmra.mxu3 %vm4677_vm3, %v6624_v14  ;;  %v15246_v58 = vsel %vm4076_vm0, %v6837_v0, %v6839_v8 }
 0x806   :  { %v6866_v60 = vmax.f32 %v15224_v57, %v15246_v58 }
 0x808   :  { %v6742_v1 = vpop.f32.mrf.mxu3 }
 0x809   :  { %v6801_v50 = vadd.f32 %v6742_v1, %v6585_v38  ;;  %v6529_v32 = vpop.f32.mrf.mxu1 }
 0x80a   :  { %v6586_v59 = vadd.f32 %v6529_v32, %v6370_v36 }
 0x80b   :  { %v6841_v35 = vrot.slane %v6801_v50, 1 }
 0x80c   :  { %9857 = vmatmul.msk.f32.gmra.mxu1 %vm4677_vm3, %v6409_v47 }
 0x80d   :  { %9889 = vmatmul.msk.f32.gmra.mxu3 %vm4677_vm3, %v6625_v31  ;;  %v6842_v37 = vsel %vm4076_vm0, %v6839_v8, %v6841_v35  ;;  %v6111_v8 = vpop.f32.mrf.mxu0 }
 0x80e   :  { %v6867_v26 = vmax.f32 %v15237_v30, %v6842_v37  ;;  %v6156_v30 = vadd.f32 %v15072_v63, %v15082_v2  ;;  %v6330_v2 = vpop.f32.mrf.mxu2 }
 0x810   :  { %v6745_v0 = vpop.f32.mrf.mxu3  ;;  %v6372_v38 = vadd.f32 %v15125_v61, %v6156_v30 }
 0x811   :  { %v6802_v51 = vadd.f32 %v6745_v0, %v6586_v59  ;;  %v6532_v6 = vpop.f32.mrf.mxu1 }
 0x812   :  { %v6587_v33 = vadd.f32 %v6532_v6, %v6371_v20 }
 0x813   :  { %v6843_v21 = vrot.slane %v6802_v51, 1 }
 0x815   :  { %v6844_v5 = vsel %vm4076_vm0, %v6841_v35, %v6843_v21  ;;  %v6114_v47 = vpop.f32.mrf.mxu0 }
 0x816   :  { %v6868_v44 = vmax.f32 %v6801_v50, %v6844_v5  ;;  %v6157_v50 = vadd.f32 %v15085_v3, %v15093_v39  ;;  %v6333_v3 = vpop.f32.mrf.mxu2 }
 0x818   :  { %v6748_v27 = vpop.f32.mrf.mxu3  ;;  %v6373_v31 = vadd.f32 %v15132_v45, %v6157_v50 }
 0x819   :  { %v6803_v54 = vadd.f32 %v6748_v27, %v6587_v33  ;;  %v6535_v11 = vpop.f32.mrf.mxu1  ;;  %v6158_v27 = vadd.f32 %v6111_v8, %v15106_v13 }
 0x81a   :  { %v6588_v1 = vadd.f32 %v6535_v11, %v6372_v38 }
 0x81b   :  { %v6845_v14 = vrot.slane %v6803_v54, 1  ;;  %v6374_v30 = vadd.f32 %v6327_v17, %v6158_v27 }
 0x81d   :  { %v6846_v40 = vsel %vm4076_vm0, %v6843_v21, %v6845_v14  ;;  %v6117_v20 = vpop.f32.mrf.mxu0 }
 0x81e   :  { %v6869_v34 = vmax.f32 %v6802_v51, %v6846_v40  ;;  %v6160_v58 = vadd.f32 %v6117_v20, %v15121_v55 }
 0x820   :  { %v6751_v42 = vpop.f32.mrf.mxu3  ;;  %v6376_v56 = vadd.f32 %v6333_v3, %v6160_v58 }
 0x821   :  { %v6804_v32 = vadd.f32 %v6751_v42, %v6588_v1  ;;  %v6538_v22 = vpop.f32.mrf.mxu1 }
 0x822   :  { %v6589_v37 = vadd.f32 %v6538_v22, %v6373_v31 }
 0x823   :  { %v6847_v35 = vrot.slane %v6804_v32, 1 }
 0x825   :  { %v6848_v63 = vsel %vm4076_vm0, %v6845_v14, %v6847_v35  ;;  %v6120_v33 = vpop.f32.mrf.mxu0  ;;  %v6159_v14 = vadd.f32 %v6114_v47, %v15114_v29 }
 0x826   :  { %v6870_v36 = vmax.f32 %v6803_v54, %v6848_v63  ;;  %v6336_v54 = vpop.f32.mrf.mxu2  ;;  %v6161_v52 = vadd.f32 %v6120_v33, %v15128_v43 }
 0x827   :  { %v6375_v38 = vadd.f32 %v6330_v2, %v6159_v14 }
 0x828   :  { %v6754_v61 = vpop.f32.mrf.mxu3  ;;  %v6377_v55 = vadd.f32 %v6336_v54, %v6161_v52 }
 0x829   :  { %v6805_v59 = vadd.f32 %v6754_v61, %v6589_v37  ;;  %v6541_v0 = vpop.f32.mrf.mxu1 }
 0x82b   :  { %v6849_v51 = vrot.slane %v6805_v59, 1 }
 0x82d   :  { %v6872_v6 = vmax.f32 %v6805_v59, %v6849_v51  ;;  %v6850_v62 = vsel %vm4076_vm0, %v6847_v35, %v6849_v51  ;;  %v6123_v57 = vpop.f32.mrf.mxu0 }
 0x82e   :  { %v6871_v21 = vmax.f32 %v6804_v32, %v6850_v62  ;;  %v6339_v48 = vpop.f32.mrf.mxu2  ;;  %v6162_v63 = vadd.f32 %v6123_v57, %v15135_v15 }
 0x82f   :  { %9890 = vmatpush.msk.msrb.mxu0 %vm4076_vm0, %v6872_v6 }
 0x830   :  { %v6757_v39 = vpop.f32.mrf.mxu3  ;;  %v6378_v43 = vadd.f32 %v6339_v48, %v6162_v63 }
 0x831   :  { %6904 = vmatpush.msrb.mxu0 %v6871_v21  ;;  %v6543_v45 = vpop.f32.mrf.mxu1 }
 0x832   :  { %v6590_v40 = vadd.f32 %v6543_v45, %v6374_v30 }
 0x833   :  { %6905 = vmatpush.msrb.mxu0 %v6870_v36 }
 0x835   :  { %6906 = vmatpush.msrb.mxu0 %v6869_v34  ;;  %v6126_v1 = vpop.f32.mrf.mxu0 }
 0x836   :  { %v6342_v32 = vpop.f32.mrf.mxu2  ;;  %v6163_v3 = vadd.f32 %v6126_v1, %v15140_v25 }
 0x837   :  { %6907 = vmatpush.msrb.mxu0 %v6868_v44 }
 0x838   :  { %v6759_v5 = vpop.f32.mrf.mxu3  ;;  %v6379_v45 = vadd.f32 %v6342_v32, %v6163_v3 }
 0x839   :  { %6908 = vmatpush.msrb.mxu0 %v6867_v26  ;;  %v6546_v11 = vpop.f32.mrf.mxu1  ;;  %v6806_v44 = vadd.f32 %v6759_v5, %v6590_v40 }
 0x83a   :  { %v6591_v34 = vadd.f32 %v6546_v11, %v6375_v38 }
 0x83b   :  { %6909 = vmatpush.msrb.mxu0 %v6866_v60  ;;  %v6951_v60 = vrot.slane %v6806_v44, 1 }
 0x83d   :  { %6910 = vmatpush.msrb.mxu0 %v6865_v4  ;;  %v6129_v61 = vpop.f32.mrf.mxu0 }
 0x83e   :  { %v6345_v0 = vpop.f32.mrf.mxu2  ;;  %v6164_v25 = vadd.f32 %v6129_v61, %v15145_v28 }
 0x83f   :  { %6911 = vmatpush.msrb.mxu0 %v6864_v18 }
 0x840   :  { %v6762_v13 = vpop.f32.mrf.mxu3 }
 0x841   :  { %v6807_v26 = vadd.f32 %v6762_v13, %v6591_v34  ;;  %6912 = vmatpush.msrb.mxu0 %v6863_v23  ;;  %v6549_v29 = vpop.f32.mrf.mxu1 }
 0x842   :  { %v6592_v18 = vadd.f32 %v6549_v29, %v6376_v56  ;;  %v6380_v29 = vadd.f32 %v6345_v0, %v6164_v25 }
 0x843   :  { %v6952_v8 = vrot.slane %v6807_v26, 1  ;;  %6913 = vmatpush.msrb.mxu0 %v6862_v46 }
 0x845   :  { %v6953_v53 = vsel %vm4076_vm0, %v6951_v60, %v6952_v8  ;;  %v6132_v11 = vpop.f32.mrf.mxu0 }
 0x846   :  { %v6986_v24 = vmax.f32 %v6806_v44, %v6953_v53  ;;  %v6348_v14 = vpop.f32.mrf.mxu2  ;;  %v17297_v44 = vmov 0.0   ;;  %v6165_v28 = vadd.f32 %v6132_v11, %v15150_v49 }
 0x847   :  { %v15308_v13 = vsel %vm13961_vm2, 1.0, %v17297_v44  ;;  %vm7997_vm2 = vcmask 285696  }
 0x848   :  { %v6765_v4 = vpop.f32.mrf.mxu3  ;;  %v7010_v50 = vrot.slane %v6986_v24, 2  ;;  %17299 = vst [vmem:[#allocation25_spill] sm:$0xff] %v15308_v13  ;;  %9891 = vmatmul.msk.f32.vlgmr.msrb.gmra.mxu0 %vm6876_vm15, %v15308_v13 }
 0x849   :  { %v6808_v17 = vadd.f32 %v6765_v4, %v6592_v18  ;;  %v6552_v16 = vpop.f32.mrf.mxu1 }
 0x84a   :  { %v6593_v9 = vadd.f32 %v6552_v16, %v6377_v55  ;;  %v6381_v16 = vadd.f32 %v6348_v14, %v6165_v28 }
 0x84b   :  { %v6954_v23 = vrot.slane %v6808_v17, 1 }
 0x84d   :  { %v6955_v42 = vsel %vm4076_vm0, %v6952_v8, %v6954_v23  ;;  %v6135_v18 = vpop.f32.mrf.mxu0 }
 0x84e   :  { %v6987_v22 = vmax.f32 %v6807_v26, %v6955_v42 }
 0x850   :  { %v6768_v7 = vpop.f32.mrf.mxu3  ;;  %v7011_v46 = vrot.slane %v6987_v22, 2 }
 0x851   :  { %v6809_v35 = vadd.f32 %v6768_v7, %v6593_v9  ;;  %v6555_v47 = vpop.f32.mrf.mxu1 }
 0x852   :  { %v15293_v31 = vsel %vm4482_vm1, %v7010_v50, %v7011_v46  ;;  %v6594_v59 = vadd.f32 %v6555_v47, %v6378_v43 }
 0x853   :  { %v6956_v2 = vrot.slane %v6809_v35, 1 }
 0x855   :  { %v6957_v36 = vsel %vm4076_vm0, %v6954_v23, %v6956_v2  ;;  %v15321_v23 = vsel %vm13994_vm5, 1.0, %v17297_v44  ;;  %vm8072_vm5 = vcmask 1041408  }
 0x856   :  { %v6988_v37 = vmax.f32 %v6808_v17, %v6957_v36  ;;  %v6351_v17 = vpop.f32.mrf.mxu2  ;;  %17301 = vst [vmem:[#allocation26_spill] sm:$0xff] %v15321_v23  ;;  %9892 = vmatmul.msk.f32.gmra.mxu0 %vm6876_vm15, %v15321_v23 }
 0x858   :  { %v6771_v51 = vpop.f32.mrf.mxu3  ;;  %v7013_v6 = vrot.slane %v6988_v37, 2 }
 0x859   :  { %v6810_v62 = vadd.f32 %v6771_v51, %v6594_v59  ;;  %v6558_v21 = vpop.f32.mrf.mxu1 }
 0x85a   :  { %v15298_v20 = vsel %vm4482_vm1, %v7011_v46, %v7013_v6  ;;  %v6595_v33 = vadd.f32 %v6558_v21, %v6379_v45  ;;  %v6166_v46 = vadd.f32 %v6135_v18, %v15155_v19  ;;  %v7124_v45 = vld [vmem:[%s16959_s5 + $0x58] sm:$0xff] }
 0x85b   :  { %v6958_v39 = vrot.slane %v6810_v62, 1 }
 0x85c   :  { %v6382_v47 = vadd.f32 %v6351_v17, %v6166_v46 }
 0x85d   :  { %v6959_v15 = vsel %vm4076_vm0, %v6956_v2, %v6958_v39  ;;  %v15333_v2 = vsel %vm14015_vm7, 1.0, %v17297_v44  ;;  %vm8676_vm7 = vcmask 1040384  }
 0x85e   :  { %v6989_v5 = vmax.f32 %v6809_v35, %v6959_v15  ;;  %v6138_v35 = vpop.f32.mrf.mxu0  ;;  %17303 = vst [vmem:[#allocation8_spill] sm:$0xff] %v15333_v2  ;;  %v6354_v36 = vpop.f32.mrf.mxu2  ;;  %9893 = vmatmul.msk.f32.gmra.mxu0 %vm6876_vm15, %v15333_v2  ;;  %v15344_v15 = vsel %vm14041_vm9, 1.0, %v17297_v44  ;;  %vm8673_vm9 = vcmask 72704  }
 0x860   :  { %v6774_v27 = vpop.f32.mrf.mxu3  ;;  %v7015_v54 = vrot.slane %v6989_v5, 2 }
 0x861   :  { %v6811_v30 = vadd.f32 %v6774_v27, %v6595_v33  ;;  %v6561_v38 = vpop.f32.mrf.mxu1 }
 0x862   :  { %v15303_v40 = vsel %vm4482_vm1, %v7013_v6, %v7015_v54  ;;  %v6596_v60 = vadd.f32 %v6561_v38, %v6380_v29 }
 0x863   :  { %v6960_v26 = vrot.slane %v6811_v30, 1 }
 0x865   :  { %v6961_v57 = vsel %vm4076_vm0, %v6958_v39, %v6960_v26 }
 0x866   :  { %v6990_v58 = vmax.f32 %v6810_v62, %v6961_v57  ;;  %v6167_v62 = vadd.f32 %v6138_v35, %v15160_v41  ;;  %9894 = vmatmul.msk.f32.gmra.mxu0 %vm6876_vm15, %v15344_v15  ;;  %v6141_v33 = vpop.f32.mrf.mxu0  ;;  %v7120_v57 = vld [vmem:[%s16959_s5 + $0x38] sm:$0xff] }
 0x867   :  { %v6168_v34 = vadd.f32 %v6141_v33, %v15165_v10  ;;  %v9964_v33 = vld [vmem:[%s16959_s5 + $0x260] sm:$0xff] }
 0x868   :  { %v6777_v8 = vpop.f32.mrf.mxu3  ;;  %v7017_v48 = vrot.slane %v6990_v58, 2  ;;  %v6383_v3 = vadd.f32 %v6354_v36, %v6167_v62  ;;  %v15354_v58 = vsel %vm14075_vm11, 1.0, %v17297_v44  ;;  %v9916_v62 = vld [vmem:[%s16959_s5 + $0xe0] sm:$0xff]  ;;  %vm8712_vm11 = vcmask 1043456  }
 0x869   :  { %v6812_v56 = vadd.f32 %v6777_v8, %v6596_v60  ;;  %v6564_v53 = vpop.f32.mrf.mxu1 }
 0x86a   :  { %v15315_v24 = vsel %vm4482_vm1, %v7015_v54, %v7017_v48  ;;  %v6597_v42 = vadd.f32 %v6564_v53, %v6381_v16  ;;  %v6357_v54 = vpop.f32.mrf.mxu2 }
 0x86b   :  { %v6962_v4 = vrot.slane %v6812_v56, 1 }
 0x86d   :  { %v6963_v1 = vsel %vm4076_vm0, %v6960_v26, %v6962_v4  ;;  %v6384_v26 = vadd.f32 %v6357_v54, %v6168_v34  ;;  %v7123_v54 = vld [vmem:[%s16959_s5 + $0x50] sm:$0xff]  ;;  %v9912_v34 = vld [vmem:[%s16959_s5 + $0xc0] sm:$0xff] }
 0x86e   :  { %v6991_v55 = vmax.f32 %v6811_v30, %v6963_v1  ;;  %9895 = vmatmul.msk.f32.gmra.mxu0 %vm6876_vm15, %v15354_v58  ;;  %v6144_v18 = vpop.f32.mrf.mxu0 }
 0x870   :  { %v6780_v32 = vpop.f32.mrf.mxu3  ;;  %v7019_v22 = vrot.slane %v6991_v55, 2 }
 0x871   :  { %v6813_v9 = vadd.f32 %v6780_v32, %v6597_v42  ;;  %v6567_v7 = vpop.f32.mrf.mxu1 }
 0x872   :  { %v15327_v49 = vsel %vm4482_vm1, %v7017_v48, %v7019_v22  ;;  %v6598_v61 = vadd.f32 %v6567_v7, %v6382_v47  ;;  %v6360_v28 = vpop.f32.mrf.mxu2  ;;  %v15364_v7 = vsel %vm14090_vm13, 1.0, %v17297_v44 }
 0x873   :  { %v6964_v50 = vrot.slane %v6813_v9, 1 }
 0x875   :  { %v6965_v43 = vsel %vm4076_vm0, %v6962_v4, %v6964_v50  ;;  %v6169_v4 = vadd.f32 %v6144_v18, %v15170_v12  ;;  %v9976_v18 = vld [vmem:[%s16959_s5 + $0x2c0] sm:$0xff] }
 0x876   :  { %v6992_v37 = vmax.f32 %v6812_v56, %v6965_v43  ;;  %9896 = vmatmul.msk.f32.gmra.mxu0 %vm6876_vm15, %v15364_v7 }
 0x877   :  { %v6385_v52 = vadd.f32 %v6360_v28, %v6169_v4  ;;  %v9909_v28 = vld [vmem:[%s16959_s5 + $0xa8] sm:$0xff]  ;;  %v9959_v4 = vld [vmem:[%s16959_s5 + $0x238] sm:$0xff] }
 0x878   :  { %v6783_v59 = vpop.f32.mrf.mxu3  ;;  %v7021_v0 = vrot.slane %v6992_v37, 2 }
 0x879   :  { %v6814_v51 = vadd.f32 %v6783_v59, %v6598_v61  ;;  %v6570_v19 = vpop.f32.mrf.mxu1  ;;  %v9919_v59 = vld [vmem:[%s16959_s5 + $0xf8] sm:$0xff] }
 0x87a   :  { %v7022_v6 = vsel %vm4482_vm1, %v7019_v22, %v7021_v0  ;;  %v6599_v27 = vadd.f32 %v6570_v19, %v6383_v3  ;;  %7157 = vmatpush.msra.mxu0 %v9919_v59  ;;  %v9966_v19 = vld [vmem:[%s16959_s5 + $0x270] sm:$0xff]  ;;  %v9965_v3 = vld [vmem:[%s16959_s5 + $0x268] sm:$0xff] }
 0x87b   :  { %v6966_v21 = vrot.slane %v6814_v51, 1  ;;  %v9970_v59 = vld [vmem:[%s16959_s5 + $0x290] sm:$0xff] }
 0x87d   :  { %v6967_v39 = vsel %vm4076_vm0, %v6964_v50, %v6966_v21 }
 0x87e   :  { %v6993_v5 = vmax.f32 %v6813_v9, %v6967_v39  ;;  %v9915_v39 = vld [vmem:[%s16959_s5 + $0xd8] sm:$0xff]  ;;  %v9906_v9 = vld [vmem:[%s16959_s5 + $0x90] sm:$0xff] }
 0x880   :  { %v6786_v11 = vpop.f32.mrf.mxu3  ;;  %v7023_v30 = vrot.slane %v6993_v5, 2  ;;  %v9981_v5 = vld [vmem:[%s16959_s5 + $0x2e8] sm:$0xff] }
 0x881   :  { %v6815_v14 = vadd.f32 %v6786_v11, %v6599_v27  ;;  %v6573_v41 = vpop.f32.mrf.mxu1  ;;  %v9914_v27 = vld [vmem:[%s16959_s5 + $0xd0] sm:$0xff]  ;;  %v9980_v11 = vld [vmem:[%s16959_s5 + $0x2e0] sm:$0xff] }
 0x882   :  { %v7024_v38 = vsel %vm4482_vm1, %v7021_v0, %v7023_v30  ;;  %v6600_v8 = vadd.f32 %v6573_v41, %v6384_v26  ;;  %v9967_v0 = vld [vmem:[%s16959_s5 + $0x278] sm:$0xff]  ;;  %v7122_v41 = vld [vmem:[%s16959_s5 + $0x48] sm:$0xff]  ;;  %v9962_v26 = vld [vmem:[%s16959_s5 + $0x250] sm:$0xff] }
 0x883   :  { %v6968_v25 = vrot.slane %v6815_v14, 1  ;;  %7463 = vmatpush.msra.mxu1 %v9967_v0 }
 0x885   :  { %v6969_v29 = vsel %vm4076_vm0, %v6966_v21, %v6968_v25  ;;  %v7125_v21 = vld [vmem:[%s16959_s5 + $0x60] sm:$0xff]  ;;  %7464 = vmatpush.msra.mxu1 %v9966_v19 }
 0x886   :  { %v6994_v60 = vmax.f32 %v6814_v51, %v6969_v29  ;;  %v9983_v51 = vld [vmem:[%s16959_s5 + $0x2f8] sm:$0xff]  ;;  %v9978_v29 = vld [vmem:[%s16959_s5 + $0x2d0] sm:$0xff] }
 0x887   :  { %7552 = vmatpush.msra.mxu3 %v9983_v51  ;;  %7465 = vmatpush.msra.mxu1 %v9965_v3 }
 0x888   :  { %v6789_v48 = vpop.f32.mrf.mxu3  ;;  %v7025_v56 = vrot.slane %v6994_v60, 2  ;;  %v9961_v60 = vld [vmem:[%s16959_s5 + $0x248] sm:$0xff] }
 0x889   :  { %v6816_v53 = vadd.f32 %v6789_v48, %v6600_v8  ;;  %v6576_v16 = vpop.f32.mrf.mxu1  ;;  %7466 = vmatpush.msra.mxu1 %v9964_v33  ;;  %v9977_v8 = vld [vmem:[%s16959_s5 + $0x2c8] sm:$0xff]  ;;  %v9910_v48 = vld [vmem:[%s16959_s5 + $0xb0] sm:$0xff] }
 0x88a   :  { %v7026_v10 = vsel %vm4482_vm1, %v7023_v30, %v7025_v56  ;;  %v6601_v42 = vadd.f32 %v6576_v16, %v6385_v52  ;;  %v9963_v30 = vld [vmem:[%s16959_s5 + $0x258] sm:$0xff]  ;;  %v9908_v16 = vld [vmem:[%s16959_s5 + $0xa0] sm:$0xff] }
 0x88b   :  { %v6970_v17 = vrot.slane %v6816_v53, 1  ;;  %7467 = vmatpush.msra.mxu1 %v9963_v30  ;;  %v7117_v52 = vld [vmem:[%s16959_s5 + $0x20] sm:$0xff] }
 0x88d   :  { %v6971_v1 = vsel %vm4076_vm0, %v6968_v25, %v6970_v17  ;;  %v7121_v25 = vld [vmem:[%s16959_s5 + $0x40] sm:$0xff]  ;;  %7468 = vmatpush.msra.mxu1 %v9962_v26 }
 0x88e   :  { %v6995_v55 = vmax.f32 %v6815_v14, %v6971_v1  ;;  %v9913_v14 = vld [vmem:[%s16959_s5 + $0xc8] sm:$0xff]  ;;  %v9958_v1 = vld [vmem:[%s16959_s5 + $0x230] sm:$0xff] }
 0x88f   :  { %7469 = vmatpush.msra.mxu1 %v9961_v60 }
 0x890   :  { %v6792_v32 = vpop.f32.mrf.mxu3  ;;  %v7027_v22 = vrot.slane %v6995_v55, 2  ;;  %v9974_v55 = vld [vmem:[%s16959_s5 + $0x2b0] sm:$0xff] }
 0x891   :  { %v6817_v46 = vadd.f32 %v6792_v32, %v6601_v42  ;;  %v7116_v42 = vld [vmem:[%s16959_s5 + $0x18] sm:$0xff]  ;;  %v9957_v32 = vld [vmem:[%s16959_s5 + $0x228] sm:$0xff] }
 0x892   :  { %v7028_v12 = vsel %vm4482_vm1, %v7025_v56, %v7027_v22  ;;  %v7119_v56 = vld [vmem:[%s16959_s5 + $0x30] sm:$0xff] }
 0x893   :  { %v6972_v50 = vrot.slane %v6817_v46, 1 }
 0x895   :  { %v6973_v35 = vsel %vm4076_vm0, %v6970_v17, %v6972_v50  ;;  %v6997_v47 = vmax.f32 %v6817_v46, %v6972_v50  ;;  %v9975_v17 = vld [vmem:[%s16959_s5 + $0x2b8] sm:$0xff]  ;;  %v7115_v46 = vld [vmem:[%s16959_s5 + $0x10] sm:$0xff]  ;;  %v9972_v50 = vld [vmem:[%s16959_s5 + $0x2a0] sm:$0xff] }
 0x896   :  { %v6996_v63 = vmax.f32 %v6816_v53, %v6973_v35  ;;  %v9960_v53 = vld [vmem:[%s16959_s5 + $0x240] sm:$0xff]  ;;  %v9905_v35 = vld [vmem:[%s16959_s5 + $0x88] sm:$0xff] }
 0x897   :  { %v7031_v43 = vrot.slane %v6997_v47, 2  ;;  %7470 = vmatpush.msra.mxu1 %v9960_v53  ;;  %v9955_v47 = vld [vmem:[%s16959_s5 + $0x218] sm:$0xff] }
 0x898   :  { %v7029_v36 = vrot.slane %v6996_v63, 2  ;;  %v7114_v63 = vld [vmem:[%s16959_s5 + $0x8] sm:$0xff] }
 0x899   :  { %7471 = vmatpush.msra.mxu1 %v9959_v4  ;;  %v9935_v4 = vld [vmem:[%s16959_s5 + $0x178] sm:$0xff] }
 0x89a   :  { %v7032_v37 = vsel %vm4482_vm1, %v7029_v36, %v7031_v43  ;;  %v7030_v61 = vsel %vm4482_vm1, %v7027_v22, %v7029_v36  ;;  %v9973_v22 = vld [vmem:[%s16959_s5 + $0x2a8] sm:$0xff]  ;;  %v9971_v43 = vld [vmem:[%s16959_s5 + $0x298] sm:$0xff]  ;;  %v9904_v36 = vld [vmem:[%s16959_s5 + $0x80] sm:$0xff]  ;;  %vm8004_vm1 = vcmask 1042432  }
 0x89b   :  { %9897 = vmatpush.msk.msrb.mxu2 %vm4076_vm0, %v7032_v37  ;;  %7472 = vmatpush.msra.mxu1 %v9958_v1  ;;  %v7113_v37 = vld [vmem:[%s16959_s5] sm:$0xff] }
 0x89d   :  { %7051 = vmatpush.msrb.mxu2 %v7030_v61  ;;  %7473 = vmatpush.msra.mxu1 %v9957_v32  ;;  %v9954_v61 = vld [vmem:[%s16959_s5 + $0x210] sm:$0xff] }
 0x89e   :  { %v9950_v32 = vld [vmem:[%s16959_s5 + $0x1f0] sm:$0xff] }
 0x89f   :  { %7052 = vmatpush.msrb.mxu2 %v7028_v12  ;;  %v9956_v12 = vld [vmem:[%s16959_s5 + $0x220] sm:$0xff] }
 0x8a0   :  { %7474 = vmatpush.msra.mxu1 %v9956_v12  ;;  %v9948_v12 = vld [vmem:[%s16959_s5 + $0x1e0] sm:$0xff] }
 0x8a1   :  { %7053 = vmatpush.msrb.mxu2 %v7026_v10  ;;  %v7118_v10 = vld [vmem:[%s16959_s5 + $0x28] sm:$0xff] }
 0x8a2   :  { %7475 = vmatpush.msra.mxu1 %v9955_v47 }
 0x8a3   :  { %7054 = vmatpush.msrb.mxu2 %v7024_v38  ;;  %v9979_v38 = vld [vmem:[%s16959_s5 + $0x2d8] sm:$0xff] }
 0x8a4   :  { %7476 = vmatpush.msra.mxu1 %v9954_v61  ;;  %v9947_v61 = vld [vmem:[%s16959_s5 + $0x1d8] sm:$0xff] }
 0x8a5   :  { %7055 = vmatpush.msrb.mxu2 %v7022_v6  ;;  %v9982_v6 = vld [vmem:[%s16959_s5 + $0x2f0] sm:$0xff] }
 0x8a6   :  { %7553 = vmatpush.msra.mxu3 %v9982_v6 }
 0x8a7   :  { %7056 = vmatpush.msrb.mxu2 %v15327_v49  ;;  %v7126_v49 = vld [vmem:[%s16959_s5 + $0x68] sm:$0xff] }
 0x8a8   :  { %7554 = vmatpush.msra.mxu3 %v9981_v5 }
 0x8a9   :  { %7057 = vmatpush.msrb.mxu2 %v15315_v24  ;;  %v7128_v24 = vld [vmem:[%s16959_s5 + $0x78] sm:$0xff] }
 0x8aa   :  { %7555 = vmatpush.msra.mxu3 %v9980_v11 }
 0x8ab   :  { %7058 = vmatpush.msrb.mxu2 %v15303_v40  ;;  %v9917_v40 = vld [vmem:[%s16959_s5 + $0xe8] sm:$0xff] }
 0x8ac   :  { %7556 = vmatpush.msra.mxu3 %v9979_v38 }
 0x8ad   :  { %7059 = vmatpush.msrb.mxu2 %v15298_v20  ;;  %v9918_v20 = vld [vmem:[%s16959_s5 + $0xf0] sm:$0xff] }
 0x8ae   :  { %7158 = vmatpush.msra.mxu0 %v9918_v20  ;;  %7557 = vmatpush.msra.mxu3 %v9978_v29  ;;  %v9952_v20 = vld [vmem:[%s16959_s5 + $0x200] sm:$0xff] }
 0x8af   :  { %7060 = vmatpush.msrb.mxu2 %v15293_v31  ;;  %v7127_v31 = vld [vmem:[%s16959_s5 + $0x70] sm:$0xff] }
 0x8b0   :  { %9898 = vmatmul.msk.f32.vlgmr.msrb.gmra.mxu2 %vm6876_vm15, %v15308_v13  ;;  %7159 = vmatpush.msra.mxu0 %v9917_v40  ;;  %v15585_v40 = vld [vmem:[%s16958_s4] ss:$0 sm:$0xff] }
 0x8b1   :  { %7207 = vmatpush.msra.mxu2 %v7128_v24  ;;  %7558 = vmatpush.msra.mxu3 %v9977_v8  ;;  %v9969_v24 = vld [vmem:[%s16959_s5 + $0x288] sm:$0xff] }
 0x8b2   :  { %7160 = vmatpush.msra.mxu0 %v9916_v62 }
 0x8b3   :  { %7208 = vmatpush.msra.mxu2 %v7127_v31  ;;  %7559 = vmatpush.msra.mxu3 %v9976_v18  ;;  %v9968_v31 = vld [vmem:[%s16959_s5 + $0x280] sm:$0xff] }
 0x8b4   :  { %7161 = vmatpush.msra.mxu0 %v9915_v39 }
 0x8b5   :  { %7209 = vmatpush.msra.mxu2 %v7126_v49  ;;  %7560 = vmatpush.msra.mxu3 %v9975_v17  ;;  %v9951_v17 = vld [vmem:[%s16959_s5 + $0x1f8] sm:$0xff] }
 0x8b6   :  { %7162 = vmatpush.msra.mxu0 %v9914_v27 }
 0x8b7   :  { %7210 = vmatpush.msra.mxu2 %v7125_v21  ;;  %7561 = vmatpush.msra.mxu3 %v9974_v55  ;;  %v10031_v55 = vld [vmem:[%s16959_s5 + $0x478] sm:$0xff] }
 0x8b8   :  { %9899 = vmatmul.msk.f32.gmra.mxu2 %vm6876_vm15, %v15321_v23  ;;  %7163 = vmatpush.msra.mxu0 %v9913_v14 }
 0x8b9   :  { %7211 = vmatpush.msra.mxu2 %v7124_v45  ;;  %7562 = vmatpush.msra.mxu3 %v9973_v22  ;;  %v9933_v22 = vld [vmem:[%s16959_s5 + $0x168] sm:$0xff] }
 0x8ba   :  { %7164 = vmatpush.msra.mxu0 %v9912_v34 }
 0x8bb   :  { %7212 = vmatpush.msra.mxu2 %v7123_v54  ;;  %7563 = vmatpush.msra.mxu3 %v9972_v50  ;;  %v10030_v50 = vld [vmem:[%s16959_s5 + $0x470] sm:$0xff] }
 0x8bd   :  { %7213 = vmatpush.msra.mxu2 %v7122_v41  ;;  %7564 = vmatpush.msra.mxu3 %v9971_v43  ;;  %v10045_v43 = vld [vmem:[%s16959_s5 + $0x4e8] sm:$0xff] }
 0x8bf   :  { %7214 = vmatpush.msra.mxu2 %v7121_v25  ;;  %7565 = vmatpush.msra.mxu3 %v9970_v59 }
 0x8c0   :  { %9900 = vmatmul.msk.f32.gmra.mxu2 %vm6876_vm15, %v15333_v2 }
 0x8c1   :  { %7215 = vmatpush.msra.mxu2 %v7120_v57  ;;  %7566 = vmatpush.msra.mxu3 %v9969_v24  ;;  %v9946_v24 = vld [vmem:[%s16959_s5 + $0x1d0] sm:$0xff] }
 0x8c3   :  { %7216 = vmatpush.msra.mxu2 %v7119_v56  ;;  %7567 = vmatpush.msra.mxu3 %v9968_v31 }
 0x8c5   :  { %7217 = vmatpush.msra.mxu2 %v7118_v10  ;;  %v6915_v49 = vpop.f32.mrf.mxu0 }
 0x8c6   :  { %v6916_v0 = vadd.f32 %v15585_v40, %v6915_v49 }
 0x8c7   :  { %7218 = vmatpush.msra.mxu2 %v7117_v52 }
 0x8c8   :  { %9901 = vmatmul.msk.f32.gmra.mxu2 %vm6876_vm15, %v15344_v15  ;;  %v9911_v15 = vld [vmem:[%s16959_s5 + $0xb8] sm:$0xff]  ;;  %v6933_v51 = vmax.f32 %v6916_v0, 0.0 }
 0x8c9   :  { %7165 = vmatpush.msra.mxu0 %v9911_v15  ;;  %7219 = vmatpush.msra.mxu2 %v7116_v42  ;;  %v9934_v42 = vld [vmem:[%s16959_s5 + $0x170] sm:$0xff] }
 0x8ca   :  { %7087 = vst [vmem:[#allocation3 + $0x1] sm:$0xff] %v6933_v51 }
 0x8cb   :  { %7166 = vmatpush.msra.mxu0 %v9910_v48  ;;  %7220 = vmatpush.msra.mxu2 %v7115_v46  ;;  %v9932_v46 = vld [vmem:[%s16959_s5 + $0x160] sm:$0xff] }
 0x8cd   :  { %7167 = vmatpush.msra.mxu0 %v9909_v28  ;;  %7221 = vmatpush.msra.mxu2 %v7114_v63  ;;  %v10029_v63 = vld [vmem:[%s16959_s5 + $0x468] sm:$0xff] }
 0x8cf   :  { %7168 = vmatpush.msra.mxu0 %v9908_v16  ;;  %7222 = vmatpush.msra.mxu2 %v7113_v37  ;;  %v9931_v37 = vld [vmem:[%s16959_s5 + $0x158] sm:$0xff] }
 0x8d0   :  { %9902 = vmatmul.msk.f32.gmra.mxu2 %vm6876_vm15, %v15354_v58  ;;  %v9907_v58 = vld [vmem:[%s16959_s5 + $0x98] sm:$0xff] }
 0x8d1   :  { %7169 = vmatpush.msra.mxu0 %v9907_v58  ;;  %v7102_v21 = vld [vmem:[#allocation3] sm:$0xff]  ;;  %7374 = vmatpush.msrb.mxu2 %v9951_v17  ;;  %v10047_v58 = vld [vmem:[%s16959_s5 + $0x4f8] sm:$0xff]  ;;  %v10040_v17 = vld [vmem:[%s16959_s5 + $0x4c0] sm:$0xff] }
 0x8d2   :  { %7908 = vmatpush.msrb.mxu3 %v10047_v58  ;;  %v9941_v58 = vld [vmem:[%s16959_s5 + $0x1a8] sm:$0xff] }
 0x8d3   :  { %7170 = vmatpush.msra.mxu0 %v9906_v9  ;;  %v6918_v19 = vpop.f32.mrf.mxu0  ;;  %7375 = vmatpush.msrb.mxu2 %v9950_v32  ;;  %v9949_v9 = vld [vmem:[%s16959_s5 + $0x1e8] sm:$0xff]  ;;  %v10023_v32 = vld [vmem:[%s16959_s5 + $0x438] sm:$0xff] }
 0x8d4   :  { %v6919_v6 = vadd.f32 %v15585_v40, %v6918_v19  ;;  %v10044_v19 = vld [vmem:[%s16959_s5 + $0x4e0] sm:$0xff] }
 0x8d5   :  { %7171 = vmatpush.msra.mxu0 %v9905_v35  ;;  %v10046_v35 = vld [vmem:[%s16959_s5 + $0x4f0] sm:$0xff]  ;;  %7376 = vmatpush.msrb.mxu2 %v9949_v9 }
 0x8d6   :  { %v15589_v62 = vmax.f32 %v6919_v6, 0.0  ;;  %7909 = vmatpush.msrb.mxu3 %v10046_v35  ;;  %v9929_v6 = vld [vmem:[%s16959_s5 + $0x148] sm:$0xff] }
 0x8d7   :  { %7172 = vmatpush.msra.mxu0 %v9904_v36  ;;  %7377 = vmatpush.msrb.mxu2 %v9948_v12  ;;  %v9940_v12 = vld [vmem:[%s16959_s5 + $0x1a0] sm:$0xff] }
 0x8d8   :  { %9903 = vmatmul.msk.f32.gmra.mxu2 %vm6876_vm15, %v15364_v7  ;;  %v9953_v7 = vld [vmem:[%s16959_s5 + $0x208] sm:$0xff]  ;;  %7173 = vmatmul.f32.vlgmr.msra.gmra.mxu0 %v6933_v51  ;;  %7088 = vst [vmem:[#allocation3 + $0x9] sm:$0xff] %v15589_v62  ;;  %v10028_v51 = vld [vmem:[%s16959_s5 + $0x460] sm:$0xff] }
 0x8d9   :  { %7477 = vmatpush.msra.mxu1 %v9953_v7  ;;  %7285 = vmatpush.msrb.mxu0 %v9935_v4  ;;  %v9930_v7 = vld [vmem:[%s16959_s5 + $0x150] sm:$0xff]  ;;  %v10024_v4 = vld [vmem:[%s16959_s5 + $0x440] sm:$0xff] }
 0x8da   :  { %7910 = vmatpush.msrb.mxu3 %v10045_v43  ;;  %7378 = vmatpush.msrb.mxu2 %v9947_v61  ;;  %v10022_v43 = vld [vmem:[%s16959_s5 + $0x430] sm:$0xff]  ;;  %v9923_v61 = vld [vmem:[%s16959_s5 + $0x118] sm:$0xff] }
 0x8db   :  { %7478 = vmatpush.msra.mxu1 %v9952_v20  ;;  %v6921_v3 = vpop.f32.mrf.mxu0  ;;  %7286 = vmatpush.msrb.mxu0 %v9934_v42 }
 0x8dc   :  { %v6922_v39 = vadd.f32 %v15585_v40, %v6921_v3  ;;  %7379 = vmatpush.msrb.mxu2 %v9946_v24  ;;  %v10027_v3 = vld [vmem:[%s16959_s5 + $0x458] sm:$0xff]  ;;  %7911 = vmatpush.msrb.mxu3 %v10044_v19  ;;  %v10021_v24 = vld [vmem:[%s16959_s5 + $0x428] sm:$0xff]  ;;  %v9938_v19 = vld [vmem:[%s16959_s5 + $0x190] sm:$0xff] }
 0x8dd   :  { %7819 = vmatpush.msrb.mxu1 %v10031_v55  ;;  %7287 = vmatpush.msrb.mxu0 %v9933_v22  ;;  %v9925_v55 = vld [vmem:[%s16959_s5 + $0x128] sm:$0xff]  ;;  %v10039_v22 = vld [vmem:[%s16959_s5 + $0x4b8] sm:$0xff] }
 0x8de   :  { %v15594_v45 = vmax.f32 %v6922_v39, 0.0  ;;  %v10043_v39 = vld [vmem:[%s16959_s5 + $0x4d8] sm:$0xff] }
 0x8df   :  { %v7435_v5 = vld [vmem:[#allocation3 + $0x4] sm:$0xff]  ;;  %7820 = vmatpush.msrb.mxu1 %v10030_v50  ;;  %7288 = vmatpush.msrb.mxu0 %v9932_v46  ;;  %v9924_v46 = vld [vmem:[%s16959_s5 + $0x120] sm:$0xff] }
 0x8e0   :  { %7223 = vmatmul.f32.vlgmr.msra.gmra.mxu2 %v7102_v21  ;;  %7176 = vmatmul.f32.gmra.mxu0 %v15589_v62  ;;  %v7524_v33 = vld [vmem:[#allocation3 + $0x5] sm:$0xff]  ;;  %7089 = vst [vmem:[#allocation3 + $0x11] sm:$0xff] %v15594_v45 }
 0x8e1   :  { %v15596_v27 = vld [vmem:[#allocation3 + $0x8] sm:$0xff]  ;;  %7479 = vmatmul.f32.vlgmr.msra.gmra.mxu1 %v7435_v5  ;;  %7568 = vmatmul.f32.vlgmr.msra.gmra.mxu3 %v7524_v33  ;;  %v9945_v21 = vld [vmem:[%s16959_s5 + $0x1c8] sm:$0xff]  ;;  %v9928_v33 = vld [vmem:[%s16959_s5 + $0x140] sm:$0xff] }
 0x8e2   :  { %7821 = vmatpush.msrb.mxu1 %v10029_v63  ;;  %7289 = vmatpush.msrb.mxu0 %v9931_v37  ;;  %v10038_v37 = vld [vmem:[%s16959_s5 + $0x4b0] sm:$0xff] }
 0x8e3   :  { %v6924_v54 = vpop.f32.mrf.mxu0  ;;  %7380 = vmatpush.msrb.mxu2 %v9945_v21  ;;  %7912 = vmatpush.msrb.mxu3 %v10043_v39  ;;  %v10020_v21 = vld [vmem:[%s16959_s5 + $0x420] sm:$0xff] }
 0x8e4   :  { %v6925_v11 = vadd.f32 %v15585_v40, %v6924_v54  ;;  %7290 = vmatpush.msrb.mxu0 %v9930_v7  ;;  %7822 = vmatpush.msrb.mxu1 %v10028_v51  ;;  %v9944_v54 = vld [vmem:[%s16959_s5 + $0x1c0] sm:$0xff]  ;;  %v9939_v7 = vld [vmem:[%s16959_s5 + $0x198] sm:$0xff]  ;;  %v9922_v51 = vld [vmem:[%s16959_s5 + $0x110] sm:$0xff] }
 0x8e5   :  { %7381 = vmatpush.msrb.mxu2 %v9944_v54 }
 0x8e6   :  { %v15602_v30 = vmax.f32 %v6925_v11, 0.0  ;;  %7291 = vmatpush.msrb.mxu0 %v9929_v6  ;;  %7823 = vmatpush.msrb.mxu1 %v10027_v3  ;;  %v10036_v3 = vld [vmem:[%s16959_s5 + $0x4a0] sm:$0xff] }
 0x8e7   :  { %v7436_v14 = vld [vmem:[#allocation3 + $0xc] sm:$0xff] }
 0x8e8   :  { %7226 = vmatmul.f32.gmra.mxu2 %v15596_v27  ;;  %7179 = vmatmul.f32.gmra.mxu0 %v15594_v45  ;;  %v7525_v41 = vld [vmem:[#allocation3 + $0xd] sm:$0xff]  ;;  %7090 = vst [vmem:[#allocation3 + $0x19] sm:$0xff] %v15602_v30 }
 0x8e9   :  { %v15604_v38 = vld [vmem:[#allocation3 + $0x10] sm:$0xff]  ;;  %7482 = vmatmul.f32.gmra.mxu1 %v7436_v14  ;;  %7571 = vmatmul.f32.gmra.mxu3 %v7525_v41  ;;  %v10026_v14 = vld [vmem:[%s16959_s5 + $0x450] sm:$0xff] }
 0x8ea   :  { %v10042_v41 = vld [vmem:[%s16959_s5 + $0x4d0] sm:$0xff]  ;;  %7292 = vmatpush.msrb.mxu0 %v9928_v33  ;;  %7824 = vmatpush.msrb.mxu1 %v10026_v14  ;;  %v9937_v33 = vld [vmem:[%s16959_s5 + $0x188] sm:$0xff] }
 0x8eb   :  { %v6927_v34 = vpop.f32.mrf.mxu0  ;;  %7913 = vmatpush.msrb.mxu3 %v10042_v41 }
 0x8ec   :  { %v6928_v25 = vadd.f32 %v15585_v40, %v6927_v34 }
 0x8ee   :  { %v15610_v26 = vmax.f32 %v6928_v25, 0.0  ;;  %v9927_v25 = vld [vmem:[%s16959_s5 + $0x138] sm:$0xff] }
 0x8ef   :  { %v7437_v29 = vld [vmem:[#allocation3 + $0x14] sm:$0xff]  ;;  %7293 = vmatpush.msrb.mxu0 %v9927_v25 }
 0x8f0   :  { %7229 = vmatmul.f32.gmra.mxu2 %v15604_v38  ;;  %7182 = vmatmul.f32.gmra.mxu0 %v15602_v30  ;;  %v7526_v15 = vld [vmem:[#allocation3 + $0x15] sm:$0xff]  ;;  %7091 = vst [vmem:[#allocation3 + $0x21] sm:$0xff] %v15610_v26 }
 0x8f1   :  { %v15612_v57 = vld [vmem:[#allocation3 + $0x18] sm:$0xff]  ;;  %7485 = vmatmul.f32.gmra.mxu1 %v7437_v29  ;;  %7574 = vmatmul.f32.gmra.mxu3 %v7526_v15  ;;  %v9943_v29 = vld [vmem:[%s16959_s5 + $0x1b8] sm:$0xff] }
 0x8f2   :  { %7382 = vmatpush.msrb.mxu2 %v9943_v29  ;;  %v10019_v29 = vld [vmem:[%s16959_s5 + $0x418] sm:$0xff] }
 0x8f3   :  { %v6930_v60 = vpop.f32.mrf.mxu0 }
 0x8f4   :  { %v6931_v8 = vadd.f32 %v15585_v40, %v6930_v60 }
 0x8f6   :  { %v6938_v56 = vmax.f32 %v6931_v8, 0.0 }
 0x8f7   :  { %v15618_v48 = vld [vmem:[#allocation3 + $0x20] sm:$0xff] }
 0x8f8   :  { %7232 = vmatmul.f32.gmra.mxu2 %v15612_v57  ;;  %7185 = vmatmul.f32.gmra.mxu0 %v15610_v26  ;;  %7092 = vst [vmem:[#allocation3 + $0x29] sm:$0xf] %v6938_v56  ;;  %v7438_v53 = vld [vmem:[#allocation3 + $0x1c] sm:$0xff] }
 0x8f9   :  { %v7527_v18 = vld [vmem:[#allocation3 + $0x1d] sm:$0xff]  ;;  %7488 = vmatmul.f32.gmra.mxu1 %v7438_v53 }
 0x8fa   :  { %7577 = vmatmul.f32.gmra.mxu3 %v7527_v18  ;;  %v10025_v53 = vld [vmem:[%s16959_s5 + $0x448] sm:$0xff] }
 0x8fb   :  { %v10041_v18 = vld [vmem:[%s16959_s5 + $0x4c8] sm:$0xff]  ;;  %7825 = vmatpush.msrb.mxu1 %v10025_v53  ;;  %v9936_v53 = vld [vmem:[%s16959_s5 + $0x180] sm:$0xff] }
 0x8fc   :  { %7914 = vmatpush.msrb.mxu3 %v10041_v18  ;;  %v10018_v18 = vld [vmem:[%s16959_s5 + $0x410] sm:$0xff] }
 0x8fd   :  { %7826 = vmatpush.msrb.mxu1 %v10024_v4 }
 0x8fe   :  { %7915 = vmatpush.msrb.mxu3 %v10040_v17  ;;  %v10017_v17 = vld [vmem:[%s16959_s5 + $0x408] sm:$0xff] }
 0x8ff   :  { %v7439_v28 = vld [vmem:[#allocation3 + $0x24] sm:$0xff]  ;;  %7827 = vmatpush.msrb.mxu1 %v10023_v32 }
 0x900   :  { %7235 = vmatmul.f32.gmra.mxu2 %v15618_v48  ;;  %v7528_v10 = vld [vmem:[#allocation3 + $0x25] sm:$0xff]  ;;  %7916 = vmatpush.msrb.mxu3 %v10039_v22 }
 0x901   :  { %7491 = vmatmul.f32.gmra.mxu1 %v7439_v28  ;;  %v9926_v28 = vld [vmem:[%s16959_s5 + $0x130] sm:$0xff] }
 0x902   :  { %7580 = vmatmul.f32.gmra.mxu3 %v7528_v10  ;;  %v9942_v10 = vld [vmem:[%s16959_s5 + $0x1b0] sm:$0xff]  ;;  %7294 = vmatpush.msrb.mxu0 %v9926_v28 }
 0x903   :  { %7383 = vmatpush.msrb.mxu2 %v9942_v10  ;;  %7828 = vmatpush.msrb.mxu1 %v10022_v43  ;;  %v10034_v28 = vld [vmem:[%s16959_s5 + $0x490] sm:$0xff] }
 0x904   :  { %7295 = vmatpush.msrb.mxu0 %v9925_v55  ;;  %7917 = vmatpush.msrb.mxu3 %v10038_v37 }
 0x905   :  { %7384 = vmatpush.msrb.mxu2 %v9941_v58  ;;  %7829 = vmatpush.msrb.mxu1 %v10021_v24  ;;  %v10016_v58 = vld [vmem:[%s16959_s5 + $0x400] sm:$0xff]  ;;  %v7258_v24 = vld [vmem:[#allocation3 + $0xa] sm:$0xff] }
 0x906   :  { %7296 = vmatpush.msrb.mxu0 %v9924_v46 }
 0x907   :  { %7385 = vmatpush.msrb.mxu2 %v9940_v12  ;;  %7830 = vmatpush.msrb.mxu1 %v10020_v21  ;;  %v7261_v21 = vld [vmem:[#allocation3 + $0x22] sm:$0xff] }
 0x908   :  { %7297 = vmatpush.msrb.mxu0 %v9923_v61  ;;  %v7257_v61 = vld [vmem:[#allocation3 + $0x2] sm:$0xff] }
 0x909   :  { %7386 = vmatpush.msrb.mxu2 %v9939_v7  ;;  %7831 = vmatpush.msrb.mxu1 %v10019_v29  ;;  %v7346_v7 = vld [vmem:[#allocation3 + $0x3] sm:$0xff] }
 0x90a   :  { %7298 = vmatpush.msrb.mxu0 %v9922_v51  ;;  %v7348_v51 = vld [vmem:[#allocation3 + $0x13] sm:$0xff] }
 0x90b   :  { %7387 = vmatpush.msrb.mxu2 %v9938_v19  ;;  %7832 = vmatpush.msrb.mxu1 %v10018_v18  ;;  %v7260_v19 = vld [vmem:[#allocation3 + $0x1a] sm:$0xff] }
 0x90c   :  { %v9993_v18 = vld [vmem:[%s16959_s5 + $0x348] sm:$0xff] }
 0x90d   :  { %7388 = vmatpush.msrb.mxu2 %v9937_v33  ;;  %7833 = vmatpush.msrb.mxu1 %v10017_v17  ;;  %v10012_v33 = vld [vmem:[%s16959_s5 + $0x3e0] sm:$0xff]  ;;  %v9991_v17 = vld [vmem:[%s16959_s5 + $0x338] sm:$0xff] }
 0x90f   :  { %7389 = vmatpush.msrb.mxu2 %v9936_v53  ;;  %7834 = vmatpush.msrb.mxu1 %v10016_v58  ;;  %v9990_v58 = vld [vmem:[%s16959_s5 + $0x330] sm:$0xff] }
 0x933   :  { %v7062_v16 = vpop.f32.mrf.mxu2 }
 0x934   :  { %v15628_v52 = vadd.f32 %v15585_v40, %v7062_v16 }
 0x936   :  { %v7080_v1 = vmax.f32 %v15628_v52, 0.0 }
 0x938   :  { %7095 = vst [vmem:[#allocation3 + $0x2f] sm:$0xff] %v7080_v1 }
 0x93b   :  { %v7065_v47 = vpop.f32.mrf.mxu2 }
 0x93c   :  { %v15670_v36 = vadd.f32 %v15585_v40, %v7065_v47 }
 0x93e   :  { %v7081_v59 = vmax.f32 %v15670_v36, 0.0 }
 0x93f   :  { %v15685_v20 = vld [vmem:[#allocation3 + $0x29] sm:$0xff] }
 0x940   :  { %v15687_v31 = vld [vmem:[#allocation3 + $0x28] sm:$0xff]  ;;  %7096 = vst [vmem:[#allocation3 + $0x37] sm:$0xff] %v7081_v59  ;;  %7188 = vmatmul.f32.gmra.mxu0 %v15685_v20 }
 0x941   :  { %v7440_v49 = vld [vmem:[#allocation3 + $0x2c] sm:$0xff]  ;;  %7238 = vmatmul.f32.gmra.mxu2 %v15687_v31 }
 0x942   :  { %v7529_v0 = vld [vmem:[#allocation3 + $0x2d] sm:$0xff]  ;;  %7494 = vmatmul.f32.gmra.mxu1 %v7440_v49  ;;  %v10037_v49 = vld [vmem:[%s16959_s5 + $0x4a8] sm:$0xff] }
 0x943   :  { %7583 = vmatmul.f32.gmra.mxu3 %v7529_v0  ;;  %v7068_v5 = vpop.f32.mrf.mxu2 }
 0x944   :  { %v15718_v11 = vadd.f32 %v15585_v40, %v7068_v5  ;;  %7918 = vmatpush.msrb.mxu3 %v10037_v49  ;;  %v9921_v5 = vld [vmem:[%s16959_s5 + $0x108] sm:$0xff]  ;;  %v7347_v49 = vld [vmem:[#allocation3 + $0xb] sm:$0xff] }
 0x945   :  { %7299 = vmatpush.msrb.mxu0 %v9921_v5  ;;  %v9996_v5 = vld [vmem:[%s16959_s5 + $0x360] sm:$0xff] }
 0x946   :  { %v7082_v34 = vmax.f32 %v15718_v11, 0.0  ;;  %7919 = vmatpush.msrb.mxu3 %v10036_v3  ;;  %v7350_v3 = vld [vmem:[#allocation3 + $0x23] sm:$0xff] }
 0x947   :  { %v15733_v15 = vld [vmem:[#allocation3 + $0x31] sm:$0xff] }
 0x948   :  { %v15735_v60 = vld [vmem:[#allocation3 + $0x30] sm:$0xff]  ;;  %7097 = vst [vmem:[#allocation3 + $0x3f] sm:$0xff] %v7082_v34  ;;  %7191 = vmatmul.f32.gmra.mxu0 %v15733_v15 }
 0x949   :  { %v7441_v8 = vld [vmem:[#allocation3 + $0x34] sm:$0xff]  ;;  %7241 = vmatmul.f32.gmra.mxu2 %v15735_v60 }
 0x94a   :  { %v7530_v56 = vld [vmem:[#allocation3 + $0x35] sm:$0xff]  ;;  %7497 = vmatmul.f32.gmra.mxu1 %v7441_v8 }
 0x94b   :  { %7586 = vmatmul.f32.gmra.mxu3 %v7530_v56  ;;  %v7071_v16 = vpop.f32.mrf.mxu2  ;;  %v10035_v8 = vld [vmem:[%s16959_s5 + $0x498] sm:$0xff]  ;;  %v9920_v56 = vld [vmem:[%s16959_s5 + $0x100] sm:$0xff] }
 0x94c   :  { %v15766_v42 = vadd.f32 %v15585_v40, %v7071_v16  ;;  %7920 = vmatpush.msrb.mxu3 %v10035_v8  ;;  %7300 = vmatpush.msrb.mxu0 %v9920_v56  ;;  %v10033_v16 = vld [vmem:[%s16959_s5 + $0x488] sm:$0xff]  ;;  %v9994_v8 = vld [vmem:[%s16959_s5 + $0x350] sm:$0xff] }
 0x94d   :  { %v7351_v56 = vld [vmem:[#allocation3 + $0x2b] sm:$0xff] }
 0x94e   :  { %v7083_v9 = vmax.f32 %v15766_v42, 0.0  ;;  %7921 = vmatpush.msrb.mxu3 %v10034_v28  ;;  %v10009_v28 = vld [vmem:[%s16959_s5 + $0x3c8] sm:$0xff] }
 0x94f   :  { %v15781_v50 = vld [vmem:[#allocation3 + $0x39] sm:$0xff] }
 0x950   :  { %v15783_v35 = vld [vmem:[#allocation3 + $0x38] sm:$0xff]  ;;  %7098 = vst [vmem:[#allocation3 + $0x47] sm:$0xff] %v7083_v9  ;;  %7194 = vmatmul.f32.gmra.mxu0 %v15781_v50  ;;  %7922 = vmatpush.msrb.mxu3 %v10033_v16 }
 0x951   :  { %v7442_v47 = vld [vmem:[#allocation3 + $0x3c] sm:$0xff]  ;;  %7244 = vmatmul.f32.gmra.mxu2 %v15783_v35  ;;  %v7263_v16 = vld [vmem:[#allocation3 + $0x32] sm:$0xff] }
 0x952   :  { %v7531_v63 = vld [vmem:[#allocation3 + $0x3d] sm:$0xff]  ;;  %7500 = vmatmul.f32.gmra.mxu1 %v7442_v47 }
 0x953   :  { %7589 = vmatmul.f32.gmra.mxu3 %v7531_v63  ;;  %v7074_v0 = vpop.f32.mrf.mxu2 }
 0x954   :  { %v15814_v6 = vadd.f32 %v15585_v40, %v7074_v0  ;;  %v7259_v0 = vld [vmem:[#allocation3 + $0x12] sm:$0xff] }
 0x956   :  { %v7084_v39 = vmax.f32 %v15814_v6, 0.0 }
 0x957   :  { %v15829_v54 = vld [vmem:[#allocation3 + $0x41] sm:$0xff] }
 0x958   :  { %v15831_v14 = vld [vmem:[#allocation3 + $0x40] sm:$0xff]  ;;  %7099 = vst [vmem:[#allocation3 + $0x4f] sm:$0xff] %v7084_v39  ;;  %7197 = vmatmul.f32.gmra.mxu0 %v15829_v54 }
 0x959   :  { %v7443_v41 = vld [vmem:[#allocation3 + $0x44] sm:$0xff]  ;;  %7247 = vmatmul.f32.gmra.mxu2 %v15831_v14 }
 0x95a   :  { %v7532_v25 = vld [vmem:[#allocation3 + $0x45] sm:$0xff]  ;;  %7503 = vmatmul.f32.gmra.mxu1 %v7443_v41  ;;  %v9995_v41 = vld [vmem:[%s16959_s5 + $0x358] sm:$0xff] }
 0x95b   :  { %7592 = vmatmul.f32.gmra.mxu3 %v7532_v25  ;;  %v7077_v10 = vpop.f32.mrf.mxu2  ;;  %v10011_v25 = vld [vmem:[%s16959_s5 + $0x3d8] sm:$0xff] }
 0x95c   :  { %v7078_v4 = vadd.f32 %v15585_v40, %v7077_v10  ;;  %v10032_v40 = vld [vmem:[%s16959_s5 + $0x480] sm:$0xff] }
 0x95d   :  { %7923 = vmatpush.msrb.mxu3 %v10032_v40  ;;  %v9992_v10 = vld [vmem:[%s16959_s5 + $0x340] sm:$0xff]  ;;  %v10006_v40 = vld [vmem:[%s16959_s5 + $0x3b0] sm:$0xff] }
 0x95e   :  { %v7085_v55 = vmax.f32 %v7078_v4, 0.0  ;;  %v10008_v4 = vld [vmem:[%s16959_s5 + $0x3c0] sm:$0xff] }
 0x95f   :  { %v15868_v32 = vld [vmem:[#allocation3 + $0x49] sm:$0xff]  ;;  %v7139_v47 = vld [vmem:[#allocation3 + $0x51] sm:$0x7]  ;;  %v7445_v37 = vld [vmem:[#allocation3 + $0x54] sm:$0x7] }
 0x960   :  { %v15870_v22 = vld [vmem:[#allocation3 + $0x48] sm:$0xff]  ;;  %7100 = vst [vmem:[#allocation3 + $0x57] sm:$0xf] %v7085_v55  ;;  %7200 = vmatmul.f32.gmra.mxu0 %v15868_v32  ;;  %v7112_v63 = vld [vmem:[#allocation3 + $0x50] sm:$0x7]  ;;  %v7352_v55 = vld [vmem:[#allocation3 + $0x33] sm:$0xff] }
 0x961   :  { %v7444_v46 = vld [vmem:[#allocation3 + $0x4c] sm:$0xff]  ;;  %7250 = vmatmul.f32.gmra.mxu2 %v15870_v22 }
 0x962   :  { %v7533_v12 = vld [vmem:[#allocation3 + $0x4d] sm:$0xff]  ;;  %7506 = vmatmul.f32.gmra.mxu1 %v7444_v46 }
 0x963   :  { %7595 = vmatmul.f32.gmra.mxu3 %v7533_v12  ;;  %v15916_v29 = vpop.f32.mrf.mxu2  ;;  %v9989_v12 = vld [vmem:[%s16959_s5 + $0x328] sm:$0xff] }
 0x967   :  { %v7534_v43 = vld [vmem:[#allocation3 + $0x55] sm:$0x7] }
 0x968   :  { %7203 = vmatmul.f32.gmra.mxu0 %v7139_v47  ;;  %v10005_v47 = vld [vmem:[%s16959_s5 + $0x3a8] sm:$0xff] }
 0x969   :  { %7253 = vmatmul.f32.gmra.mxu2 %v7112_v63  ;;  %v9988_v63 = vld [vmem:[%s16959_s5 + $0x320] sm:$0xff] }
 0x96a   :  { %7509 = vmatmul.f32.gmra.mxu1 %v7445_v37 }
 0x96b   :  { %7598 = vmatmul.f32.gmra.mxu3 %v7534_v43  ;;  %v7353_v43 = vld [vmem:[#allocation3 + $0x3b] sm:$0xff] }
 0x970   :  { %7301 = vmatmul.f32.vlgmr.msrb.gmra.mxu0 %v7257_v61  ;;  %v9987_v61 = vld [vmem:[%s16959_s5 + $0x318] sm:$0xff] }
 0x971   :  { %7390 = vmatmul.f32.vlgmr.msrb.gmra.mxu2 %v7346_v7  ;;  %v10003_v7 = vld [vmem:[%s16959_s5 + $0x398] sm:$0xff] }
 0x972   :  { %7835 = vmatmul.f32.vlgmr.msrb.gmra.mxu1 %v15596_v27  ;;  %v7349_v27 = vld [vmem:[#allocation3 + $0x1b] sm:$0xff] }
 0x973   :  { %7924 = vmatmul.f32.vlgmr.msrb.gmra.mxu3 %v15589_v62  ;;  %v9999_v62 = vld [vmem:[%s16959_s5 + $0x378] sm:$0xff] }
 0x974   :  { %7641 = vmatpush.msra.mxu0 %v9999_v62  ;;  %v10000_v62 = vld [vmem:[%s16959_s5 + $0x380] sm:$0xff] }
 0x978   :  { %7304 = vmatmul.f32.gmra.mxu0 %v7258_v24  ;;  %v9986_v24 = vld [vmem:[%s16959_s5 + $0x310] sm:$0xff] }
 0x979   :  { %7393 = vmatmul.f32.gmra.mxu2 %v7347_v49  ;;  %v10002_v49 = vld [vmem:[%s16959_s5 + $0x390] sm:$0xff] }
 0x97a   :  { %7838 = vmatmul.f32.gmra.mxu1 %v15604_v38  ;;  %v10014_v38 = vld [vmem:[%s16959_s5 + $0x3f0] sm:$0xff] }
 0x97b   :  { %7927 = vmatmul.f32.gmra.mxu3 %v15594_v45  ;;  %v10015_v45 = vld [vmem:[%s16959_s5 + $0x3f8] sm:$0xff] }
 0x97c   :  { %7730 = vmatpush.msra.mxu2 %v10015_v45 }
 0x97e   :  { %7731 = vmatpush.msra.mxu2 %v10014_v38  ;;  %v7266_v38 = vld [vmem:[#allocation3 + $0x4a] sm:$0xff] }
 0x980   :  { %7307 = vmatmul.f32.gmra.mxu0 %v7259_v0 }
 0x981   :  { %7396 = vmatmul.f32.gmra.mxu2 %v7348_v51  ;;  %v9985_v51 = vld [vmem:[%s16959_s5 + $0x308] sm:$0xff] }
 0x982   :  { %7841 = vmatmul.f32.gmra.mxu1 %v15612_v57  ;;  %v9997_v57 = vld [vmem:[%s16959_s5 + $0x368] sm:$0xff] }
 0x983   :  { %7930 = vmatmul.f32.gmra.mxu3 %v15602_v30  ;;  %v9998_v30 = vld [vmem:[%s16959_s5 + $0x370] sm:$0xff] }
 0x984   :  { %7642 = vmatpush.msra.mxu0 %v9998_v30 }
 0x986   :  { %7643 = vmatpush.msra.mxu0 %v9997_v57  ;;  %v7355_v57 = vld [vmem:[#allocation3 + $0x4b] sm:$0xff] }
 0x988   :  { %7310 = vmatmul.f32.gmra.mxu0 %v7260_v19  ;;  %v7354_v19 = vld [vmem:[#allocation3 + $0x43] sm:$0xff] }
 0x989   :  { %7399 = vmatmul.f32.gmra.mxu2 %v7349_v27  ;;  %7644 = vmatpush.msra.mxu0 %v9996_v5  ;;  %v9984_v27 = vld [vmem:[%s16959_s5 + $0x300] sm:$0xff] }
 0x98a   :  { %7844 = vmatmul.f32.gmra.mxu1 %v15618_v48  ;;  %v10013_v48 = vld [vmem:[%s16959_s5 + $0x3e8] sm:$0xff] }
 0x98b   :  { %7933 = vmatmul.f32.gmra.mxu3 %v15610_v26  ;;  %v15900_v26 = vpop.f32.mrf.mxu0  ;;  %7732 = vmatpush.msra.mxu2 %v10013_v48  ;;  %v7800_v48 = vld [vmem:[#allocation3 + $0x50] sm:$0xff] }
 0x98c   :  { %7645 = vmatpush.msra.mxu0 %v9995_v41  ;;  %v7356_v41 = vld [vmem:[#allocation3 + $0x53] sm:$0x7] }
 0x98d   :  { %7733 = vmatpush.msra.mxu2 %v10012_v33  ;;  %v7267_v33 = vld [vmem:[#allocation3 + $0x52] sm:$0x7] }
 0x98e   :  { %7646 = vmatpush.msra.mxu0 %v9994_v8 }
 0x98f   :  { %7734 = vmatpush.msra.mxu2 %v10011_v25 }
 0x990   :  { %7313 = vmatmul.f32.gmra.mxu0 %v7261_v21  ;;  %v7889_v21 = vld [vmem:[#allocation3 + $0x51] sm:$0xff] }
 0x991   :  { %7402 = vmatmul.f32.gmra.mxu2 %v7350_v3  ;;  %7647 = vmatpush.msra.mxu0 %v9993_v18  ;;  %v16010_v18 = vpop.f32.mrf.mxu1 }
 0x992   :  { %7847 = vmatmul.f32.gmra.mxu1 %v15687_v31  ;;  %v7262_v31 = vld [vmem:[#allocation3 + $0x2a] sm:$0xff] }
 0x993   :  { %7936 = vmatmul.f32.gmra.mxu3 %v15685_v20  ;;  %v10010_v20 = vld [vmem:[%s16959_s5 + $0x3d0] sm:$0xff]  ;;  %v15924_v53 = vpop.f32.mrf.mxu0  ;;  %7648 = vmatpush.msra.mxu0 %v9992_v10 }
 0x994   :  { %7735 = vmatpush.msra.mxu2 %v10010_v20 }
 0x995   :  { %7649 = vmatpush.msra.mxu0 %v9991_v17 }
 0x996   :  { %7736 = vmatpush.msra.mxu2 %v10009_v28 }
 0x997   :  { %7650 = vmatpush.msra.mxu0 %v9990_v58 }
 0x998   :  { %7316 = vmatmul.f32.gmra.mxu0 %v7262_v31  ;;  %7737 = vmatpush.msra.mxu2 %v10008_v4  ;;  %v7613_v31 = vld [vmem:[#allocation3 + $0x6] sm:$0xff]  ;;  %v16014_v4 = vpop.f32.mrf.mxu3 }
 0x999   :  { %7405 = vmatmul.f32.gmra.mxu2 %v7351_v56  ;;  %7651 = vmatpush.msra.mxu0 %v9989_v12  ;;  %v7702_v56 = vld [vmem:[#allocation3 + $0x7] sm:$0xff] }
 0x99a   :  { %7850 = vmatmul.f32.gmra.mxu1 %v15735_v60  ;;  %v10007_v60 = vld [vmem:[%s16959_s5 + $0x3b8] sm:$0xff] }
 0x99b   :  { %7939 = vmatmul.f32.gmra.mxu3 %v15733_v15  ;;  %v15946_v15 = vpop.f32.mrf.mxu2  ;;  %7738 = vmatpush.msra.mxu2 %v10007_v60  ;;  %v15956_v46 = vpop.f32.mrf.mxu0  ;;  %v7614_v60 = vld [vmem:[#allocation3 + $0xe] sm:$0xff] }
 0x99c   :  { %7652 = vmatpush.msra.mxu0 %v9988_v63  ;;  %v7615_v63 = vld [vmem:[#allocation3 + $0x16] sm:$0xff] }
 0x99d   :  { %7739 = vmatpush.msra.mxu2 %v10006_v40  ;;  %v16018_v40 = vpop.f32.mrf.mxu1 }
 0x99e   :  { %7653 = vmatpush.msra.mxu0 %v9987_v61 }
 0x99f   :  { %7740 = vmatpush.msra.mxu2 %v10005_v47 }
 0x9a0   :  { %7319 = vmatmul.f32.gmra.mxu0 %v7263_v16  ;;  %v7703_v16 = vld [vmem:[#allocation3 + $0xf] sm:$0xff]  ;;  %v16020_v47 = vpop.f32.mrf.mxu3 }
 0x9a1   :  { %7408 = vmatmul.f32.gmra.mxu2 %v7352_v55  ;;  %7654 = vmatpush.msra.mxu0 %v9986_v24  ;;  %v7616_v24 = vld [vmem:[#allocation3 + $0x1e] sm:$0xff] }
 0x9a2   :  { %7853 = vmatmul.f32.gmra.mxu1 %v15783_v35  ;;  %v7264_v35 = vld [vmem:[#allocation3 + $0x3a] sm:$0xff] }
 0x9a3   :  { %7942 = vmatmul.f32.gmra.mxu3 %v15781_v50  ;;  %v10004_v50 = vld [vmem:[%s16959_s5 + $0x3a0] sm:$0xff]  ;;  %v15970_v37 = vpop.f32.mrf.mxu2  ;;  %v15986_v0 = vpop.f32.mrf.mxu0  ;;  %7655 = vmatpush.msra.mxu0 %v9985_v51 }
 0x9a4   :  { %7741 = vmatpush.msra.mxu2 %v10004_v50  ;;  %v7704_v50 = vld [vmem:[#allocation3 + $0x17] sm:$0xff] }
 0x9a5   :  { %7656 = vmatpush.msra.mxu0 %v9984_v27  ;;  %v7706_v27 = vld [vmem:[#allocation3 + $0x27] sm:$0xff] }
 0x9a6   :  { %7742 = vmatpush.msra.mxu2 %v10003_v7  ;;  %v16026_v7 = vpop.f32.mrf.mxu1 }
 0x9a8   :  { %7322 = vmatmul.f32.gmra.mxu0 %v7264_v35  ;;  %7743 = vmatpush.msra.mxu2 %v10002_v49  ;;  %v7705_v49 = vld [vmem:[#allocation3 + $0x1f] sm:$0xff]  ;;  %v16028_v51 = vpop.f32.mrf.mxu3 }
 0x9a9   :  { %7411 = vmatmul.f32.gmra.mxu2 %v7353_v43 }
 0x9aa   :  { %7856 = vmatmul.f32.gmra.mxu1 %v15831_v14  ;;  %v7265_v14 = vld [vmem:[#allocation3 + $0x42] sm:$0xff] }
 0x9ab   :  { %7945 = vmatmul.f32.gmra.mxu3 %v15829_v54  ;;  %v10001_v54 = vld [vmem:[%s16959_s5 + $0x388] sm:$0xff]  ;;  %v16000_v45 = vpop.f32.mrf.mxu2  ;;  %v16004_v30 = vpop.f32.mrf.mxu0 }
 0x9ac   :  { %7744 = vmatpush.msra.mxu2 %v10001_v54 }
 0x9ae   :  { %7745 = vmatpush.msra.mxu2 %v10000_v62  ;;  %v16034_v62 = vpop.f32.mrf.mxu1 }
 0x9b0   :  { %7325 = vmatmul.f32.gmra.mxu0 %v7265_v14 }
 0x9b1   :  { %7414 = vmatmul.f32.gmra.mxu2 %v7354_v19  ;;  %v7617_v19 = vld [vmem:[#allocation3 + $0x26] sm:$0xff] }
 0x9b2   :  { %7859 = vmatmul.f32.gmra.mxu1 %v15870_v22  ;;  %v7890_v22 = vld [vmem:[#allocation3 + $0x59] sm:$0x7] }
 0x9b3   :  { %7948 = vmatmul.f32.gmra.mxu3 %v15868_v32  ;;  %v16006_v3 = vpop.f32.mrf.mxu2  ;;  %v7801_v32 = vld [vmem:[#allocation3 + $0x58] sm:$0x7] }
 0x9b8   :  { %7328 = vmatmul.f32.gmra.mxu0 %v7266_v38  ;;  %v16036_v38 = vpop.f32.mrf.mxu3 }
 0x9b9   :  { %7417 = vmatmul.f32.gmra.mxu2 %v7355_v57 }
 0x9ba   :  { %7862 = vmatmul.f32.gmra.mxu1 %v7800_v48 }
 0x9bb   :  { %7951 = vmatmul.f32.gmra.mxu3 %v7889_v21  ;;  %v7618_v21 = vld [vmem:[#allocation3 + $0x2e] sm:$0xff] }
 0x9bd   :  { %v7189_v5 = vpop.f32.mrf.mxu0 }
 0x9c0   :  { %7331 = vmatmul.f32.gmra.mxu0 %v7267_v33 }
 0x9c1   :  { %7420 = vmatmul.f32.gmra.mxu2 %v7356_v41  ;;  %v16048_v41 = vpop.f32.mrf.mxu3 }
 0x9c2   :  { %7865 = vmatmul.f32.gmra.mxu1 %v7801_v32 }
 0x9c3   :  { %7954 = vmatmul.f32.gmra.mxu3 %v7890_v22  ;;  %v7619_v22 = vld [vmem:[#allocation3 + $0x36] sm:$0xff] }
 0x9c4   :  { %v7239_v25 = vpop.f32.mrf.mxu2 }
 0x9c5   :  { %v16008_v8 = vadd.f32 %v7239_v25, %v7189_v5  ;;  %v7192_v20 = vpop.f32.mrf.mxu0  ;;  %v16044_v5 = vpop.f32.mrf.mxu1 }
 0x9c8   :  { %7657 = vmatmul.f32.vlgmr.msra.gmra.mxu0 %v7613_v31 }
 0x9c9   :  { %7746 = vmatmul.f32.vlgmr.msra.gmra.mxu2 %v7702_v56  ;;  %v16058_v52 = vpop.f32.mrf.mxu3 }
 0x9cc   :  { %v7242_v28 = vpop.f32.mrf.mxu2 }
 0x9cd   :  { %v16012_v10 = vadd.f32 %v7242_v28, %v7192_v20  ;;  %v7195_v17 = vpop.f32.mrf.mxu0  ;;  %v16056_v20 = vpop.f32.mrf.mxu1 }
 0x9d0   :  { %7660 = vmatmul.f32.gmra.mxu0 %v7614_v60  ;;  %v7621_v60 = vld [vmem:[#allocation3 + $0x46] sm:$0xff] }
 0x9d1   :  { %7749 = vmatmul.f32.gmra.mxu2 %v7703_v16  ;;  %v16066_v36 = vpop.f32.mrf.mxu3 }
 0x9d2   :  { %17312 = vst [vmem:[#allocation14_spill] sm:$0xff] %v16066_v36 }
 0x9d4   :  { %v7245_v55 = vpop.f32.mrf.mxu2 }
 0x9d5   :  { %v16016_v58 = vadd.f32 %v7245_v55, %v7195_v17  ;;  %v7198_v12 = vpop.f32.mrf.mxu0  ;;  %v16062_v17 = vpop.f32.mrf.mxu1  ;;  %v7622_v55 = vld [vmem:[#allocation3 + $0x4e] sm:$0xff] }
 0x9d8   :  { %7663 = vmatmul.f32.gmra.mxu0 %v7615_v63 }
 0x9d9   :  { %7752 = vmatmul.f32.gmra.mxu2 %v7704_v50  ;;  %v7623_v50 = vld [vmem:[#allocation3 + $0x56] sm:$0x7] }
 0x9dc   :  { %v7248_v35 = vpop.f32.mrf.mxu2 }
 0x9dd   :  { %v16022_v43 = vadd.f32 %v7248_v35, %v7198_v12  ;;  %v16024_v61 = vpop.f32.mrf.mxu0  ;;  %v16070_v11 = vpop.f32.mrf.mxu1  ;;  %v7712_v35 = vld [vmem:[#allocation3 + $0x57] sm:$0x7] }
 0x9de   :  { %17308 = vst [vmem:[#allocation31_spill] sm:$0xff] %v16024_v61 }
 0x9df   :  { %17307 = vst [vmem:[#allocation33_spill] sm:$0xff] %v16022_v43  ;;  %v7225_v43 = vadd.f32 %v15916_v29, %v15900_v26 }
 0x9e0   :  { %7666 = vmatmul.f32.gmra.mxu0 %v7616_v24  ;;  %17313 = vst [vmem:[#allocation7_spill] sm:$0xff] %v16070_v11 }
 0x9e1   :  { %7755 = vmatmul.f32.gmra.mxu2 %v7705_v49 }
 0x9e4   :  { %v16030_v54 = vpop.f32.mrf.mxu2 }
 0x9e5   :  { %17309 = vst [vmem:[#allocation30_spill] sm:$0xff] %v16030_v54  ;;  %v16032_v14 = vpop.f32.mrf.mxu0  ;;  %v16076_v42 = vpop.f32.mrf.mxu1 }
 0x9e6   :  { %17310 = vst [vmem:[#allocation43_spill] sm:$0xff] %v16032_v14 }
 0x9e7   :  { %17315 = vst [vmem:[#allocation32_spill] sm:$0xff] %v16076_v42 }
 0x9e8   :  { %7669 = vmatmul.f32.gmra.mxu0 %v7617_v19 }
 0x9e9   :  { %7758 = vmatmul.f32.gmra.mxu2 %v7706_v27 }
 0x9ec   :  { %v16038_v57 = vpop.f32.mrf.mxu2 }
 0x9ed   :  { %17311 = vst [vmem:[#allocation38_spill] sm:$0xff] %v16038_v57  ;;  %v16040_v48 = vpop.f32.mrf.mxu0 }
 0x9f0   :  { %7672 = vmatmul.f32.gmra.mxu0 %v7618_v21 }
 0x9f1   :  { %7761 = vmatmul.f32.gmra.mxu2 %v7080_v1  ;;  %v7620_v1 = vld [vmem:[#allocation3 + $0x3e] sm:$0xff] }
 0x9f4   :  { %v16046_v33 = vpop.f32.mrf.mxu2 }
 0x9f5   :  { %v16050_v32 = vpop.f32.mrf.mxu0 }
 0x9f8   :  { %7675 = vmatmul.f32.gmra.mxu0 %v7619_v22 }
 0x9f9   :  { %7764 = vmatmul.f32.gmra.mxu2 %v7081_v59 }
 0x9fc   :  { %v16054_v25 = vpop.f32.mrf.mxu2 }
 0x9fd   :  { %v7308_v31 = vpop.f32.mrf.mxu0 }
 0xa00   :  { %7678 = vmatmul.f32.gmra.mxu0 %v7620_v1 }
 0xa01   :  { %7767 = vmatmul.f32.gmra.mxu2 %v7082_v34  ;;  %v16072_v34 = vpop.f32.mrf.mxu3 }
 0xa02   :  { %17314 = vst [vmem:[#allocation35_spill] sm:$0xff] %v16072_v34 }
 0xa04   :  { %v7397_v56 = vpop.f32.mrf.mxu2 }
 0xa05   :  { %v7311_v28 = vpop.f32.mrf.mxu0 }
 0xa08   :  { %7681 = vmatmul.f32.gmra.mxu0 %v7621_v60 }
 0xa09   :  { %7770 = vmatmul.f32.gmra.mxu2 %v7083_v9  ;;  %v16080_v24 = vpop.f32.mrf.mxu3 }
 0xa0a   :  { %17316 = vst [vmem:[#allocation11_spill] sm:$0xff] %v16080_v24 }
 0xa0c   :  { %v7400_v59 = vpop.f32.mrf.mxu2 }
 0xa0d   :  { %v7314_v16 = vpop.f32.mrf.mxu0 }
 0xa10   :  { %7684 = vmatmul.f32.gmra.mxu0 %v7622_v55 }
 0xa11   :  { %7773 = vmatmul.f32.gmra.mxu2 %v7084_v39  ;;  %v16086_v39 = vpop.f32.mrf.mxu1  ;;  %v16090_v27 = vpop.f32.mrf.mxu3 }
 0xa12   :  { %17317 = vst [vmem:[#allocation23_spill] sm:$0xff] %v16086_v39 }
 0xa13   :  { %17318 = vst [vmem:[#allocation47_spill] sm:$0xff] %v16090_v27 }
 0xa14   :  { %v7403_v12 = vpop.f32.mrf.mxu2 }
 0xa15   :  { %v16074_v63 = vpop.f32.mrf.mxu0 }
 0xa18   :  { %7687 = vmatmul.f32.gmra.mxu0 %v7623_v50 }
 0xa19   :  { %7776 = vmatmul.f32.gmra.mxu2 %v7712_v35  ;;  %v16096_v1 = vpop.f32.mrf.mxu1  ;;  %v16098_v60 = vpop.f32.mrf.mxu3 }
 0xa1a   :  { %17321 = vst [vmem:[#allocation17_spill] sm:$0xff] %v16096_v1 }
 0xa1b   :  { %17322 = vst [vmem:[#allocation40_spill] sm:$0xff] %v16098_v60 }
 0xa1c   :  { %v16078_v9 = vpop.f32.mrf.mxu2 }
 0xa1d   :  { %v16082_v49 = vpop.f32.mrf.mxu0 }
 0xa21   :  { %v16104_v35 = vpop.f32.mrf.mxu1  ;;  %v16106_v44 = vpop.f32.mrf.mxu3 }
 0xa24   :  { %v16084_v6 = vpop.f32.mrf.mxu2 }
 0xa25   :  { %v16088_v19 = vpop.f32.mrf.mxu0 }
 0xa29   :  { %v7839_v27 = vpop.f32.mrf.mxu1  ;;  %v16114_v57 = vpop.f32.mrf.mxu3 }
 0xa2c   :  { %v16092_v21 = vpop.f32.mrf.mxu2 }
 0xa2d   :  { %17319 = vst [vmem:[#allocation48_spill] sm:$0xff] %v16092_v21  ;;  %v16094_v22 = vpop.f32.mrf.mxu0 }
 0xa2e   :  { %17320 = vst [vmem:[#allocation45_spill] sm:$0xff] %v16094_v22 }
 0xa31   :  { %v7842_v60 = vpop.f32.mrf.mxu1  ;;  %v7931_v13 = vpop.f32.mrf.mxu3 }
 0xa34   :  { %v16100_v55 = vpop.f32.mrf.mxu2 }
 0xa35   :  { %17323 = vst [vmem:[#allocation15_spill] sm:$0xff] %v16100_v55  ;;  %v16102_v50 = vpop.f32.mrf.mxu0 }
 0xa36   :  { %17324 = vst [vmem:[#allocation13_spill] sm:$0xff] %v16102_v50  ;;  %v7234_v50 = vadd.f32 %v16000_v45, %v15986_v0  ;;  %v7237_v0 = vadd.f32 %v16006_v3, %v16004_v30 }
 0xa38   :  { %v7338_v61 = vadd.f32 %v7311_v28, %v7234_v50 }
 0xa39   :  { %v7934_v22 = vpop.f32.mrf.mxu3 }
 0xa3a   :  { %v7427_v55 = vadd.f32 %v7400_v59, %v7338_v61 }
 0xa3c   :  { %v16108_v2 = vpop.f32.mrf.mxu2  ;;  %v7516_v45 = vadd.f32 %v16034_v62, %v7427_v55 }
 0xa3d   :  { %17325 = vst [vmem:[#allocation39_spill] sm:$0xff] %v16108_v2  ;;  %v16110_v23 = vpop.f32.mrf.mxu0  ;;  %v7231_v2 = vadd.f32 %v15970_v37, %v15956_v46  ;;  %v7335_v46 = vadd.f32 %v16040_v48, %v7225_v43 }
 0xa3e   :  { %17326 = vst [vmem:[#allocation36_spill] sm:$0xff] %v16110_v23  ;;  %v7845_v23 = vpop.f32.mrf.mxu1 }
 0xa3f   :  { %v7337_v34 = vadd.f32 %v7308_v31, %v7231_v2  ;;  %v7339_v2 = vadd.f32 %v7314_v16, %v7237_v0  ;;  %v7605_v31 = vadd.f32 %v16036_v38, %v7516_v45  ;;  %v7340_v38 = vadd.f32 %v16074_v63, %v16008_v8 }
 0xa40   :  { %v7341_v8 = vadd.f32 %v16082_v49, %v16012_v10 }
 0xa41   :  { %v7426_v36 = vadd.f32 %v7397_v56, %v7337_v34  ;;  %v7428_v26 = vadd.f32 %v7403_v12, %v7339_v2  ;;  %v7937_v3 = vpop.f32.mrf.mxu3  ;;  %v7429_v34 = vadd.f32 %v16078_v9, %v7340_v38 }
 0xa43   :  { %v7515_v61 = vadd.f32 %v16026_v7, %v7426_v36  ;;  %v7517_v62 = vadd.f32 %v16044_v5, %v7428_v26  ;;  %v7518_v0 = vadd.f32 %v16056_v20, %v7429_v34 }
 0xa44   :  { %v16112_v39 = vpop.f32.mrf.mxu2 }
 0xa45   :  { %17327 = vst [vmem:[#allocation9_spill] sm:$0xff] %v16112_v39  ;;  %v7658_v1 = vpop.f32.mrf.mxu0  ;;  %v7228_v39 = vadd.f32 %v15946_v15, %v15924_v53  ;;  %v7424_v15 = vadd.f32 %v16046_v33, %v7335_v46  ;;  %v7604_v43 = vadd.f32 %v16028_v51, %v7515_v61  ;;  %v17328_v61 = vld [vmem:[#allocation48_spill] sm:$0xff] }
 0xa47   :  { %v7336_v11 = vadd.f32 %v16050_v32, %v7228_v39  ;;  %v7848_v32 = vpop.f32.mrf.mxu1  ;;  %v7513_v30 = vadd.f32 %v16010_v18, %v7424_v15  ;;  %v7606_v18 = vadd.f32 %v16048_v41, %v7517_v62 }
 0xa49   :  { %v7425_v37 = vadd.f32 %v16054_v25, %v7336_v11  ;;  %v7602_v36 = vadd.f32 %v16014_v4, %v7513_v30  ;;  %v7940_v50 = vpop.f32.mrf.mxu3 }
 0xa4b   :  { %v7514_v29 = vadd.f32 %v16018_v40, %v7425_v37  ;;  %v7691_v16 = vadd.f32 %v7658_v1, %v7602_v36 }
 0xa4c   :  { %v7747_v14 = vpop.f32.mrf.mxu2 }
 0xa4d   :  { %v7661_v24 = vpop.f32.mrf.mxu0  ;;  %v7603_v56 = vadd.f32 %v16020_v47, %v7514_v29  ;;  %v7780_v47 = vadd.f32 %v7747_v14, %v7691_v16  ;;  %v17329_v29 = vld [vmem:[#allocation14_spill] sm:$0xff] }
 0xa4f   :  { %v7692_v40 = vadd.f32 %v7661_v24, %v7603_v56  ;;  %v7851_v12 = vpop.f32.mrf.mxu1 }
 0xa54   :  { %v7750_v42 = vpop.f32.mrf.mxu2 }
 0xa55   :  { %v7664_v54 = vpop.f32.mrf.mxu0  ;;  %v7781_v51 = vadd.f32 %v7750_v42, %v7692_v40  ;;  %v7430_v42 = vadd.f32 %v16084_v6, %v7341_v8 }
 0xa56   :  { %v7693_v33 = vadd.f32 %v7664_v54, %v7604_v43 }
 0xa57   :  { %v7870_v4 = vadd.f32 %v7839_v27, %v7781_v51  ;;  %v7607_v27 = vadd.f32 %v16058_v52, %v7518_v0  ;;  %v7519_v10 = vadd.f32 %v16062_v17, %v7430_v42  ;;  %v7342_v52 = vadd.f32 %v16088_v19, %v16016_v58  ;;  %v17330_v19 = vld [vmem:[#allocation7_spill] sm:$0xff] }
 0xa59   :  { %v7959_v14 = vadd.f32 %v16114_v57, %v7870_v4  ;;  %v7431_v26 = vadd.f32 %v17328_v61, %v7342_v52  ;;  %v17336_v4 = vld [vmem:[#allocation30_spill] sm:$0xff] }
 0xa5b   :  { %v7976_v6 = vrot.slane %v7959_v14, 1 }
 0xa5c   :  { %v7753_v21 = vpop.f32.mrf.mxu2 }
 0xa5d   :  { %v7667_v53 = vpop.f32.mrf.mxu0  ;;  %v7782_v59 = vadd.f32 %v7753_v21, %v7693_v33 }
 0xa5e   :  { %v7694_v48 = vadd.f32 %v7667_v53, %v7605_v31 }
 0xa5f   :  { %v7871_v54 = vadd.f32 %v7842_v60, %v7782_v59 }
 0xa61   :  { %v7960_v63 = vadd.f32 %v7931_v13, %v7871_v54 }
 0xa63   :  { %v7978_v46 = vrot.slane %v7960_v63, 1 }
 0xa64   :  { %v7756_v25 = vpop.f32.mrf.mxu2 }
 0xa65   :  { %v7783_v28 = vadd.f32 %v7756_v25, %v7694_v48  ;;  %v7670_v7 = vpop.f32.mrf.mxu0  ;;  %v7979_v17 = vsel %vm4076_vm0, %v7976_v6, %v7978_v46  ;;  %v7520_v25 = vadd.f32 %v17330_v19, %v7431_v26 }
 0xa66   :  { %v7695_v5 = vadd.f32 %v7670_v7, %v7606_v18  ;;  %v7990_v48 = vmax.f32 %v7959_v14, %v7979_v17  ;;  %v17332_v7 = vld [vmem:[#allocation45_spill] sm:$0xff]  ;;  %v17333_v18 = vld [vmem:[#allocation15_spill] sm:$0xff]  ;;  %v17345_v17 = vld [vmem:[#allocation36_spill] sm:$0xff] }
 0xa67   :  { %v7872_v11 = vadd.f32 %v7845_v23, %v7783_v28  ;;  %v7869_v23 = vadd.f32 %v16104_v35, %v7780_v47  ;;  %v7854_v35 = vpop.f32.mrf.mxu1  ;;  %v17331_v28 = vld [vmem:[#allocation33_spill] sm:$0xff] }
 0xa68   :  { %v7343_v36 = vadd.f32 %v17332_v7, %v17331_v28  ;;  %v17339_v14 = vld [vmem:[#allocation25_spill] sm:$0xff] }
 0xa69   :  { %v7961_v24 = vadd.f32 %v7934_v22, %v7872_v11  ;;  %v7958_v22 = vadd.f32 %v16106_v44, %v7869_v23  ;;  %v7943_v44 = vpop.f32.mrf.mxu3  ;;  %v17334_v11 = vld [vmem:[#allocation35_spill] sm:$0xff]  ;;  %v17349_v28 = vld [vmem:[#allocation17_spill] sm:$0xff] }
 0xa6a   :  { %v7432_v16 = vadd.f32 %v17333_v18, %v7343_v36  ;;  %v7609_v34 = vadd.f32 %v17334_v11, %v7520_v25  ;;  %v17350_v11 = vld [vmem:[#allocation8_spill] sm:$0xff] }
 0xa6b   :  { %v7980_v1 = vrot.slane %v7961_v24, 1  ;;  %v7975_v15 = vrot.slane %v7958_v22, 1 }
 0xa6c   :  { %v7759_v39 = vpop.f32.mrf.mxu2 }
 0xa6d   :  { %v7784_v55 = vadd.f32 %v7759_v39, %v7695_v5  ;;  %v7673_v21 = vpop.f32.mrf.mxu0  ;;  %v7981_v57 = vsel %vm4076_vm0, %v7978_v46, %v7980_v1  ;;  %v7977_v30 = vsel %vm4076_vm0, %v7975_v15, %v7976_v6  ;;  %v17343_v6 = vld [vmem:[#allocation38_spill] sm:$0xff] }
 0xa6e   :  { %v7696_v37 = vadd.f32 %v7673_v21, %v7607_v27  ;;  %v7991_v31 = vmax.f32 %v7960_v63, %v7981_v57  ;;  %v7989_v56 = vmax.f32 %v7958_v22, %v7977_v30  ;;  %v17337_v21 = vld [vmem:[#allocation32_spill] sm:$0xff]  ;;  %v17338_v63 = vld [vmem:[#allocation13_spill] sm:$0xff]  ;;  %v17341_v22 = vld [vmem:[#allocation11_spill] sm:$0xff] }
 0xa6f   :  { %v7873_v41 = vadd.f32 %v7848_v32, %v7784_v55  ;;  %v7608_v32 = vadd.f32 %v17329_v29, %v7519_v10  ;;  %v7857_v38 = vpop.f32.mrf.mxu1  ;;  %v17335_v55 = vld [vmem:[#allocation31_spill] sm:$0xff]  ;;  %v7521_v0 = vadd.f32 %v17337_v21, %v7432_v16  ;;  %v17347_v30 = vld [vmem:[#allocation9_spill] sm:$0xff] }
 0xa71   :  { %v7962_v9 = vadd.f32 %v7937_v3, %v7873_v41  ;;  %v7946_v5 = vpop.f32.mrf.mxu3  ;;  %v7610_v46 = vadd.f32 %v17341_v22, %v7521_v0 }
 0xa73   :  { %v7982_v60 = vrot.slane %v7962_v9, 1 }
 0xa74   :  { %v7762_v20 = vpop.f32.mrf.mxu2 }
 0xa75   :  { %v7993_v49 = vmax.f32 %v7962_v9, %v7982_v60  ;;  %v7983_v13 = vsel %vm4076_vm0, %v7980_v1, %v7982_v60  ;;  %v7676_v45 = vpop.f32.mrf.mxu0  ;;  %v7785_v2 = vadd.f32 %v7762_v20, %v7696_v37  ;;  %v17340_v1 = vld [vmem:[#allocation39_spill] sm:$0xff] }
 0xa76   :  { %v7992_v53 = vmax.f32 %v7961_v24, %v7983_v13  ;;  %v7697_v43 = vadd.f32 %v7676_v45, %v7608_v32  ;;  %v7252_v24 = vadd.f32 %v17336_v4, %v17335_v55  ;;  %v17346_v32 = vld [vmem:[#allocation26_spill] sm:$0xff] }
 0xa77   :  { %10048 = vmatpush.msk.msrb.mxu0 %vm8004_vm1, %v7993_v49  ;;  %v7874_v3 = vadd.f32 %v7851_v12, %v7785_v2  ;;  %v7860_v20 = vpop.f32.mrf.mxu1 }
 0xa78   :  { %v7344_v42 = vadd.f32 %v17338_v63, %v7252_v24 }
 0xa79   :  { %8020 = vmatpush.msrb.mxu0 %v7992_v53  ;;  %v7963_v40 = vadd.f32 %v7940_v50, %v7874_v3  ;;  %v7949_v37 = vpop.f32.mrf.mxu3  ;;  %v17344_v53 = vld [vmem:[#allocation23_spill] sm:$0xff] }
 0xa7a   :  { %v7433_v60 = vadd.f32 %v17340_v1, %v7344_v42 }
 0xa7b   :  { %8021 = vmatpush.msrb.mxu0 %v7991_v31  ;;  %v8043_v12 = vrot.slane %v7963_v40, 1 }
 0xa7c   :  { %v7765_v58 = vpop.f32.mrf.mxu2  ;;  %v7522_v57 = vadd.f32 %v17344_v53, %v7433_v60  ;;  %v8148_v53 = vld [vmem:[%s16961_s7 + $0x78] sm:$0xff] }
 0xa7d   :  { %v7786_v62 = vadd.f32 %v7765_v58, %v7697_v43  ;;  %8022 = vmatpush.msrb.mxu0 %v7990_v48  ;;  %v7679_v33 = vpop.f32.mrf.mxu0  ;;  %v17348_v48 = vld [vmem:[#allocation47_spill] sm:$0xff] }
 0xa7e   :  { %v7698_v54 = vadd.f32 %v7679_v33, %v7609_v34  ;;  %v7611_v58 = vadd.f32 %v17348_v48, %v7522_v57  ;;  %v8147_v57 = vld [vmem:[%s16961_s7 + $0x70] sm:$0xff]  ;;  %v10061_v48 = vld [vmem:[%s16961_s7 + $0xa8] sm:$0xff] }
 0xa7f   :  { %v7875_v59 = vadd.f32 %v7854_v35, %v7786_v62  ;;  %8023 = vmatpush.msrb.mxu0 %v7989_v56  ;;  %v17342_v35 = vld [vmem:[#allocation43_spill] sm:$0xff]  ;;  %v7863_v56 = vpop.f32.mrf.mxu1 }
 0xa80   :  { %10049 = vmatmul.msk.f32.vlgmr.msrb.gmra.mxu0 %vm7997_vm2, %v17339_v14  ;;  %v7255_v45 = vadd.f32 %v17343_v6, %v17342_v35  ;;  %v10066_v6 = vld [vmem:[%s16961_s7 + $0xd0] sm:$0xff] }
 0xa81   :  { %v7964_v51 = vadd.f32 %v7943_v44, %v7875_v59  ;;  %v7952_v59 = vpop.f32.mrf.mxu3 }
 0xa82   :  { %v7345_v61 = vadd.f32 %v17345_v17, %v7255_v45  ;;  %v10065_v45 = vld [vmem:[%s16961_s7 + $0xc8] sm:$0xff] }
 0xa83   :  { %v8044_v47 = vrot.slane %v7964_v51, 1  ;;  %v8142_v17 = vld [vmem:[%s16961_s7 + $0x48] sm:$0xff] }
 0xa84   :  { %v7768_v39 = vpop.f32.mrf.mxu2  ;;  %v7434_v3 = vadd.f32 %v17347_v30, %v7345_v61  ;;  %v8141_v61 = vld [vmem:[%s16961_s7 + $0x40] sm:$0xff]  ;;  %v8138_v30 = vld [vmem:[%s16961_s7 + $0x28] sm:$0xff] }
 0xa85   :  { %v7787_v8 = vadd.f32 %v7768_v39, %v7698_v54  ;;  %v8045_v50 = vsel %vm4076_vm0, %v8043_v12, %v8044_v47  ;;  %v7682_v41 = vpop.f32.mrf.mxu0 }
 0xa86   :  { %v8060_v23 = vmax.f32 %v7963_v40, %v8045_v50  ;;  %v7699_v49 = vadd.f32 %v7682_v41, %v7610_v46  ;;  %v7523_v7 = vadd.f32 %v17349_v28, %v7434_v3  ;;  %v10069_v46 = vld [vmem:[%s16961_s7 + $0xe8] sm:$0xff]  ;;  %v10062_v3 = vld [vmem:[%s16961_s7 + $0xb0] sm:$0xff] }
 0xa87   :  { %v7876_v9 = vadd.f32 %v7857_v38, %v7787_v8  ;;  %v7866_v21 = vpop.f32.mrf.mxu1  ;;  %v10058_v28 = vld [vmem:[%s16961_s7 + $0x90] sm:$0xff] }
 0xa88   :  { %10050 = vmatmul.msk.f32.gmra.mxu0 %vm7997_vm2, %v17346_v32  ;;  %v8073_v31 = vrot.slane %v8060_v23, 6 }
 0xa89   :  { %v7965_v27 = vadd.f32 %v7946_v5, %v7876_v9  ;;  %v17351_v5 = vld [vmem:[#allocation40_spill] sm:$0xff]  ;;  %v7955_v50 = vpop.f32.mrf.mxu3  ;;  %v10071_v9 = vld [vmem:[%s16961_s7 + $0xf8] sm:$0xff] }
 0xa8a   :  { %v7612_v12 = vadd.f32 %v17351_v5, %v7523_v7  ;;  %8170 = vmatpush.msra.mxu0 %v10071_v9  ;;  %v8133_v7 = vld [vmem:[%s16961_s7] sm:$0xff]  ;;  %v10085_v5 = vld [vmem:[%s16961_s7 + $0x168] sm:$0xff] }
 0xa8b   :  { %v8046_v10 = vrot.slane %v7965_v27, 1 }
 0xa8c   :  { %v7771_v13 = vpop.f32.mrf.mxu2 }
 0xa8d   :  { %v7788_v52 = vadd.f32 %v7771_v13, %v7699_v49  ;;  %v8047_v2 = vsel %vm4076_vm0, %v8044_v47, %v8046_v10  ;;  %v7685_v44 = vpop.f32.mrf.mxu0  ;;  %v10068_v49 = vld [vmem:[%s16961_s7 + $0xe0] sm:$0xff]  ;;  %v10067_v13 = vld [vmem:[%s16961_s7 + $0xd8] sm:$0xff] }
 0xa8e   :  { %v8061_v15 = vmax.f32 %v7964_v51, %v8047_v2  ;;  %v7700_v62 = vadd.f32 %v7685_v44, %v7611_v58  ;;  %v8145_v2 = vld [vmem:[%s16961_s7 + $0x60] sm:$0xff]  ;;  %v8144_v44 = vld [vmem:[%s16961_s7 + $0x58] sm:$0xff] }
 0xa8f   :  { %v7877_v26 = vadd.f32 %v7860_v20, %v7788_v52  ;;  %v8146_v52 = vld [vmem:[%s16961_s7 + $0x68] sm:$0xff]  ;;  %v8136_v58 = vld [vmem:[%s16961_s7 + $0x18] sm:$0xff] }
 0xa90   :  { %v8074_v29 = vrot.slane %v8061_v15, 6  ;;  %10051 = vmatmul.msk.f32.gmra.mxu0 %vm7997_vm2, %v17350_v11  ;;  %v8143_v15 = vld [vmem:[%s16961_s7 + $0x50] sm:$0xff] }
 0xa91   :  { %v7966_v43 = vadd.f32 %v7949_v37, %v7877_v26  ;;  %v8140_v26 = vld [vmem:[%s16961_s7 + $0x38] sm:$0xff] }
 0xa92   :  { %v8075_v19 = vsel %vm8072_vm5, %v8073_v31, %v8074_v29  ;;  %v10063_v31 = vld [vmem:[%s16961_s7 + $0xb8] sm:$0xff] }
 0xa93   :  { %v8048_v25 = vrot.slane %v7966_v43, 1 }
 0xa94   :  { %v7774_v33 = vpop.f32.mrf.mxu2 }
 0xa95   :  { %v7789_v36 = vadd.f32 %v7774_v33, %v7700_v62  ;;  %v8049_v40 = vsel %vm4076_vm0, %v8046_v10, %v8048_v25  ;;  %v7688_v16 = vpop.f32.mrf.mxu0  ;;  %v10059_v62 = vld [vmem:[%s16961_s7 + $0x98] sm:$0xff] }
 0xa96   :  { %v8062_v38 = vmax.f32 %v7965_v27, %v8049_v40  ;;  %v7701_v39 = vadd.f32 %v7688_v16, %v7612_v12  ;;  %v10070_v27 = vld [vmem:[%s16961_s7 + $0xf0] sm:$0xff]  ;;  %v10103_v33 = vld [vmem:[%s16961_s7 + $0x1f8] sm:$0xff]  ;;  %v16314_v16 = vld [vmem:[%s16960_s6] ss:$0 sm:$0xff] }
 0xa97   :  { %v7878_v18 = vadd.f32 %v7863_v56, %v7789_v36  ;;  %8171 = vmatpush.msra.mxu0 %v10070_v27  ;;  %v8134_v56 = vld [vmem:[%s16961_s7 + $0x8] sm:$0xff]  ;;  %8303 = vmatpush.msra.mxu3 %v10103_v33  ;;  %v10102_v36 = vld [vmem:[%s16961_s7 + $0x1f0] sm:$0xff]  ;;  %v10087_v40 = vld [vmem:[%s16961_s7 + $0x178] sm:$0xff] }
 0xa98   :  { %v8076_v51 = vrot.slane %v8062_v38, 6  ;;  %v10135_v38 = vld [vmem:[%s16961_s7 + $0x2f8] sm:$0xff]  ;;  %8249 = vmatpush.msra.mxu1 %v10087_v40  ;;  %v10093_v27 = vld [vmem:[%s16961_s7 + $0x1a8] sm:$0xff]  ;;  %v10128_v33 = vld [vmem:[%s16961_s7 + $0x2c0] sm:$0xff] }
 0xa99   :  { %v7967_v34 = vadd.f32 %v7952_v59, %v7878_v18  ;;  %8172 = vmatpush.msra.mxu0 %v10069_v46  ;;  %v10101_v59 = vld [vmem:[%s16961_s7 + $0x1e8] sm:$0xff]  ;;  %8304 = vmatpush.msra.mxu3 %v10102_v36  ;;  %v10099_v12 = vld [vmem:[%s16961_s7 + $0x1d8] sm:$0xff]  ;;  %v10092_v46 = vld [vmem:[%s16961_s7 + $0x1a0] sm:$0xff] }
 0xa9a   :  { %v8077_v47 = vsel %vm8072_vm5, %v8074_v29, %v8076_v51  ;;  %v10064_v29 = vld [vmem:[%s16961_s7 + $0xc0] sm:$0xff]  ;;  %v10057_v18 = vld [vmem:[%s16961_s7 + $0x88] sm:$0xff]  ;;  %v10167_v36 = vld [vmem:[%s16961_s7 + $0x3f8] sm:$0xff] }
 0xa9b   :  { %v8050_v54 = vrot.slane %v7967_v34, 1  ;;  %8173 = vmatpush.msra.mxu0 %v10068_v49  ;;  %8305 = vmatpush.msra.mxu3 %v10101_v59  ;;  %v10091_v49 = vld [vmem:[%s16961_s7 + $0x198] sm:$0xff]  ;;  %v10166_v40 = vld [vmem:[%s16961_s7 + $0x3f0] sm:$0xff] }
 0xa9c   :  { %v7777_v55 = vpop.f32.mrf.mxu2  ;;  %v10151_v59 = vld [vmem:[%s16961_s7 + $0x378] sm:$0xff] }
 0xa9d   :  { %v7790_v4 = vadd.f32 %v7777_v55, %v7701_v39  ;;  %v8051_v24 = vsel %vm4076_vm0, %v8048_v25, %v8050_v54  ;;  %8174 = vmatpush.msra.mxu0 %v10067_v13  ;;  %v8135_v25 = vld [vmem:[%s16961_s7 + $0x10] sm:$0xff]  ;;  %v10076_v13 = vld [vmem:[%s16961_s7 + $0x120] sm:$0xff] }
 0xa9e   :  { %v8063_v0 = vmax.f32 %v7966_v43, %v8051_v24  ;;  %v8137_v43 = vld [vmem:[%s16961_s7 + $0x20] sm:$0xff]  ;;  %v10098_v39 = vld [vmem:[%s16961_s7 + $0x1d0] sm:$0xff]  ;;  %v10097_v24 = vld [vmem:[%s16961_s7 + $0x1c8] sm:$0xff] }
 0xa9f   :  { %v7879_v8 = vadd.f32 %v7866_v21, %v7790_v4  ;;  %8175 = vmatpush.msra.mxu0 %v10066_v6  ;;  %v10083_v4 = vld [vmem:[%s16961_s7 + $0x158] sm:$0xff]  ;;  %v10082_v21 = vld [vmem:[%s16961_s7 + $0x150] sm:$0xff] }
 0xaa0   :  { %v8078_v41 = vrot.slane %v8063_v0, 6  ;;  %v10096_v0 = vld [vmem:[%s16961_s7 + $0x1c0] sm:$0xff] }
 0xaa1   :  { %v7968_v23 = vadd.f32 %v7955_v50, %v7879_v8  ;;  %8176 = vmatpush.msra.mxu0 %v10065_v45  ;;  %v10081_v50 = vld [vmem:[%s16961_s7 + $0x148] sm:$0xff]  ;;  %v10075_v45 = vld [vmem:[%s16961_s7 + $0x118] sm:$0xff] }
 0xaa2   :  { %v8079_v63 = vsel %vm8072_vm5, %v8076_v51, %v8078_v41  ;;  %v10086_v51 = vld [vmem:[%s16961_s7 + $0x170] sm:$0xff] }
 0xaa3   :  { %v8052_v42 = vrot.slane %v7968_v23, 1  ;;  %8177 = vmatpush.msra.mxu0 %v10064_v29  ;;  %8250 = vmatpush.msra.mxu1 %v10086_v51  ;;  %v10150_v51 = vld [vmem:[%s16961_s7 + $0x370] sm:$0xff] }
 0xaa5   :  { %v8053_v1 = vsel %vm4076_vm0, %v8050_v54, %v8052_v42  ;;  %v8065_v60 = vmax.f32 %v7968_v23, %v8052_v42  ;;  %8178 = vmatpush.msra.mxu0 %v10063_v31  ;;  %8251 = vmatpush.msra.mxu1 %v10085_v5  ;;  %v10084_v54 = vld [vmem:[%s16961_s7 + $0x160] sm:$0xff]  ;;  %v10094_v42 = vld [vmem:[%s16961_s7 + $0x1b0] sm:$0xff]  ;;  %v10073_v31 = vld [vmem:[%s16961_s7 + $0x108] sm:$0xff] }
 0xaa6   :  { %v8064_v22 = vmax.f32 %v7967_v34, %v8053_v1  ;;  %v10111_v5 = vld [vmem:[%s16961_s7 + $0x238] sm:$0xff] }
 0xaa7   :  { %v8082_v20 = vrot.slane %v8065_v60, 6  ;;  %8179 = vmatpush.msra.mxu0 %v10062_v3  ;;  %8252 = vmatpush.msra.mxu1 %v10084_v54  ;;  %v10079_v60 = vld [vmem:[%s16961_s7 + $0x138] sm:$0xff]  ;;  %v10124_v54 = vld [vmem:[%s16961_s7 + $0x2a0] sm:$0xff] }
 0xaa8   :  { %v8080_v10 = vrot.slane %v8064_v22, 6  ;;  %v10078_v22 = vld [vmem:[%s16961_s7 + $0x130] sm:$0xff]  ;;  %v10131_v3 = vld [vmem:[%s16961_s7 + $0x2d8] sm:$0xff] }
 0xaa9   :  { %8180 = vmatpush.msra.mxu0 %v10061_v48  ;;  %8253 = vmatpush.msra.mxu1 %v10083_v4  ;;  %v10148_v4 = vld [vmem:[%s16961_s7 + $0x360] sm:$0xff] }
 0xaaa   :  { %v8083_v37 = vsel %vm8072_vm5, %v8080_v10, %v8082_v20  ;;  %v8081_v35 = vsel %vm8072_vm5, %v8078_v41, %v8080_v10  ;;  %v10095_v41 = vld [vmem:[%s16961_s7 + $0x1b8] sm:$0xff]  ;;  %v10077_v10 = vld [vmem:[%s16961_s7 + $0x128] sm:$0xff] }
 0xaab   :  { %10052 = vmatpush.msk.msrb.mxu2 %vm8004_vm1, %v8083_v37  ;;  %8254 = vmatpush.msra.mxu1 %v10082_v21  ;;  %v10109_v21 = vld [vmem:[%s16961_s7 + $0x228] sm:$0xff] }
 0xaad   :  { %8102 = vmatpush.msrb.mxu2 %v8081_v35  ;;  %8255 = vmatpush.msra.mxu1 %v10081_v50  ;;  %v10090_v35 = vld [vmem:[%s16961_s7 + $0x190] sm:$0xff]  ;;  %v10147_v50 = vld [vmem:[%s16961_s7 + $0x358] sm:$0xff] }
 0xaaf   :  { %8103 = vmatpush.msrb.mxu2 %v8079_v63  ;;  %v10080_v63 = vld [vmem:[%s16961_s7 + $0x140] sm:$0xff] }
 0xab0   :  { %8256 = vmatpush.msra.mxu1 %v10080_v63  ;;  %v10162_v63 = vld [vmem:[%s16961_s7 + $0x3d0] sm:$0xff] }
 0xab1   :  { %8104 = vmatpush.msrb.mxu2 %v8077_v47 }
 0xab2   :  { %8257 = vmatpush.msra.mxu1 %v10079_v60  ;;  %v10121_v60 = vld [vmem:[%s16961_s7 + $0x288] sm:$0xff] }
 0xab3   :  { %8105 = vmatpush.msrb.mxu2 %v8075_v19  ;;  %v10060_v19 = vld [vmem:[%s16961_s7 + $0xa0] sm:$0xff] }
 0xab4   :  { %10053 = vmatmul.msk.f32.vlgmr.msrb.gmra.mxu2 %vm7997_vm2, %v17339_v14  ;;  %8181 = vmatpush.msra.mxu0 %v10060_v19  ;;  %v10130_v19 = vld [vmem:[%s16961_s7 + $0x2d0] sm:$0xff] }
 0xab5   :  { %8199 = vmatpush.msra.mxu2 %v8148_v53  ;;  %8258 = vmatpush.msra.mxu1 %v10078_v22  ;;  %v10089_v53 = vld [vmem:[%s16961_s7 + $0x188] sm:$0xff] }
 0xab6   :  { %8182 = vmatpush.msra.mxu0 %v10059_v62  ;;  %v10129_v62 = vld [vmem:[%s16961_s7 + $0x2c8] sm:$0xff] }
 0xab7   :  { %8200 = vmatpush.msra.mxu2 %v8147_v57  ;;  %8259 = vmatpush.msra.mxu1 %v10077_v10  ;;  %v10074_v57 = vld [vmem:[%s16961_s7 + $0x110] sm:$0xff]  ;;  %v10145_v22 = vld [vmem:[%s16961_s7 + $0x348] sm:$0xff] }
 0xab8   :  { %8183 = vmatpush.msra.mxu0 %v10058_v28  ;;  %v10113_v28 = vld [vmem:[%s16961_s7 + $0x248] sm:$0xff] }
 0xab9   :  { %8201 = vmatpush.msra.mxu2 %v8146_v52  ;;  %8260 = vmatpush.msra.mxu1 %v10076_v13  ;;  %v10088_v52 = vld [vmem:[%s16961_s7 + $0x180] sm:$0xff] }
 0xaba   :  { %8184 = vmatpush.msra.mxu0 %v10057_v18  ;;  %v10126_v18 = vld [vmem:[%s16961_s7 + $0x2b0] sm:$0xff] }
 0xabb   :  { %8202 = vmatpush.msra.mxu2 %v8145_v2  ;;  %8261 = vmatpush.msra.mxu1 %v10075_v45  ;;  %v10056_v2 = vld [vmem:[%s16961_s7 + $0x80] sm:$0xff]  ;;  %v10198_v45 = vld [vmem:[%s16961_s7 + $0x4f0] sm:$0xff] }
 0xabc   :  { %10054 = vmatmul.msk.f32.gmra.mxu2 %vm7997_vm2, %v17346_v32  ;;  %v8139_v32 = vld [vmem:[%s16961_s7 + $0x30] sm:$0xff]  ;;  %8185 = vmatpush.msra.mxu0 %v10056_v2  ;;  %v10143_v2 = vld [vmem:[%s16961_s7 + $0x338] sm:$0xff] }
 0xabd   :  { %8203 = vmatpush.msra.mxu2 %v8144_v44  ;;  %v10134_v44 = vld [vmem:[%s16961_s7 + $0x2f0] sm:$0xff]  ;;  %8262 = vmatpush.msra.mxu1 %v10074_v57 }
 0xabf   :  { %8204 = vmatpush.msra.mxu2 %v8143_v15  ;;  %v10119_v15 = vld [vmem:[%s16961_s7 + $0x278] sm:$0xff]  ;;  %8263 = vmatpush.msra.mxu1 %v10073_v31  ;;  %v10157_v31 = vld [vmem:[%s16961_s7 + $0x3a8] sm:$0xff] }
 0xac0   :  { %8357 = vmatpush.msrb.mxu0 %v10119_v15  ;;  %v10197_v15 = vld [vmem:[%s16961_s7 + $0x4e8] sm:$0xff] }
 0xac1   :  { %8205 = vmatpush.msra.mxu2 %v8142_v17  ;;  %v10133_v17 = vld [vmem:[%s16961_s7 + $0x2e8] sm:$0xff] }
 0xac3   :  { %8206 = vmatpush.msra.mxu2 %v8141_v61  ;;  %v10118_v61 = vld [vmem:[%s16961_s7 + $0x270] sm:$0xff] }
 0xac4   :  { %10055 = vmatmul.msk.f32.gmra.mxu2 %vm7997_vm2, %v17350_v11  ;;  %v10100_v11 = vld [vmem:[%s16961_s7 + $0x1e0] sm:$0xff]  ;;  %8358 = vmatpush.msrb.mxu0 %v10118_v61  ;;  %v10142_v61 = vld [vmem:[%s16961_s7 + $0x330] sm:$0xff] }
 0xac5   :  { %8207 = vmatpush.msra.mxu2 %v8140_v26  ;;  %8306 = vmatpush.msra.mxu3 %v10100_v11  ;;  %v10132_v26 = vld [vmem:[%s16961_s7 + $0x2e0] sm:$0xff]  ;;  %v10165_v11 = vld [vmem:[%s16961_s7 + $0x3e8] sm:$0xff] }
 0xac7   :  { %8208 = vmatpush.msra.mxu2 %v8139_v32  ;;  %8307 = vmatpush.msra.mxu3 %v10099_v12  ;;  %v10125_v12 = vld [vmem:[%s16961_s7 + $0x2a8] sm:$0xff] }
 0xac9   :  { %8209 = vmatpush.msra.mxu2 %v8138_v30  ;;  %8308 = vmatpush.msra.mxu3 %v10098_v39  ;;  %v10117_v30 = vld [vmem:[%s16961_s7 + $0x268] sm:$0xff]  ;;  %v10164_v39 = vld [vmem:[%s16961_s7 + $0x3e0] sm:$0xff] }
 0xaca   :  { %8359 = vmatpush.msrb.mxu0 %v10117_v30  ;;  %v10141_v30 = vld [vmem:[%s16961_s7 + $0x328] sm:$0xff] }
 0xacb   :  { %8210 = vmatpush.msra.mxu2 %v8137_v43  ;;  %8309 = vmatpush.msra.mxu3 %v10097_v24  ;;  %v10072_v43 = vld [vmem:[%s16961_s7 + $0x100] sm:$0xff] }
 0xacc   :  { %8264 = vmatpush.msra.mxu1 %v10072_v43  ;;  %v10181_v43 = vld [vmem:[%s16961_s7 + $0x468] sm:$0xff] }
 0xacd   :  { %8211 = vmatpush.msra.mxu2 %v8136_v58  ;;  %8310 = vmatpush.msra.mxu3 %v10096_v0  ;;  %v10116_v58 = vld [vmem:[%s16961_s7 + $0x260] sm:$0xff]  ;;  %v10123_v0 = vld [vmem:[%s16961_s7 + $0x298] sm:$0xff] }
 0xace   :  { %8360 = vmatpush.msrb.mxu0 %v10116_v58  ;;  %8465 = vmatpush.msrb.mxu1 %v10151_v59  ;;  %v10193_v59 = vld [vmem:[%s16961_s7 + $0x4c8] sm:$0xff] }
 0xacf   :  { %8212 = vmatpush.msra.mxu2 %v8135_v25  ;;  %8311 = vmatpush.msra.mxu3 %v10095_v41  ;;  %v10115_v25 = vld [vmem:[%s16961_s7 + $0x258] sm:$0xff]  ;;  %v10108_v41 = vld [vmem:[%s16961_s7 + $0x220] sm:$0xff] }
 0xad0   :  { %8361 = vmatpush.msrb.mxu0 %v10115_v25  ;;  %8466 = vmatpush.msrb.mxu1 %v10150_v51  ;;  %v10140_v25 = vld [vmem:[%s16961_s7 + $0x320] sm:$0xff]  ;;  %v10139_v51 = vld [vmem:[%s16961_s7 + $0x318] sm:$0xff] }
 0xad1   :  { %8213 = vmatpush.msra.mxu2 %v8134_v56  ;;  %8312 = vmatpush.msra.mxu3 %v10094_v42  ;;  %v10114_v56 = vld [vmem:[%s16961_s7 + $0x250] sm:$0xff] }
 0xad2   :  { %8362 = vmatpush.msrb.mxu0 %v10114_v56  ;;  %v10146_v42 = vld [vmem:[%s16961_s7 + $0x350] sm:$0xff]  ;;  %v10180_v56 = vld [vmem:[%s16961_s7 + $0x460] sm:$0xff] }
 0xad3   :  { %8214 = vmatpush.msra.mxu2 %v8133_v7  ;;  %8313 = vmatpush.msra.mxu3 %v10093_v27  ;;  %v10127_v7 = vld [vmem:[%s16961_s7 + $0x2b8] sm:$0xff]  ;;  %v10161_v27 = vld [vmem:[%s16961_s7 + $0x3c8] sm:$0xff] }
 0xad4   :  { %8363 = vmatpush.msrb.mxu0 %v10113_v28 }
 0xad5   :  { %8411 = vmatpush.msrb.mxu2 %v10135_v38  ;;  %8314 = vmatpush.msra.mxu3 %v10092_v46  ;;  %v10112_v38 = vld [vmem:[%s16961_s7 + $0x240] sm:$0xff]  ;;  %v10106_v46 = vld [vmem:[%s16961_s7 + $0x210] sm:$0xff] }
 0xad6   :  { %8364 = vmatpush.msrb.mxu0 %v10112_v38 }
 0xad7   :  { %8315 = vmatpush.msra.mxu3 %v10091_v49  ;;  %8412 = vmatpush.msrb.mxu2 %v10134_v44  ;;  %v10199_v49 = vld [vmem:[%s16961_s7 + $0x4f8] sm:$0xff] }
 0xad8   :  { %8365 = vmatpush.msrb.mxu0 %v10111_v5  ;;  %v10183_v44 = vld [vmem:[%s16961_s7 + $0x478] sm:$0xff]  ;;  %v10154_v5 = vld [vmem:[%s16961_s7 + $0x390] sm:$0xff] }
 0xad9   :  { %8316 = vmatpush.msra.mxu3 %v10090_v35  ;;  %8413 = vmatpush.msrb.mxu2 %v10133_v17  ;;  %v10105_v35 = vld [vmem:[%s16961_s7 + $0x208] sm:$0xff]  ;;  %v10158_v17 = vld [vmem:[%s16961_s7 + $0x3b0] sm:$0xff] }
 0xadb   :  { %8317 = vmatpush.msra.mxu3 %v10089_v53  ;;  %8414 = vmatpush.msrb.mxu2 %v10132_v26  ;;  %v10159_v53 = vld [vmem:[%s16961_s7 + $0x3b8] sm:$0xff]  ;;  %v10182_v26 = vld [vmem:[%s16961_s7 + $0x470] sm:$0xff] }
 0xadd   :  { %8318 = vmatpush.msra.mxu3 %v10088_v52  ;;  %8415 = vmatpush.msrb.mxu2 %v10131_v3  ;;  %v10104_v52 = vld [vmem:[%s16961_s7 + $0x200] sm:$0xff] }
 0xadf   :  { %8416 = vmatpush.msrb.mxu2 %v10130_v19  ;;  %8519 = vmatpush.msrb.mxu3 %v10167_v36  ;;  %v10156_v19 = vld [vmem:[%s16961_s7 + $0x3a0] sm:$0xff] }
 0xae1   :  { %8417 = vmatpush.msrb.mxu2 %v10129_v62  ;;  %8520 = vmatpush.msrb.mxu3 %v10166_v40  ;;  %v10179_v40 = vld [vmem:[%s16961_s7 + $0x458] sm:$0xff] }
 0xae3   :  { %8418 = vmatpush.msrb.mxu2 %v10128_v33  ;;  %8521 = vmatpush.msrb.mxu3 %v10165_v11  ;;  %v10194_v33 = vld [vmem:[%s16961_s7 + $0x4d0] sm:$0xff] }
 0xae4   :  { %v10178_v11 = vld [vmem:[%s16961_s7 + $0x450] sm:$0xff] }
 0xae5   :  { %8419 = vmatpush.msrb.mxu2 %v10127_v7  ;;  %8522 = vmatpush.msrb.mxu3 %v10164_v39  ;;  %v10191_v39 = vld [vmem:[%s16961_s7 + $0x4b8] sm:$0xff] }
 0xae7   :  { %8420 = vmatpush.msrb.mxu2 %v10126_v18  ;;  %v10155_v18 = vld [vmem:[%s16961_s7 + $0x398] sm:$0xff] }
 0xae9   :  { %8421 = vmatpush.msrb.mxu2 %v10125_v12  ;;  %v10138_v12 = vld [vmem:[%s16961_s7 + $0x310] sm:$0xff] }
 0xaeb   :  { %8422 = vmatpush.msrb.mxu2 %v10124_v54  ;;  %v10177_v54 = vld [vmem:[%s16961_s7 + $0x448] sm:$0xff] }
 0xaed   :  { %8423 = vmatpush.msrb.mxu2 %v10123_v0 }
 0xafd   :  { %v8025_v34 = vpop.f32.mrf.mxu0 }
 0xafe   :  { %v16329_v47 = vadd.f32 %v16314_v16, %v8025_v34  ;;  %v10149_v34 = vld [vmem:[%s16961_s7 + $0x368] sm:$0xff] }
 0xaff   :  { %8467 = vmatpush.msrb.mxu1 %v10149_v34  ;;  %v10192_v34 = vld [vmem:[%s16961_s7 + $0x4c0] sm:$0xff] }
 0xb00   :  { %v8034_v55 = vmax.f32 %v16329_v47, 0.0  ;;  %v10110_v47 = vld [vmem:[%s16961_s7 + $0x230] sm:$0xff] }
 0xb01   :  { %8468 = vmatpush.msrb.mxu1 %v10148_v4  ;;  %8366 = vmatpush.msrb.mxu0 %v10110_v47  ;;  %v10176_v4 = vld [vmem:[%s16961_s7 + $0x440] sm:$0xff] }
 0xb02   :  { %8120 = vst [vmem:[#allocation4 + $0x1] sm:$0xff] %v8034_v55  ;;  %8186 = vmatmul.f32.vlgmr.msra.gmra.mxu0 %v8034_v55 }
 0xb03   :  { %8367 = vmatpush.msrb.mxu0 %v10109_v21  ;;  %8469 = vmatpush.msrb.mxu1 %v10147_v50 }
 0xb05   :  { %v8028_v8 = vpop.f32.mrf.mxu0  ;;  %8368 = vmatpush.msrb.mxu0 %v10108_v41  ;;  %8470 = vmatpush.msrb.mxu1 %v10146_v42  ;;  %v10189_v41 = vld [vmem:[%s16961_s7 + $0x4a8] sm:$0xff] }
 0xb06   :  { %v8029_v23 = vadd.f32 %v16314_v16, %v8028_v8  ;;  %v10163_v8 = vld [vmem:[%s16961_s7 + $0x3d8] sm:$0xff]  ;;  %v10137_v42 = vld [vmem:[%s16961_s7 + $0x308] sm:$0xff] }
 0xb07   :  { %8523 = vmatpush.msrb.mxu3 %v10163_v8  ;;  %8471 = vmatpush.msrb.mxu1 %v10145_v22  ;;  %v10136_v22 = vld [vmem:[%s16961_s7 + $0x300] sm:$0xff] }
 0xb08   :  { %v16363_v9 = vmax.f32 %v8029_v23, 0.0  ;;  %v10122_v23 = vld [vmem:[%s16961_s7 + $0x290] sm:$0xff] }
 0xb09   :  { %v8129_v1 = vld [vmem:[#allocation4] sm:$0xff]  ;;  %8424 = vmatpush.msrb.mxu2 %v10122_v23  ;;  %8524 = vmatpush.msrb.mxu3 %v10162_v63 }
 0xb0a   :  { %8121 = vst [vmem:[#allocation4 + $0x9] sm:$0xff] %v16363_v9  ;;  %8215 = vmatmul.f32.vlgmr.msra.gmra.mxu2 %v8129_v1  ;;  %8189 = vmatmul.f32.gmra.mxu0 %v16363_v9  ;;  %v10107_v1 = vld [vmem:[%s16961_s7 + $0x218] sm:$0xff]  ;;  %v10153_v63 = vld [vmem:[%s16961_s7 + $0x388] sm:$0xff] }
 0xb0b   :  { %8369 = vmatpush.msrb.mxu0 %v10107_v1  ;;  %8425 = vmatpush.msrb.mxu2 %v10121_v60  ;;  %v10174_v1 = vld [vmem:[%s16961_s7 + $0x430] sm:$0xff]  ;;  %v10188_v60 = vld [vmem:[%s16961_s7 + $0x4a0] sm:$0xff] }
 0xb0c   :  { %8525 = vmatpush.msrb.mxu3 %v10161_v27  ;;  %v10152_v27 = vld [vmem:[%s16961_s7 + $0x380] sm:$0xff] }
 0xb0d   :  { %v8031_v20 = vpop.f32.mrf.mxu0  ;;  %8370 = vmatpush.msrb.mxu0 %v10106_v46  ;;  %v10173_v46 = vld [vmem:[%s16961_s7 + $0x428] sm:$0xff] }
 0xb0e   :  { %v8032_v37 = vadd.f32 %v16314_v16, %v8031_v20  ;;  %v10120_v20 = vld [vmem:[%s16961_s7 + $0x280] sm:$0xff] }
 0xb0f   :  { %8426 = vmatpush.msrb.mxu2 %v10120_v20  ;;  %8371 = vmatpush.msrb.mxu0 %v10105_v35  ;;  %v10187_v20 = vld [vmem:[%s16961_s7 + $0x498] sm:$0xff] }
 0xb10   :  { %v8036_v6 = vmax.f32 %v8032_v37, 0.0  ;;  %v10160_v37 = vld [vmem:[%s16961_s7 + $0x3c0] sm:$0xff] }
 0xb11   :  { %v16421_v29 = vld [vmem:[#allocation4 + $0x8] sm:$0xff]  ;;  %8627 = vmatpush.msra.mxu2 %v10199_v49  ;;  %8526 = vmatpush.msrb.mxu3 %v10160_v37 }
 0xb12   :  { %8122 = vst [vmem:[#allocation4 + $0x11] sm:$0x3] %v8036_v6  ;;  %v8282_v32 = vld [vmem:[#allocation4 + $0x3] sm:$0xff]  ;;  %8218 = vmatmul.f32.gmra.mxu2 %v16421_v29  ;;  %v10144_v6 = vld [vmem:[%s16961_s7 + $0x340] sm:$0xff]  ;;  %8372 = vmatpush.msrb.mxu0 %v10104_v52 }
 0xb13   :  { %8319 = vmatmul.f32.vlgmr.msra.gmra.mxu3 %v8282_v32  ;;  %v8228_v48 = vld [vmem:[#allocation4 + $0x2] sm:$0xff]  ;;  %8472 = vmatpush.msrb.mxu1 %v10144_v6  ;;  %v10196_v32 = vld [vmem:[%s16961_s7 + $0x4e0] sm:$0xff]  ;;  %v10171_v6 = vld [vmem:[%s16961_s7 + $0x418] sm:$0xff] }
 0xb14   :  { %8265 = vmatmul.f32.vlgmr.msra.gmra.mxu1 %v8228_v48  ;;  %8628 = vmatpush.msra.mxu2 %v10198_v45  ;;  %v10195_v48 = vld [vmem:[%s16961_s7 + $0x4d8] sm:$0xff]  ;;  %v10186_v49 = vld [vmem:[%s16961_s7 + $0x490] sm:$0xff]  ;;  %v10185_v45 = vld [vmem:[%s16961_s7 + $0x488] sm:$0xff] }
 0xb15   :  { %8527 = vmatpush.msrb.mxu3 %v10159_v53  ;;  %8473 = vmatpush.msrb.mxu1 %v10143_v2  ;;  %v8390_v37 = vld [vmem:[#allocation4 + $0x5] sm:$0xff] }
 0xb16   :  { %8573 = vmatpush.msra.mxu0 %v10183_v44  ;;  %8629 = vmatpush.msra.mxu2 %v10197_v15  ;;  %v8336_v35 = vld [vmem:[#allocation4 + $0x4] sm:$0xff]  ;;  %v10184_v44 = vld [vmem:[%s16961_s7 + $0x480] sm:$0xff] }
 0xb17   :  { %8528 = vmatpush.msrb.mxu3 %v10158_v17  ;;  %8474 = vmatpush.msrb.mxu1 %v10142_v61  ;;  %v8498_v53 = vld [vmem:[#allocation4 + $0x7] sm:$0xff]  ;;  %v10168_v17 = vld [vmem:[%s16961_s7 + $0x400] sm:$0xff] }
 0xb18   :  { %8574 = vmatpush.msra.mxu0 %v10182_v26  ;;  %8630 = vmatpush.msra.mxu2 %v10196_v32  ;;  %v8444_v52 = vld [vmem:[#allocation4 + $0x6] sm:$0xff] }
 0xb19   :  { %v8283_v55 = vld [vmem:[#allocation4 + $0xb] sm:$0xff]  ;;  %8529 = vmatpush.msrb.mxu3 %v10157_v31  ;;  %8475 = vmatpush.msrb.mxu1 %v10141_v30  ;;  %v10169_v15 = vld [vmem:[%s16961_s7 + $0x408] sm:$0xff] }
 0xb1a   :  { %v8229_v24 = vld [vmem:[#allocation4 + $0xa] sm:$0xff]  ;;  %8575 = vmatpush.msra.mxu0 %v10181_v43  ;;  %8631 = vmatpush.msra.mxu2 %v10195_v48 }
 0xb1b   :  { %8322 = vmatmul.f32.gmra.mxu3 %v8283_v55  ;;  %8476 = vmatpush.msrb.mxu1 %v10140_v25  ;;  %v10170_v2 = vld [vmem:[%s16961_s7 + $0x410] sm:$0xff] }
 0xb1c   :  { %8268 = vmatmul.f32.gmra.mxu1 %v8229_v24  ;;  %8530 = vmatpush.msrb.mxu3 %v10156_v19  ;;  %v10190_v24 = vld [vmem:[%s16961_s7 + $0x4b0] sm:$0xff] }
 0xb1d   :  { %8576 = vmatpush.msra.mxu0 %v10180_v56  ;;  %8632 = vmatpush.msra.mxu2 %v10194_v33  ;;  %v8391_v61 = vld [vmem:[#allocation4 + $0xd] sm:$0xff] }
 0xb1e   :  { %8531 = vmatpush.msrb.mxu3 %v10155_v18  ;;  %8477 = vmatpush.msrb.mxu1 %v10139_v51  ;;  %v8337_v26 = vld [vmem:[#allocation4 + $0xc] sm:$0xff] }
 0xb1f   :  { %8577 = vmatpush.msra.mxu0 %v10179_v40  ;;  %8633 = vmatpush.msra.mxu2 %v10193_v59 }
 0xb20   :  { %8532 = vmatpush.msrb.mxu3 %v10154_v5  ;;  %8478 = vmatpush.msrb.mxu1 %v10138_v12 }
 0xb21   :  { %8578 = vmatpush.msra.mxu0 %v10178_v11  ;;  %8634 = vmatpush.msra.mxu2 %v10192_v34 }
 0xb22   :  { %8533 = vmatpush.msrb.mxu3 %v10153_v63  ;;  %8479 = vmatpush.msrb.mxu1 %v10137_v42 }
 0xb23   :  { %8579 = vmatpush.msra.mxu0 %v10177_v54  ;;  %8635 = vmatpush.msra.mxu2 %v10191_v39 }
 0xb24   :  { %8534 = vmatpush.msrb.mxu3 %v10152_v27  ;;  %8480 = vmatpush.msrb.mxu1 %v10136_v22 }
 0xb25   :  { %8580 = vmatpush.msra.mxu0 %v10176_v4  ;;  %8636 = vmatpush.msra.mxu2 %v10190_v24 }
 0xb27   :  { %8637 = vmatpush.msra.mxu2 %v10189_v41 }
 0xb29   :  { %8638 = vmatpush.msra.mxu2 %v10188_v60 }
 0xb2b   :  { %8639 = vmatpush.msra.mxu2 %v10187_v20 }
 0xb2d   :  { %8640 = vmatpush.msra.mxu2 %v10186_v49 }
 0xb2f   :  { %8641 = vmatpush.msra.mxu2 %v10185_v45 }
 0xb31   :  { %8642 = vmatpush.msra.mxu2 %v10184_v44 }
 0xb37   :  { %v8107_v10 = vpop.f32.mrf.mxu2 }
 0xb38   :  { %v16552_v13 = vadd.f32 %v16314_v16, %v8107_v10  ;;  %v10172_v10 = vld [vmem:[%s16961_s7 + $0x420] sm:$0xff] }
 0xb3a   :  { %v8116_v57 = vmax.f32 %v16552_v13, 0.0 }
 0xb3c   :  { %8125 = vst [vmem:[#allocation4 + $0x15] sm:$0xff] %v8116_v57 }
 0xb3f   :  { %v8110_v3 = vpop.f32.mrf.mxu2 }
 0xb40   :  { %v8111_v58 = vadd.f32 %v16314_v16, %v8110_v3 }
 0xb42   :  { %v8117_v62 = vmax.f32 %v8111_v58, 0.0 }
 0xb43   :  { %v16618_v28 = vld [vmem:[#allocation4 + $0x10] sm:$0xff] }
 0xb44   :  { %v16620_v7 = vld [vmem:[#allocation4 + $0x11] sm:$0xff]  ;;  %8126 = vst [vmem:[#allocation4 + $0x1d] sm:$0xff] %v8117_v62  ;;  %8221 = vmatmul.f32.gmra.mxu2 %v16618_v28 }
 0xb45   :  { %v8284_v36 = vld [vmem:[#allocation4 + $0x13] sm:$0xff]  ;;  %8192 = vmatmul.f32.gmra.mxu0 %v16620_v7 }
 0xb46   :  { %v8230_v38 = vld [vmem:[#allocation4 + $0x12] sm:$0xff]  ;;  %8325 = vmatmul.f32.gmra.mxu3 %v8284_v36 }
 0xb47   :  { %8271 = vmatmul.f32.gmra.mxu1 %v8230_v38  ;;  %v8113_v47 = vpop.f32.mrf.mxu2  ;;  %v8499_v32 = vld [vmem:[#allocation4 + $0xf] sm:$0xff] }
 0xb48   :  { %v8114_v55 = vadd.f32 %v16314_v16, %v8113_v47  ;;  %v10175_v16 = vld [vmem:[%s16961_s7 + $0x438] sm:$0xff] }
 0xb49   :  { %8581 = vmatpush.msra.mxu0 %v10175_v16  ;;  %v8445_v31 = vld [vmem:[#allocation4 + $0xe] sm:$0xff] }
 0xb4a   :  { %v8118_v21 = vmax.f32 %v8114_v55, 0.0  ;;  %v8338_v30 = vld [vmem:[#allocation4 + $0x14] sm:$0xff] }
 0xb4b   :  { %v8132_v0 = vld [vmem:[#allocation4 + $0x18] sm:$0x7f]  ;;  %8582 = vmatpush.msra.mxu0 %v10174_v1 }
 0xb4c   :  { %v8152_v8 = vld [vmem:[#allocation4 + $0x19] sm:$0x7f]  ;;  %8224 = vmatmul.f32.gmra.mxu2 %v8132_v0  ;;  %8127 = vst [vmem:[#allocation4 + $0x25] sm:$0x3] %v8118_v21 }
 0xb4d   :  { %v8285_v50 = vld [vmem:[#allocation4 + $0x1b] sm:$0x7f]  ;;  %8195 = vmatmul.f32.gmra.mxu0 %v8152_v8 }
 0xb4e   :  { %v8231_v23 = vld [vmem:[#allocation4 + $0x1a] sm:$0x7f]  ;;  %8328 = vmatmul.f32.gmra.mxu3 %v8285_v50  ;;  %8583 = vmatpush.msra.mxu0 %v10173_v46 }
 0xb4f   :  { %8274 = vmatmul.f32.gmra.mxu1 %v8231_v23  ;;  %v8500_v3 = vld [vmem:[#allocation4 + $0x17] sm:$0xff] }
 0xb50   :  { %8584 = vmatpush.msra.mxu0 %v10172_v10  ;;  %v8446_v43 = vld [vmem:[#allocation4 + $0x16] sm:$0xff]  ;;  %v8447_v25 = vld [vmem:[#allocation4 + $0x1e] sm:$0x7f] }
 0xb51   :  { %v8393_v48 = vld [vmem:[#allocation4 + $0x1d] sm:$0x7f] }
 0xb52   :  { %8585 = vmatpush.msra.mxu0 %v10171_v6  ;;  %v8339_v58 = vld [vmem:[#allocation4 + $0x1c] sm:$0x7f] }
 0xb53   :  { %v8501_v19 = vld [vmem:[#allocation4 + $0x1f] sm:$0x7f] }
 0xb54   :  { %8427 = vmatmul.f32.vlgmr.msrb.gmra.mxu2 %v8390_v37  ;;  %8586 = vmatpush.msra.mxu0 %v10170_v2  ;;  %v8608_v13 = vld [vmem:[#allocation4 + $0x19] sm:$0xff]  ;;  %v8609_v62 = vld [vmem:[#allocation4 + $0x21] sm:$0x7f] }
 0xb55   :  { %8373 = vmatmul.f32.vlgmr.msrb.gmra.mxu0 %v8336_v35  ;;  %v8555_v56 = vld [vmem:[#allocation4 + $0x20] sm:$0x7f] }
 0xb56   :  { %8535 = vmatmul.f32.vlgmr.msrb.gmra.mxu3 %v8498_v53  ;;  %8587 = vmatpush.msra.mxu0 %v10169_v15 }
 0xb57   :  { %8481 = vmatmul.f32.vlgmr.msrb.gmra.mxu1 %v8444_v52 }
 0xb58   :  { %8588 = vmatpush.msra.mxu0 %v10168_v17 }
 0xb5c   :  { %8430 = vmatmul.f32.gmra.mxu2 %v8391_v61 }
 0xb5d   :  { %8376 = vmatmul.f32.gmra.mxu0 %v8337_v26 }
 0xb5e   :  { %8538 = vmatmul.f32.gmra.mxu3 %v8499_v32 }
 0xb5f   :  { %8484 = vmatmul.f32.gmra.mxu1 %v8445_v31 }
 0xb64   :  { %8433 = vmatmul.f32.gmra.mxu2 %v8116_v57  ;;  %v8554_v57 = vld [vmem:[#allocation4 + $0x18] sm:$0xff] }
 0xb65   :  { %8379 = vmatmul.f32.gmra.mxu0 %v8338_v30 }
 0xb66   :  { %8541 = vmatmul.f32.gmra.mxu3 %v8500_v3 }
 0xb67   :  { %8487 = vmatmul.f32.gmra.mxu1 %v8446_v43 }
 0xb6c   :  { %8436 = vmatmul.f32.gmra.mxu2 %v8393_v48 }
 0xb6d   :  { %8382 = vmatmul.f32.gmra.mxu0 %v8339_v58 }
 0xb6e   :  { %8544 = vmatmul.f32.gmra.mxu3 %v8501_v19 }
 0xb6f   :  { %8490 = vmatmul.f32.gmra.mxu1 %v8447_v25 }
 0xb74   :  { %8643 = vmatmul.f32.vlgmr.msra.gmra.mxu2 %v16363_v9 }
 0xb75   :  { %8589 = vmatmul.f32.vlgmr.msra.gmra.mxu0 %v16421_v29 }
 0xb7c   :  { %8646 = vmatmul.f32.gmra.mxu2 %v16620_v7 }
 0xb7d   :  { %8592 = vmatmul.f32.gmra.mxu0 %v16618_v28 }
 0xb7f   :  { %v8187_v33 = vpop.f32.mrf.mxu0 }
 0xb84   :  { %8649 = vmatmul.f32.gmra.mxu2 %v8608_v13 }
 0xb85   :  { %8595 = vmatmul.f32.gmra.mxu0 %v8554_v57 }
 0xb87   :  { %v8190_v40 = vpop.f32.mrf.mxu0 }
 0xb8c   :  { %8652 = vmatmul.f32.gmra.mxu2 %v8609_v62 }
 0xb8d   :  { %8598 = vmatmul.f32.gmra.mxu0 %v8555_v56  ;;  %v8216_v36 = vpop.f32.mrf.mxu2 }
 0xb8e   :  { %v8217_v21 = vadd.f32 %v8216_v36, %v8187_v33 }
 0xb91   :  { %v8266_v9 = vpop.f32.mrf.mxu1 }
 0xb92   :  { %v8278_v41 = vadd.f32 %v8266_v9, %v8217_v21 }
 0xb95   :  { %v8219_v59 = vpop.f32.mrf.mxu2 }
 0xb96   :  { %v8320_v29 = vpop.f32.mrf.mxu3  ;;  %v8220_v8 = vadd.f32 %v8219_v59, %v8190_v40 }
 0xb97   :  { %v8332_v42 = vadd.f32 %v8320_v29, %v8278_v41 }
 0xb99   :  { %v8269_v7 = vpop.f32.mrf.mxu1 }
 0xb9a   :  { %v8279_v23 = vadd.f32 %v8269_v7, %v8220_v8  ;;  %v8747_v7 = vld [vmem:[%s16963_s9 + $0x38] sm:$0xff] }
 0xb9e   :  { %v8323_v34 = vpop.f32.mrf.mxu3 }
 0xb9f   :  { %v8333_v27 = vadd.f32 %v8323_v34, %v8279_v23 }
 0xbc2   :  { %v8193_v38 = vpop.f32.mrf.mxu0 }
 0xbc4   :  { %v8272_v5 = vpop.f32.mrf.mxu1 }
 0xbc7   :  { %v8222_v18 = vpop.f32.mrf.mxu2 }
 0xbc8   :  { %v8223_v37 = vadd.f32 %v8222_v18, %v8193_v38 }
 0xbc9   :  { %v8326_v54 = vpop.f32.mrf.mxu3 }
 0xbca   :  { %v8196_v51 = vpop.f32.mrf.mxu0  ;;  %v8280_v44 = vadd.f32 %v8272_v5, %v8223_v37  ;;  %v8746_v5 = vld [vmem:[%s16963_s9 + $0x30] sm:$0xff] }
 0xbcc   :  { %v8275_v55 = vpop.f32.mrf.mxu1  ;;  %v8334_v31 = vadd.f32 %v8326_v54, %v8280_v44  ;;  %v8745_v54 = vld [vmem:[%s16963_s9 + $0x28] sm:$0xff]  ;;  %v10248_v44 = vld [vmem:[%s16964_s11] ss:$0 sm:$0xff]  ;;  %s10372_s11 = smov 64  }
 0xbcf   :  { %v8225_v11 = vpop.f32.mrf.mxu2 }
 0xbd0   :  { %v8226_v53 = vadd.f32 %v8225_v11, %v8196_v51 }
 0xbd1   :  { %v8329_v24 = vpop.f32.mrf.mxu3 }
 0xbd2   :  { %v8374_v28 = vpop.f32.mrf.mxu0  ;;  %v8281_v17 = vadd.f32 %v8275_v55, %v8226_v53 }
 0xbd3   :  { %v8386_v60 = vadd.f32 %v8374_v28, %v8332_v42 }
 0xbd4   :  { %v8482_v16 = vpop.f32.mrf.mxu1  ;;  %v8335_v58 = vadd.f32 %v8329_v24, %v8281_v17  ;;  %v8744_v24 = vld [vmem:[%s16963_s9 + $0x20] sm:$0xff] }
 0xbd7   :  { %v8428_v12 = vpop.f32.mrf.mxu2 }
 0xbd8   :  { %v8440_v46 = vadd.f32 %v8428_v12, %v8386_v60  ;;  %v8742_v60 = vld [vmem:[%s16963_s9 + $0x10] sm:$0xff] }
 0xbd9   :  { %v8536_v63 = vpop.f32.mrf.mxu3 }
 0xbda   :  { %v8377_v47 = vpop.f32.mrf.mxu0  ;;  %v8494_v35 = vadd.f32 %v8482_v16, %v8440_v46  ;;  %v16761_v46 = vld [vmem:[%s16965_s10 + $0x10] sm:$0xff] }
 0xbdb   :  { %v8387_v20 = vadd.f32 %v8377_v47, %v8333_v27  ;;  %v8741_v27 = vld [vmem:[%s16963_s9 + $0x8] sm:$0xff] }
 0xbdc   :  { %v8485_v10 = vpop.f32.mrf.mxu1  ;;  %v8548_v15 = vadd.f32 %v8536_v63, %v8494_v35  ;;  %v16776_v35 = vld [vmem:[%s16965_s10] sm:$0xff] }
 0xbdf   :  { %v8431_v39 = vpop.f32.mrf.mxu2 }
 0xbe0   :  { %v8441_v49 = vadd.f32 %v8431_v39, %v8387_v20  ;;  %v10247_v20 = vld [vmem:[%s16962_s8] ss:$0 sm:$0xff] }
 0xbe1   :  { %v8539_v45 = vpop.f32.mrf.mxu3 }
 0xbe2   :  { %v8380_v4 = vpop.f32.mrf.mxu0  ;;  %v8495_v52 = vadd.f32 %v8485_v10, %v8441_v49  ;;  %v16770_v10 = vld [vmem:[%s16965_s10 + $0x8] sm:$0xff] }
 0xbe3   :  { %v8388_v48 = vadd.f32 %v8380_v4, %v8334_v31 }
 0xbe4   :  { %v8549_v26 = vadd.f32 %v8539_v45, %v8495_v52  ;;  %v8488_v32 = vpop.f32.mrf.mxu1  ;;  %v17352_v45 = vmov 0.0  }
 0xbe7   :  { %v8434_v0 = vpop.f32.mrf.mxu2 }
 0xbe8   :  { %v8442_v57 = vadd.f32 %v8434_v0, %v8388_v48  ;;  %v8743_v0 = vld [vmem:[%s16963_s9 + $0x18] sm:$0xff] }
 0xbe9   :  { %v8542_v25 = vpop.f32.mrf.mxu3 }
 0xbea   :  { %v8383_v50 = vpop.f32.mrf.mxu0  ;;  %v8496_v9 = vadd.f32 %v8488_v32, %v8442_v57 }
 0xbeb   :  { %v8389_v62 = vadd.f32 %v8383_v50, %v8335_v58 }
 0xbec   :  { %v8491_v29 = vpop.f32.mrf.mxu1  ;;  %v8550_v11 = vadd.f32 %v8542_v25, %v8496_v9 }
 0xbef   :  { %v8437_v1 = vpop.f32.mrf.mxu2 }
 0xbf0   :  { %v8443_v36 = vadd.f32 %v8437_v1, %v8389_v62 }
 0xbf1   :  { %v8545_v28 = vpop.f32.mrf.mxu3 }
 0xbf2   :  { %v8590_v22 = vpop.f32.mrf.mxu0  ;;  %v8497_v51 = vadd.f32 %v8491_v29, %v8443_v36 }
 0xbf3   :  { %v8602_v61 = vadd.f32 %v8590_v22, %v8548_v15  ;;  %v8740_v22 = vld [vmem:[%s16963_s9] sm:$0xff] }
 0xbf4   :  { %v8551_v47 = vadd.f32 %v8545_v28, %v8497_v51 }
 0xbf7   :  { %v8644_v6 = vpop.f32.mrf.mxu2 }
 0xbf8   :  { %v8656_v30 = vadd.f32 %v8644_v6, %v8602_v61 }
 0xbfa   :  { %v8593_v2 = vpop.f32.mrf.mxu0  ;;  %v8663_v56 = vrot.slane %v8656_v30, 1 }
 0xbfb   :  { %v8603_v3 = vadd.f32 %v8593_v2, %v8549_v26 }
 0xbff   :  { %v8647_v43 = vpop.f32.mrf.mxu2 }
 0xc00   :  { %v8657_v19 = vadd.f32 %v8647_v43, %v8603_v3 }
 0xc02   :  { %v8596_v13 = vpop.f32.mrf.mxu0  ;;  %v8664_v33 = vrot.slane %v8657_v19, 1 }
 0xc03   :  { %v8604_v12 = vadd.f32 %v8596_v13, %v8550_v11 }
 0xc04   :  { %v8669_v40 = vmax.f32 %v8657_v19, %v8664_v33  ;;  %v8665_v59 = vsel %vm4076_vm0, %v8663_v56, %v8664_v33 }
 0xc05   :  { %v8668_v38 = vmax.f32 %v8656_v30, %v8665_v59 }
 0xc06   :  { %10200 = vmatpush.msk.msra.mxu1 %vm8676_vm7, %v8669_v40 }
 0xc07   :  { %v8650_v18 = vpop.f32.mrf.mxu2 }
 0xc08   :  { %8695 = vmatpush.msra.mxu1 %v8668_v38  ;;  %v8658_v39 = vadd.f32 %v8650_v18, %v8604_v12 }
 0xc09   :  { %10201 = vmatmul.msk.f32.vlgmr.msra.gmra.mxu1 %vm8673_vm9, %v17339_v14 }
 0xc0a   :  { %8776 = vmatpush.msrb.mxu1 %v8747_v7  ;;  %v8599_v34 = vpop.f32.mrf.mxu0  ;;  %v8703_v8 = vrot.slane %v8658_v39, 1 }
 0xc0b   :  { %v8605_v55 = vadd.f32 %v8599_v34, %v8551_v47 }
 0xc0c   :  { %8777 = vmatpush.msrb.mxu1 %v8746_v5 }
 0xc0e   :  { %8778 = vmatpush.msrb.mxu1 %v8745_v54 }
 0xc0f   :  { %v8653_v4 = vpop.f32.mrf.mxu2 }
 0xc10   :  { %v8659_v21 = vadd.f32 %v8653_v4, %v8605_v55  ;;  %8779 = vmatpush.msrb.mxu1 %v8744_v24 }
 0xc12   :  { %v8704_v50 = vrot.slane %v8659_v21, 1  ;;  %8780 = vmatpush.msrb.mxu1 %v8743_v0 }
 0xc14   :  { %v8705_v16 = vsel %vm4076_vm0, %v8703_v8, %v8704_v50  ;;  %v8709_v41 = vmax.f32 %v8659_v21, %v8704_v50  ;;  %8781 = vmatpush.msrb.mxu1 %v8742_v60  ;;  %v8759_v8 = vld [vmem:[%s16966_s12 + $0x30] sm:$0xff]  ;;  %v8758_v50 = vld [vmem:[%s16966_s12 + $0x28] sm:$0xff] }
 0xc15   :  { %v8708_v23 = vmax.f32 %v8658_v39, %v8705_v16  ;;  %v8757_v16 = vld [vmem:[%s16966_s12 + $0x20] sm:$0xff] }
 0xc16   :  { %v8714_v63 = vrot.slane %v8709_v41, 4  ;;  %8782 = vmatpush.msrb.mxu1 %v8741_v27  ;;  %v8756_v41 = vld [vmem:[%s16966_s12 + $0x18] sm:$0xff] }
 0xc17   :  { %v8713_v42 = vrot.slane %v8708_v23, 4  ;;  %v8755_v23 = vld [vmem:[%s16966_s12 + $0x10] sm:$0xff] }
 0xc18   :  { %10202 = vmatpush.msk.msra.mxu3 %vm8676_vm7, %v8714_v63  ;;  %8783 = vmatpush.msrb.mxu1 %v8740_v22 }
 0xc19   :  { %v8715_v1 = vsel %vm8712_vm11, %v8713_v42, %v8714_v63  ;;  %v8754_v63 = vld [vmem:[%s16966_s12 + $0x8] sm:$0xff] }
 0xc1a   :  { %8734 = vmatpush.msra.mxu3 %v8715_v1 }
 0xc1b   :  { %10203 = vmatmul.msk.f32.vlgmr.msra.gmra.mxu3 %vm8673_vm9, %v17339_v14  ;;  %v16756_v14 = vld [vmem:[%s16965_s10 + $0x18] sm:$0xff] }
 0xc1c   :  { %8799 = vmatpush.msrb.mxu3 %v8747_v7  ;;  %8831 = vmatpush.msrb.mxu0 %v16756_v14 }
 0xc1d   :  { %8963 = vmatpush.msra.mxu1 %v16756_v14 }
 0xc1e   :  { %8800 = vmatpush.msrb.mxu3 %v8746_v5  ;;  %8832 = vmatpush.msrb.mxu0 %v16761_v46 }
 0xc1f   :  { %8964 = vmatpush.msra.mxu1 %v16761_v46 }
 0xc20   :  { %8801 = vmatpush.msrb.mxu3 %v8745_v54  ;;  %8833 = vmatpush.msrb.mxu0 %v16770_v10 }
 0xc21   :  { %8965 = vmatpush.msra.mxu1 %v16770_v10 }
 0xc22   :  { %8802 = vmatpush.msrb.mxu3 %v8744_v24  ;;  %8834 = vmatpush.msrb.mxu0 %v16776_v35 }
 0xc23   :  { %8835 = vmatmul.f32.vlgmr.msrb.gmra.mxu0 %v17352_v45  ;;  %8966 = vmatpush.msra.mxu1 %v16776_v35 }
 0xc24   :  { %8803 = vmatpush.msrb.mxu3 %v8743_v0  ;;  %9097 = vmatpush.msra.mxu0 %v16756_v14  ;;  %v8760_v0 = vld [vmem:[%s16966_s12 + $0x38] sm:$0xff] }
 0xc25   :  { %8896 = vmatpush.msrb.mxu2 %v8760_v0 }
 0xc26   :  { %8804 = vmatpush.msrb.mxu3 %v8742_v60  ;;  %9098 = vmatpush.msra.mxu0 %v16761_v46  ;;  %v8753_v60 = vld [vmem:[%s16966_s12] sm:$0xff] }
 0xc27   :  { %8897 = vmatpush.msrb.mxu2 %v8759_v8 }
 0xc28   :  { %8805 = vmatpush.msrb.mxu3 %v8741_v27  ;;  %9099 = vmatpush.msra.mxu0 %v16770_v10 }
 0xc29   :  { %8898 = vmatpush.msrb.mxu2 %v8758_v50 }
 0xc2a   :  { %8806 = vmatpush.msrb.mxu3 %v8740_v22  ;;  %9100 = vmatpush.msra.mxu0 %v16776_v35 }
 0xc2b   :  { %8899 = vmatpush.msrb.mxu2 %v8757_v16 }
 0xc2c   :  { %9029 = vmatpush.msra.mxu3 %v8760_v0  ;;  %9297 = vmatpush.msrb.mxu0 %v8760_v0 }
 0xc2d   :  { %8900 = vmatpush.msrb.mxu2 %v8756_v41 }
 0xc2e   :  { %9030 = vmatpush.msra.mxu3 %v8759_v8  ;;  %9298 = vmatpush.msrb.mxu0 %v8759_v8 }
 0xc2f   :  { %8901 = vmatpush.msrb.mxu2 %v8755_v23 }
 0xc30   :  { %9031 = vmatpush.msra.mxu3 %v8758_v50  ;;  %9299 = vmatpush.msrb.mxu0 %v8758_v50 }
 0xc31   :  { %8902 = vmatpush.msrb.mxu2 %v8754_v63 }
 0xc32   :  { %9032 = vmatpush.msra.mxu3 %v8757_v16  ;;  %9300 = vmatpush.msrb.mxu0 %v8757_v16 }
 0xc33   :  { %8903 = vmatpush.msrb.mxu2 %v8753_v60 }
 0xc34   :  { %9033 = vmatpush.msra.mxu3 %v8756_v41  ;;  %9301 = vmatpush.msrb.mxu0 %v8756_v41 }
 0xc35   :  { %9231 = vmatpush.msra.mxu2 %v16756_v14 }
 0xc36   :  { %9034 = vmatpush.msra.mxu3 %v8755_v23  ;;  %9302 = vmatpush.msrb.mxu0 %v8755_v23 }
 0xc37   :  { %9232 = vmatpush.msra.mxu2 %v16761_v46 }
 0xc38   :  { %9035 = vmatpush.msra.mxu3 %v8754_v63  ;;  %9303 = vmatpush.msrb.mxu0 %v8754_v63 }
 0xc39   :  { %9233 = vmatpush.msra.mxu2 %v16770_v10 }
 0xc3a   :  { %9036 = vmatpush.msra.mxu3 %v8753_v60  ;;  %9304 = vmatpush.msrb.mxu0 %v8753_v60 }
 0xc3b   :  { %9234 = vmatpush.msra.mxu2 %v16776_v35 }
 0xc86   :  { %v8697_v49 = vpop.f32.mrf.mxu1 }
 0xc87   :  { %v8698_v37 = vadd.f32 %v10247_v20, %v8697_v49 }
 0xc89   :  { %v8700_v6 = vmax.f32 %v8698_v37, 0.0  ;;  %v16853_v37 = vld [vmem:[%s16967_s13] ss:$0 sm:$0xff] }
 0xc8b   :  { %10204 = vmatmul.msk.f32.vlgmr.msrb.gmra.mxu1 %vm4677_vm3, %v8700_v6 }
 0xc8c   :  { %9163 = vmatpush.msrb.mxu1 %v8760_v0 }
 0xc8e   :  { %9164 = vmatpush.msrb.mxu1 %v8759_v8 }
 0xc90   :  { %9165 = vmatpush.msrb.mxu1 %v8758_v50 }
 0xc92   :  { %9166 = vmatpush.msrb.mxu1 %v8757_v16 }
 0xc94   :  { %9167 = vmatpush.msrb.mxu1 %v8756_v41 }
 0xc96   :  { %9168 = vmatpush.msrb.mxu1 %v8755_v23 }
 0xc98   :  { %9169 = vmatpush.msrb.mxu1 %v8754_v63 }
 0xc9a   :  { %9170 = vmatpush.msrb.mxu1 %v8753_v60 }
 0xc9e   :  { %v8736_v53 = vpop.f32.mrf.mxu3 }
 0xc9f   :  { %v8737_v52 = vadd.f32 %v10247_v20, %v8736_v53 }
 0xca0   :  { %v8836_v48 = vpop.f32.mrf.mxu0 }
 0xca1   :  { %v8739_v2 = vmax.f32 %v8737_v52, 0.0 }
 0xca3   :  { %10205 = vmatmul.msk.f32.vlgmr.msrb.gmra.mxu3 %vm4677_vm3, %v8739_v2 }
 0xca4   :  { %9431 = vmatpush.msrb.mxu3 %v8760_v0 }
 0xca6   :  { %9432 = vmatpush.msrb.mxu3 %v8759_v8 }
 0xca8   :  { %9433 = vmatpush.msrb.mxu3 %v8758_v50 }
 0xcaa   :  { %9434 = vmatpush.msrb.mxu3 %v8757_v16 }
 0xcac   :  { %9435 = vmatpush.msrb.mxu3 %v8756_v41 }
 0xcae   :  { %9436 = vmatpush.msrb.mxu3 %v8755_v23 }
 0xcb0   :  { %9437 = vmatpush.msrb.mxu3 %v8754_v63 }
 0xcb2   :  { %9438 = vmatpush.msrb.mxu3 %v8753_v60 }
 0xd08   :  { %v8785_v15 = vpop.f32.mrf.mxu1 }
 0xd09   :  { %v8786_v17 = vadd.f32 %v10248_v44, %v8785_v15 }
 0xd0b   :  { %v8946_v61 = vrot.slane %v8786_v17, 1  ;;  %v9078_v31 = vrot.slane %v8786_v17, 2  ;;  %v9212_v30 = vrot.slane %v8786_v17, 3  ;;  %v9346_v3 = vrot.slane %v8786_v17, 4 }
 0xd26   :  { %v8808_v26 = vpop.f32.mrf.mxu3 }
 0xd27   :  { %v8809_v32 = vadd.f32 %v10248_v44, %v8808_v26 }
 0xd29   :  { %v8812_v43 = vrot.slane %v8809_v32, 7  ;;  %v16795_v58 = vsel %vm8676_vm7, %v8946_v61, %v8809_v32  ;;  %v9080_v19 = vrot.slane %v8809_v32, 1  ;;  %v9214_v25 = vrot.slane %v8809_v32, 2 }
 0xd2a   :  { %v9348_v13 = vrot.slane %v8809_v32, 3 }
 0xd2b   :  { %v8814_v57 = vsel %vm8676_vm7, %v8786_v17, %v8812_v43  ;;  %v16799_v62 = vsel %vm8676_vm7, %v9078_v31, %v9080_v19  ;;  %v16802_v56 = vsel %vm8676_vm7, %v9212_v30, %v9214_v25 }
 0xd2c   :  { %v8839_v33 = vadd.f32 %v8836_v48, %v8814_v57  ;;  %v16805_v36 = vsel %vm8676_vm7, %v9346_v3, %v9348_v13 }
 0xd2e   :  { %10251 = vtanh.f32 %v8839_v33  ;;  %v10206_v59 = vmul.f32 -1.442695, %v8839_v33 }
 0xd30   :  { %10253 = vpow2.f32 %v10206_v59 }
 0xd34   :  { %v10252_v40 = vpop.eup %10251 }
 0xd35   :  { %8862 = vrot.lane.b32.xlu1 %v10252_v40, %s10372_s11 }
 0xd36   :  { %v10254_v38 = vpop.eup %10253 }
 0xd37   :  { %v8843_v9 = vadd.f32 1.0, %v10254_v38 }
 0xd39   :  { %10255 = vrcp.f32 %v8843_v9  ;;  %v8855_v28 = vand.u32 2147483648, %v8843_v9  ;;  %vm8849_vm13 = vweird.f32 %v8843_v9  ;;  %v8853_v34 = vand.u32 2147483647, %v8843_v9 }
 0xd3b   :  { %v8856_v12 = vor.u32 1.1754944e-38, %v8855_v28  ;;  %vm8854_vm10 = vcmp.eq.f32.partialorder %v8853_v34, 8.507059e+37 }
 0xd3f   :  { %v10256_v18 = vpop.eup %10255 }
 0xd40   :  { %v8845_v29 = vmul.f32 %v10256_v18, %v8843_v9  ;;  %vm8850_vm0 = vweird.f32 %v10256_v18 }
 0xd41   :  { %vm8851_vm6 = vmor %vm8849_vm13, %vm8850_vm0 }
 0xd42   :  { %v8846_v51 = vsub.f32 1.0, %v8845_v29 }
 0xd44   :  { %v8847_v7 = vmul.f32 %v10256_v18, %v8846_v51 }
 0xd46   :  { %v8848_v11 = vadd.f32 %v10256_v18, %v8847_v7 }
 0xd48   :  { %v8852_v5 = vsel %vm8851_vm6, %v10256_v18, %v8848_v11 }
 0xd49   :  { %v8857_v54 = vsel %vm8854_vm10, %v8856_v12, %v8852_v5 }
 0xd4a   :  { %v8860_v55 = vmul.f32 0.0, %v8857_v54 }
 0xda7   :  { %v8863_v47 = vpop.permute.xlu1 %8862 }
 0xda8   :  { %v8865_v39 = vmul.f32 %v8863_v47, %v8857_v54 }
 0xdaa   :  { %8867 = vrot.lane.b32.xlu2 %v8865_v39, %s10373_s19 }
 0xe04   :  { %v8868_v4 = vpop.permute.xlu2 %8867 }
 0xe05   :  { %v16809_v24 = vadd.f32 %v8868_v4, %v8860_v55 }
 0xe07   :  { %10257 = vtanh.f32 %v16809_v24 }
 0xe0d   :  { %v10258_v21 = vpop.eup %10257 }
 0xe0e   :  { %8873 = vrot.lane.b32.xlu0 %v10258_v21, %s10372_s11 }
 0xe80   :  { %v8874_v42 = vpop.permute.xlu0 %8873 }
 0xe81   :  { %v8876_v1 = vmul.f32 %v8874_v42, %v8857_v54 }
 0xe83   :  { %8878 = vrot.lane.b32.xlu1 %v8876_v1, %s10373_s19 }
 0xef5   :  { %v8879_v27 = vpop.permute.xlu1 %8878 }
 0xef6   :  { %v8881_v22 = vsel %vm8815_vm14, %v8879_v27, 0.0  ;;  %10209 = vmatmul.msk.f32.vlgmr.msra.gmra.mxu1 %vm8815_vm14, %v8879_v27 }
 0xef7   :  { %10207 = vmatmul.msk.f32.vlgmr.msrb.gmra.mxu2 %vm4677_vm3, %v8881_v22 }
 0xef8   :  { %9365 = vmatpush.msrb.mxu2 %v16756_v14 }
 0xefa   :  { %9366 = vmatpush.msrb.mxu2 %v16761_v46 }
 0xefc   :  { %9367 = vmatpush.msrb.mxu2 %v16770_v10 }
 0xefe   :  { %9368 = vmatpush.msrb.mxu2 %v16776_v35 }
 0xf73   :  { %v8968_v20 = vpop.f32.mrf.mxu1 }
 0xf74   :  { %v8971_v49 = vadd.f32 %v8968_v20, %v16795_v58 }
 0xf76   :  { %10259 = vtanh.f32 %v8971_v49  ;;  %v10210_v46 = vmul.f32 -1.442695, %v8971_v49 }
 0xf7a   :  { %v8905_v6 = vpop.f32.mrf.mxu2 }
 0xf7b   :  { %v8906_v45 = vadd.f32 %v16853_v37, %v8905_v6 }
 0xf7c   :  { %v10260_v53 = vpop.eup %10259 }
 0xf7d   :  { %10261 = vtanh.f32 %v8906_v45  ;;  %8994 = vrot.lane.b32.xlu2 %v10260_v53, %s10372_s11  ;;  %v10208_v15 = vmul.f32 -1.442695, %v8906_v45 }
 0xf7e   :  { %10263 = vpow2.f32 %v10210_v46 }
 0xf83   :  { %v10262_v14 = vpop.eup %10261 }
 0xf84   :  { %8930 = vrot.lane.b32.xlu0 %v10262_v14, %s10372_s11  ;;  %v10264_v10 = vpop.eup %10263 }
 0xf85   :  { %v8975_v35 = vadd.f32 1.0, %v10264_v10 }
 0xf87   :  { %10265 = vrcp.f32 %v8975_v35  ;;  %v8987_v26 = vand.u32 2147483648, %v8975_v35  ;;  %vm8981_vm4 = vweird.f32 %v8975_v35  ;;  %v8985_v32 = vand.u32 2147483647, %v8975_v35 }
 0xf88   :  { %10267 = vpow2.f32 %v10208_v15 }
 0xf89   :  { %v8988_v3 = vor.u32 1.1754944e-38, %v8987_v26  ;;  %vm8986_vm15 = vcmp.eq.f32.partialorder %v8985_v32, 8.507059e+37 }
 0xf8d   :  { %v10266_v52 = vpop.eup %10265 }
 0xf8e   :  { %v8977_v2 = vmul.f32 %v10266_v52, %v8975_v35  ;;  %vm8982_vm8 = vweird.f32 %v10266_v52  ;;  %v10268_v31 = vpop.eup %10267 }
 0xf8f   :  { %vm8983_vm12 = vmor %vm8981_vm4, %vm8982_vm8  ;;  %v8911_v43 = vadd.f32 1.0, %v10268_v31 }
 0xf90   :  { %v8978_v44 = vsub.f32 1.0, %v8977_v2 }
 0xf91   :  { %10269 = vrcp.f32 %v8911_v43  ;;  %v8923_v59 = vand.u32 2147483648, %v8911_v43  ;;  %vm8917_vm2 = vweird.f32 %v8911_v43  ;;  %v8921_v38 = vand.u32 2147483647, %v8911_v43 }
 0xf92   :  { %v8979_v17 = vmul.f32 %v10266_v52, %v8978_v44 }
 0xf93   :  { %v8924_v18 = vor.u32 1.1754944e-38, %v8923_v59  ;;  %vm8922_vm7 = vcmp.eq.f32.partialorder %v8921_v38, 8.507059e+37 }
 0xf94   :  { %v8980_v61 = vadd.f32 %v10266_v52, %v8979_v17 }
 0xf96   :  { %v8984_v30 = vsel %vm8983_vm12, %v10266_v52, %v8980_v61 }
 0xf97   :  { %v8989_v58 = vsel %vm8986_vm15, %v8988_v3, %v8984_v30  ;;  %v10270_v25 = vpop.eup %10269 }
 0xf98   :  { %v8913_v13 = vmul.f32 %v10270_v25, %v8911_v43  ;;  %vm8918_vm1 = vweird.f32 %v10270_v25  ;;  %v8992_v11 = vmul.f32 %v8989_v58, %v16809_v24 }
 0xf99   :  { %vm8919_vm5 = vmor %vm8917_vm2, %vm8918_vm1 }
 0xf9a   :  { %v8914_v57 = vsub.f32 1.0, %v8913_v13 }
 0xf9c   :  { %v8915_v33 = vmul.f32 %v10270_v25, %v8914_v57 }
 0xf9e   :  { %v8916_v40 = vadd.f32 %v10270_v25, %v8915_v33 }
 0xfa0   :  { %v8920_v9 = vsel %vm8919_vm5, %v10270_v25, %v8916_v40 }
 0xfa1   :  { %v8925_v51 = vsel %vm8922_vm7, %v8924_v18, %v8920_v9 }
 0xfa2   :  { %v8928_v5 = vmul.f32 0.0, %v8925_v51 }
 0xfd7   :  { %v8995_v48 = vpop.permute.xlu2 %8994 }
 0xfd8   :  { %v8997_v19 = vmul.f32 %v8995_v48, %v8989_v58 }
 0xfda   :  { %8999 = vrot.lane.b32.xlu1 %v8997_v19, %s10373_s19 }
 0xff6   :  { %v8931_v29 = vpop.permute.xlu0 %8930 }
 0xff7   :  { %v8933_v7 = vmul.f32 %v8931_v29, %v8925_v51 }
 0xff9   :  { %8935 = vrot.lane.b32.xlu2 %v8933_v7, %s10373_s19 }
0x104c   :  { %v9000_v28 = vpop.permute.xlu1 %8999 }
0x104d   :  { %v16861_v34 = vadd.f32 %v9000_v28, %v8992_v11 }
0x104f   :  { %10271 = vtanh.f32 %v16861_v34 }
0x1053   :  { %v8936_v12 = vpop.permute.xlu2 %8935 }
0x1054   :  { %v16864_v47 = vadd.f32 %v8936_v12, %v8928_v5 }
0x1055   :  { %v10272_v54 = vpop.eup %10271 }
0x1056   :  { %10273 = vtanh.f32 %v16864_v47  ;;  %9005 = vrot.lane.b32.xlu0 %v10272_v54, %s10372_s11 }
0x105c   :  { %v10274_v39 = vpop.eup %10273 }
0x105d   :  { %8941 = vrot.lane.b32.xlu1 %v10274_v39, %s10372_s11 }
0x10c8   :  { %v9006_v55 = vpop.permute.xlu0 %9005 }
0x10c9   :  { %v9008_v4 = vmul.f32 %v9006_v55, %v8989_v58 }
0x10cb   :  { %9010 = vrot.lane.b32.xlu2 %v9008_v4, %s10373_s19 }
0x10cf   :  { %v8942_v24 = vpop.permute.xlu1 %8941 }
0x10d0   :  { %v8944_v21 = vmul.f32 %v8942_v24, %v8925_v51 }
0x10d2   :  { %9014 = vrot.lane.b32.xlu0 %v8944_v21, %s10372_s11 }
0x1125   :  { %v9011_v0 = vpop.permute.xlu2 %9010 }
0x1126   :  { %10213 = vmatmul.msk.f32.vlgmr.msra.gmra.mxu0 %vm8815_vm14, %v9011_v0 }
0x1144   :  { %v9015_v8 = vpop.permute.xlu0 %9014 }
0x1145   :  { %v9017_v50 = vsel %vm8815_vm14, %v9011_v0, %v9015_v8 }
0x1146   :  { %10211 = vmatmul.msk.f32.vlgmr.msra.gmra.mxu3 %vm4677_vm3, %v9017_v50 }
0x11a3   :  { %v9102_v16 = vpop.f32.mrf.mxu0 }
0x11a4   :  { %v9105_v41 = vadd.f32 %v9102_v16, %v16799_v62 }
0x11a6   :  { %10275 = vtanh.f32 %v9105_v41  ;;  %v10214_v60 = vmul.f32 -1.442695, %v9105_v41 }
0x11ac   :  { %v10276_v23 = vpop.eup %10275 }
0x11ad   :  { %9128 = vrot.lane.b32.xlu1 %v10276_v23, %s10372_s11 }
0x11c9   :  { %v9038_v63 = vpop.f32.mrf.mxu3 }
0x11ca   :  { %v9039_v42 = vadd.f32 %v16853_v37, %v9038_v63 }
0x11cc   :  { %10277 = vtanh.f32 %v9039_v42  ;;  %v10212_v20 = vmul.f32 -1.442695, %v9039_v42 }
0x11cd   :  { %10279 = vpow2.f32 %v10214_v60 }
0x11d2   :  { %v10278_v1 = vpop.eup %10277 }
0x11d3   :  { %9063 = vrot.lane.b32.xlu2 %v10278_v1, %s10372_s11  ;;  %v10280_v27 = vpop.eup %10279 }
0x11d4   :  { %v9109_v22 = vadd.f32 1.0, %v10280_v27 }
0x11d6   :  { %10281 = vrcp.f32 %v9109_v22  ;;  %v9121_v35 = vand.u32 2147483648, %v9109_v22  ;;  %vm9115_vm11 = vweird.f32 %v9109_v22  ;;  %v9119_v52 = vand.u32 2147483647, %v9109_v22 }
0x11d7   :  { %10283 = vpow2.f32 %v10212_v20 }
0x11d8   :  { %v9122_v15 = vor.u32 1.1754944e-38, %v9121_v35  ;;  %vm9120_vm13 = vcmp.eq.f32.partialorder %v9119_v52, 8.507059e+37 }
0x11dc   :  { %v10282_v49 = vpop.eup %10281 }
0x11dd   :  { %v10284_v62 = vpop.eup %10283  ;;  %v9111_v6 = vmul.f32 %v10282_v49, %v9109_v22  ;;  %vm9116_vm9 = vweird.f32 %v10282_v49 }
0x11de   :  { %v9044_v45 = vadd.f32 1.0, %v10284_v62  ;;  %vm9117_vm0 = vmor %vm9115_vm11, %vm9116_vm9 }
0x11df   :  { %v9112_v53 = vsub.f32 1.0, %v9111_v6 }
0x11e0   :  { %10285 = vrcp.f32 %v9044_v45  ;;  %v9056_v3 = vand.u32 2147483648, %v9044_v45  ;;  %vm9050_vm10 = vweird.f32 %v9044_v45  ;;  %v9054_v43 = vand.u32 2147483647, %v9044_v45 }
0x11e1   :  { %v9113_v14 = vmul.f32 %v10282_v49, %v9112_v53 }
0x11e2   :  { %v9057_v58 = vor.u32 1.1754944e-38, %v9056_v3  ;;  %vm9055_vm4 = vcmp.eq.f32.partialorder %v9054_v43, 8.507059e+37 }
0x11e3   :  { %v9114_v10 = vadd.f32 %v10282_v49, %v9113_v14 }
0x11e5   :  { %v9118_v44 = vsel %vm9117_vm0, %v10282_v49, %v9114_v10 }
0x11e6   :  { %v10286_v46 = vpop.eup %10285  ;;  %v9123_v61 = vsel %vm9120_vm13, %v9122_v15, %v9118_v44 }
0x11e7   :  { %v9046_v2 = vmul.f32 %v10286_v46, %v9044_v45  ;;  %vm9051_vm6 = vweird.f32 %v10286_v46  ;;  %v9126_v57 = vmul.f32 %v9123_v61, %v16861_v34 }
0x11e8   :  { %vm9052_vm8 = vmor %vm9050_vm10, %vm9051_vm6 }
0x11e9   :  { %v9047_v17 = vsub.f32 1.0, %v9046_v2 }
0x11eb   :  { %v9048_v31 = vmul.f32 %v10286_v46, %v9047_v17 }
0x11ed   :  { %v9049_v30 = vadd.f32 %v10286_v46, %v9048_v31 }
0x11ef   :  { %v9053_v48 = vsel %vm9052_vm8, %v10286_v46, %v9049_v30 }
0x11f0   :  { %v9058_v25 = vsel %vm9055_vm4, %v9057_v58, %v9053_v48 }
0x11f1   :  { %v9061_v38 = vmul.f32 %v9058_v25, %v16864_v47 }
0x121f   :  { %v9129_v26 = vpop.permute.xlu1 %9128 }
0x1220   :  { %v9131_v32 = vmul.f32 %v9129_v26, %v9123_v61 }
0x1222   :  { %9133 = vrot.lane.b32.xlu0 %v9131_v32, %s10373_s19 }
0x122d   :  { %v9064_v19 = vpop.permute.xlu2 %9063 }
0x122e   :  { %v9066_v13 = vmul.f32 %v9064_v19, %v9058_v25 }
0x1230   :  { %9068 = vrot.lane.b32.xlu1 %v9066_v13, %s10373_s19 }
0x1294   :  { %v9134_v33 = vpop.permute.xlu0 %9133 }
0x1295   :  { %v16881_v40 = vadd.f32 %v9134_v33, %v9126_v57 }
0x1297   :  { %10287 = vtanh.f32 %v16881_v40 }
0x129d   :  { %v10288_v59 = vpop.eup %10287 }
0x129e   :  { %9139 = vrot.lane.b32.xlu2 %v10288_v59, %s10372_s11 }
0x12a2   :  { %v9069_v9 = vpop.permute.xlu1 %9068 }
0x12a3   :  { %v16886_v18 = vadd.f32 %v9069_v9, %v9061_v38 }
0x12a5   :  { %10289 = vtanh.f32 %v16886_v18 }
0x12ab   :  { %v10290_v29 = vpop.eup %10289 }
0x12ac   :  { %9074 = vrot.lane.b32.xlu0 %v10290_v29, %s10372_s11 }
0x12f8   :  { %v9140_v51 = vpop.permute.xlu2 %9139 }
0x12f9   :  { %v9142_v7 = vmul.f32 %v9140_v51, %v9123_v61 }
0x12fb   :  { %9144 = vrot.lane.b32.xlu1 %v9142_v7, %s10373_s19 }
0x131e   :  { %v9075_v11 = vpop.permute.xlu0 %9074 }
0x131f   :  { %v9077_v28 = vmul.f32 %v9075_v11, %v9058_v25 }
0x1321   :  { %9148 = vrot.lane.b32.xlu2 %v9077_v28, %s10372_s11 }
0x136d   :  { %v9145_v34 = vpop.permute.xlu1 %9144 }
0x136e   :  { %10217 = vmatmul.msk.f32.vlgmr.msra.gmra.mxu2 %vm8815_vm14, %v9145_v34 }
0x137b   :  { %v9149_v5 = vpop.permute.xlu2 %9148 }
0x137c   :  { %v9151_v12 = vsel %vm8815_vm14, %v9145_v34, %v9149_v5 }
0x137d   :  { %10215 = vmatmul.msk.f32.vlgmr.msrb.gmra.mxu1 %vm4677_vm3, %v9151_v12 }
0x13f1   :  { %v9236_v47 = vpop.f32.mrf.mxu2 }
0x13f2   :  { %v9239_v54 = vadd.f32 %v9236_v47, %v16802_v56 }
0x13f4   :  { %10291 = vtanh.f32 %v9239_v54  ;;  %v10218_v21 = vmul.f32 -1.442695, %v9239_v54 }
0x13fa   :  { %v10292_v39 = vpop.eup %10291  ;;  %v9172_v55 = vpop.f32.mrf.mxu1 }
0x13fb   :  { %v9173_v4 = vadd.f32 %v16853_v37, %v9172_v55  ;;  %9262 = vrot.lane.b32.xlu0 %v10292_v39, %s10372_s11 }
0x13fd   :  { %10293 = vtanh.f32 %v9173_v4  ;;  %v10216_v0 = vmul.f32 -1.442695, %v9173_v4 }
0x13fe   :  { %10295 = vpow2.f32 %v10218_v21 }
0x13ff   :  { %10297 = vpow2.f32 %v10216_v0 }
0x1403   :  { %v10294_v24 = vpop.eup %10293 }
0x1404   :  { %9197 = vrot.lane.b32.xlu1 %v10294_v24, %s10372_s11  ;;  %v10296_v8 = vpop.eup %10295 }
0x1405   :  { %v9243_v50 = vadd.f32 1.0, %v10296_v8  ;;  %v10298_v16 = vpop.eup %10297 }
0x1406   :  { %v9178_v56 = vadd.f32 1.0, %v10298_v16 }
0x1407   :  { %10299 = vrcp.f32 %v9243_v50  ;;  %v9255_v22 = vand.u32 2147483648, %v9243_v50  ;;  %vm9249_vm15 = vweird.f32 %v9243_v50  ;;  %v9253_v49 = vand.u32 2147483647, %v9243_v50 }
0x1408   :  { %10301 = vrcp.f32 %v9178_v56  ;;  %v9190_v35 = vand.u32 2147483648, %v9178_v56  ;;  %vm9184_vm7 = vweird.f32 %v9178_v56  ;;  %v9188_v52 = vand.u32 2147483647, %v9178_v56 }
0x1409   :  { %v9256_v6 = vor.u32 1.1754944e-38, %v9255_v22  ;;  %vm9254_vm2 = vcmp.eq.f32.partialorder %v9253_v49, 8.507059e+37 }
0x140a   :  { %v9191_v44 = vor.u32 1.1754944e-38, %v9190_v35  ;;  %vm9189_vm11 = vcmp.eq.f32.partialorder %v9188_v52, 8.507059e+37 }
0x140d   :  { %v10300_v41 = vpop.eup %10299 }
0x140e   :  { %v9245_v23 = vmul.f32 %v10300_v41, %v9243_v50  ;;  %v10302_v42 = vpop.eup %10301  ;;  %vm9250_vm12 = vweird.f32 %v10300_v41 }
0x140f   :  { %v9180_v60 = vmul.f32 %v10302_v42, %v9178_v56  ;;  %vm9251_vm1 = vmor %vm9249_vm15, %vm9250_vm12  ;;  %vm9185_vm5 = vweird.f32 %v10302_v42 }
0x1410   :  { %v9246_v63 = vsub.f32 1.0, %v9245_v23  ;;  %vm9186_vm9 = vmor %vm9184_vm7, %vm9185_vm5  ;;  %vm9513_vm7 = vcmask 1024  }
0x1411   :  { %v9181_v20 = vsub.f32 1.0, %v9180_v60 }
0x1412   :  { %v9247_v1 = vmul.f32 %v10300_v41, %v9246_v63 }
0x1413   :  { %v9182_v45 = vmul.f32 %v10302_v42, %v9181_v20 }
0x1414   :  { %v9248_v27 = vadd.f32 %v10300_v41, %v9247_v1 }
0x1415   :  { %v9183_v10 = vadd.f32 %v10302_v42, %v9182_v45 }
0x1416   :  { %v9252_v62 = vsel %vm9251_vm1, %v10300_v41, %v9248_v27 }
0x1417   :  { %v9257_v14 = vsel %vm9254_vm2, %v9256_v6, %v9252_v62  ;;  %v9187_v2 = vsel %vm9186_vm9, %v10302_v42, %v9183_v10 }
0x1418   :  { %v9192_v17 = vsel %vm9189_vm11, %v9191_v44, %v9187_v2  ;;  %v9260_v26 = vmul.f32 %v9257_v14, %v16881_v40 }
0x1419   :  { %v9195_v3 = vmul.f32 %v9192_v17, %v16886_v18 }
0x146d   :  { %v9263_v53 = vpop.permute.xlu0 %9262 }
0x146e   :  { %v9265_v46 = vmul.f32 %v9263_v53, %v9257_v14 }
0x1470   :  { %9267 = vrot.lane.b32.xlu2 %v9265_v46, %s10373_s19 }
0x1476   :  { %v9198_v15 = vpop.permute.xlu1 %9197 }
0x1477   :  { %v9200_v61 = vmul.f32 %v9198_v15, %v9192_v17 }
0x1479   :  { %9202 = vrot.lane.b32.xlu0 %v9200_v61, %s10373_s19 }
0x14ca   :  { %v9268_v32 = vpop.permute.xlu2 %9267 }
0x14cb   :  { %v16902_v31 = vadd.f32 %v9268_v32, %v9260_v26 }
0x14cd   :  { %10303 = vtanh.f32 %v16902_v31 }
0x14d3   :  { %v10304_v30 = vpop.eup %10303 }
0x14d4   :  { %9273 = vrot.lane.b32.xlu1 %v10304_v30, %s10372_s11 }
0x14eb   :  { %v9203_v43 = vpop.permute.xlu0 %9202 }
0x14ec   :  { %v16907_v48 = vadd.f32 %v9203_v43, %v9195_v3 }
0x14ee   :  { %10305 = vtanh.f32 %v16907_v48 }
0x14f4   :  { %v10306_v58 = vpop.eup %10305 }
0x14f5   :  { %9208 = vrot.lane.b32.xlu2 %v10306_v58, %s10372_s11 }
0x1546   :  { %v9274_v19 = vpop.permute.xlu1 %9273 }
0x1547   :  { %v9276_v25 = vmul.f32 %v9274_v19, %v9257_v14 }
0x1549   :  { %9278 = vrot.lane.b32.xlu0 %v9276_v25, %s10373_s19 }
0x154f   :  { %v9209_v13 = vpop.permute.xlu2 %9208 }
0x1550   :  { %v9211_v57 = vmul.f32 %v9209_v13, %v9192_v17 }
0x1552   :  { %9282 = vrot.lane.b32.xlu1 %v9211_v57, %s10372_s11 }
0x15bb   :  { %v9279_v33 = vpop.permute.xlu0 %9278 }
0x15bc   :  { %10221 = vmatmul.msk.f32.vlgmr.msrb.gmra.mxu2 %vm8815_vm14, %v9279_v33 }
0x15c4   :  { %v9283_v40 = vpop.permute.xlu1 %9282 }
0x15c5   :  { %v9285_v59 = vsel %vm8815_vm14, %v9279_v33, %v9283_v40 }
0x15c6   :  { %10219 = vmatmul.msk.f32.vlgmr.msrb.gmra.mxu0 %vm4677_vm3, %v9285_v59 }
0x163f   :  { %v9370_v38 = vpop.f32.mrf.mxu2 }
0x1640   :  { %v9373_v9 = vadd.f32 %v9370_v38, %v16805_v36 }
0x1642   :  { %10307 = vtanh.f32 %v9373_v9  ;;  %v10222_v5 = vmul.f32 -1.442695, %v9373_v9 }
0x1643   :  { %v9306_v18 = vpop.f32.mrf.mxu0 }
0x1644   :  { %v9307_v29 = vadd.f32 %v16853_v37, %v9306_v18 }
0x1646   :  { %10309 = vtanh.f32 %v9307_v29  ;;  %v10220_v11 = vmul.f32 -1.442695, %v9307_v29 }
0x1648   :  { %v10308_v51 = vpop.eup %10307  ;;  %10311 = vpow2.f32 %v10220_v11 }
0x1649   :  { %9396 = vrot.lane.b32.xlu0 %v10308_v51, %s10372_s11 }
0x164c   :  { %v10310_v7 = vpop.eup %10309 }
0x164d   :  { %9331 = vrot.lane.b32.xlu2 %v10310_v7, %s10372_s11 }
0x164e   :  { %v10312_v28 = vpop.eup %10311 }
0x164f   :  { %v9312_v34 = vadd.f32 1.0, %v10312_v28 }
0x1651   :  { %10313 = vrcp.f32 %v9312_v34  ;;  %v9324_v24 = vand.u32 2147483648, %v9312_v34  ;;  %vm9318_vm13 = vweird.f32 %v9312_v34  ;;  %v9322_v21 = vand.u32 2147483647, %v9312_v34 }
0x1652   :  { %10315 = vpow2.f32 %v10222_v5  ;;  %v9483_v5 = vld [vmem:[%s16968_s14 + $0x18] sm:$0xff] }
0x1653   :  { %v9325_v50 = vor.u32 1.1754944e-38, %v9324_v24  ;;  %vm9323_vm10 = vcmp.eq.f32.partialorder %v9322_v21, 8.507059e+37  ;;  %9505 = vmatpush.msra.mxu1 %v9483_v5 }
0x1657   :  { %v10314_v12 = vpop.eup %10313 }
0x1658   :  { %v9314_v36 = vmul.f32 %v10314_v12, %v9312_v34  ;;  %v10316_v47 = vpop.eup %10315  ;;  %vm9319_vm0 = vweird.f32 %v10314_v12 }
0x1659   :  { %v9377_v39 = vadd.f32 1.0, %v10316_v47  ;;  %vm9320_vm6 = vmor %vm9318_vm13, %vm9319_vm0  ;;  %v9480_v47 = vld [vmem:[%s16968_s14] sm:$0xff] }
0x165a   :  { %v9315_v54 = vsub.f32 1.0, %v9314_v36  ;;  %v9481_v36 = vld [vmem:[%s16968_s14 + $0x8] sm:$0xff] }
0x165b   :  { %10317 = vrcp.f32 %v9377_v39  ;;  %v9389_v60 = vand.u32 2147483648, %v9377_v39  ;;  %vm9383_vm4 = vweird.f32 %v9377_v39  ;;  %v9387_v27 = vand.u32 2147483647, %v9377_v39 }
0x165c   :  { %v9316_v55 = vmul.f32 %v10314_v12, %v9315_v54 }
0x165d   :  { %v9390_v20 = vor.u32 1.1754944e-38, %v9389_v60  ;;  %vm9388_vm15 = vcmp.eq.f32.partialorder %v9387_v27, 8.507059e+37 }
0x165e   :  { %v9317_v4 = vadd.f32 %v10314_v12, %v9316_v55  ;;  %v21_v55 = vstv %s16969_s15 }
0x165f   :  { %22 = vst [vmem:[#allocation5] sm:$0x1] %v21_v55 }
0x1660   :  { %v9321_v0 = vsel %vm9320_vm6, %v10314_v12, %v9317_v4  ;;  %v9482_v12 = vld [vmem:[%s16968_s14 + $0x10] sm:$0xff] }
0x1661   :  { %v10318_v8 = vpop.eup %10317  ;;  %v9326_v56 = vsel %vm9323_vm10, %v9325_v50, %v9321_v0  ;;  %9506 = vmatpush.msra.mxu1 %v9482_v12 }
0x1662   :  { %v9379_v23 = vmul.f32 %v10318_v8, %v9377_v39  ;;  %vm9384_vm8 = vweird.f32 %v10318_v8  ;;  %v9329_v46 = vmul.f32 %v9326_v56, %v16907_v48 }
0x1663   :  { %vm9385_vm12 = vmor %vm9383_vm4, %vm9384_vm8  ;;  %9507 = vmatpush.msra.mxu1 %v9481_v36 }
0x1664   :  { %v9380_v63 = vsub.f32 1.0, %v9379_v23 }
0x1665   :  { %9508 = vmatpush.msra.mxu1 %v9480_v47 }
0x1666   :  { %v9381_v42 = vmul.f32 %v10318_v8, %v9380_v63  ;;  %v10250_v24 = vld [vmem:[#allocation5] ss:$0 sm:$0xff] }
0x1668   :  { %v9382_v1 = vadd.f32 %v10318_v8, %v9381_v42 }
0x166a   :  { %v9386_v22 = vsel %vm9385_vm12, %v10318_v8, %v9382_v1 }
0x166b   :  { %v9391_v62 = vsel %vm9388_vm15, %v9390_v20, %v9386_v22 }
0x166c   :  { %v9394_v45 = vmul.f32 %v9391_v62, %v16902_v31 }
0x16a7   :  { %v9332_v16 = vpop.permute.xlu2 %9331 }
0x16a8   :  { %v9334_v41 = vmul.f32 %v9332_v16, %v9326_v56 }
0x16aa   :  { %9336 = vrot.lane.b32.xlu1 %v9334_v41, %s10373_s19 }
0x16bb   :  { %v9397_v49 = vpop.permute.xlu0 %9396 }
0x16bc   :  { %v9399_v6 = vmul.f32 %v9397_v49, %v9391_v62 }
0x16be   :  { %9401 = vrot.lane.b32.xlu2 %v9399_v6, %s10373_s19 }
0x1718   :  { %v9402_v53 = vpop.permute.xlu2 %9401 }
0x1719   :  { %v9404_v14 = vadd.f32 %v9402_v53, %v9394_v45 }
0x171b   :  { %10319 = vtanh.f32 %v9404_v14 }
0x171c   :  { %v9337_v10 = vpop.permute.xlu1 %9336 }
0x171d   :  { %v9339_v35 = vadd.f32 %v9337_v10, %v9329_v46 }
0x171f   :  { %10321 = vtanh.f32 %v9339_v35 }
0x1721   :  { %v10320_v52 = vpop.eup %10319 }
0x1722   :  { %9407 = vrot.lane.b32.xlu1 %v10320_v52, %s10372_s11 }
0x1725   :  { %v10322_v2 = vpop.eup %10321 }
0x1726   :  { %9342 = vrot.lane.b32.xlu0 %v10322_v2, %s10372_s11 }
0x1794   :  { %v9408_v44 = vpop.permute.xlu1 %9407 }
0x1795   :  { %v9410_v15 = vmul.f32 %v9408_v44, %v9391_v62 }
0x1797   :  { %9412 = vrot.lane.b32.xlu2 %v9410_v15, %s10373_s19 }
0x1798   :  { %v9343_v17 = vpop.permute.xlu0 %9342 }
0x1799   :  { %v9345_v61 = vmul.f32 %v9343_v17, %v9326_v56 }
0x179b   :  { %9416 = vrot.lane.b32.xlu0 %v9345_v61, %s10372_s11 }
0x17f1   :  { %v9413_v26 = vpop.permute.xlu2 %9412 }
0x180d   :  { %v9417_v32 = vpop.permute.xlu0 %9416 }
0x180e   :  { %v9419_v31 = vsel %vm8815_vm14, %v9413_v26, %v9417_v32 }
0x180f   :  { %10223 = vmatmul.msk.f32.vlgmr.msrb.gmra.mxu3 %vm4677_vm3, %v9419_v31 }
0x1892   :  { %v9440_v30 = vpop.f32.mrf.mxu3 }
0x1893   :  { %v9441_v3 = vadd.f32 %v16853_v37, %v9440_v30 }
0x1895   :  { %10323 = vtanh.f32 %v9441_v3  ;;  %v10224_v48 = vmul.f32 -1.442695, %v9441_v3 }
0x1897   :  { %10325 = vpow2.f32 %v10224_v48 }
0x189b   :  { %v10324_v43 = vpop.eup %10323 }
0x189c   :  { %9465 = vrot.lane.b32.xlu1 %v10324_v43, %s10372_s11 }
0x189d   :  { %v10326_v58 = vpop.eup %10325 }
0x189e   :  { %v9446_v19 = vadd.f32 1.0, %v10326_v58 }
0x18a0   :  { %10327 = vrcp.f32 %v9446_v19  ;;  %v9458_v59 = vand.u32 2147483648, %v9446_v19  ;;  %vm9452_vm3 = vweird.f32 %v9446_v19  ;;  %v9456_v38 = vand.u32 2147483647, %v9446_v19 }
0x18a2   :  { %v9459_v9 = vor.u32 1.1754944e-38, %v9458_v59  ;;  %vm9457_vm5 = vcmp.eq.f32.partialorder %v9456_v38, 8.507059e+37 }
0x18a6   :  { %v10328_v25 = vpop.eup %10327 }
0x18a7   :  { %v9448_v13 = vmul.f32 %v10328_v25, %v9446_v19  ;;  %vm9453_vm1 = vweird.f32 %v10328_v25 }
0x18a8   :  { %vm9454_vm2 = vmor %vm9452_vm3, %vm9453_vm1 }
0x18a9   :  { %v9449_v57 = vsub.f32 1.0, %v9448_v13 }
0x18ab   :  { %v9450_v33 = vmul.f32 %v10328_v25, %v9449_v57 }
0x18ad   :  { %v9451_v40 = vadd.f32 %v10328_v25, %v9450_v33 }
0x18af   :  { %v9455_v37 = vsel %vm9454_vm2, %v10328_v25, %v9451_v40 }
0x18b0   :  { %v9460_v29 = vsel %vm9457_vm5, %v9459_v9, %v9455_v37 }
0x18b1   :  { %v9463_v7 = vmul.f32 %v9460_v29, %v9339_v35 }
0x190e   :  { %v9466_v18 = vpop.permute.xlu1 %9465 }
0x190f   :  { %v9468_v51 = vmul.f32 %v9466_v18, %v9460_v29 }
0x1911   :  { %9470 = vrot.lane.b32.xlu2 %v9468_v51, %s10373_s19 }
0x196b   :  { %v9471_v11 = vpop.permute.xlu2 %9470 }
0x196c   :  { %v9473_v28 = vadd.f32 %v9471_v11, %v9463_v7 }
0x196e   :  { %10329 = vtanh.f32 %v9473_v28 }
0x1974   :  { %v10330_v34 = vpop.eup %10329 }
0x1975   :  { %9476 = vrot.lane.b32.xlu0 %v10330_v34, %s10372_s11 }
0x19e7   :  { %v9477_v54 = vpop.permute.xlu0 %9476 }
0x19e8   :  { %v9479_v39 = vmul.f32 %v9477_v54, %v9460_v29 }
0x19ea   :  { %9489 = vrot.lane.b32.xlu1 %v9479_v39, %s10373_s19 }
0x1a5c   :  { %v9490_v4 = vpop.permute.xlu1 %9489 }
0x1a5d   :  { %10225 = vmatmul.msk.f32.vlgmr.msra.gmra.mxu1 %vm8815_vm14, %v9490_v4 }
0x1ada   :  { %v9510_v21 = vpop.f32.mrf.mxu1 }
0x1adb   :  { %v9511_v0 = vadd.f32 %v10250_v24, %v9510_v21 }
0x1add   :  { %9514 = vst.msk [vmem:[%s16970_s16] sm:$0x3] %vm9513_vm7, %v9511_v0 }

</bundles_post_ra>
